<compile_context>
chip_gen: v7x
topology: tpu7x:2x2x1
jax: 0.10.0
libtpu: 0.0.40
codegen_flags: <defaults>
</compile_context>

<pallas_src>
import jax
import jax.numpy as jnp
from jax.experimental import pallas as pl
from jax.experimental.pallas import tpu as pltpu

EPS = 1e-5
CP = 128                          # lane-dense channel width (Cout padded to 128)
VMEM_LIMIT = 40 * 1024 * 1024     # scoped-VMEM cap (fits v7x's 64 MiB physical)


def _cdiv(a, b):
    return -(-a // b)


def _round_up(a, m):
    return _cdiv(a, m) * m


# ------------------------- XLA-side im2col gathering -------------------------

def _im2col(x, cin, k, s, pad, h_out, w0, w_count, w_step, w_pad_to, k_pad_to):
    """Full k*k*cin im2col patches for conv output rows [0, h_out) and output
    columns w0, w0+w_step, ... (w_count of them).  K ordering is (kh, kw, cin),
    matching w.reshape(k*k*cin, cout).  Returns bf16 (N, h_out, w_pad_to, k_pad_to)."""
    x = x[..., :cin]                                  # drop lane padding -> honest K
    N, H, W, _ = x.shape
    h_hi = (h_out - 1) * s + k - pad                  # exclusive end, input coords
    w_hi = (w0 + (w_count - 1) * w_step) * s + k - pad
    xp = jnp.pad(x, ((0, 0), (pad, max(0, h_hi - H)),
                     (pad, max(0, w_hi - W)), (0, 0)))
    taps = []
    for ki in range(k):
        for kj in range(k):
            ws = w0 * s + kj
            taps.append(xp[:, ki: ki + (h_out - 1) * s + 1: s,
                            ws: ws + (w_count - 1) * w_step * s + 1: w_step * s, :])
    cols = jnp.concatenate(taps, axis=-1)             # (N, h_out, w_count, k*k*cin)
    cols = jnp.pad(cols, ((0, 0), (0, 0), (0, w_pad_to - w_count),
                          (0, k_pad_to - k * k * cin)))
    return cols.astype(jnp.bfloat16)


# ---------------------------- Pallas kernels ----------------------------

def _make_conv_kernel(ho, wo, w_pad, kp, cp):
    """conv + folded-BN affine + ReLU, one grid step per image (single big dot)."""

    def kernel(xc_ref, w_ref, sc_ref, sh_ref, o_ref):
        # xc_ref: (HO, Wpad, Kp) bf16; w_ref: (Kp, CP) bf16; sc/sh: (1, CP) f32
        acc = jnp.dot(xc_ref[...].reshape(ho * w_pad, kp), w_ref[...],
                      preferred_element_type=jnp.float32)
        y = jnp.maximum(acc * sc_ref[...] + sh_ref[...], 0.0)
        o_ref[...] = y.reshape(ho, w_pad, cp)[:, :wo, :].astype(o_ref.dtype)

    return kernel


def _make_conv_pool_kernel(trp, trc, pwo, we_pad, wo_pad, kp, cp, h_over, w_over):
    """conv + affine + ReLU fused with a ceil-mode 3x3/s2 max-pool, over one
    block of `trp` pool rows (`trc` conv rows).  The conv W columns arrive
    phase-split (even / odd output columns) so the pool's W taps are
    contiguous slices."""

    def kernel(xe_ref, xo_ref, w_ref, sc_ref, sh_ref, o_ref):
        # xe_ref: (HOc, WEpad, Kp)  even conv columns (whole image, VMEM resident)
        # xo_ref: (HOc, WOpad, Kp)  odd  conv columns
        # w_ref:  (Kp, CP) bf16; sc/sh: (1, CP) f32; o_ref: (TRP, PWO, CP) bf16
        r = pl.program_id(1)
        row0 = r * (2 * trp)
        w = w_ref[...]
        sc = sc_ref[...]
        sh = sh_ref[...]
        xe = xe_ref[pl.ds(row0, trc)]                         # (trc, WEpad, Kp)
        xo = xo_ref[pl.ds(row0, trc)]                         # (trc, WOpad, Kp)
        ce = jnp.dot(xe.reshape(trc * we_pad, kp), w,
                     preferred_element_type=jnp.float32)
        co = jnp.dot(xo.reshape(trc * wo_pad, kp), w,
                     preferred_element_type=jnp.float32)
        ce = jnp.maximum(ce * sc + sh, 0.0).reshape(trc, we_pad, cp)
        co = jnp.maximum(co * sc + sh, 0.0).reshape(trc, wo_pad, cp)
        # W-direction taps: conv cols 2j, 2j+1, 2j+2 for pool col j.
        a = ce[:, :pwo, :]
        b = co[:, :pwo, :]
        if w_over:
            # conv col 2*pwo is past the conv output: replacing it by 0 is safe
            # because all (ReLU'd) conv values are >= 0 and col 2j is in-bounds.
            c = jnp.concatenate([ce[:, 1:pwo, :], jnp.zeros_like(ce[:, :1, :])],
                                axis=1)
        else:
            c = ce[:, 1:pwo + 1, :]
        wmax = jnp.maximum(jnp.maximum(a, b), c)              # (trc, pwo, cp)
        # H-direction: pool row ph uses conv rows 2ph, 2ph+1, 2ph+2.
        for ph in range(trp):
            m = jnp.maximum(wmax[2 * ph], wmax[2 * ph + 1])
            if not (h_over and ph == trp - 1):                # skip overhang row
                m = jnp.maximum(m, wmax[2 * ph + 2])
            o_ref[ph] = m.astype(o_ref.dtype)

    return kernel


# ------------------------------ layer wrappers ------------------------------

def conv_bn_relu(x, p, k, s, pad, cin):
    """x: (N,H,W,C>=cin) bf16 NHWC -> (N,HO,WO,CP) bf16 (Cout zero-padded)."""
    N, H, W, _ = x.shape
    HO = (H + 2 * pad - k) // s + 1
    WO = (W + 2 * pad - k) // s + 1
    WP = _round_up(WO, 16)
    KP = _round_up(k * k * cin, 128)
    xcol = _im2col(x, cin, k, s, pad, HO, 0, WO, 1, WP, KP)

    kernel = _make_conv_kernel(HO, WO, WP, KP, CP)
    return pl.pallas_call(
        kernel,
        out_shape=jax.ShapeDtypeStruct((N, HO, WO, CP), jnp.bfloat16),
        grid=(N,),
        in_specs=[
            pl.BlockSpec((None, HO, WP, KP), lambda n: (n, 0, 0, 0)),
            pl.BlockSpec((KP, CP), lambda n: (0, 0)),
            pl.BlockSpec((1, CP), lambda n: (0, 0)),
            pl.BlockSpec((1, CP), lambda n: (0, 0)),
        ],
        out_specs=pl.BlockSpec((None, HO, WO, CP), lambda n: (n, 0, 0, 0)),
        compiler_params=pltpu.CompilerParams(
            dimension_semantics=("parallel",),
            vmem_limit_bytes=VMEM_LIMIT),
    )(xcol, p["w2"], p["scale"], p["shift"])


def conv_bn_relu_pool(x, p, k, s, pad, cin):
    """conv + folded BN + ReLU fused with a ceil-mode 3x3/stride-2 max-pool."""
    N, H, W, _ = x.shape
    HOc = (H + 2 * pad - k) // s + 1
    WOc = (W + 2 * pad - k) // s + 1
    PHO = _cdiv(HOc - 3, 2) + 1
    PWO = _cdiv(WOc - 3, 2) + 1
    h_over = 2 * PHO >= HOc          # last pool row's 3rd tap is past the conv
    w_over = 2 * PWO >= WOc
    WE = PWO + (0 if w_over else 1)  # even conv cols needed (0, 2, ...)
    # pool-row block size: largest divisor of PHO that is <= 16
    TRP = max(d for d in range(1, min(PHO, 16) + 1) if PHO % d == 0)
    R = PHO // TRP
    assert R == 1 or not h_over, "H overhang only supported in single-step mode"
    TRC = HOc if R == 1 else 2 * TRP + 1
    WEP = _round_up(WE, 16)
    WOP = _round_up(PWO, 16)
    KP = _round_up(k * k * cin, 128)

    xcol_e = _im2col(x, cin, k, s, pad, HOc, 0, WE, 2, WEP, KP)
    xcol_o = _im2col(x, cin, k, s, pad, HOc, 1, PWO, 2, WOP, KP)

    kernel = _make_conv_pool_kernel(TRP, TRC, PWO, WEP, WOP, KP, CP,
                                    h_over, w_over)
    return pl.pallas_call(
        kernel,
        out_shape=jax.ShapeDtypeStruct((N, PHO, PWO, CP), jnp.bfloat16),
        grid=(N, R),
        in_specs=[
            # whole per-image phase tensors, resident across the row-block axis
            pl.BlockSpec((None, HOc, WEP, KP), lambda n, r: (n, 0, 0, 0)),
            pl.BlockSpec((None, HOc, WOP, KP), lambda n, r: (n, 0, 0, 0)),
            pl.BlockSpec((KP, CP), lambda n, r: (0, 0)),
            pl.BlockSpec((1, CP), lambda n, r: (0, 0)),
            pl.BlockSpec((1, CP), lambda n, r: (0, 0)),
        ],
        out_specs=pl.BlockSpec((None, TRP, PWO, CP), lambda n, r: (n, r, 0, 0)),
        compiler_params=pltpu.CompilerParams(
            dimension_semantics=("parallel", "arbitrary"),
            vmem_limit_bytes=VMEM_LIMIT),
    )(xcol_e, xcol_o, p["w2"], p["scale"], p["shift"])


# ----------------------------- model definition -----------------------------

# (name, kernel, stride, pad, Cin, Cout) -- channel widths reduced for the test
LAYER_SPECS = [
    ("conv1", 7, 2, 0, 3, 16),
    ("conv2", 5, 2, 1, 16, 32),
    ("conv3", 3, 1, 1, 32, 64),
    ("conv4", 3, 1, 1, 64, 64),
    ("conv5", 3, 1, 1, 64, 64),
    ("fc6",   6, 1, 0, 64, 128),
]


def init_params(key):
    params = {}
    for name, k, s, p, cin, cout in LAYER_SPECS:
        key, kw_, kb_, kg_, kbt_, km_, kv_ = jax.random.split(key, 7)
        # NOTE: (kh, kw, cin, cout) layout; real PyTorch OIHW weights must be
        # permuted to this layout before the reshape below.
        w = jax.random.normal(kw_, (k, k, cin, cout), jnp.float32)
        w = w * (1.0 / jnp.sqrt(float(k * k * cin)))
        b = 0.01 * jax.random.normal(kb_, (cout,), jnp.float32)
        gamma = 1.0 + 0.1 * jax.random.normal(kg_, (cout,), jnp.float32)
        beta = 0.1 * jax.random.normal(kbt_, (cout,), jnp.float32)
        mean = 0.1 * jax.random.normal(km_, (cout,), jnp.float32)
        var = 1.0 + 0.1 * jax.random.uniform(kv_, (cout,), jnp.float32)
        # fold conv bias + inference-mode BN into a per-channel affine
        scale = gamma / jnp.sqrt(var + EPS)
        shift = (b - mean) * scale + beta
        if name == "fc6":
            # fc6 runs as a plain XLA dot (perf feedback: M == batch rows)
            params[name] = {
                "w2d": w.reshape(k * k * cin, cout),
                "scale": scale.reshape(1, cout),
                "shift": shift.reshape(1, cout),
            }
        else:
            kp = _round_up(k * k * cin, 128)
            # weights as (Kp, CP): K zero-padded to a 128 multiple, Cout
            # zero-padded to 128 lanes; padded scale/shift are ZERO so the
            # padded output channels stay exactly 0 through conv+ReLU+pool.
            w2 = jnp.pad(w.reshape(k * k * cin, cout),
                         ((0, kp - k * k * cin), (0, CP - cout)))
            params[name] = {
                "w2": w2.astype(jnp.bfloat16),
                "scale": jnp.pad(scale, (0, CP - cout)).reshape(1, CP),
                "shift": jnp.pad(shift, (0, CP - cout)).reshape(1, CP),
            }
    return params


def vggf2_face_forward(imgs_nchw, params):
    # NCHW in (PyTorch) -> NHWC internally; bf16 activations, f32 accumulation.
    x = jnp.transpose(imgs_nchw, (0, 2, 3, 1)).astype(jnp.bfloat16)
    x = conv_bn_relu_pool(x, params["conv1"], 7, 2, 0, 3)    # conv1+bn49+relu1+pool1
    x = conv_bn_relu_pool(x, params["conv2"], 5, 2, 1, 16)   # conv2+bn50+relu2+pool2
    x = conv_bn_relu(x, params["conv3"], 3, 1, 1, 32)        # conv3+bn51+relu3
    x = conv_bn_relu(x, params["conv4"], 3, 1, 1, 64)        # conv4+bn52+relu4
    x = conv_bn_relu_pool(x, params["conv5"], 3, 1, 1, 64)   # conv5+bn53+relu5+pool5
    # fc6 (6x6 conv -> 1x1) + bn54 + relu6 as a plain XLA dot (M = batch rows).
    n = x.shape[0]
    p6 = params["fc6"]
    feat = x[..., :64].astype(jnp.float32).reshape(n, -1)    # (N, 6*6*64)
    out = jnp.maximum((feat @ p6["w2d"]) * p6["scale"] + p6["shift"], 0.0)
    return out                                               # == out.reshape(batch, -1)


if __name__ == "__main__":
    key = jax.random.PRNGKey(0)
    pkey, xkey = jax.random.split(key)
    params = init_params(pkey)
    # 208 is the smallest spatial size for which the 6x6 fc6 kernel is valid.
    imgs = jax.random.normal(xkey, (2, 3, 208, 208), jnp.float32)

    fwd = jax.jit(vggf2_face_forward)
    out = fwd(imgs, params)
    jax.block_until_ready(out)
    assert out.shape == (2, 128), out.shape
    assert bool(jnp.all(jnp.isfinite(out)))
    print("KERNEL_OK")
</pallas_src>

<mosaic_0001>
module attributes {stable_mosaic.version = 11 : i64} {
  func.func @kernel(%arg0: i32, %arg1: i32, %arg2: memref<1x101x64x256xbf16, #tpu.memory_space<vmem>>, %arg3: memref<1x101x64x256xbf16, #tpu.memory_space<vmem>>, %arg4: memref<256x128xbf16, #tpu.memory_space<vmem>>, %arg5: memref<1x128xf32, #tpu.memory_space<vmem>>, %arg6: memref<1x128xf32, #tpu.memory_space<vmem>>, %arg7: memref<1x10x50x128xbf16, #tpu.memory_space<vmem>>) attributes {dimension_semantics = [#tpu.dimension_semantics<parallel>, #tpu.dimension_semantics<arbitrary>], iteration_bounds = array<i64: 2, 5>, scalar_prefetch = 0 : i64, scratch_operands = 0 : i64, tpu.core_type = #tpu.core_type<tc>, window_params = [{transform_indices = @transform_0, window_bounds = array<i64: 1, 101, 64, 256>}, {transform_indices = @transform_1, window_bounds = array<i64: 1, 101, 64, 256>}, {pipeline_mode = #tpu.pipeline_mode<synchronous>, transform_indices = @transform_2, window_bounds = array<i64: 256, 128>}, {pipeline_mode = #tpu.pipeline_mode<synchronous>, transform_indices = @transform_3, window_bounds = array<i64: 1, 128>}, {pipeline_mode = #tpu.pipeline_mode<synchronous>, transform_indices = @transform_4, window_bounds = array<i64: 1, 128>}, {transform_indices = @transform_5, window_bounds = array<i64: 1, 10, 50, 128>}]} {
    %c20_i32 = arith.constant 20 : i32
    %0 = arith.muli %arg1, %c20_i32 : i32
    %c0 = arith.constant 0 : index
    %c0_0 = arith.constant 0 : index
    %1 = vector.load %arg4[%c0, %c0_0] : memref<256x128xbf16, #tpu.memory_space<vmem>>, vector<256x128xbf16>
    %c0_1 = arith.constant 0 : index
    %c0_2 = arith.constant 0 : index
    %2 = vector.load %arg5[%c0_1, %c0_2] : memref<1x128xf32, #tpu.memory_space<vmem>>, vector<1x128xf32>
    %c0_3 = arith.constant 0 : index
    %c0_4 = arith.constant 0 : index
    %3 = vector.load %arg6[%c0_3, %c0_4] : memref<1x128xf32, #tpu.memory_space<vmem>>, vector<1x128xf32>
    %c0_5 = arith.constant 0 : index
    %4 = arith.index_cast %0 : i32 to index
    %c0_6 = arith.constant 0 : index
    %c0_7 = arith.constant 0 : index
    %5 = vector.load %arg2[%c0_5, %4, %c0_6, %c0_7] : memref<1x101x64x256xbf16, #tpu.memory_space<vmem>>, vector<1x21x64x256xbf16>
    %6 = vector.shape_cast %5 : vector<1x21x64x256xbf16> to vector<21x64x256xbf16>
    %c0_8 = arith.constant 0 : index
    %7 = arith.index_cast %0 : i32 to index
    %c0_9 = arith.constant 0 : index
    %c0_10 = arith.constant 0 : index
    %8 = vector.load %arg3[%c0_8, %7, %c0_9, %c0_10] : memref<1x101x64x256xbf16, #tpu.memory_space<vmem>>, vector<1x21x64x256xbf16>
    %9 = vector.shape_cast %8 : vector<1x21x64x256xbf16> to vector<21x64x256xbf16>
    %10 = vector.shape_cast %6 : vector<21x64x256xbf16> to vector<1344x256xbf16>
    %cst = arith.constant dense<0.000000e+00> : vector<1344x128xf32>
    %11 = tpu.matmul %10, %1, %cst {dimension_numbers = #tpu.dot_dimension_numbers<[1], [0], [0], [1], [0, 0, 1, 1], [], []>} : vector<1344x256xbf16>, vector<256x128xbf16>, vector<1344x128xf32> -> vector<1344x128xf32>
    %12 = vector.shape_cast %9 : vector<21x64x256xbf16> to vector<1344x256xbf16>
    %cst_11 = arith.constant dense<0.000000e+00> : vector<1344x128xf32>
    %13 = tpu.matmul %12, %1, %cst_11 {dimension_numbers = #tpu.dot_dimension_numbers<[1], [0], [0], [1], [0, 0, 1, 1], [], []>} : vector<1344x256xbf16>, vector<256x128xbf16>, vector<1344x128xf32> -> vector<1344x128xf32>
    %14 = vector.broadcast %2 : vector<1x128xf32> to vector<1344x128xf32>
    %15 = arith.mulf %11, %14 : vector<1344x128xf32>
    %16 = vector.broadcast %3 : vector<1x128xf32> to vector<1344x128xf32>
    %17 = arith.addf %15, %16 : vector<1344x128xf32>
    %cst_12 = arith.constant 0.000000e+00 : f32
    %18 = vector.broadcast %cst_12 : f32 to vector<1344x128xf32>
    %19 = arith.maximumf %17, %18 : vector<1344x128xf32>
    %20 = vector.shape_cast %19 : vector<1344x128xf32> to vector<21x64x128xf32>
    %21 = vector.broadcast %2 : vector<1x128xf32> to vector<1344x128xf32>
    %22 = arith.mulf %13, %21 : vector<1344x128xf32>
    %23 = vector.broadcast %3 : vector<1x128xf32> to vector<1344x128xf32>
    %24 = arith.addf %22, %23 : vector<1344x128xf32>
    %cst_13 = arith.constant 0.000000e+00 : f32
    %25 = vector.broadcast %cst_13 : f32 to vector<1344x128xf32>
    %26 = arith.maximumf %24, %25 : vector<1344x128xf32>
    %27 = vector.shape_cast %26 : vector<1344x128xf32> to vector<21x64x128xf32>
    %28 = vector.extract_strided_slice %20 {offsets = [0, 0, 0], sizes = [21, 50, 128], strides = [1, 1, 1]} : vector<21x64x128xf32> to vector<21x50x128xf32>
    %29 = vector.extract_strided_slice %27 {offsets = [0, 0, 0], sizes = [21, 50, 128], strides = [1, 1, 1]} : vector<21x64x128xf32> to vector<21x50x128xf32>
    %30 = vector.extract_strided_slice %20 {offsets = [0, 1, 0], sizes = [21, 50, 128], strides = [1, 1, 1]} : vector<21x64x128xf32> to vector<21x50x128xf32>
    %31 = arith.maximumf %28, %29 : vector<21x50x128xf32>
    %32 = arith.maximumf %31, %30 : vector<21x50x128xf32>
    %33 = vector.extract_strided_slice %32 {offsets = [0, 0, 0], sizes = [1, 50, 128], strides = [1, 1, 1]} : vector<21x50x128xf32> to vector<1x50x128xf32>
    %34 = vector.shape_cast %33 : vector<1x50x128xf32> to vector<50x128xf32>
    %35 = vector.extract_strided_slice %32 {offsets = [1, 0, 0], sizes = [1, 50, 128], strides = [1, 1, 1]} : vector<21x50x128xf32> to vector<1x50x128xf32>
    %36 = vector.shape_cast %35 : vector<1x50x128xf32> to vector<50x128xf32>
    %37 = arith.maximumf %34, %36 : vector<50x128xf32>
    %38 = vector.extract_strided_slice %32 {offsets = [2, 0, 0], sizes = [1, 50, 128], strides = [1, 1, 1]} : vector<21x50x128xf32> to vector<1x50x128xf32>
    %39 = vector.shape_cast %38 : vector<1x50x128xf32> to vector<50x128xf32>
    %40 = arith.maximumf %37, %39 : vector<50x128xf32>
    %41 = arith.truncf %40 : vector<50x128xf32> to vector<50x128xbf16>
    %c0_14 = arith.constant 0 : index
    %c0_15 = arith.constant 0 : index
    %c0_16 = arith.constant 0 : index
    %c0_17 = arith.constant 0 : index
    %42 = vector.load %arg7[%c0_14, %c0_15, %c0_16, %c0_17] : memref<1x10x50x128xbf16, #tpu.memory_space<vmem>>, vector<1x1x50x128xbf16>
    %43 = vector.shape_cast %42 : vector<1x1x50x128xbf16> to vector<50x128xbf16>
    %44 = vector.shape_cast %41 : vector<50x128xbf16> to vector<1x1x50x128xbf16>
    tpu.vector_store %arg7[%c0_14, %c0_15, %c0_16, %c0_17], %44 {strides = array<i32>} : memref<1x10x50x128xbf16, #tpu.memory_space<vmem>>, vector<1x1x50x128xbf16>,
    %45 = vector.extract_strided_slice %32 {offsets = [2, 0, 0], sizes = [1, 50, 128], strides = [1, 1, 1]} : vector<21x50x128xf32> to vector<1x50x128xf32>
    %46 = vector.shape_cast %45 : vector<1x50x128xf32> to vector<50x128xf32>
    %47 = vector.extract_strided_slice %32 {offsets = [3, 0, 0], sizes = [1, 50, 128], strides = [1, 1, 1]} : vector<21x50x128xf32> to vector<1x50x128xf32>
    %48 = vector.shape_cast %47 : vector<1x50x128xf32> to vector<50x128xf32>
    %49 = arith.maximumf %46, %48 : vector<50x128xf32>
    %50 = vector.extract_strided_slice %32 {offsets = [4, 0, 0], sizes = [1, 50, 128], strides = [1, 1, 1]} : vector<21x50x128xf32> to vector<1x50x128xf32>
    %51 = vector.shape_cast %50 : vector<1x50x128xf32> to vector<50x128xf32>
    %52 = arith.maximumf %49, %51 : vector<50x128xf32>
    %53 = arith.truncf %52 : vector<50x128xf32> to vector<50x128xbf16>
    %c0_18 = arith.constant 0 : index
    %c1 = arith.constant 1 : index
    %c0_19 = arith.constant 0 : index
    %c0_20 = arith.constant 0 : index
    %54 = vector.load %arg7[%c0_18, %c1, %c0_19, %c0_20] : memref<1x10x50x128xbf16, #tpu.memory_space<vmem>>, vector<1x1x50x128xbf16>
    %55 = vector.shape_cast %54 : vector<1x1x50x128xbf16> to vector<50x128xbf16>
    %56 = vector.shape_cast %53 : vector<50x128xbf16> to vector<1x1x50x128xbf16>
    tpu.vector_store %arg7[%c0_18, %c1, %c0_19, %c0_20], %56 {strides = array<i32>} : memref<1x10x50x128xbf16, #tpu.memory_space<vmem>>, vector<1x1x50x128xbf16>,
    %57 = vector.extract_strided_slice %32 {offsets = [4, 0, 0], sizes = [1, 50, 128], strides = [1, 1, 1]} : vector<21x50x128xf32> to vector<1x50x128xf32>
    %58 = vector.shape_cast %57 : vector<1x50x128xf32> to vector<50x128xf32>
    %59 = vector.extract_strided_slice %32 {offsets = [5, 0, 0], sizes = [1, 50, 128], strides = [1, 1, 1]} : vector<21x50x128xf32> to vector<1x50x128xf32>
    %60 = vector.shape_cast %59 : vector<1x50x128xf32> to vector<50x128xf32>
    %61 = arith.maximumf %58, %60 : vector<50x128xf32>
    %62 = vector.extract_strided_slice %32 {offsets = [6, 0, 0], sizes = [1, 50, 128], strides = [1, 1, 1]} : vector<21x50x128xf32> to vector<1x50x128xf32>
    %63 = vector.shape_cast %62 : vector<1x50x128xf32> to vector<50x128xf32>
    %64 = arith.maximumf %61, %63 : vector<50x128xf32>
    %65 = arith.truncf %64 : vector<50x128xf32> to vector<50x128xbf16>
    %c0_21 = arith.constant 0 : index
    %c2 = arith.constant 2 : index
    %c0_22 = arith.constant 0 : index
    %c0_23 = arith.constant 0 : index
    %66 = vector.load %arg7[%c0_21, %c2, %c0_22, %c0_23] : memref<1x10x50x128xbf16, #tpu.memory_space<vmem>>, vector<1x1x50x128xbf16>
    %67 = vector.shape_cast %66 : vector<1x1x50x128xbf16> to vector<50x128xbf16>
    %68 = vector.shape_cast %65 : vector<50x128xbf16> to vector<1x1x50x128xbf16>
    tpu.vector_store %arg7[%c0_21, %c2, %c0_22, %c0_23], %68 {strides = array<i32>} : memref<1x10x50x128xbf16, #tpu.memory_space<vmem>>, vector<1x1x50x128xbf16>,
    %69 = vector.extract_strided_slice %32 {offsets = [6, 0, 0], sizes = [1, 50, 128], strides = [1, 1, 1]} : vector<21x50x128xf32> to vector<1x50x128xf32>
    %70 = vector.shape_cast %69 : vector<1x50x128xf32> to vector<50x128xf32>
    %71 = vector.extract_strided_slice %32 {offsets = [7, 0, 0], sizes = [1, 50, 128], strides = [1, 1, 1]} : vector<21x50x128xf32> to vector<1x50x128xf32>
    %72 = vector.shape_cast %71 : vector<1x50x128xf32> to vector<50x128xf32>
    %73 = arith.maximumf %70, %72 : vector<50x128xf32>
    %74 = vector.extract_strided_slice %32 {offsets = [8, 0, 0], sizes = [1, 50, 128], strides = [1, 1, 1]} : vector<21x50x128xf32> to vector<1x50x128xf32>
    %75 = vector.shape_cast %74 : vector<1x50x128xf32> to vector<50x128xf32>
    %76 = arith.maximumf %73, %75 : vector<50x128xf32>
    %77 = arith.truncf %76 : vector<50x128xf32> to vector<50x128xbf16>
    %c0_24 = arith.constant 0 : index
    %c3 = arith.constant 3 : index
    %c0_25 = arith.constant 0 : index
    %c0_26 = arith.constant 0 : index
    %78 = vector.load %arg7[%c0_24, %c3, %c0_25, %c0_26] : memref<1x10x50x128xbf16, #tpu.memory_space<vmem>>, vector<1x1x50x128xbf16>
    %79 = vector.shape_cast %78 : vector<1x1x50x128xbf16> to vector<50x128xbf16>
    %80 = vector.shape_cast %77 : vector<50x128xbf16> to vector<1x1x50x128xbf16>
    tpu.vector_store %arg7[%c0_24, %c3, %c0_25, %c0_26], %80 {strides = array<i32>} : memref<1x10x50x128xbf16, #tpu.memory_space<vmem>>, vector<1x1x50x128xbf16>,
    %81 = vector.extract_strided_slice %32 {offsets = [8, 0, 0], sizes = [1, 50, 128], strides = [1, 1, 1]} : vector<21x50x128xf32> to vector<1x50x128xf32>
    %82 = vector.shape_cast %81 : vector<1x50x128xf32> to vector<50x128xf32>
    %83 = vector.extract_strided_slice %32 {offsets = [9, 0, 0], sizes = [1, 50, 128], strides = [1, 1, 1]} : vector<21x50x128xf32> to vector<1x50x128xf32>
    %84 = vector.shape_cast %83 : vector<1x50x128xf32> to vector<50x128xf32>
    %85 = arith.maximumf %82, %84 : vector<50x128xf32>
    %86 = vector.extract_strided_slice %32 {offsets = [10, 0, 0], sizes = [1, 50, 128], strides = [1, 1, 1]} : vector<21x50x128xf32> to vector<1x50x128xf32>
    %87 = vector.shape_cast %86 : vector<1x50x128xf32> to vector<50x128xf32>
    %88 = arith.maximumf %85, %87 : vector<50x128xf32>
    %89 = arith.truncf %88 : vector<50x128xf32> to vector<50x128xbf16>
    %c0_27 = arith.constant 0 : index
    %c4 = arith.constant 4 : index
    %c0_28 = arith.constant 0 : index
    %c0_29 = arith.constant 0 : index
    %90 = vector.load %arg7[%c0_27, %c4, %c0_28, %c0_29] : memref<1x10x50x128xbf16, #tpu.memory_space<vmem>>, vector<1x1x50x128xbf16>
    %91 = vector.shape_cast %90 : vector<1x1x50x128xbf16> to vector<50x128xbf16>
    %92 = vector.shape_cast %89 : vector<50x128xbf16> to vector<1x1x50x128xbf16>
    tpu.vector_store %arg7[%c0_27, %c4, %c0_28, %c0_29], %92 {strides = array<i32>} : memref<1x10x50x128xbf16, #tpu.memory_space<vmem>>, vector<1x1x50x128xbf16>,
    %93 = vector.extract_strided_slice %32 {offsets = [10, 0, 0], sizes = [1, 50, 128], strides = [1, 1, 1]} : vector<21x50x128xf32> to vector<1x50x128xf32>
    %94 = vector.shape_cast %93 : vector<1x50x128xf32> to vector<50x128xf32>
    %95 = vector.extract_strided_slice %32 {offsets = [11, 0, 0], sizes = [1, 50, 128], strides = [1, 1, 1]} : vector<21x50x128xf32> to vector<1x50x128xf32>
    %96 = vector.shape_cast %95 : vector<1x50x128xf32> to vector<50x128xf32>
    %97 = arith.maximumf %94, %96 : vector<50x128xf32>
    %98 = vector.extract_strided_slice %32 {offsets = [12, 0, 0], sizes = [1, 50, 128], strides = [1, 1, 1]} : vector<21x50x128xf32> to vector<1x50x128xf32>
    %99 = vector.shape_cast %98 : vector<1x50x128xf32> to vector<50x128xf32>
    %100 = arith.maximumf %97, %99 : vector<50x128xf32>
    %101 = arith.truncf %100 : vector<50x128xf32> to vector<50x128xbf16>
    %c0_30 = arith.constant 0 : index
    %c5 = arith.constant 5 : index
    %c0_31 = arith.constant 0 : index
    %c0_32 = arith.constant 0 : index
    %102 = vector.load %arg7[%c0_30, %c5, %c0_31, %c0_32] : memref<1x10x50x128xbf16, #tpu.memory_space<vmem>>, vector<1x1x50x128xbf16>
    %103 = vector.shape_cast %102 : vector<1x1x50x128xbf16> to vector<50x128xbf16>
    %104 = vector.shape_cast %101 : vector<50x128xbf16> to vector<1x1x50x128xbf16>
    tpu.vector_store %arg7[%c0_30, %c5, %c0_31, %c0_32], %104 {strides = array<i32>} : memref<1x10x50x128xbf16, #tpu.memory_space<vmem>>, vector<1x1x50x128xbf16>,
    %105 = vector.extract_strided_slice %32 {offsets = [12, 0, 0], sizes = [1, 50, 128], strides = [1, 1, 1]} : vector<21x50x128xf32> to vector<1x50x128xf32>
    %106 = vector.shape_cast %105 : vector<1x50x128xf32> to vector<50x128xf32>
    %107 = vector.extract_strided_slice %32 {offsets = [13, 0, 0], sizes = [1, 50, 128], strides = [1, 1, 1]} : vector<21x50x128xf32> to vector<1x50x128xf32>
    %108 = vector.shape_cast %107 : vector<1x50x128xf32> to vector<50x128xf32>
    %109 = arith.maximumf %106, %108 : vector<50x128xf32>
    %110 = vector.extract_strided_slice %32 {offsets = [14, 0, 0], sizes = [1, 50, 128], strides = [1, 1, 1]} : vector<21x50x128xf32> to vector<1x50x128xf32>
    %111 = vector.shape_cast %110 : vector<1x50x128xf32> to vector<50x128xf32>
    %112 = arith.maximumf %109, %111 : vector<50x128xf32>
    %113 = arith.truncf %112 : vector<50x128xf32> to vector<50x128xbf16>
    %c0_33 = arith.constant 0 : index
    %c6 = arith.constant 6 : index
    %c0_34 = arith.constant 0 : index
    %c0_35 = arith.constant 0 : index
    %114 = vector.load %arg7[%c0_33, %c6, %c0_34, %c0_35] : memref<1x10x50x128xbf16, #tpu.memory_space<vmem>>, vector<1x1x50x128xbf16>
    %115 = vector.shape_cast %114 : vector<1x1x50x128xbf16> to vector<50x128xbf16>
    %116 = vector.shape_cast %113 : vector<50x128xbf16> to vector<1x1x50x128xbf16>
    tpu.vector_store %arg7[%c0_33, %c6, %c0_34, %c0_35], %116 {strides = array<i32>} : memref<1x10x50x128xbf16, #tpu.memory_space<vmem>>, vector<1x1x50x128xbf16>,
    %117 = vector.extract_strided_slice %32 {offsets = [14, 0, 0], sizes = [1, 50, 128], strides = [1, 1, 1]} : vector<21x50x128xf32> to vector<1x50x128xf32>
    %118 = vector.shape_cast %117 : vector<1x50x128xf32> to vector<50x128xf32>
    %119 = vector.extract_strided_slice %32 {offsets = [15, 0, 0], sizes = [1, 50, 128], strides = [1, 1, 1]} : vector<21x50x128xf32> to vector<1x50x128xf32>
    %120 = vector.shape_cast %119 : vector<1x50x128xf32> to vector<50x128xf32>
    %121 = arith.maximumf %118, %120 : vector<50x128xf32>
    %122 = vector.extract_strided_slice %32 {offsets = [16, 0, 0], sizes = [1, 50, 128], strides = [1, 1, 1]} : vector<21x50x128xf32> to vector<1x50x128xf32>
    %123 = vector.shape_cast %122 : vector<1x50x128xf32> to vector<50x128xf32>
    %124 = arith.maximumf %121, %123 : vector<50x128xf32>
    %125 = arith.truncf %124 : vector<50x128xf32> to vector<50x128xbf16>
    %c0_36 = arith.constant 0 : index
    %c7 = arith.constant 7 : index
    %c0_37 = arith.constant 0 : index
    %c0_38 = arith.constant 0 : index
    %126 = vector.load %arg7[%c0_36, %c7, %c0_37, %c0_38] : memref<1x10x50x128xbf16, #tpu.memory_space<vmem>>, vector<1x1x50x128xbf16>
    %127 = vector.shape_cast %126 : vector<1x1x50x128xbf16> to vector<50x128xbf16>
    %128 = vector.shape_cast %125 : vector<50x128xbf16> to vector<1x1x50x128xbf16>
    tpu.vector_store %arg7[%c0_36, %c7, %c0_37, %c0_38], %128 {strides = array<i32>} : memref<1x10x50x128xbf16, #tpu.memory_space<vmem>>, vector<1x1x50x128xbf16>,
    %129 = vector.extract_strided_slice %32 {offsets = [16, 0, 0], sizes = [1, 50, 128], strides = [1, 1, 1]} : vector<21x50x128xf32> to vector<1x50x128xf32>
    %130 = vector.shape_cast %129 : vector<1x50x128xf32> to vector<50x128xf32>
    %131 = vector.extract_strided_slice %32 {offsets = [17, 0, 0], sizes = [1, 50, 128], strides = [1, 1, 1]} : vector<21x50x128xf32> to vector<1x50x128xf32>
    %132 = vector.shape_cast %131 : vector<1x50x128xf32> to vector<50x128xf32>
    %133 = arith.maximumf %130, %132 : vector<50x128xf32>
    %134 = vector.extract_strided_slice %32 {offsets = [18, 0, 0], sizes = [1, 50, 128], strides = [1, 1, 1]} : vector<21x50x128xf32> to vector<1x50x128xf32>
    %135 = vector.shape_cast %134 : vector<1x50x128xf32> to vector<50x128xf32>
    %136 = arith.maximumf %133, %135 : vector<50x128xf32>
    %137 = arith.truncf %136 : vector<50x128xf32> to vector<50x128xbf16>
    %c0_39 = arith.constant 0 : index
    %c8 = arith.constant 8 : index
    %c0_40 = arith.constant 0 : index
    %c0_41 = arith.constant 0 : index
    %138 = vector.load %arg7[%c0_39, %c8, %c0_40, %c0_41] : memref<1x10x50x128xbf16, #tpu.memory_space<vmem>>, vector<1x1x50x128xbf16>
    %139 = vector.shape_cast %138 : vector<1x1x50x128xbf16> to vector<50x128xbf16>
    %140 = vector.shape_cast %137 : vector<50x128xbf16> to vector<1x1x50x128xbf16>
    tpu.vector_store %arg7[%c0_39, %c8, %c0_40, %c0_41], %140 {strides = array<i32>} : memref<1x10x50x128xbf16, #tpu.memory_space<vmem>>, vector<1x1x50x128xbf16>,
    %141 = vector.extract_strided_slice %32 {offsets = [18, 0, 0], sizes = [1, 50, 128], strides = [1, 1, 1]} : vector<21x50x128xf32> to vector<1x50x128xf32>
    %142 = vector.shape_cast %141 : vector<1x50x128xf32> to vector<50x128xf32>
    %143 = vector.extract_strided_slice %32 {offsets = [19, 0, 0], sizes = [1, 50, 128], strides = [1, 1, 1]} : vector<21x50x128xf32> to vector<1x50x128xf32>
    %144 = vector.shape_cast %143 : vector<1x50x128xf32> to vector<50x128xf32>
    %145 = arith.maximumf %142, %144 : vector<50x128xf32>
    %146 = vector.extract_strided_slice %32 {offsets = [20, 0, 0], sizes = [1, 50, 128], strides = [1, 1, 1]} : vector<21x50x128xf32> to vector<1x50x128xf32>
    %147 = vector.shape_cast %146 : vector<1x50x128xf32> to vector<50x128xf32>
    %148 = arith.maximumf %145, %147 : vector<50x128xf32>
    %149 = arith.truncf %148 : vector<50x128xf32> to vector<50x128xbf16>
    %c0_42 = arith.constant 0 : index
    %c9 = arith.constant 9 : index
    %c0_43 = arith.constant 0 : index
    %c0_44 = arith.constant 0 : index
    %150 = vector.load %arg7[%c0_42, %c9, %c0_43, %c0_44] : memref<1x10x50x128xbf16, #tpu.memory_space<vmem>>, vector<1x1x50x128xbf16>
    %151 = vector.shape_cast %150 : vector<1x1x50x128xbf16> to vector<50x128xbf16>
    %152 = vector.shape_cast %149 : vector<50x128xbf16> to vector<1x1x50x128xbf16>
    tpu.vector_store %arg7[%c0_42, %c9, %c0_43, %c0_44], %152 {strides = array<i32>} : memref<1x10x50x128xbf16, #tpu.memory_space<vmem>>, vector<1x1x50x128xbf16>,
    return
  }
  func.func @transform_0(%arg0: i32, %arg1: i32) -> (i32, i32, i32, i32) {
    %c0_i32 = arith.constant 0 : i32
    %c0_i32_0 = arith.constant 0 : i32
    %c0_i32_1 = arith.constant 0 : i32
    %c0_i32_2 = arith.constant 0 : i32
    return %arg0, %c0_i32, %c0_i32_0, %c0_i32_1 : i32, i32, i32, i32
  }
  func.func @transform_1(%arg0: i32, %arg1: i32) -> (i32, i32, i32, i32) {
    %c0_i32 = arith.constant 0 : i32
    %c0_i32_0 = arith.constant 0 : i32
    %c0_i32_1 = arith.constant 0 : i32
    %c0_i32_2 = arith.constant 0 : i32
    return %arg0, %c0_i32, %c0_i32_0, %c0_i32_1 : i32, i32, i32, i32
  }
  func.func @transform_2(%arg0: i32, %arg1: i32) -> (i32, i32) {
    %c0_i32 = arith.constant 0 : i32
    %c0_i32_0 = arith.constant 0 : i32
    %c0_i32_1 = arith.constant 0 : i32
    return %c0_i32, %c0_i32_0 : i32, i32
  }
  func.func @transform_3(%arg0: i32, %arg1: i32) -> (i32, i32) {
    %c0_i32 = arith.constant 0 : i32
    %c0_i32_0 = arith.constant 0 : i32
    %c0_i32_1 = arith.constant 0 : i32
    return %c0_i32, %c0_i32_0 : i32, i32
  }
  func.func @transform_4(%arg0: i32, %arg1: i32) -> (i32, i32) {
    %c0_i32 = arith.constant 0 : i32
    %c0_i32_0 = arith.constant 0 : i32
    %c0_i32_1 = arith.constant 0 : i32
    return %c0_i32, %c0_i32_0 : i32, i32
  }
  func.func @transform_5(%arg0: i32, %arg1: i32) -> (i32, i32, i32, i32) {
    %c0_i32 = arith.constant 0 : i32
    %c0_i32_0 = arith.constant 0 : i32
    %c0_i32_1 = arith.constant 0 : i32
    return %arg0, %arg1, %c0_i32, %c0_i32_0 : i32, i32, i32, i32
  }
}

module attributes {stable_mosaic.version = 11 : i64} {
  func.func @kernel(%arg0: i32, %arg1: i32, %arg2: memref<1x24x16x512xbf16, #tpu.memory_space<vmem>>, %arg3: memref<1x24x16x512xbf16, #tpu.memory_space<vmem>>, %arg4: memref<512x128xbf16, #tpu.memory_space<vmem>>, %arg5: memref<1x128xf32, #tpu.memory_space<vmem>>, %arg6: memref<1x128xf32, #tpu.memory_space<vmem>>, %arg7: memref<1x12x12x128xbf16, #tpu.memory_space<vmem>>) attributes {dimension_semantics = [#tpu.dimension_semantics<parallel>, #tpu.dimension_semantics<arbitrary>], iteration_bounds = array<i64: 2, 1>, scalar_prefetch = 0 : i64, scratch_operands = 0 : i64, tpu.core_type = #tpu.core_type<tc>, window_params = [{transform_indices = @transform_0, window_bounds = array<i64: 1, 24, 16, 512>}, {transform_indices = @transform_1, window_bounds = array<i64: 1, 24, 16, 512>}, {pipeline_mode = #tpu.pipeline_mode<synchronous>, transform_indices = @transform_2, window_bounds = array<i64: 512, 128>}, {pipeline_mode = #tpu.pipeline_mode<synchronous>, transform_indices = @transform_3, window_bounds = array<i64: 1, 128>}, {pipeline_mode = #tpu.pipeline_mode<synchronous>, transform_indices = @transform_4, window_bounds = array<i64: 1, 128>}, {transform_indices = @transform_5, window_bounds = array<i64: 1, 12, 12, 128>}]} {
    %c24_i32 = arith.constant 24 : i32
    %0 = arith.muli %arg1, %c24_i32 : i32
    %c0 = arith.constant 0 : index
    %c0_0 = arith.constant 0 : index
    %1 = vector.load %arg4[%c0, %c0_0] : memref<512x128xbf16, #tpu.memory_space<vmem>>, vector<512x128xbf16>
    %c0_1 = arith.constant 0 : index
    %c0_2 = arith.constant 0 : index
    %2 = vector.load %arg5[%c0_1, %c0_2] : memref<1x128xf32, #tpu.memory_space<vmem>>, vector<1x128xf32>
    %c0_3 = arith.constant 0 : index
    %c0_4 = arith.constant 0 : index
    %3 = vector.load %arg6[%c0_3, %c0_4] : memref<1x128xf32, #tpu.memory_space<vmem>>, vector<1x128xf32>
    %c0_5 = arith.constant 0 : index
    %4 = arith.index_cast %0 : i32 to index
    %c0_6 = arith.constant 0 : index
    %c0_7 = arith.constant 0 : index
    %5 = vector.load %arg2[%c0_5, %4, %c0_6, %c0_7] : memref<1x24x16x512xbf16, #tpu.memory_space<vmem>>, vector<1x24x16x512xbf16>
    %6 = vector.shape_cast %5 : vector<1x24x16x512xbf16> to vector<24x16x512xbf16>
    %c0_8 = arith.constant 0 : index
    %7 = arith.index_cast %0 : i32 to index
    %c0_9 = arith.constant 0 : index
    %c0_10 = arith.constant 0 : index
    %8 = vector.load %arg3[%c0_8, %7, %c0_9, %c0_10] : memref<1x24x16x512xbf16, #tpu.memory_space<vmem>>, vector<1x24x16x512xbf16>
    %9 = vector.shape_cast %8 : vector<1x24x16x512xbf16> to vector<24x16x512xbf16>
    %10 = vector.shape_cast %6 : vector<24x16x512xbf16> to vector<384x512xbf16>
    %cst = arith.constant dense<0.000000e+00> : vector<384x128xf32>
    %11 = tpu.matmul %10, %1, %cst {dimension_numbers = #tpu.dot_dimension_numbers<[1], [0], [0], [1], [0, 0, 1, 1], [], []>} : vector<384x512xbf16>, vector<512x128xbf16>, vector<384x128xf32> -> vector<384x128xf32>
    %12 = vector.shape_cast %9 : vector<24x16x512xbf16> to vector<384x512xbf16>
    %cst_11 = arith.constant dense<0.000000e+00> : vector<384x128xf32>
    %13 = tpu.matmul %12, %1, %cst_11 {dimension_numbers = #tpu.dot_dimension_numbers<[1], [0], [0], [1], [0, 0, 1, 1], [], []>} : vector<384x512xbf16>, vector<512x128xbf16>, vector<384x128xf32> -> vector<384x128xf32>
    %14 = vector.broadcast %2 : vector<1x128xf32> to vector<384x128xf32>
    %15 = arith.mulf %11, %14 : vector<384x128xf32>
    %16 = vector.broadcast %3 : vector<1x128xf32> to vector<384x128xf32>
    %17 = arith.addf %15, %16 : vector<384x128xf32>
    %cst_12 = arith.constant 0.000000e+00 : f32
    %18 = vector.broadcast %cst_12 : f32 to vector<384x128xf32>
    %19 = arith.maximumf %17, %18 : vector<384x128xf32>
    %20 = vector.shape_cast %19 : vector<384x128xf32> to vector<24x16x128xf32>
    %21 = vector.broadcast %2 : vector<1x128xf32> to vector<384x128xf32>
    %22 = arith.mulf %13, %21 : vector<384x128xf32>
    %23 = vector.broadcast %3 : vector<1x128xf32> to vector<384x128xf32>
    %24 = arith.addf %22, %23 : vector<384x128xf32>
    %cst_13 = arith.constant 0.000000e+00 : f32
    %25 = vector.broadcast %cst_13 : f32 to vector<384x128xf32>
    %26 = arith.maximumf %24, %25 : vector<384x128xf32>
    %27 = vector.shape_cast %26 : vector<384x128xf32> to vector<24x16x128xf32>
    %28 = vector.extract_strided_slice %20 {offsets = [0, 0, 0], sizes = [24, 12, 128], strides = [1, 1, 1]} : vector<24x16x128xf32> to vector<24x12x128xf32>
    %29 = vector.extract_strided_slice %27 {offsets = [0, 0, 0], sizes = [24, 12, 128], strides = [1, 1, 1]} : vector<24x16x128xf32> to vector<24x12x128xf32>
    %30 = vector.extract_strided_slice %20 {offsets = [0, 1, 0], sizes = [24, 11, 128], strides = [1, 1, 1]} : vector<24x16x128xf32> to vector<24x11x128xf32>
    %cst_14 = arith.constant 0.000000e+00 : f32
    %31 = vector.broadcast %cst_14 : f32 to vector<24x1x128xf32>
    %32 = tpu.concatenate %30, %31 in 1 : vector<24x11x128xf32>, vector<24x1x128xf32> -> vector<24x12x128xf32>
    %33 = arith.maximumf %28, %29 : vector<24x12x128xf32>
    %34 = arith.maximumf %33, %32 : vector<24x12x128xf32>
    %35 = vector.extract_strided_slice %34 {offsets = [0, 0, 0], sizes = [1, 12, 128], strides = [1, 1, 1]} : vector<24x12x128xf32> to vector<1x12x128xf32>
    %36 = vector.shape_cast %35 : vector<1x12x128xf32> to vector<12x128xf32>
    %37 = vector.extract_strided_slice %34 {offsets = [1, 0, 0], sizes = [1, 12, 128], strides = [1, 1, 1]} : vector<24x12x128xf32> to vector<1x12x128xf32>
    %38 = vector.shape_cast %37 : vector<1x12x128xf32> to vector<12x128xf32>
    %39 = arith.maximumf %36, %38 : vector<12x128xf32>
    %40 = vector.extract_strided_slice %34 {offsets = [2, 0, 0], sizes = [1, 12, 128], strides = [1, 1, 1]} : vector<24x12x128xf32> to vector<1x12x128xf32>
    %41 = vector.shape_cast %40 : vector<1x12x128xf32> to vector<12x128xf32>
    %42 = arith.maximumf %39, %41 : vector<12x128xf32>
    %43 = arith.truncf %42 : vector<12x128xf32> to vector<12x128xbf16>
    %c0_15 = arith.constant 0 : index
    %c0_16 = arith.constant 0 : index
    %c0_17 = arith.constant 0 : index
    %c0_18 = arith.constant 0 : index
    %44 = vector.load %arg7[%c0_15, %c0_16, %c0_17, %c0_18] : memref<1x12x12x128xbf16, #tpu.memory_space<vmem>>, vector<1x1x12x128xbf16>
    %45 = vector.shape_cast %44 : vector<1x1x12x128xbf16> to vector<12x128xbf16>
    %46 = vector.shape_cast %43 : vector<12x128xbf16> to vector<1x1x12x128xbf16>
    tpu.vector_store %arg7[%c0_15, %c0_16, %c0_17, %c0_18], %46 {strides = array<i32>} : memref<1x12x12x128xbf16, #tpu.memory_space<vmem>>, vector<1x1x12x128xbf16>,
    %47 = vector.extract_strided_slice %34 {offsets = [2, 0, 0], sizes = [1, 12, 128], strides = [1, 1, 1]} : vector<24x12x128xf32> to vector<1x12x128xf32>
    %48 = vector.shape_cast %47 : vector<1x12x128xf32> to vector<12x128xf32>
    %49 = vector.extract_strided_slice %34 {offsets = [3, 0, 0], sizes = [1, 12, 128], strides = [1, 1, 1]} : vector<24x12x128xf32> to vector<1x12x128xf32>
    %50 = vector.shape_cast %49 : vector<1x12x128xf32> to vector<12x128xf32>
    %51 = arith.maximumf %48, %50 : vector<12x128xf32>
    %52 = vector.extract_strided_slice %34 {offsets = [4, 0, 0], sizes = [1, 12, 128], strides = [1, 1, 1]} : vector<24x12x128xf32> to vector<1x12x128xf32>
    %53 = vector.shape_cast %52 : vector<1x12x128xf32> to vector<12x128xf32>
    %54 = arith.maximumf %51, %53 : vector<12x128xf32>
    %55 = arith.truncf %54 : vector<12x128xf32> to vector<12x128xbf16>
    %c0_19 = arith.constant 0 : index
    %c1 = arith.constant 1 : index
    %c0_20 = arith.constant 0 : index
    %c0_21 = arith.constant 0 : index
    %56 = vector.load %arg7[%c0_19, %c1, %c0_20, %c0_21] : memref<1x12x12x128xbf16, #tpu.memory_space<vmem>>, vector<1x1x12x128xbf16>
    %57 = vector.shape_cast %56 : vector<1x1x12x128xbf16> to vector<12x128xbf16>
    %58 = vector.shape_cast %55 : vector<12x128xbf16> to vector<1x1x12x128xbf16>
    tpu.vector_store %arg7[%c0_19, %c1, %c0_20, %c0_21], %58 {strides = array<i32>} : memref<1x12x12x128xbf16, #tpu.memory_space<vmem>>, vector<1x1x12x128xbf16>,
    %59 = vector.extract_strided_slice %34 {offsets = [4, 0, 0], sizes = [1, 12, 128], strides = [1, 1, 1]} : vector<24x12x128xf32> to vector<1x12x128xf32>
    %60 = vector.shape_cast %59 : vector<1x12x128xf32> to vector<12x128xf32>
    %61 = vector.extract_strided_slice %34 {offsets = [5, 0, 0], sizes = [1, 12, 128], strides = [1, 1, 1]} : vector<24x12x128xf32> to vector<1x12x128xf32>
    %62 = vector.shape_cast %61 : vector<1x12x128xf32> to vector<12x128xf32>
    %63 = arith.maximumf %60, %62 : vector<12x128xf32>
    %64 = vector.extract_strided_slice %34 {offsets = [6, 0, 0], sizes = [1, 12, 128], strides = [1, 1, 1]} : vector<24x12x128xf32> to vector<1x12x128xf32>
    %65 = vector.shape_cast %64 : vector<1x12x128xf32> to vector<12x128xf32>
    %66 = arith.maximumf %63, %65 : vector<12x128xf32>
    %67 = arith.truncf %66 : vector<12x128xf32> to vector<12x128xbf16>
    %c0_22 = arith.constant 0 : index
    %c2 = arith.constant 2 : index
    %c0_23 = arith.constant 0 : index
    %c0_24 = arith.constant 0 : index
    %68 = vector.load %arg7[%c0_22, %c2, %c0_23, %c0_24] : memref<1x12x12x128xbf16, #tpu.memory_space<vmem>>, vector<1x1x12x128xbf16>
    %69 = vector.shape_cast %68 : vector<1x1x12x128xbf16> to vector<12x128xbf16>
    %70 = vector.shape_cast %67 : vector<12x128xbf16> to vector<1x1x12x128xbf16>
    tpu.vector_store %arg7[%c0_22, %c2, %c0_23, %c0_24], %70 {strides = array<i32>} : memref<1x12x12x128xbf16, #tpu.memory_space<vmem>>, vector<1x1x12x128xbf16>,
    %71 = vector.extract_strided_slice %34 {offsets = [6, 0, 0], sizes = [1, 12, 128], strides = [1, 1, 1]} : vector<24x12x128xf32> to vector<1x12x128xf32>
    %72 = vector.shape_cast %71 : vector<1x12x128xf32> to vector<12x128xf32>
    %73 = vector.extract_strided_slice %34 {offsets = [7, 0, 0], sizes = [1, 12, 128], strides = [1, 1, 1]} : vector<24x12x128xf32> to vector<1x12x128xf32>
    %74 = vector.shape_cast %73 : vector<1x12x128xf32> to vector<12x128xf32>
    %75 = arith.maximumf %72, %74 : vector<12x128xf32>
    %76 = vector.extract_strided_slice %34 {offsets = [8, 0, 0], sizes = [1, 12, 128], strides = [1, 1, 1]} : vector<24x12x128xf32> to vector<1x12x128xf32>
    %77 = vector.shape_cast %76 : vector<1x12x128xf32> to vector<12x128xf32>
    %78 = arith.maximumf %75, %77 : vector<12x128xf32>
    %79 = arith.truncf %78 : vector<12x128xf32> to vector<12x128xbf16>
    %c0_25 = arith.constant 0 : index
    %c3 = arith.constant 3 : index
    %c0_26 = arith.constant 0 : index
    %c0_27 = arith.constant 0 : index
    %80 = vector.load %arg7[%c0_25, %c3, %c0_26, %c0_27] : memref<1x12x12x128xbf16, #tpu.memory_space<vmem>>, vector<1x1x12x128xbf16>
    %81 = vector.shape_cast %80 : vector<1x1x12x128xbf16> to vector<12x128xbf16>
    %82 = vector.shape_cast %79 : vector<12x128xbf16> to vector<1x1x12x128xbf16>
    tpu.vector_store %arg7[%c0_25, %c3, %c0_26, %c0_27], %82 {strides = array<i32>} : memref<1x12x12x128xbf16, #tpu.memory_space<vmem>>, vector<1x1x12x128xbf16>,
    %83 = vector.extract_strided_slice %34 {offsets = [8, 0, 0], sizes = [1, 12, 128], strides = [1, 1, 1]} : vector<24x12x128xf32> to vector<1x12x128xf32>
    %84 = vector.shape_cast %83 : vector<1x12x128xf32> to vector<12x128xf32>
    %85 = vector.extract_strided_slice %34 {offsets = [9, 0, 0], sizes = [1, 12, 128], strides = [1, 1, 1]} : vector<24x12x128xf32> to vector<1x12x128xf32>
    %86 = vector.shape_cast %85 : vector<1x12x128xf32> to vector<12x128xf32>
    %87 = arith.maximumf %84, %86 : vector<12x128xf32>
    %88 = vector.extract_strided_slice %34 {offsets = [10, 0, 0], sizes = [1, 12, 128], strides = [1, 1, 1]} : vector<24x12x128xf32> to vector<1x12x128xf32>
    %89 = vector.shape_cast %88 : vector<1x12x128xf32> to vector<12x128xf32>
    %90 = arith.maximumf %87, %89 : vector<12x128xf32>
    %91 = arith.truncf %90 : vector<12x128xf32> to vector<12x128xbf16>
    %c0_28 = arith.constant 0 : index
    %c4 = arith.constant 4 : index
    %c0_29 = arith.constant 0 : index
    %c0_30 = arith.constant 0 : index
    %92 = vector.load %arg7[%c0_28, %c4, %c0_29, %c0_30] : memref<1x12x12x128xbf16, #tpu.memory_space<vmem>>, vector<1x1x12x128xbf16>
    %93 = vector.shape_cast %92 : vector<1x1x12x128xbf16> to vector<12x128xbf16>
    %94 = vector.shape_cast %91 : vector<12x128xbf16> to vector<1x1x12x128xbf16>
    tpu.vector_store %arg7[%c0_28, %c4, %c0_29, %c0_30], %94 {strides = array<i32>} : memref<1x12x12x128xbf16, #tpu.memory_space<vmem>>, vector<1x1x12x128xbf16>,
    %95 = vector.extract_strided_slice %34 {offsets = [10, 0, 0], sizes = [1, 12, 128], strides = [1, 1, 1]} : vector<24x12x128xf32> to vector<1x12x128xf32>
    %96 = vector.shape_cast %95 : vector<1x12x128xf32> to vector<12x128xf32>
    %97 = vector.extract_strided_slice %34 {offsets = [11, 0, 0], sizes = [1, 12, 128], strides = [1, 1, 1]} : vector<24x12x128xf32> to vector<1x12x128xf32>
    %98 = vector.shape_cast %97 : vector<1x12x128xf32> to vector<12x128xf32>
    %99 = arith.maximumf %96, %98 : vector<12x128xf32>
    %100 = vector.extract_strided_slice %34 {offsets = [12, 0, 0], sizes = [1, 12, 128], strides = [1, 1, 1]} : vector<24x12x128xf32> to vector<1x12x128xf32>
    %101 = vector.shape_cast %100 : vector<1x12x128xf32> to vector<12x128xf32>
    %102 = arith.maximumf %99, %101 : vector<12x128xf32>
    %103 = arith.truncf %102 : vector<12x128xf32> to vector<12x128xbf16>
    %c0_31 = arith.constant 0 : index
    %c5 = arith.constant 5 : index
    %c0_32 = arith.constant 0 : index
    %c0_33 = arith.constant 0 : index
    %104 = vector.load %arg7[%c0_31, %c5, %c0_32, %c0_33] : memref<1x12x12x128xbf16, #tpu.memory_space<vmem>>, vector<1x1x12x128xbf16>
    %105 = vector.shape_cast %104 : vector<1x1x12x128xbf16> to vector<12x128xbf16>
    %106 = vector.shape_cast %103 : vector<12x128xbf16> to vector<1x1x12x128xbf16>
    tpu.vector_store %arg7[%c0_31, %c5, %c0_32, %c0_33], %106 {strides = array<i32>} : memref<1x12x12x128xbf16, #tpu.memory_space<vmem>>, vector<1x1x12x128xbf16>,
    %107 = vector.extract_strided_slice %34 {offsets = [12, 0, 0], sizes = [1, 12, 128], strides = [1, 1, 1]} : vector<24x12x128xf32> to vector<1x12x128xf32>
    %108 = vector.shape_cast %107 : vector<1x12x128xf32> to vector<12x128xf32>
    %109 = vector.extract_strided_slice %34 {offsets = [13, 0, 0], sizes = [1, 12, 128], strides = [1, 1, 1]} : vector<24x12x128xf32> to vector<1x12x128xf32>
    %110 = vector.shape_cast %109 : vector<1x12x128xf32> to vector<12x128xf32>
    %111 = arith.maximumf %108, %110 : vector<12x128xf32>
    %112 = vector.extract_strided_slice %34 {offsets = [14, 0, 0], sizes = [1, 12, 128], strides = [1, 1, 1]} : vector<24x12x128xf32> to vector<1x12x128xf32>
    %113 = vector.shape_cast %112 : vector<1x12x128xf32> to vector<12x128xf32>
    %114 = arith.maximumf %111, %113 : vector<12x128xf32>
    %115 = arith.truncf %114 : vector<12x128xf32> to vector<12x128xbf16>
    %c0_34 = arith.constant 0 : index
    %c6 = arith.constant 6 : index
    %c0_35 = arith.constant 0 : index
    %c0_36 = arith.constant 0 : index
    %116 = vector.load %arg7[%c0_34, %c6, %c0_35, %c0_36] : memref<1x12x12x128xbf16, #tpu.memory_space<vmem>>, vector<1x1x12x128xbf16>
    %117 = vector.shape_cast %116 : vector<1x1x12x128xbf16> to vector<12x128xbf16>
    %118 = vector.shape_cast %115 : vector<12x128xbf16> to vector<1x1x12x128xbf16>
    tpu.vector_store %arg7[%c0_34, %c6, %c0_35, %c0_36], %118 {strides = array<i32>} : memref<1x12x12x128xbf16, #tpu.memory_space<vmem>>, vector<1x1x12x128xbf16>,
    %119 = vector.extract_strided_slice %34 {offsets = [14, 0, 0], sizes = [1, 12, 128], strides = [1, 1, 1]} : vector<24x12x128xf32> to vector<1x12x128xf32>
    %120 = vector.shape_cast %119 : vector<1x12x128xf32> to vector<12x128xf32>
    %121 = vector.extract_strided_slice %34 {offsets = [15, 0, 0], sizes = [1, 12, 128], strides = [1, 1, 1]} : vector<24x12x128xf32> to vector<1x12x128xf32>
    %122 = vector.shape_cast %121 : vector<1x12x128xf32> to vector<12x128xf32>
    %123 = arith.maximumf %120, %122 : vector<12x128xf32>
    %124 = vector.extract_strided_slice %34 {offsets = [16, 0, 0], sizes = [1, 12, 128], strides = [1, 1, 1]} : vector<24x12x128xf32> to vector<1x12x128xf32>
    %125 = vector.shape_cast %124 : vector<1x12x128xf32> to vector<12x128xf32>
    %126 = arith.maximumf %123, %125 : vector<12x128xf32>
    %127 = arith.truncf %126 : vector<12x128xf32> to vector<12x128xbf16>
    %c0_37 = arith.constant 0 : index
    %c7 = arith.constant 7 : index
    %c0_38 = arith.constant 0 : index
    %c0_39 = arith.constant 0 : index
    %128 = vector.load %arg7[%c0_37, %c7, %c0_38, %c0_39] : memref<1x12x12x128xbf16, #tpu.memory_space<vmem>>, vector<1x1x12x128xbf16>
    %129 = vector.shape_cast %128 : vector<1x1x12x128xbf16> to vector<12x128xbf16>
    %130 = vector.shape_cast %127 : vector<12x128xbf16> to vector<1x1x12x128xbf16>
    tpu.vector_store %arg7[%c0_37, %c7, %c0_38, %c0_39], %130 {strides = array<i32>} : memref<1x12x12x128xbf16, #tpu.memory_space<vmem>>, vector<1x1x12x128xbf16>,
    %131 = vector.extract_strided_slice %34 {offsets = [16, 0, 0], sizes = [1, 12, 128], strides = [1, 1, 1]} : vector<24x12x128xf32> to vector<1x12x128xf32>
    %132 = vector.shape_cast %131 : vector<1x12x128xf32> to vector<12x128xf32>
    %133 = vector.extract_strided_slice %34 {offsets = [17, 0, 0], sizes = [1, 12, 128], strides = [1, 1, 1]} : vector<24x12x128xf32> to vector<1x12x128xf32>
    %134 = vector.shape_cast %133 : vector<1x12x128xf32> to vector<12x128xf32>
    %135 = arith.maximumf %132, %134 : vector<12x128xf32>
    %136 = vector.extract_strided_slice %34 {offsets = [18, 0, 0], sizes = [1, 12, 128], strides = [1, 1, 1]} : vector<24x12x128xf32> to vector<1x12x128xf32>
    %137 = vector.shape_cast %136 : vector<1x12x128xf32> to vector<12x128xf32>
    %138 = arith.maximumf %135, %137 : vector<12x128xf32>
    %139 = arith.truncf %138 : vector<12x128xf32> to vector<12x128xbf16>
    %c0_40 = arith.constant 0 : index
    %c8 = arith.constant 8 : index
    %c0_41 = arith.constant 0 : index
    %c0_42 = arith.constant 0 : index
    %140 = vector.load %arg7[%c0_40, %c8, %c0_41, %c0_42] : memref<1x12x12x128xbf16, #tpu.memory_space<vmem>>, vector<1x1x12x128xbf16>
    %141 = vector.shape_cast %140 : vector<1x1x12x128xbf16> to vector<12x128xbf16>
    %142 = vector.shape_cast %139 : vector<12x128xbf16> to vector<1x1x12x128xbf16>
    tpu.vector_store %arg7[%c0_40, %c8, %c0_41, %c0_42], %142 {strides = array<i32>} : memref<1x12x12x128xbf16, #tpu.memory_space<vmem>>, vector<1x1x12x128xbf16>,
    %143 = vector.extract_strided_slice %34 {offsets = [18, 0, 0], sizes = [1, 12, 128], strides = [1, 1, 1]} : vector<24x12x128xf32> to vector<1x12x128xf32>
    %144 = vector.shape_cast %143 : vector<1x12x128xf32> to vector<12x128xf32>
    %145 = vector.extract_strided_slice %34 {offsets = [19, 0, 0], sizes = [1, 12, 128], strides = [1, 1, 1]} : vector<24x12x128xf32> to vector<1x12x128xf32>
    %146 = vector.shape_cast %145 : vector<1x12x128xf32> to vector<12x128xf32>
    %147 = arith.maximumf %144, %146 : vector<12x128xf32>
    %148 = vector.extract_strided_slice %34 {offsets = [20, 0, 0], sizes = [1, 12, 128], strides = [1, 1, 1]} : vector<24x12x128xf32> to vector<1x12x128xf32>
    %149 = vector.shape_cast %148 : vector<1x12x128xf32> to vector<12x128xf32>
    %150 = arith.maximumf %147, %149 : vector<12x128xf32>
    %151 = arith.truncf %150 : vector<12x128xf32> to vector<12x128xbf16>
    %c0_43 = arith.constant 0 : index
    %c9 = arith.constant 9 : index
    %c0_44 = arith.constant 0 : index
    %c0_45 = arith.constant 0 : index
    %152 = vector.load %arg7[%c0_43, %c9, %c0_44, %c0_45] : memref<1x12x12x128xbf16, #tpu.memory_space<vmem>>, vector<1x1x12x128xbf16>
    %153 = vector.shape_cast %152 : vector<1x1x12x128xbf16> to vector<12x128xbf16>
    %154 = vector.shape_cast %151 : vector<12x128xbf16> to vector<1x1x12x128xbf16>
    tpu.vector_store %arg7[%c0_43, %c9, %c0_44, %c0_45], %154 {strides = array<i32>} : memref<1x12x12x128xbf16, #tpu.memory_space<vmem>>, vector<1x1x12x128xbf16>,
    %155 = vector.extract_strided_slice %34 {offsets = [20, 0, 0], sizes = [1, 12, 128], strides = [1, 1, 1]} : vector<24x12x128xf32> to vector<1x12x128xf32>
    %156 = vector.shape_cast %155 : vector<1x12x128xf32> to vector<12x128xf32>
    %157 = vector.extract_strided_slice %34 {offsets = [21, 0, 0], sizes = [1, 12, 128], strides = [1, 1, 1]} : vector<24x12x128xf32> to vector<1x12x128xf32>
    %158 = vector.shape_cast %157 : vector<1x12x128xf32> to vector<12x128xf32>
    %159 = arith.maximumf %156, %158 : vector<12x128xf32>
    %160 = vector.extract_strided_slice %34 {offsets = [22, 0, 0], sizes = [1, 12, 128], strides = [1, 1, 1]} : vector<24x12x128xf32> to vector<1x12x128xf32>
    %161 = vector.shape_cast %160 : vector<1x12x128xf32> to vector<12x128xf32>
    %162 = arith.maximumf %159, %161 : vector<12x128xf32>
    %163 = arith.truncf %162 : vector<12x128xf32> to vector<12x128xbf16>
    %c0_46 = arith.constant 0 : index
    %c10 = arith.constant 10 : index
    %c0_47 = arith.constant 0 : index
    %c0_48 = arith.constant 0 : index
    %164 = vector.load %arg7[%c0_46, %c10, %c0_47, %c0_48] : memref<1x12x12x128xbf16, #tpu.memory_space<vmem>>, vector<1x1x12x128xbf16>
    %165 = vector.shape_cast %164 : vector<1x1x12x128xbf16> to vector<12x128xbf16>
    %166 = vector.shape_cast %163 : vector<12x128xbf16> to vector<1x1x12x128xbf16>
    tpu.vector_store %arg7[%c0_46, %c10, %c0_47, %c0_48], %166 {strides = array<i32>} : memref<1x12x12x128xbf16, #tpu.memory_space<vmem>>, vector<1x1x12x128xbf16>,
    %167 = vector.extract_strided_slice %34 {offsets = [22, 0, 0], sizes = [1, 12, 128], strides = [1, 1, 1]} : vector<24x12x128xf32> to vector<1x12x128xf32>
    %168 = vector.shape_cast %167 : vector<1x12x128xf32> to vector<12x128xf32>
    %169 = vector.extract_strided_slice %34 {offsets = [23, 0, 0], sizes = [1, 12, 128], strides = [1, 1, 1]} : vector<24x12x128xf32> to vector<1x12x128xf32>
    %170 = vector.shape_cast %169 : vector<1x12x128xf32> to vector<12x128xf32>
    %171 = arith.maximumf %168, %170 : vector<12x128xf32>
    %172 = arith.truncf %171 : vector<12x128xf32> to vector<12x128xbf16>
    %c0_49 = arith.constant 0 : index
    %c11 = arith.constant 11 : index
    %c0_50 = arith.constant 0 : index
    %c0_51 = arith.constant 0 : index
    %173 = vector.load %arg7[%c0_49, %c11, %c0_50, %c0_51] : memref<1x12x12x128xbf16, #tpu.memory_space<vmem>>, vector<1x1x12x128xbf16>
    %174 = vector.shape_cast %173 : vector<1x1x12x128xbf16> to vector<12x128xbf16>
    %175 = vector.shape_cast %172 : vector<12x128xbf16> to vector<1x1x12x128xbf16>
    tpu.vector_store %arg7[%c0_49, %c11, %c0_50, %c0_51], %175 {strides = array<i32>} : memref<1x12x12x128xbf16, #tpu.memory_space<vmem>>, vector<1x1x12x128xbf16>,
    return
  }
  func.func @transform_0(%arg0: i32, %arg1: i32) -> (i32, i32, i32, i32) {
    %c0_i32 = arith.constant 0 : i32
    %c0_i32_0 = arith.constant 0 : i32
    %c0_i32_1 = arith.constant 0 : i32
    %c0_i32_2 = arith.constant 0 : i32
    return %arg0, %c0_i32, %c0_i32_0, %c0_i32_1 : i32, i32, i32, i32
  }
  func.func @transform_1(%arg0: i32, %arg1: i32) -> (i32, i32, i32, i32) {
    %c0_i32 = arith.constant 0 : i32
    %c0_i32_0 = arith.constant 0 : i32
    %c0_i32_1 = arith.constant 0 : i32
    %c0_i32_2 = arith.constant 0 : i32
    return %arg0, %c0_i32, %c0_i32_0, %c0_i32_1 : i32, i32, i32, i32
  }
  func.func @transform_2(%arg0: i32, %arg1: i32) -> (i32, i32) {
    %c0_i32 = arith.constant 0 : i32
    %c0_i32_0 = arith.constant 0 : i32
    %c0_i32_1 = arith.constant 0 : i32
    return %c0_i32, %c0_i32_0 : i32, i32
  }
  func.func @transform_3(%arg0: i32, %arg1: i32) -> (i32, i32) {
    %c0_i32 = arith.constant 0 : i32
    %c0_i32_0 = arith.constant 0 : i32
    %c0_i32_1 = arith.constant 0 : i32
    return %c0_i32, %c0_i32_0 : i32, i32
  }
  func.func @transform_4(%arg0: i32, %arg1: i32) -> (i32, i32) {
    %c0_i32 = arith.constant 0 : i32
    %c0_i32_0 = arith.constant 0 : i32
    %c0_i32_1 = arith.constant 0 : i32
    return %c0_i32, %c0_i32_0 : i32, i32
  }
  func.func @transform_5(%arg0: i32, %arg1: i32) -> (i32, i32, i32, i32) {
    %c0_i32 = arith.constant 0 : i32
    %c0_i32_0 = arith.constant 0 : i32
    %c0_i32_1 = arith.constant 0 : i32
    return %arg0, %arg1, %c0_i32, %c0_i32_0 : i32, i32, i32, i32
  }
}

module attributes {stable_mosaic.version = 11 : i64} {
  func.func @kernel(%arg0: i32, %arg1: memref<1x12x16x384xbf16, #tpu.memory_space<vmem>>, %arg2: memref<384x128xbf16, #tpu.memory_space<vmem>>, %arg3: memref<1x128xf32, #tpu.memory_space<vmem>>, %arg4: memref<1x128xf32, #tpu.memory_space<vmem>>, %arg5: memref<1x12x12x128xbf16, #tpu.memory_space<vmem>>) attributes {dimension_semantics = [#tpu.dimension_semantics<parallel>], iteration_bounds = array<i64: 2>, scalar_prefetch = 0 : i64, scratch_operands = 0 : i64, tpu.core_type = #tpu.core_type<tc>, window_params = [{transform_indices = @transform_0, window_bounds = array<i64: 1, 12, 16, 384>}, {pipeline_mode = #tpu.pipeline_mode<synchronous>, transform_indices = @transform_1, window_bounds = array<i64: 384, 128>}, {pipeline_mode = #tpu.pipeline_mode<synchronous>, transform_indices = @transform_2, window_bounds = array<i64: 1, 128>}, {pipeline_mode = #tpu.pipeline_mode<synchronous>, transform_indices = @transform_3, window_bounds = array<i64: 1, 128>}, {transform_indices = @transform_4, window_bounds = array<i64: 1, 12, 12, 128>}]} {
    %c0 = arith.constant 0 : index
    %c0_0 = arith.constant 0 : index
    %c0_1 = arith.constant 0 : index
    %c0_2 = arith.constant 0 : index
    %0 = vector.load %arg1[%c0, %c0_0, %c0_1, %c0_2] : memref<1x12x16x384xbf16, #tpu.memory_space<vmem>>, vector<1x12x16x384xbf16>
    %1 = vector.shape_cast %0 : vector<1x12x16x384xbf16> to vector<12x16x384xbf16>
    %2 = vector.shape_cast %1 : vector<12x16x384xbf16> to vector<192x384xbf16>
    %c0_3 = arith.constant 0 : index
    %c0_4 = arith.constant 0 : index
    %3 = vector.load %arg2[%c0_3, %c0_4] : memref<384x128xbf16, #tpu.memory_space<vmem>>, vector<384x128xbf16>
    %cst = arith.constant dense<0.000000e+00> : vector<192x128xf32>
    %4 = tpu.matmul %2, %3, %cst {dimension_numbers = #tpu.dot_dimension_numbers<[1], [0], [0], [1], [0, 0, 1, 1], [], []>} : vector<192x384xbf16>, vector<384x128xbf16>, vector<192x128xf32> -> vector<192x128xf32>
    %c0_5 = arith.constant 0 : index
    %c0_6 = arith.constant 0 : index
    %5 = vector.load %arg3[%c0_5, %c0_6] : memref<1x128xf32, #tpu.memory_space<vmem>>, vector<1x128xf32>
    %6 = vector.broadcast %5 : vector<1x128xf32> to vector<192x128xf32>
    %7 = arith.mulf %4, %6 : vector<192x128xf32>
    %c0_7 = arith.constant 0 : index
    %c0_8 = arith.constant 0 : index
    %8 = vector.load %arg4[%c0_7, %c0_8] : memref<1x128xf32, #tpu.memory_space<vmem>>, vector<1x128xf32>
    %9 = vector.broadcast %8 : vector<1x128xf32> to vector<192x128xf32>
    %10 = arith.addf %7, %9 : vector<192x128xf32>
    %cst_9 = arith.constant 0.000000e+00 : f32
    %11 = vector.broadcast %cst_9 : f32 to vector<192x128xf32>
    %12 = arith.maximumf %10, %11 : vector<192x128xf32>
    %13 = vector.shape_cast %12 : vector<192x128xf32> to vector<12x16x128xf32>
    %14 = vector.extract_strided_slice %13 {offsets = [0, 0, 0], sizes = [12, 12, 128], strides = [1, 1, 1]} : vector<12x16x128xf32> to vector<12x12x128xf32>
    %15 = arith.truncf %14 : vector<12x12x128xf32> to vector<12x12x128xbf16>
    %c0_10 = arith.constant 0 : index
    %c0_11 = arith.constant 0 : index
    %c0_12 = arith.constant 0 : index
    %c0_13 = arith.constant 0 : index
    %16 = vector.load %arg5[%c0_10, %c0_11, %c0_12, %c0_13] : memref<1x12x12x128xbf16, #tpu.memory_space<vmem>>, vector<1x12x12x128xbf16>
    %17 = vector.shape_cast %16 : vector<1x12x12x128xbf16> to vector<12x12x128xbf16>
    %18 = vector.shape_cast %15 : vector<12x12x128xbf16> to vector<1x12x12x128xbf16>
    tpu.vector_store %arg5[%c0_10, %c0_11, %c0_12, %c0_13], %18 {strides = array<i32>} : memref<1x12x12x128xbf16, #tpu.memory_space<vmem>>, vector<1x12x12x128xbf16>,
    return
  }
  func.func @transform_0(%arg0: i32) -> (i32, i32, i32, i32) {
    %c0_i32 = arith.constant 0 : i32
    %c0_i32_0 = arith.constant 0 : i32
    %c0_i32_1 = arith.constant 0 : i32
    %c0_i32_2 = arith.constant 0 : i32
    return %arg0, %c0_i32, %c0_i32_0, %c0_i32_1 : i32, i32, i32, i32
  }
  func.func @transform_1(%arg0: i32) -> (i32, i32) {
    %c0_i32 = arith.constant 0 : i32
    %c0_i32_0 = arith.constant 0 : i32
    %c0_i32_1 = arith.constant 0 : i32
    return %c0_i32, %c0_i32_0 : i32, i32
  }
  func.func @transform_2(%arg0: i32) -> (i32, i32) {
    %c0_i32 = arith.constant 0 : i32
    %c0_i32_0 = arith.constant 0 : i32
    %c0_i32_1 = arith.constant 0 : i32
    return %c0_i32, %c0_i32_0 : i32, i32
  }
  func.func @transform_3(%arg0: i32) -> (i32, i32) {
    %c0_i32 = arith.constant 0 : i32
    %c0_i32_0 = arith.constant 0 : i32
    %c0_i32_1 = arith.constant 0 : i32
    return %c0_i32, %c0_i32_0 : i32, i32
  }
  func.func @transform_4(%arg0: i32) -> (i32, i32, i32, i32) {
    %c0_i32 = arith.constant 0 : i32
    %c0_i32_0 = arith.constant 0 : i32
    %c0_i32_1 = arith.constant 0 : i32
    %c0_i32_2 = arith.constant 0 : i32
    return %arg0, %c0_i32, %c0_i32_0, %c0_i32_1 : i32, i32, i32, i32
  }
}

module attributes {stable_mosaic.version = 11 : i64} {
  func.func @kernel(%arg0: i32, %arg1: memref<1x12x16x640xbf16, #tpu.memory_space<vmem>>, %arg2: memref<640x128xbf16, #tpu.memory_space<vmem>>, %arg3: memref<1x128xf32, #tpu.memory_space<vmem>>, %arg4: memref<1x128xf32, #tpu.memory_space<vmem>>, %arg5: memref<1x12x12x128xbf16, #tpu.memory_space<vmem>>) attributes {dimension_semantics = [#tpu.dimension_semantics<parallel>], iteration_bounds = array<i64: 2>, scalar_prefetch = 0 : i64, scratch_operands = 0 : i64, tpu.core_type = #tpu.core_type<tc>, window_params = [{transform_indices = @transform_0, window_bounds = array<i64: 1, 12, 16, 640>}, {pipeline_mode = #tpu.pipeline_mode<synchronous>, transform_indices = @transform_1, window_bounds = array<i64: 640, 128>}, {pipeline_mode = #tpu.pipeline_mode<synchronous>, transform_indices = @transform_2, window_bounds = array<i64: 1, 128>}, {pipeline_mode = #tpu.pipeline_mode<synchronous>, transform_indices = @transform_3, window_bounds = array<i64: 1, 128>}, {transform_indices = @transform_4, window_bounds = array<i64: 1, 12, 12, 128>}]} {
    %c0 = arith.constant 0 : index
    %c0_0 = arith.constant 0 : index
    %c0_1 = arith.constant 0 : index
    %c0_2 = arith.constant 0 : index
    %0 = vector.load %arg1[%c0, %c0_0, %c0_1, %c0_2] : memref<1x12x16x640xbf16, #tpu.memory_space<vmem>>, vector<1x12x16x640xbf16>
    %1 = vector.shape_cast %0 : vector<1x12x16x640xbf16> to vector<12x16x640xbf16>
    %2 = vector.shape_cast %1 : vector<12x16x640xbf16> to vector<192x640xbf16>
    %c0_3 = arith.constant 0 : index
    %c0_4 = arith.constant 0 : index
    %3 = vector.load %arg2[%c0_3, %c0_4] : memref<640x128xbf16, #tpu.memory_space<vmem>>, vector<640x128xbf16>
    %cst = arith.constant dense<0.000000e+00> : vector<192x128xf32>
    %4 = tpu.matmul %2, %3, %cst {dimension_numbers = #tpu.dot_dimension_numbers<[1], [0], [0], [1], [0, 0, 1, 1], [], []>} : vector<192x640xbf16>, vector<640x128xbf16>, vector<192x128xf32> -> vector<192x128xf32>
    %c0_5 = arith.constant 0 : index
    %c0_6 = arith.constant 0 : index
    %5 = vector.load %arg3[%c0_5, %c0_6] : memref<1x128xf32, #tpu.memory_space<vmem>>, vector<1x128xf32>
    %6 = vector.broadcast %5 : vector<1x128xf32> to vector<192x128xf32>
    %7 = arith.mulf %4, %6 : vector<192x128xf32>
    %c0_7 = arith.constant 0 : index
    %c0_8 = arith.constant 0 : index
    %8 = vector.load %arg4[%c0_7, %c0_8] : memref<1x128xf32, #tpu.memory_space<vmem>>, vector<1x128xf32>
    %9 = vector.broadcast %8 : vector<1x128xf32> to vector<192x128xf32>
    %10 = arith.addf %7, %9 : vector<192x128xf32>
    %cst_9 = arith.constant 0.000000e+00 : f32
    %11 = vector.broadcast %cst_9 : f32 to vector<192x128xf32>
    %12 = arith.maximumf %10, %11 : vector<192x128xf32>
    %13 = vector.shape_cast %12 : vector<192x128xf32> to vector<12x16x128xf32>
    %14 = vector.extract_strided_slice %13 {offsets = [0, 0, 0], sizes = [12, 12, 128], strides = [1, 1, 1]} : vector<12x16x128xf32> to vector<12x12x128xf32>
    %15 = arith.truncf %14 : vector<12x12x128xf32> to vector<12x12x128xbf16>
    %c0_10 = arith.constant 0 : index
    %c0_11 = arith.constant 0 : index
    %c0_12 = arith.constant 0 : index
    %c0_13 = arith.constant 0 : index
    %16 = vector.load %arg5[%c0_10, %c0_11, %c0_12, %c0_13] : memref<1x12x12x128xbf16, #tpu.memory_space<vmem>>, vector<1x12x12x128xbf16>
    %17 = vector.shape_cast %16 : vector<1x12x12x128xbf16> to vector<12x12x128xbf16>
    %18 = vector.shape_cast %15 : vector<12x12x128xbf16> to vector<1x12x12x128xbf16>
    tpu.vector_store %arg5[%c0_10, %c0_11, %c0_12, %c0_13], %18 {strides = array<i32>} : memref<1x12x12x128xbf16, #tpu.memory_space<vmem>>, vector<1x12x12x128xbf16>,
    return
  }
  func.func @transform_0(%arg0: i32) -> (i32, i32, i32, i32) {
    %c0_i32 = arith.constant 0 : i32
    %c0_i32_0 = arith.constant 0 : i32
    %c0_i32_1 = arith.constant 0 : i32
    %c0_i32_2 = arith.constant 0 : i32
    return %arg0, %c0_i32, %c0_i32_0, %c0_i32_1 : i32, i32, i32, i32
  }
  func.func @transform_1(%arg0: i32) -> (i32, i32) {
    %c0_i32 = arith.constant 0 : i32
    %c0_i32_0 = arith.constant 0 : i32
    %c0_i32_1 = arith.constant 0 : i32
    return %c0_i32, %c0_i32_0 : i32, i32
  }
  func.func @transform_2(%arg0: i32) -> (i32, i32) {
    %c0_i32 = arith.constant 0 : i32
    %c0_i32_0 = arith.constant 0 : i32
    %c0_i32_1 = arith.constant 0 : i32
    return %c0_i32, %c0_i32_0 : i32, i32
  }
  func.func @transform_3(%arg0: i32) -> (i32, i32) {
    %c0_i32 = arith.constant 0 : i32
    %c0_i32_0 = arith.constant 0 : i32
    %c0_i32_1 = arith.constant 0 : i32
    return %c0_i32, %c0_i32_0 : i32, i32
  }
  func.func @transform_4(%arg0: i32) -> (i32, i32, i32, i32) {
    %c0_i32 = arith.constant 0 : i32
    %c0_i32_0 = arith.constant 0 : i32
    %c0_i32_1 = arith.constant 0 : i32
    %c0_i32_2 = arith.constant 0 : i32
    return %arg0, %c0_i32, %c0_i32_0, %c0_i32_1 : i32, i32, i32, i32
  }
}

module attributes {stable_mosaic.version = 11 : i64} {
  func.func @kernel(%arg0: i32, %arg1: i32, %arg2: memref<1x12x16x640xbf16, #tpu.memory_space<vmem>>, %arg3: memref<1x12x16x640xbf16, #tpu.memory_space<vmem>>, %arg4: memref<640x128xbf16, #tpu.memory_space<vmem>>, %arg5: memref<1x128xf32, #tpu.memory_space<vmem>>, %arg6: memref<1x128xf32, #tpu.memory_space<vmem>>, %arg7: memref<1x6x6x128xbf16, #tpu.memory_space<vmem>>) attributes {dimension_semantics = [#tpu.dimension_semantics<parallel>, #tpu.dimension_semantics<arbitrary>], iteration_bounds = array<i64: 2, 1>, scalar_prefetch = 0 : i64, scratch_operands = 0 : i64, tpu.core_type = #tpu.core_type<tc>, window_params = [{transform_indices = @transform_0, window_bounds = array<i64: 1, 12, 16, 640>}, {transform_indices = @transform_1, window_bounds = array<i64: 1, 12, 16, 640>}, {pipeline_mode = #tpu.pipeline_mode<synchronous>, transform_indices = @transform_2, window_bounds = array<i64: 640, 128>}, {pipeline_mode = #tpu.pipeline_mode<synchronous>, transform_indices = @transform_3, window_bounds = array<i64: 1, 128>}, {pipeline_mode = #tpu.pipeline_mode<synchronous>, transform_indices = @transform_4, window_bounds = array<i64: 1, 128>}, {transform_indices = @transform_5, window_bounds = array<i64: 1, 6, 6, 128>}]} {
    %c12_i32 = arith.constant 12 : i32
    %0 = arith.muli %arg1, %c12_i32 : i32
    %c0 = arith.constant 0 : index
    %c0_0 = arith.constant 0 : index
    %1 = vector.load %arg4[%c0, %c0_0] : memref<640x128xbf16, #tpu.memory_space<vmem>>, vector<640x128xbf16>
    %c0_1 = arith.constant 0 : index
    %c0_2 = arith.constant 0 : index
    %2 = vector.load %arg5[%c0_1, %c0_2] : memref<1x128xf32, #tpu.memory_space<vmem>>, vector<1x128xf32>
    %c0_3 = arith.constant 0 : index
    %c0_4 = arith.constant 0 : index
    %3 = vector.load %arg6[%c0_3, %c0_4] : memref<1x128xf32, #tpu.memory_space<vmem>>, vector<1x128xf32>
    %c0_5 = arith.constant 0 : index
    %4 = arith.index_cast %0 : i32 to index
    %c0_6 = arith.constant 0 : index
    %c0_7 = arith.constant 0 : index
    %5 = vector.load %arg2[%c0_5, %4, %c0_6, %c0_7] : memref<1x12x16x640xbf16, #tpu.memory_space<vmem>>, vector<1x12x16x640xbf16>
    %6 = vector.shape_cast %5 : vector<1x12x16x640xbf16> to vector<12x16x640xbf16>
    %c0_8 = arith.constant 0 : index
    %7 = arith.index_cast %0 : i32 to index
    %c0_9 = arith.constant 0 : index
    %c0_10 = arith.constant 0 : index
    %8 = vector.load %arg3[%c0_8, %7, %c0_9, %c0_10] : memref<1x12x16x640xbf16, #tpu.memory_space<vmem>>, vector<1x12x16x640xbf16>
    %9 = vector.shape_cast %8 : vector<1x12x16x640xbf16> to vector<12x16x640xbf16>
    %10 = vector.shape_cast %6 : vector<12x16x640xbf16> to vector<192x640xbf16>
    %cst = arith.constant dense<0.000000e+00> : vector<192x128xf32>
    %11 = tpu.matmul %10, %1, %cst {dimension_numbers = #tpu.dot_dimension_numbers<[1], [0], [0], [1], [0, 0, 1, 1], [], []>} : vector<192x640xbf16>, vector<640x128xbf16>, vector<192x128xf32> -> vector<192x128xf32>
    %12 = vector.shape_cast %9 : vector<12x16x640xbf16> to vector<192x640xbf16>
    %cst_11 = arith.constant dense<0.000000e+00> : vector<192x128xf32>
    %13 = tpu.matmul %12, %1, %cst_11 {dimension_numbers = #tpu.dot_dimension_numbers<[1], [0], [0], [1], [0, 0, 1, 1], [], []>} : vector<192x640xbf16>, vector<640x128xbf16>, vector<192x128xf32> -> vector<192x128xf32>
    %14 = vector.broadcast %2 : vector<1x128xf32> to vector<192x128xf32>
    %15 = arith.mulf %11, %14 : vector<192x128xf32>
    %16 = vector.broadcast %3 : vector<1x128xf32> to vector<192x128xf32>
    %17 = arith.addf %15, %16 : vector<192x128xf32>
    %cst_12 = arith.constant 0.000000e+00 : f32
    %18 = vector.broadcast %cst_12 : f32 to vector<192x128xf32>
    %19 = arith.maximumf %17, %18 : vector<192x128xf32>
    %20 = vector.shape_cast %19 : vector<192x128xf32> to vector<12x16x128xf32>
    %21 = vector.broadcast %2 : vector<1x128xf32> to vector<192x128xf32>
    %22 = arith.mulf %13, %21 : vector<192x128xf32>
    %23 = vector.broadcast %3 : vector<1x128xf32> to vector<192x128xf32>
    %24 = arith.addf %22, %23 : vector<192x128xf32>
    %cst_13 = arith.constant 0.000000e+00 : f32
    %25 = vector.broadcast %cst_13 : f32 to vector<192x128xf32>
    %26 = arith.maximumf %24, %25 : vector<192x128xf32>
    %27 = vector.shape_cast %26 : vector<192x128xf32> to vector<12x16x128xf32>
    %28 = vector.extract_strided_slice %20 {offsets = [0, 0, 0], sizes = [12, 6, 128], strides = [1, 1, 1]} : vector<12x16x128xf32> to vector<12x6x128xf32>
    %29 = vector.extract_strided_slice %27 {offsets = [0, 0, 0], sizes = [12, 6, 128], strides = [1, 1, 1]} : vector<12x16x128xf32> to vector<12x6x128xf32>
    %30 = vector.extract_strided_slice %20 {offsets = [0, 1, 0], sizes = [12, 5, 128], strides = [1, 1, 1]} : vector<12x16x128xf32> to vector<12x5x128xf32>
    %cst_14 = arith.constant 0.000000e+00 : f32
    %31 = vector.broadcast %cst_14 : f32 to vector<12x1x128xf32>
    %32 = tpu.concatenate %30, %31 in 1 : vector<12x5x128xf32>, vector<12x1x128xf32> -> vector<12x6x128xf32>
    %33 = arith.maximumf %28, %29 : vector<12x6x128xf32>
    %34 = arith.maximumf %33, %32 : vector<12x6x128xf32>
    %35 = vector.extract_strided_slice %34 {offsets = [0, 0, 0], sizes = [1, 6, 128], strides = [1, 1, 1]} : vector<12x6x128xf32> to vector<1x6x128xf32>
    %36 = vector.shape_cast %35 : vector<1x6x128xf32> to vector<6x128xf32>
    %37 = vector.extract_strided_slice %34 {offsets = [1, 0, 0], sizes = [1, 6, 128], strides = [1, 1, 1]} : vector<12x6x128xf32> to vector<1x6x128xf32>
    %38 = vector.shape_cast %37 : vector<1x6x128xf32> to vector<6x128xf32>
    %39 = arith.maximumf %36, %38 : vector<6x128xf32>
    %40 = vector.extract_strided_slice %34 {offsets = [2, 0, 0], sizes = [1, 6, 128], strides = [1, 1, 1]} : vector<12x6x128xf32> to vector<1x6x128xf32>
    %41 = vector.shape_cast %40 : vector<1x6x128xf32> to vector<6x128xf32>
    %42 = arith.maximumf %39, %41 : vector<6x128xf32>
    %43 = arith.truncf %42 : vector<6x128xf32> to vector<6x128xbf16>
    %c0_15 = arith.constant 0 : index
    %c0_16 = arith.constant 0 : index
    %c0_17 = arith.constant 0 : index
    %c0_18 = arith.constant 0 : index
    %44 = vector.load %arg7[%c0_15, %c0_16, %c0_17, %c0_18] : memref<1x6x6x128xbf16, #tpu.memory_space<vmem>>, vector<1x1x6x128xbf16>
    %45 = vector.shape_cast %44 : vector<1x1x6x128xbf16> to vector<6x128xbf16>
    %46 = vector.shape_cast %43 : vector<6x128xbf16> to vector<1x1x6x128xbf16>
    tpu.vector_store %arg7[%c0_15, %c0_16, %c0_17, %c0_18], %46 {strides = array<i32>} : memref<1x6x6x128xbf16, #tpu.memory_space<vmem>>, vector<1x1x6x128xbf16>,
    %47 = vector.extract_strided_slice %34 {offsets = [2, 0, 0], sizes = [1, 6, 128], strides = [1, 1, 1]} : vector<12x6x128xf32> to vector<1x6x128xf32>
    %48 = vector.shape_cast %47 : vector<1x6x128xf32> to vector<6x128xf32>
    %49 = vector.extract_strided_slice %34 {offsets = [3, 0, 0], sizes = [1, 6, 128], strides = [1, 1, 1]} : vector<12x6x128xf32> to vector<1x6x128xf32>
    %50 = vector.shape_cast %49 : vector<1x6x128xf32> to vector<6x128xf32>
    %51 = arith.maximumf %48, %50 : vector<6x128xf32>
    %52 = vector.extract_strided_slice %34 {offsets = [4, 0, 0], sizes = [1, 6, 128], strides = [1, 1, 1]} : vector<12x6x128xf32> to vector<1x6x128xf32>
    %53 = vector.shape_cast %52 : vector<1x6x128xf32> to vector<6x128xf32>
    %54 = arith.maximumf %51, %53 : vector<6x128xf32>
    %55 = arith.truncf %54 : vector<6x128xf32> to vector<6x128xbf16>
    %c0_19 = arith.constant 0 : index
    %c1 = arith.constant 1 : index
    %c0_20 = arith.constant 0 : index
    %c0_21 = arith.constant 0 : index
    %56 = vector.load %arg7[%c0_19, %c1, %c0_20, %c0_21] : memref<1x6x6x128xbf16, #tpu.memory_space<vmem>>, vector<1x1x6x128xbf16>
    %57 = vector.shape_cast %56 : vector<1x1x6x128xbf16> to vector<6x128xbf16>
    %58 = vector.shape_cast %55 : vector<6x128xbf16> to vector<1x1x6x128xbf16>
    tpu.vector_store %arg7[%c0_19, %c1, %c0_20, %c0_21], %58 {strides = array<i32>} : memref<1x6x6x128xbf16, #tpu.memory_space<vmem>>, vector<1x1x6x128xbf16>,
    %59 = vector.extract_strided_slice %34 {offsets = [4, 0, 0], sizes = [1, 6, 128], strides = [1, 1, 1]} : vector<12x6x128xf32> to vector<1x6x128xf32>
    %60 = vector.shape_cast %59 : vector<1x6x128xf32> to vector<6x128xf32>
    %61 = vector.extract_strided_slice %34 {offsets = [5, 0, 0], sizes = [1, 6, 128], strides = [1, 1, 1]} : vector<12x6x128xf32> to vector<1x6x128xf32>
    %62 = vector.shape_cast %61 : vector<1x6x128xf32> to vector<6x128xf32>
    %63 = arith.maximumf %60, %62 : vector<6x128xf32>
    %64 = vector.extract_strided_slice %34 {offsets = [6, 0, 0], sizes = [1, 6, 128], strides = [1, 1, 1]} : vector<12x6x128xf32> to vector<1x6x128xf32>
    %65 = vector.shape_cast %64 : vector<1x6x128xf32> to vector<6x128xf32>
    %66 = arith.maximumf %63, %65 : vector<6x128xf32>
    %67 = arith.truncf %66 : vector<6x128xf32> to vector<6x128xbf16>
    %c0_22 = arith.constant 0 : index
    %c2 = arith.constant 2 : index
    %c0_23 = arith.constant 0 : index
    %c0_24 = arith.constant 0 : index
    %68 = vector.load %arg7[%c0_22, %c2, %c0_23, %c0_24] : memref<1x6x6x128xbf16, #tpu.memory_space<vmem>>, vector<1x1x6x128xbf16>
    %69 = vector.shape_cast %68 : vector<1x1x6x128xbf16> to vector<6x128xbf16>
    %70 = vector.shape_cast %67 : vector<6x128xbf16> to vector<1x1x6x128xbf16>
    tpu.vector_store %arg7[%c0_22, %c2, %c0_23, %c0_24], %70 {strides = array<i32>} : memref<1x6x6x128xbf16, #tpu.memory_space<vmem>>, vector<1x1x6x128xbf16>,
    %71 = vector.extract_strided_slice %34 {offsets = [6, 0, 0], sizes = [1, 6, 128], strides = [1, 1, 1]} : vector<12x6x128xf32> to vector<1x6x128xf32>
    %72 = vector.shape_cast %71 : vector<1x6x128xf32> to vector<6x128xf32>
    %73 = vector.extract_strided_slice %34 {offsets = [7, 0, 0], sizes = [1, 6, 128], strides = [1, 1, 1]} : vector<12x6x128xf32> to vector<1x6x128xf32>
    %74 = vector.shape_cast %73 : vector<1x6x128xf32> to vector<6x128xf32>
    %75 = arith.maximumf %72, %74 : vector<6x128xf32>
    %76 = vector.extract_strided_slice %34 {offsets = [8, 0, 0], sizes = [1, 6, 128], strides = [1, 1, 1]} : vector<12x6x128xf32> to vector<1x6x128xf32>
    %77 = vector.shape_cast %76 : vector<1x6x128xf32> to vector<6x128xf32>
    %78 = arith.maximumf %75, %77 : vector<6x128xf32>
    %79 = arith.truncf %78 : vector<6x128xf32> to vector<6x128xbf16>
    %c0_25 = arith.constant 0 : index
    %c3 = arith.constant 3 : index
    %c0_26 = arith.constant 0 : index
    %c0_27 = arith.constant 0 : index
    %80 = vector.load %arg7[%c0_25, %c3, %c0_26, %c0_27] : memref<1x6x6x128xbf16, #tpu.memory_space<vmem>>, vector<1x1x6x128xbf16>
    %81 = vector.shape_cast %80 : vector<1x1x6x128xbf16> to vector<6x128xbf16>
    %82 = vector.shape_cast %79 : vector<6x128xbf16> to vector<1x1x6x128xbf16>
    tpu.vector_store %arg7[%c0_25, %c3, %c0_26, %c0_27], %82 {strides = array<i32>} : memref<1x6x6x128xbf16, #tpu.memory_space<vmem>>, vector<1x1x6x128xbf16>,
    %83 = vector.extract_strided_slice %34 {offsets = [8, 0, 0], sizes = [1, 6, 128], strides = [1, 1, 1]} : vector<12x6x128xf32> to vector<1x6x128xf32>
    %84 = vector.shape_cast %83 : vector<1x6x128xf32> to vector<6x128xf32>
    %85 = vector.extract_strided_slice %34 {offsets = [9, 0, 0], sizes = [1, 6, 128], strides = [1, 1, 1]} : vector<12x6x128xf32> to vector<1x6x128xf32>
    %86 = vector.shape_cast %85 : vector<1x6x128xf32> to vector<6x128xf32>
    %87 = arith.maximumf %84, %86 : vector<6x128xf32>
    %88 = vector.extract_strided_slice %34 {offsets = [10, 0, 0], sizes = [1, 6, 128], strides = [1, 1, 1]} : vector<12x6x128xf32> to vector<1x6x128xf32>
    %89 = vector.shape_cast %88 : vector<1x6x128xf32> to vector<6x128xf32>
    %90 = arith.maximumf %87, %89 : vector<6x128xf32>
    %91 = arith.truncf %90 : vector<6x128xf32> to vector<6x128xbf16>
    %c0_28 = arith.constant 0 : index
    %c4 = arith.constant 4 : index
    %c0_29 = arith.constant 0 : index
    %c0_30 = arith.constant 0 : index
    %92 = vector.load %arg7[%c0_28, %c4, %c0_29, %c0_30] : memref<1x6x6x128xbf16, #tpu.memory_space<vmem>>, vector<1x1x6x128xbf16>
    %93 = vector.shape_cast %92 : vector<1x1x6x128xbf16> to vector<6x128xbf16>
    %94 = vector.shape_cast %91 : vector<6x128xbf16> to vector<1x1x6x128xbf16>
    tpu.vector_store %arg7[%c0_28, %c4, %c0_29, %c0_30], %94 {strides = array<i32>} : memref<1x6x6x128xbf16, #tpu.memory_space<vmem>>, vector<1x1x6x128xbf16>,
    %95 = vector.extract_strided_slice %34 {offsets = [10, 0, 0], sizes = [1, 6, 128], strides = [1, 1, 1]} : vector<12x6x128xf32> to vector<1x6x128xf32>
    %96 = vector.shape_cast %95 : vector<1x6x128xf32> to vector<6x128xf32>
    %97 = vector.extract_strided_slice %34 {offsets = [11, 0, 0], sizes = [1, 6, 128], strides = [1, 1, 1]} : vector<12x6x128xf32> to vector<1x6x128xf32>
    %98 = vector.shape_cast %97 : vector<1x6x128xf32> to vector<6x128xf32>
    %99 = arith.maximumf %96, %98 : vector<6x128xf32>
    %100 = arith.truncf %99 : vector<6x128xf32> to vector<6x128xbf16>
    %c0_31 = arith.constant 0 : index
    %c5 = arith.constant 5 : index
    %c0_32 = arith.constant 0 : index
    %c0_33 = arith.constant 0 : index
    %101 = vector.load %arg7[%c0_31, %c5, %c0_32, %c0_33] : memref<1x6x6x128xbf16, #tpu.memory_space<vmem>>, vector<1x1x6x128xbf16>
    %102 = vector.shape_cast %101 : vector<1x1x6x128xbf16> to vector<6x128xbf16>
    %103 = vector.shape_cast %100 : vector<6x128xbf16> to vector<1x1x6x128xbf16>
    tpu.vector_store %arg7[%c0_31, %c5, %c0_32, %c0_33], %103 {strides = array<i32>} : memref<1x6x6x128xbf16, #tpu.memory_space<vmem>>, vector<1x1x6x128xbf16>,
    return
  }
  func.func @transform_0(%arg0: i32, %arg1: i32) -> (i32, i32, i32, i32) {
    %c0_i32 = arith.constant 0 : i32
    %c0_i32_0 = arith.constant 0 : i32
    %c0_i32_1 = arith.constant 0 : i32
    %c0_i32_2 = arith.constant 0 : i32
    return %arg0, %c0_i32, %c0_i32_0, %c0_i32_1 : i32, i32, i32, i32
  }
  func.func @transform_1(%arg0: i32, %arg1: i32) -> (i32, i32, i32, i32) {
    %c0_i32 = arith.constant 0 : i32
    %c0_i32_0 = arith.constant 0 : i32
    %c0_i32_1 = arith.constant 0 : i32
    %c0_i32_2 = arith.constant 0 : i32
    return %arg0, %c0_i32, %c0_i32_0, %c0_i32_1 : i32, i32, i32, i32
  }
  func.func @transform_2(%arg0: i32, %arg1: i32) -> (i32, i32) {
    %c0_i32 = arith.constant 0 : i32
    %c0_i32_0 = arith.constant 0 : i32
    %c0_i32_1 = arith.constant 0 : i32
    return %c0_i32, %c0_i32_0 : i32, i32
  }
  func.func @transform_3(%arg0: i32, %arg1: i32) -> (i32, i32) {
    %c0_i32 = arith.constant 0 : i32
    %c0_i32_0 = arith.constant 0 : i32
    %c0_i32_1 = arith.constant 0 : i32
    return %c0_i32, %c0_i32_0 : i32, i32
  }
  func.func @transform_4(%arg0: i32, %arg1: i32) -> (i32, i32) {
    %c0_i32 = arith.constant 0 : i32
    %c0_i32_0 = arith.constant 0 : i32
    %c0_i32_1 = arith.constant 0 : i32
    return %c0_i32, %c0_i32_0 : i32, i32
  }
  func.func @transform_5(%arg0: i32, %arg1: i32) -> (i32, i32, i32, i32) {
    %c0_i32 = arith.constant 0 : i32
    %c0_i32_0 = arith.constant 0 : i32
    %c0_i32_1 = arith.constant 0 : i32
    return %arg0, %arg1, %c0_i32, %c0_i32_0 : i32, i32, i32, i32
  }
}

</mosaic_0001>

<bundles_post_ra>
// kernel: vggf2_face_forward.5
= control target key start
LH: loop header
LB: loop body
LE: loop exit
PB: predicated region body
PF: predicated region fallthrough
CT: control target
= control target key end

     0   :  { %s7528_s18 = smov 0   ;;  %s7530_s19 = smov 0   ;;  %s9375_s0 = inlined_call_operand.vmem [shape: bf16[2,101,64,256], index: 0, kind: input, shape index: {}]   ;;  %s9376_s1 = inlined_call_operand.vmem [shape: bf16[2,101,64,256], index: 1, kind: input, shape index: {}]   ;;  %s9377_s2 = inlined_call_operand.vmem [shape: bf16[256,128], index: 2, kind: input, shape index: {}]   ;;  %s9378_s3 = inlined_call_operand.vmem [shape: f32[1,128], index: 3, kind: input, shape index: {}]   ;;  %s9379_s4 = inlined_call_operand.vmem [shape: f32[1,128], index: 4, kind: input, shape index: {}]   ;;  %s9380_s5 = inlined_call_operand.vmem [shape: bf16[2,50,50,128], index: 5, kind: output, shape index: {}]  }
   0x1   :  { %s7532_s20 = smov 0   ;;  %s7534_s21 = smov 0  }
   0x2   :  { %s7536_s22 = smov 0  }
   0x3 LB: > { %s24_s23 = sadd.s32 1, %s7487_s20  ;;  %s27_s24 = sadd.s32 1, %s7491_s21  ;;  %s7495_s22 = sphi %s7536_s22, %s15_s22   ;;  %s7491_s21 = sphi %s7534_s21, %s9385_s21   ;;  %s7487_s20 = sphi %s7532_s20, %s9384_s20   ;;  %s7483_s19 = sphi %s7530_s19, %s9383_s19   ;;  %s7479_s18 = sphi %s7528_s18, %s9382_s18  }
   0x4   : > { %p25_p0 = scmp.ge.s32.totalorder %s24_s23, 5  ;;  %p6166_p1 = scmp.ge.s32.totalorder %s7495_s22, 1 }
   0x5   : > { %p211_p2 = scmp.lt.s32.totalorder %s7495_s22, 11 }
   0x6   : > { %s9387_s23 = smov (%p25_p0, %s24_s23), 0  ;;  %s9389_s24 = smov (!%p25_p0, %s27_s24), %s7491_s21 }
   0x7   : > { %p212_p3 = pnand %p6166_p1, %p211_p2  ;;  %p29_p4 = scmp.ge.s32.totalorder %s9389_s24, 2 }
   0x8   : > { %v6927_v0 = vld [vmem:[%s9377_s2] sm:$0xff] (!%p212_p3)   ;;  %v7497_v1 = vmov (!%p212_p3), 0   ;;  %p249_p5 = scmp.lt.s32.totalorder (!%p212_p3), %s7483_s19, 1  ;;  %v6928_v2 = vld [vmem:[%s9377_s2 + $0x8] sm:$0xff] (!%p212_p3)   ;;  %v6929_v3 = vld [vmem:[%s9377_s2 + $0x10] sm:$0xff] (!%p212_p3)   ;;  %s6662_s9 = smul.u32 (!%p212_p3), 1280, %s7479_s18 }
   0x9   : > { %s9391_s24 = smov (%p29_p4, %s9389_s24), 0  ;;  %215 = sbr.rel (%p212_p3) target bundleno = 966 (0x3c6), region = 40 }
   0xa   : > { %1583 = vmatprep.subr.bf16.mxu0 (!%p212_p3), %v7497_v1  ;;  %3107 = vmatprep.subr.bf16.mxu1 (!%p212_p3), %v7497_v1  ;;  %v6930_v4 = vld [vmem:[%s9377_s2 + $0x18] sm:$0xff] (!%p212_p3)   ;;  %v6931_v5 = vld [vmem:[%s9377_s2 + $0x20] sm:$0xff] (!%p212_p3)   ;;  %v6932_v7 = vld [vmem:[%s9377_s2 + $0x28] sm:$0xff] (!%p212_p3)   ;;  %vm4979_vm0 = vcmask (!%p212_p3), 1046528  }
   0xb   : > { %1584 = vmatpush1.bf16.msra.mxu0 (!%p212_p3), %v6927_v0  ;;  %3108 = vmatpush1.bf16.msra.mxu1 (!%p212_p3), %v6927_v0  ;;  %v6933_v9 = vld [vmem:[%s9377_s2 + $0x30] sm:$0xff] (!%p212_p3)   ;;  %v6934_v10 = vld [vmem:[%s9377_s2 + $0x38] sm:$0xff] (!%p212_p3)   ;;  %v6935_v11 = vld [vmem:[%s9377_s2 + $0x40] sm:$0xff] (!%p212_p3)  }
   0xc   : > { %1585 = vmatprep.subr.bf16.mxu0 (!%p212_p3), %v7497_v1  ;;  %3109 = vmatprep.subr.bf16.mxu1 (!%p212_p3), %v7497_v1  ;;  %v6936_v12 = vld [vmem:[%s9377_s2 + $0x48] sm:$0xff] (!%p212_p3)   ;;  %v6937_v13 = vld [vmem:[%s9377_s2 + $0x50] sm:$0xff] (!%p212_p3)   ;;  %v6938_v14 = vld [vmem:[%s9377_s2 + $0x58] sm:$0xff] (!%p212_p3)  }
   0xd   : > { %v6939_v15 = vld [vmem:[%s9377_s2 + $0x60] sm:$0xff] (!%p212_p3)   ;;  %v6940_v16 = vld [vmem:[%s9377_s2 + $0x68] sm:$0xff] (!%p212_p3)   ;;  %v6941_v17 = vld [vmem:[%s9377_s2 + $0x70] sm:$0xff] (!%p212_p3)  }
   0xe   : > { %v6942_v18 = vld [vmem:[%s9377_s2 + $0x78] sm:$0xff] (!%p212_p3)  }
   0xf   : > { %1586 = vmatpush1.bf16.msra.mxu0 (!%p212_p3), %v6928_v2  ;;  %3110 = vmatpush1.bf16.msra.mxu1 (!%p212_p3), %v6928_v2 }
  0x10   : > { %s9393_s19 = smov (!%p249_p5, %s7483_s19), 1  ;;  %1587 = vmatprep.subr.bf16.mxu0 %v7497_v1  ;;  %3111 = vmatprep.subr.bf16.mxu1 %v7497_v1 }
  0x11   : > { %s6883_s6 = smul.u32 6464, %s9393_s19 }
  0x12   : > { %s6885_s14 = smul.u32 350, %s9393_s19 }
  0x13   : > { %1588 = vmatpush1.bf16.msra.mxu0 %v6929_v3  ;;  %3112 = vmatpush1.bf16.msra.mxu1 %v6929_v3  ;;  %s253_s12 = scalar_lea.vmem %s9375_s0, %s6883_s6  ;;  %s258_s15 = scalar_lea.vmem %s9376_s1, %s6883_s6 }
  0x14   : > { %1589 = vmatprep.subr.bf16.mxu0 %v7497_v1  ;;  %3113 = vmatprep.subr.bf16.mxu1 %v7497_v1  ;;  %s7593_s25 = scalar_lea.vmem %s253_s12, %s6662_s9  ;;  %s7597_s26 = scalar_lea.vmem %s258_s15, %s6662_s9 }
  0x15   : > { %v6945_v6 = vld [vmem:[%s7593_s25 + $0x4] ss:$8 sps:$4 sm:$0xff]   ;;  %v6943_v19 = vld [vmem:[%s7593_s25] ss:$8 sps:$4 sm:$0xff]   ;;  %v6949_v21 = vld [vmem:[%s7593_s25 + $0x14] ss:$8 sps:$4 sm:$0xff]  }
  0x16   : > { %v6948_v8 = vld [vmem:[%s7597_s26 + $0x4] ss:$8 sps:$4 sm:$0xff]   ;;  %1615 = vmatprep.mubr.bf16.mxu0 %v6945_v6  ;;  %v6946_v20 = vld [vmem:[%s7597_s26] ss:$8 sps:$4 sm:$0xff]   ;;  %v6951_v22 = vld [vmem:[%s7597_s26 + $0x14] ss:$8 sps:$4 sm:$0xff]  }
  0x17   : > { %1590 = vmatpush1.bf16.msra.mxu0 %v6930_v4  ;;  %3114 = vmatpush1.bf16.msra.mxu1 %v6930_v4  ;;  %v6953_v23 = vld [vmem:[%s7593_s25 + $0x10] ss:$8 sps:$4 sm:$0xff]   ;;  %v6955_v25 = vld [vmem:[%s7593_s25 + $0x24] ss:$8 sps:$4 sm:$0xff]   ;;  %v6959_v27 = vld [vmem:[%s7593_s25 + $0x20] ss:$8 sps:$4 sm:$0xff]  }
  0x18   : > { %1591 = vmatprep.subr.bf16.mxu0 %v7497_v1  ;;  %3115 = vmatprep.subr.bf16.mxu1 %v7497_v1  ;;  %v6954_v24 = vld [vmem:[%s7597_s26 + $0x10] ss:$8 sps:$4 sm:$0xff]   ;;  %v6957_v26 = vld [vmem:[%s7597_s26 + $0x24] ss:$8 sps:$4 sm:$0xff]   ;;  %v6960_v28 = vld [vmem:[%s7597_s26 + $0x20] ss:$8 sps:$4 sm:$0xff]  }
  0x19   : > { %3139 = vmatprep.mubr.bf16.mxu1 %v6948_v8  ;;  %v6961_v29 = vld [vmem:[%s7593_s25 + $0x34] ss:$8 sps:$4 sm:$0xff]   ;;  %v6965_v31 = vld [vmem:[%s7593_s25 + $0x30] ss:$8 sps:$4 sm:$0xff]   ;;  %v6967_v33 = vld [vmem:[%s7593_s25 + $0x44] ss:$8 sps:$4 sm:$0xff]  }
  0x1a   : > { %v6963_v30 = vld [vmem:[%s7597_s26 + $0x34] ss:$8 sps:$4 sm:$0xff]   ;;  %v6966_v32 = vld [vmem:[%s7597_s26 + $0x30] ss:$8 sps:$4 sm:$0xff]   ;;  %v6969_v34 = vld [vmem:[%s7597_s26 + $0x44] ss:$8 sps:$4 sm:$0xff]  }
  0x1b   : > { %1592 = vmatpush1.bf16.msra.mxu0 %v6931_v5  ;;  %3116 = vmatpush1.bf16.msra.mxu1 %v6931_v5  ;;  %v6971_v35 = vld [vmem:[%s7593_s25 + $0x40] ss:$8 sps:$4 sm:$0xff]   ;;  %v6973_v37 = vld [vmem:[%s7593_s25 + $0x54] ss:$8 sps:$4 sm:$0xff]   ;;  %v6977_v39 = vld [vmem:[%s7593_s25 + $0x50] ss:$8 sps:$4 sm:$0xff]  }
  0x1c   : > { %1593 = vmatprep.subr.bf16.mxu0 %v7497_v1  ;;  %3117 = vmatprep.subr.bf16.mxu1 %v7497_v1  ;;  %v6972_v36 = vld [vmem:[%s7597_s26 + $0x40] ss:$8 sps:$4 sm:$0xff]   ;;  %v6975_v38 = vld [vmem:[%s7597_s26 + $0x54] ss:$8 sps:$4 sm:$0xff]   ;;  %v6978_v40 = vld [vmem:[%s7597_s26 + $0x50] ss:$8 sps:$4 sm:$0xff]  }
  0x1d   : > { %v6979_v41 = vld [vmem:[%s7593_s25 + $0x64] ss:$8 sps:$4 sm:$0xff]   ;;  %v6983_v43 = vld [vmem:[%s7593_s25 + $0x60] ss:$8 sps:$4 sm:$0xff]   ;;  %v6985_v45 = vld [vmem:[%s7593_s25 + $0x74] ss:$8 sps:$4 sm:$0xff]  }
  0x1e   : > { %v6981_v42 = vld [vmem:[%s7597_s26 + $0x64] ss:$8 sps:$4 sm:$0xff]   ;;  %v6984_v44 = vld [vmem:[%s7597_s26 + $0x60] ss:$8 sps:$4 sm:$0xff]   ;;  %v6987_v46 = vld [vmem:[%s7597_s26 + $0x74] ss:$8 sps:$4 sm:$0xff]  }
  0x1f   : > { %1594 = vmatpush1.bf16.msra.mxu0 %v6932_v7  ;;  %3118 = vmatpush1.bf16.msra.mxu1 %v6932_v7  ;;  %v6989_v47 = vld [vmem:[%s7593_s25 + $0x70] ss:$8 sps:$4 sm:$0xff]   ;;  %v6991_v49 = vld [vmem:[%s7593_s25 + $0x84] ss:$8 sps:$4 sm:$0xff]   ;;  %v6995_v51 = vld [vmem:[%s7593_s25 + $0x80] ss:$8 sps:$4 sm:$0xff]  }
  0x20   : > { %1595 = vmatprep.subr.bf16.mxu0 %v7497_v1  ;;  %3119 = vmatprep.subr.bf16.mxu1 %v7497_v1  ;;  %v6990_v48 = vld [vmem:[%s7597_s26 + $0x70] ss:$8 sps:$4 sm:$0xff]   ;;  %v6993_v50 = vld [vmem:[%s7597_s26 + $0x84] ss:$8 sps:$4 sm:$0xff]   ;;  %v6996_v52 = vld [vmem:[%s7597_s26 + $0x80] ss:$8 sps:$4 sm:$0xff]  }
  0x21   : > { %v6997_v53 = vld [vmem:[%s7593_s25 + $0x94] ss:$8 sps:$4 sm:$0xff]   ;;  %v7001_v55 = vld [vmem:[%s7593_s25 + $0x90] ss:$8 sps:$4 sm:$0xff]   ;;  %v7003_v57 = vld [vmem:[%s7593_s25 + $0xa4] ss:$8 sps:$4 sm:$0xff]  }
  0x22   : > { %v6999_v54 = vld [vmem:[%s7597_s26 + $0x94] ss:$8 sps:$4 sm:$0xff]   ;;  %v7002_v56 = vld [vmem:[%s7597_s26 + $0x90] ss:$8 sps:$4 sm:$0xff]   ;;  %v7005_v58 = vld [vmem:[%s7597_s26 + $0xa4] ss:$8 sps:$4 sm:$0xff]  }
  0x23   : > { %1596 = vmatpush1.bf16.msra.mxu0 %v6933_v9  ;;  %3120 = vmatpush1.bf16.msra.mxu1 %v6933_v9  ;;  %v7007_v59 = vld [vmem:[%s7593_s25 + $0xa0] ss:$8 sps:$4 sm:$0xff]   ;;  %v7009_v61 = vld [vmem:[%s7593_s25 + $0xb4] ss:$8 sps:$4 sm:$0xff]   ;;  %v7013_v63 = vld [vmem:[%s7593_s25 + $0xb0] ss:$8 sps:$4 sm:$0xff]  }
  0x24   : > { %1597 = vmatprep.subr.bf16.mxu0 %v7497_v1  ;;  %3121 = vmatprep.subr.bf16.mxu1 %v7497_v1  ;;  %v7008_v60 = vld [vmem:[%s7597_s26 + $0xa0] ss:$8 sps:$4 sm:$0xff]   ;;  %v7011_v62 = vld [vmem:[%s7597_s26 + $0xb4] ss:$8 sps:$4 sm:$0xff]   ;;  %v7014_v0 = vld [vmem:[%s7597_s26 + $0xb0] ss:$8 sps:$4 sm:$0xff]  }
  0x25   : > { %v7017_v2 = vld [vmem:[%s7597_s26 + $0xc4] ss:$8 sps:$4 sm:$0xff]   ;;  %v7019_v3 = vld [vmem:[%s7593_s25 + $0xc0] ss:$8 sps:$4 sm:$0xff]   ;;  %v7021_v5 = vld [vmem:[%s7593_s25 + $0xd4] ss:$8 sps:$4 sm:$0xff]  }
  0x26   : > { %v7020_v4 = vld [vmem:[%s7597_s26 + $0xc0] ss:$8 sps:$4 sm:$0xff]   ;;  %v7023_v6 = vld [vmem:[%s7597_s26 + $0xd4] ss:$8 sps:$4 sm:$0xff]   ;;  %v7025_v7 = vld [vmem:[%s7593_s25 + $0xd0] ss:$8 sps:$4 sm:$0xff]  }
  0x27   : > { %1598 = vmatpush1.bf16.msra.mxu0 %v6934_v10  ;;  %3122 = vmatpush1.bf16.msra.mxu1 %v6934_v10  ;;  %v7026_v8 = vld [vmem:[%s7597_s26 + $0xd0] ss:$8 sps:$4 sm:$0xff]   ;;  %v7027_v9 = vld [vmem:[%s7593_s25 + $0xe4] ss:$8 sps:$4 sm:$0xff]   ;;  %s259_s12 = smul.u32 10, %s7479_s18 }
  0x28   : > { %1599 = vmatprep.subr.bf16.mxu0 %v7497_v1  ;;  %3123 = vmatprep.subr.bf16.mxu1 %v7497_v1  ;;  %v7029_v10 = vld [vmem:[%s7597_s26 + $0xe4] ss:$8 sps:$4 sm:$0xff]  }
  0x29   : > { %p7950_p6 = scmp.lt.s32.totalorder %s259_s12, 49 }
  0x2b   : > { %1600 = vmatpush1.bf16.msra.mxu0 %v6935_v11  ;;  %3124 = vmatpush1.bf16.msra.mxu1 %v6935_v11  ;;  %v7031_v11 = vld [vmem:[%s7593_s25 + $0xe0] ss:$8 sps:$4 sm:$0xff]   ;;  %s9395_s12 = smov (!%p7950_p6, %s259_s12), 49 }
  0x2c   : > { %1601 = vmatprep.subr.bf16.mxu0 %v7497_v1  ;;  %3125 = vmatprep.subr.bf16.mxu1 %v7497_v1  ;;  %s6884_s18 = smul.u32 7, %s9395_s12 }
  0x2e   : > { %s7997_s15 = sadd.s32 %s6885_s14, %s6884_s18 }
  0x2f   : > { %1602 = vmatpush1.bf16.msra.mxu0 %v6936_v12  ;;  %3126 = vmatpush1.bf16.msra.mxu1 %v6936_v12  ;;  %v7032_v12 = vld [vmem:[%s7597_s26 + $0xe0] ss:$8 sps:$4 sm:$0xff]   ;;  %s6169_s16 = sshll.u32 %s7997_s15, 2 }
  0x30   : > { %1603 = vmatprep.subr.bf16.mxu0 %v7497_v1  ;;  %3127 = vmatprep.subr.bf16.mxu1 %v7497_v1  ;;  %s8022_s27 = scalar_lea.vmem %s9380_s5, %s6169_s16 }
  0x33   : > { %1604 = vmatpush1.bf16.msra.mxu0 %v6937_v13  ;;  %3128 = vmatpush1.bf16.msra.mxu1 %v6937_v13  ;;  %v7033_v13 = vld [vmem:[%s7593_s25 + $0xf4] ss:$8 sps:$4 sm:$0xff]  }
  0x34   : > { %1605 = vmatprep.subr.bf16.mxu0 %v7497_v1  ;;  %3129 = vmatprep.subr.bf16.mxu1 %v7497_v1 }
  0x37   : > { %1606 = vmatpush1.bf16.msra.mxu0 %v6938_v14  ;;  %3130 = vmatpush1.bf16.msra.mxu1 %v6938_v14  ;;  %v7035_v14 = vld [vmem:[%s7597_s26 + $0xf4] ss:$8 sps:$4 sm:$0xff]  }
  0x38   : > { %1607 = vmatprep.subr.bf16.mxu0 %v7497_v1  ;;  %3131 = vmatprep.subr.bf16.mxu1 %v7497_v1 }
  0x3b   : > { %1608 = vmatpush1.bf16.msra.mxu0 %v6939_v15  ;;  %3132 = vmatpush1.bf16.msra.mxu1 %v6939_v15  ;;  %v7037_v15 = vld [vmem:[%s7593_s25 + $0xf0] ss:$8 sps:$4 sm:$0xff]  }
  0x3c   : > { %1609 = vmatprep.subr.bf16.mxu0 %v7497_v1  ;;  %3133 = vmatprep.subr.bf16.mxu1 %v7497_v1 }
  0x3f   : > { %1610 = vmatpush1.bf16.msra.mxu0 %v6940_v16  ;;  %3134 = vmatpush1.bf16.msra.mxu1 %v6940_v16  ;;  %v7038_v16 = vld [vmem:[%s7597_s26 + $0xf0] ss:$8 sps:$4 sm:$0xff]  }
  0x40   : > { %1611 = vmatprep.subr.bf16.mxu0 %v7497_v1  ;;  %3135 = vmatprep.subr.bf16.mxu1 %v7497_v1 }
  0x43   : > { %1612 = vmatpush1.bf16.msra.mxu0 %v6941_v17  ;;  %3136 = vmatpush1.bf16.msra.mxu1 %v6941_v17  ;;  %v7039_v17 = vld [vmem:[%s7593_s25 + $0x104] ss:$8 sps:$4 sm:$0xff]  }
  0x44   : > { %1613 = vmatprep.subr.bf16.mxu0 %v7497_v1  ;;  %3137 = vmatprep.subr.bf16.mxu1 %v7497_v1  ;;  %v7015_v1 = vld [vmem:[%s7593_s25 + $0xc4] ss:$8 sps:$4 sm:$0xff]  }
  0x47   : > { %1614 = vmatpush1.bf16.msra.mxu0 %v6942_v18  ;;  %3138 = vmatpush1.bf16.msra.mxu1 %v6942_v18  ;;  %v7041_v18 = vld [vmem:[%s7597_s26 + $0x104] ss:$8 sps:$4 sm:$0xff]  }
  0x4a   : > { %1616 = vmatmul.mubr.bf16.vlgmr.msra.gmra.mrb[0].mxu0 %v6943_v19  ;;  %3140 = vmatmul.mubr.bf16.vlgmr.msra.gmra.mrb[0].mxu1 %v6946_v20  ;;  %v7043_v19 = vld [vmem:[%s7593_s25 + $0x100] ss:$8 sps:$4 sm:$0xff]  }
  0x4b   : > { %1623 = vmatprep.mubr.bf16.mxu0 %v6949_v21  ;;  %3147 = vmatprep.mubr.bf16.mxu1 %v6951_v22  ;;  %v7044_v20 = vld [vmem:[%s7597_s26 + $0x100] ss:$8 sps:$4 sm:$0xff]   ;;  %v7045_v21 = vld [vmem:[%s7593_s25 + $0x114] ss:$8 sps:$4 sm:$0xff]  }
  0x4c   : > { %v7047_v22 = vld [vmem:[%s7597_s26 + $0x114] ss:$8 sps:$4 sm:$0xff]  }
  0x52   : > { %1624 = vmatmul.mubr.bf16.gmra.mrb[4].mxu0 %v6953_v23  ;;  %3148 = vmatmul.mubr.bf16.gmra.mrb[4].mxu1 %v6954_v24  ;;  %v7049_v23 = vld [vmem:[%s7593_s25 + $0x110] ss:$8 sps:$4 sm:$0xff]  }
  0x53   : > { %1631 = vmatprep.mubr.bf16.mxu0 %v6955_v25  ;;  %3155 = vmatprep.mubr.bf16.mxu1 %v6957_v26  ;;  %v7050_v24 = vld [vmem:[%s7597_s26 + $0x110] ss:$8 sps:$4 sm:$0xff]   ;;  %v7051_v25 = vld [vmem:[%s7593_s25 + $0x124] ss:$8 sps:$4 sm:$0xff]  }
  0x54   : > { %v7053_v26 = vld [vmem:[%s7597_s26 + $0x124] ss:$8 sps:$4 sm:$0xff]  }
  0x5a   : > { %1632 = vmatmul.mubr.bf16.gmra.mrb[8].mxu0 %v6959_v27  ;;  %3156 = vmatmul.mubr.bf16.gmra.mrb[8].mxu1 %v6960_v28  ;;  %v7055_v27 = vld [vmem:[%s7593_s25 + $0x120] ss:$8 sps:$4 sm:$0xff]  }
  0x5b   : > { %1639 = vmatprep.mubr.bf16.mxu0 %v6961_v29  ;;  %3163 = vmatprep.mubr.bf16.mxu1 %v6963_v30  ;;  %v7056_v28 = vld [vmem:[%s7597_s26 + $0x120] ss:$8 sps:$4 sm:$0xff]   ;;  %v7057_v29 = vld [vmem:[%s7593_s25 + $0x134] ss:$8 sps:$4 sm:$0xff]  }
  0x5c   : > { %v7059_v30 = vld [vmem:[%s7597_s26 + $0x134] ss:$8 sps:$4 sm:$0xff]  }
  0x62   : > { %1640 = vmatmul.mubr.bf16.gmra.mrb[12].mxu0 %v6965_v31  ;;  %3164 = vmatmul.mubr.bf16.gmra.mrb[12].mxu1 %v6966_v32  ;;  %v7061_v31 = vld [vmem:[%s7593_s25 + $0x130] ss:$8 sps:$4 sm:$0xff]  }
  0x63   : > { %1646 = vmatprep.mubr.bf16.mxu0 %v6967_v33  ;;  %3170 = vmatprep.mubr.bf16.mxu1 %v6969_v34  ;;  %v7062_v32 = vld [vmem:[%s7597_s26 + $0x130] ss:$8 sps:$4 sm:$0xff]   ;;  %v7063_v33 = vld [vmem:[%s7593_s25 + $0x144] ss:$8 sps:$4 sm:$0xff]  }
  0x64   : > { %v7065_v34 = vld [vmem:[%s7597_s26 + $0x144] ss:$8 sps:$4 sm:$0xff]  }
  0x6a   : > { %1647 = vmatmul.mubr.bf16.gmra.mrb[16].mxu0 %v6971_v35  ;;  %3171 = vmatmul.mubr.bf16.gmra.mrb[16].mxu1 %v6972_v36  ;;  %v7067_v35 = vld [vmem:[%s7593_s25 + $0x140] ss:$8 sps:$4 sm:$0xff]  }
  0x6b   : > { %1654 = vmatprep.mubr.bf16.mxu0 %v6973_v37  ;;  %3178 = vmatprep.mubr.bf16.mxu1 %v6975_v38  ;;  %v7068_v36 = vld [vmem:[%s7597_s26 + $0x140] ss:$8 sps:$4 sm:$0xff]   ;;  %v7069_v37 = vld [vmem:[%s7593_s25 + $0x154] ss:$8 sps:$4 sm:$0xff]  }
  0x6c   : > { %v7071_v38 = vld [vmem:[%s7597_s26 + $0x154] ss:$8 sps:$4 sm:$0xff]  }
  0x72   : > { %1655 = vmatmul.mubr.bf16.gmra.mrb[20].mxu0 %v6977_v39  ;;  %3179 = vmatmul.mubr.bf16.gmra.mrb[20].mxu1 %v6978_v40  ;;  %v7073_v39 = vld [vmem:[%s7593_s25 + $0x150] ss:$8 sps:$4 sm:$0xff]  }
  0x73   : > { %1662 = vmatprep.mubr.bf16.mxu0 %v6979_v41  ;;  %3186 = vmatprep.mubr.bf16.mxu1 %v6981_v42  ;;  %v7074_v40 = vld [vmem:[%s7597_s26 + $0x150] ss:$8 sps:$4 sm:$0xff]   ;;  %v7075_v41 = vld [vmem:[%s7593_s25 + $0x164] ss:$8 sps:$4 sm:$0xff]  }
  0x74   : > { %v7077_v42 = vld [vmem:[%s7597_s26 + $0x164] ss:$8 sps:$4 sm:$0xff]  }
  0x7a   : > { %1663 = vmatmul.mubr.bf16.gmra.mrb[24].mxu0 %v6983_v43  ;;  %3187 = vmatmul.mubr.bf16.gmra.mrb[24].mxu1 %v6984_v44  ;;  %v7079_v43 = vld [vmem:[%s7593_s25 + $0x160] ss:$8 sps:$4 sm:$0xff]  }
  0x7b   : > { %1670 = vmatprep.mubr.bf16.mxu0 %v6985_v45  ;;  %3194 = vmatprep.mubr.bf16.mxu1 %v6987_v46  ;;  %v7080_v44 = vld [vmem:[%s7597_s26 + $0x160] ss:$8 sps:$4 sm:$0xff]   ;;  %v7081_v45 = vld [vmem:[%s7593_s25 + $0x174] ss:$8 sps:$4 sm:$0xff]  }
  0x7c   : > { %v7083_v46 = vld [vmem:[%s7597_s26 + $0x174] ss:$8 sps:$4 sm:$0xff]  }
  0x82   : > { %1671 = vmatmul.mubr.bf16.gmra.mrb[28].mxu0 %v6989_v47  ;;  %3195 = vmatmul.mubr.bf16.gmra.mrb[28].mxu1 %v6990_v48  ;;  %v7085_v47 = vld [vmem:[%s7593_s25 + $0x170] ss:$8 sps:$4 sm:$0xff]  }
  0x83   : > { %1677 = vmatprep.mubr.bf16.mxu0 %v6991_v49  ;;  %3201 = vmatprep.mubr.bf16.mxu1 %v6993_v50  ;;  %v7086_v48 = vld [vmem:[%s7597_s26 + $0x170] ss:$8 sps:$4 sm:$0xff]   ;;  %v7087_v49 = vld [vmem:[%s7593_s25 + $0x184] ss:$8 sps:$4 sm:$0xff]  }
  0x84   : > { %v7089_v50 = vld [vmem:[%s7597_s26 + $0x184] ss:$8 sps:$4 sm:$0xff]  }
  0x8a   : > { %1678 = vmatmul.mubr.bf16.gmra.mrb[32].mxu0 %v6995_v51  ;;  %3202 = vmatmul.mubr.bf16.gmra.mrb[32].mxu1 %v6996_v52  ;;  %v7091_v51 = vld [vmem:[%s7593_s25 + $0x180] ss:$8 sps:$4 sm:$0xff]  }
  0x8b   : > { %1685 = vmatprep.mubr.bf16.mxu0 %v6997_v53  ;;  %3209 = vmatprep.mubr.bf16.mxu1 %v6999_v54  ;;  %v7092_v52 = vld [vmem:[%s7597_s26 + $0x180] ss:$8 sps:$4 sm:$0xff]   ;;  %v7093_v53 = vld [vmem:[%s7593_s25 + $0x194] ss:$8 sps:$4 sm:$0xff]  }
  0x8c   : > { %v7095_v54 = vld [vmem:[%s7597_s26 + $0x194] ss:$8 sps:$4 sm:$0xff]  }
  0x92   : > { %1686 = vmatmul.mubr.bf16.gmra.mrb[36].mxu0 %v7001_v55  ;;  %3210 = vmatmul.mubr.bf16.gmra.mrb[36].mxu1 %v7002_v56  ;;  %v7097_v55 = vld [vmem:[%s7593_s25 + $0x190] ss:$8 sps:$4 sm:$0xff]  }
  0x93   : > { %1693 = vmatprep.mubr.bf16.mxu0 %v7003_v57  ;;  %3217 = vmatprep.mubr.bf16.mxu1 %v7005_v58  ;;  %v7098_v56 = vld [vmem:[%s7597_s26 + $0x190] ss:$8 sps:$4 sm:$0xff]   ;;  %v7099_v57 = vld [vmem:[%s7593_s25 + $0x1a4] ss:$8 sps:$4 sm:$0xff]  }
  0x94   : > { %v7101_v58 = vld [vmem:[%s7597_s26 + $0x1a4] ss:$8 sps:$4 sm:$0xff]  }
  0x9a   : > { %1694 = vmatmul.mubr.bf16.gmra.mrb[40].mxu0 %v7007_v59  ;;  %3218 = vmatmul.mubr.bf16.gmra.mrb[40].mxu1 %v7008_v60  ;;  %v7103_v59 = vld [vmem:[%s7593_s25 + $0x1a0] ss:$8 sps:$4 sm:$0xff]  }
  0x9b   : > { %1701 = vmatprep.mubr.bf16.mxu0 %v7009_v61  ;;  %3225 = vmatprep.mubr.bf16.mxu1 %v7011_v62  ;;  %v7104_v60 = vld [vmem:[%s7597_s26 + $0x1a0] ss:$8 sps:$4 sm:$0xff]   ;;  %v7105_v61 = vld [vmem:[%s7593_s25 + $0x1b4] ss:$8 sps:$4 sm:$0xff]  }
  0x9c   : > { %v7107_v62 = vld [vmem:[%s7597_s26 + $0x1b4] ss:$8 sps:$4 sm:$0xff]  }
  0xa2   : > { %1702 = vmatmul.mubr.bf16.gmra.mrb[44].mxu0 %v7013_v63  ;;  %3226 = vmatmul.mubr.bf16.gmra.mrb[44].mxu1 %v7014_v0  ;;  %v7767_v63 = vld [vmem:[%s9378_s3] ss:$0 sm:$0xff] }
  0xa3   : > { %1708 = vmatprep.mubr.bf16.mxu0 %v7015_v1  ;;  %3232 = vmatprep.mubr.bf16.mxu1 %v7017_v2  ;;  %v7772_v0 = vld [vmem:[%s9379_s4] ss:$0 sm:$0xff] }
  0xaa   : > { %1709 = vmatmul.mubr.bf16.gmra.mrb[48].mxu0 %v7019_v3  ;;  %3233 = vmatmul.mubr.bf16.gmra.mrb[48].mxu1 %v7020_v4 }
  0xab   : > { %1716 = vmatprep.mubr.bf16.mxu0 %v7021_v5  ;;  %3240 = vmatprep.mubr.bf16.mxu1 %v7023_v6 }
  0xb2   : > { %1717 = vmatmul.mubr.bf16.gmra.mrb[52].mxu0 %v7025_v7  ;;  %3241 = vmatmul.mubr.bf16.gmra.mrb[52].mxu1 %v7026_v8  ;;  %v7109_v7 = vld [vmem:[%s7593_s25 + $0x1b0] ss:$8 sps:$4 sm:$0xff]  }
  0xb3   : > { %1724 = vmatprep.mubr.bf16.mxu0 %v7027_v9  ;;  %3248 = vmatprep.mubr.bf16.mxu1 %v7029_v10  ;;  %v7110_v8 = vld [vmem:[%s7597_s26 + $0x1b0] ss:$8 sps:$4 sm:$0xff]  }
  0xba   : > { %1725 = vmatmul.mubr.bf16.gmra.mrb[56].mxu0 %v7031_v11  ;;  %3249 = vmatmul.mubr.bf16.gmra.mrb[56].mxu1 %v7032_v12  ;;  %v7111_v11 = vld [vmem:[%s7593_s25 + $0x1c4] ss:$8 sps:$4 sm:$0xff]  }
  0xbb   : > { %1732 = vmatprep.mubr.bf16.mxu0 %v7033_v13  ;;  %3256 = vmatprep.mubr.bf16.mxu1 %v7035_v14  ;;  %v7113_v12 = vld [vmem:[%s7597_s26 + $0x1c4] ss:$8 sps:$4 sm:$0xff]  }
  0xc2   : > { %1733 = vmatmul.mubr.bf16.gmra.mrb[60].mxu0 %v7037_v15  ;;  %3257 = vmatmul.mubr.bf16.gmra.mrb[60].mxu1 %v7038_v16 }
  0xc3   : > { %1739 = vmatprep.mubr.bf16.mxu0 %v7039_v17  ;;  %3263 = vmatprep.mubr.bf16.mxu1 %v7041_v18 }
  0xca   : > { %1740 = vmatmul.mubr.bf16.gmra.mrb[64].mxu0 %v7043_v19  ;;  %3264 = vmatmul.mubr.bf16.gmra.mrb[64].mxu1 %v7044_v20 }
  0xcb   : > { %1747 = vmatprep.mubr.bf16.mxu0 %v7045_v21  ;;  %3271 = vmatprep.mubr.bf16.mxu1 %v7047_v22 }
  0xd2   : > { %1748 = vmatmul.mubr.bf16.gmra.mrb[68].mxu0 %v7049_v23  ;;  %3272 = vmatmul.mubr.bf16.gmra.mrb[68].mxu1 %v7050_v24 }
  0xd3   : > { %1755 = vmatprep.mubr.bf16.mxu0 %v7051_v25  ;;  %3279 = vmatprep.mubr.bf16.mxu1 %v7053_v26 }
  0xda   : > { %1756 = vmatmul.mubr.bf16.gmra.mrb[72].mxu0 %v7055_v27  ;;  %3280 = vmatmul.mubr.bf16.gmra.mrb[72].mxu1 %v7056_v28 }
  0xdb   : > { %1763 = vmatprep.mubr.bf16.mxu0 %v7057_v29  ;;  %3287 = vmatprep.mubr.bf16.mxu1 %v7059_v30  ;;  %v7115_v29 = vld [vmem:[%s7593_s25 + $0x1c0] ss:$8 sps:$4 sm:$0xff]  }
  0xe2   : > { %1764 = vmatmul.mubr.bf16.gmra.mrb[76].mxu0 %v7061_v31  ;;  %3288 = vmatmul.mubr.bf16.gmra.mrb[76].mxu1 %v7062_v32 }
  0xe3   : > { %1770 = vmatprep.mubr.bf16.mxu0 %v7063_v33  ;;  %3294 = vmatprep.mubr.bf16.mxu1 %v7065_v34 }
  0xea   : > { %1771 = vmatmul.mubr.bf16.gmra.mrb[80].mxu0 %v7067_v35  ;;  %3295 = vmatmul.mubr.bf16.gmra.mrb[80].mxu1 %v7068_v36  ;;  %v7116_v36 = vld [vmem:[%s7597_s26 + $0x1c0] ss:$8 sps:$4 sm:$0xff]  }
  0xeb   : > { %1778 = vmatprep.mubr.bf16.mxu0 %v7069_v37  ;;  %3302 = vmatprep.mubr.bf16.mxu1 %v7071_v38 }
  0xf2   : > { %1779 = vmatmul.mubr.bf16.gmra.mrb[84].mxu0 %v7073_v39  ;;  %3303 = vmatmul.mubr.bf16.gmra.mrb[84].mxu1 %v7074_v40  ;;  %v7117_v39 = vld [vmem:[%s7593_s25 + $0x1d4] ss:$8 sps:$4 sm:$0xff]  }
  0xf3   : > { %1786 = vmatprep.mubr.bf16.mxu0 %v7075_v41  ;;  %3310 = vmatprep.mubr.bf16.mxu1 %v7077_v42  ;;  %v7119_v40 = vld [vmem:[%s7597_s26 + $0x1d4] ss:$8 sps:$4 sm:$0xff]  }
  0xfa   : > { %1787 = vmatmul.mubr.bf16.gmra.mrb[88].mxu0 %v7079_v43  ;;  %3311 = vmatmul.mubr.bf16.gmra.mrb[88].mxu1 %v7080_v44 }
  0xfb   : > { %1794 = vmatprep.mubr.bf16.mxu0 %v7081_v45  ;;  %3318 = vmatprep.mubr.bf16.mxu1 %v7083_v46 }
 0x102   : > { %1795 = vmatmul.mubr.bf16.gmra.mrb[92].mxu0 %v7085_v47  ;;  %3319 = vmatmul.mubr.bf16.gmra.mrb[92].mxu1 %v7086_v48 }
 0x103   : > { %1801 = vmatprep.mubr.bf16.mxu0 %v7087_v49  ;;  %3325 = vmatprep.mubr.bf16.mxu1 %v7089_v50 }
 0x10a   : > { %1802 = vmatmul.mubr.bf16.gmra.mrb[96].mxu0 %v7091_v51  ;;  %3326 = vmatmul.mubr.bf16.gmra.mrb[96].mxu1 %v7092_v52 }
 0x10b   : > { %1809 = vmatprep.mubr.bf16.mxu0 %v7093_v53  ;;  %3333 = vmatprep.mubr.bf16.mxu1 %v7095_v54 }
 0x112   : > { %1810 = vmatmul.mubr.bf16.gmra.mrb[100].mxu0 %v7097_v55  ;;  %3334 = vmatmul.mubr.bf16.gmra.mrb[100].mxu1 %v7098_v56 }
 0x113   : > { %1817 = vmatprep.mubr.bf16.mxu0 %v7099_v57  ;;  %3341 = vmatprep.mubr.bf16.mxu1 %v7101_v58 }
 0x11a   : > { %1818 = vmatmul.mubr.bf16.gmra.mrb[104].mxu0 %v7103_v59  ;;  %3342 = vmatmul.mubr.bf16.gmra.mrb[104].mxu1 %v7104_v60  ;;  %v7121_v59 = vld [vmem:[%s7593_s25 + $0x1d0] ss:$8 sps:$4 sm:$0xff]  }
 0x11b   : > { %1825 = vmatprep.mubr.bf16.mxu0 %v7105_v61  ;;  %3349 = vmatprep.mubr.bf16.mxu1 %v7107_v62 }
 0x11d   : > { %v1617_v1 = vpop.f32.mrb[0].mxu0  ;;  %v3141_v2 = vpop.f32.mrb[0].mxu1 }
 0x11e   : > { %v3797_v3 = vmul.f32 %v7767_v63, %v1617_v1  ;;  %v4244_v4 = vmul.f32 %v7767_v63, %v3141_v2  ;;  %v1619_v5 = vpop.f32.mrb[1].mxu0  ;;  %v3143_v6 = vpop.f32.mrb[1].mxu1 }
 0x11f   : > { %v1620_v9 = vpop.f32.mrb[2].mxu0  ;;  %v3144_v10 = vpop.f32.mrb[2].mxu1 }
 0x120   : > { %v3950_v13 = vadd.f32 %v7772_v0, %v3797_v3  ;;  %v4391_v14 = vadd.f32 %v7772_v0, %v4244_v4  ;;  %v3798_v15 = vmul.f32 %v7767_v63, %v1620_v9  ;;  %v4245_v16 = vmul.f32 %v7767_v63, %v3144_v10  ;;  %v1622_v17 = vpop.f32.mrb[3].mxu0  ;;  %v3146_v18 = vpop.f32.mrb[3].mxu1  ;;  %v7122_v4 = vld [vmem:[%s7597_s26 + $0x1d0] ss:$8 sps:$4 sm:$0xff]   ;;  %v7123_v9 = vld [vmem:[%s7593_s25 + $0x1e4] ss:$8 sps:$4 sm:$0xff]  }
 0x121   : > { %v7125_v10 = vld [vmem:[%s7597_s26 + $0x1e4] ss:$8 sps:$4 sm:$0xff]  }
 0x122   : > { %v4097_v19 = vmax.f32 %v3950_v13, 0.0  ;;  %v4538_v20 = vmax.f32 %v4391_v14, 0.0  ;;  %v3951_v21 = vadd.f32 %v7772_v0, %v3798_v15  ;;  %v4392_v22 = vadd.f32 %v7772_v0, %v4245_v16  ;;  %1826 = vmatmul.mubr.bf16.gmra.mrb[108].mxu0 %v7109_v7  ;;  %3350 = vmatmul.mubr.bf16.gmra.mrb[108].mxu1 %v7110_v8 }
 0x123   : > { %1832 = vmatprep.mubr.bf16.mxu0 %v7111_v11  ;;  %3356 = vmatprep.mubr.bf16.mxu1 %v7113_v12 }
 0x124   : > { %v7786_v23 = vmax.f32 %v4097_v19, %v4538_v20  ;;  %v4098_v24 = vmax.f32 %v3951_v21, 0.0  ;;  %v4539_v25 = vmax.f32 %v4392_v22, 0.0  ;;  %v4980_v26 = vrot.slane %v4097_v19, 1 }
 0x125   : > { %v1625_v27 = vpop.f32.mrb[4].mxu0  ;;  %v3149_v28 = vpop.f32.mrb[4].mxu1 }
 0x126   : > { %v4981_v30 = vrot.slane %v4098_v24, 1  ;;  %v7789_v31 = vmax.f32 %v4098_v24, %v4539_v25  ;;  %v3799_v32 = vmul.f32 %v7767_v63, %v1625_v27  ;;  %v4246_v33 = vmul.f32 %v7767_v63, %v3149_v28  ;;  %v1627_v34 = vpop.f32.mrb[5].mxu0  ;;  %v3151_v35 = vpop.f32.mrb[5].mxu1 }
 0x127   : > { %v1628_v37 = vpop.f32.mrb[6].mxu0  ;;  %v3152_v38 = vpop.f32.mrb[6].mxu1 }
 0x128   : > { %v7797_v41 = vsel %vm4979_vm0, %v4980_v26, %v4981_v30  ;;  %v3952_v42 = vadd.f32 %v7772_v0, %v3799_v32  ;;  %v4393_v43 = vadd.f32 %v7772_v0, %v4246_v33  ;;  %v3800_v44 = vmul.f32 %v7767_v63, %v1628_v37  ;;  %v1630_v45 = vpop.f32.mrb[7].mxu0  ;;  %v3154_v46 = vpop.f32.mrb[7].mxu1 }
 0x129   : > { %v5400_v47 = vmax.f32 %v7786_v23, %v7797_v41  ;;  %v4247_v48 = vmul.f32 %v7767_v63, %v3152_v38  ;;  %v7128_v38 = vld [vmem:[%s7597_s26 + $0x1e0] ss:$8 sps:$4 sm:$0xff]   ;;  %v7131_v45 = vld [vmem:[%s7597_s26 + $0x1f4] ss:$8 sps:$4 sm:$0xff]  }
 0x12a   : > { %v4099_v49 = vmax.f32 %v3952_v42, 0.0  ;;  %v4540_v50 = vmax.f32 %v4393_v43, 0.0  ;;  %v3953_v51 = vadd.f32 %v7772_v0, %v3800_v44  ;;  %1833 = vmatmul.mubr.bf16.gmra.mrb[112].mxu0 %v7115_v29  ;;  %3357 = vmatmul.mubr.bf16.gmra.mrb[112].mxu1 %v7116_v36  ;;  %v7129_v44 = vld [vmem:[%s7593_s25 + $0x1f4] ss:$8 sps:$4 sm:$0xff]  }
 0x12b   : > { %v4394_v52 = vadd.f32 %v7772_v0, %v4247_v48  ;;  %1840 = vmatprep.mubr.bf16.mxu0 %v7117_v39  ;;  %3364 = vmatprep.mubr.bf16.mxu1 %v7119_v40 }
 0x12c   : > { %v4983_v53 = vrot.slane %v4099_v49, 1  ;;  %v7807_v54 = vmax.f32 %v4099_v49, %v4540_v50  ;;  %v4100_v55 = vmax.f32 %v3953_v51, 0.0 }
 0x12d   : > { %v4541_v56 = vmax.f32 %v4394_v52, 0.0  ;;  %v1633_v57 = vpop.f32.mrb[8].mxu0  ;;  %v3157_v58 = vpop.f32.mrb[8].mxu1 }
 0x12e   : > { %v7811_v60 = vsel %vm4979_vm0, %v4981_v30, %v4983_v53  ;;  %v4985_v61 = vrot.slane %v4100_v55, 1  ;;  %v3801_v62 = vmul.f32 %v7767_v63, %v1633_v57  ;;  %v4248_v1 = vmul.f32 %v7767_v63, %v3157_v58  ;;  %v1635_v2 = vpop.f32.mrb[9].mxu0  ;;  %v3159_v3 = vpop.f32.mrb[9].mxu1  ;;  %v7127_v30 = vld [vmem:[%s7593_s25 + $0x1e0] ss:$8 sps:$4 sm:$0xff]  }
 0x12f   : > { %v5401_v5 = vmax.f32 %v7789_v31, %v7811_v60  ;;  %v7818_v6 = vmax.f32 %v4100_v55, %v4541_v56  ;;  %v1636_v7 = vpop.f32.mrb[10].mxu0  ;;  %v3160_v8 = vpop.f32.mrb[10].mxu1 }
 0x130   : > { %v7823_v11 = vsel %vm4979_vm0, %v4983_v53, %v4985_v61  ;;  %v3954_v12 = vadd.f32 %v7772_v0, %v3801_v62  ;;  %v4395_v13 = vadd.f32 %v7772_v0, %v4248_v1  ;;  %v3802_v14 = vmul.f32 %v7767_v63, %v1636_v7  ;;  %v1638_v15 = vpop.f32.mrb[11].mxu0  ;;  %v3162_v16 = vpop.f32.mrb[11].mxu1  ;;  %v7133_v7 = vld [vmem:[%s7593_s25 + $0x1f0] ss:$8 sps:$4 sm:$0xff]  }
 0x131   : > { %v5402_v17 = vmax.f32 %v7807_v54, %v7823_v11  ;;  %v4249_v18 = vmul.f32 %v7767_v63, %v3160_v8  ;;  %v7134_v8 = vld [vmem:[%s7597_s26 + $0x1f0] ss:$8 sps:$4 sm:$0xff]  }
 0x132   : > { %v4101_v19 = vmax.f32 %v3954_v12, 0.0  ;;  %v4542_v20 = vmax.f32 %v4395_v13, 0.0  ;;  %v3955_v21 = vadd.f32 %v7772_v0, %v3802_v14  ;;  %1841 = vmatmul.mubr.bf16.gmra.mrb[116].mxu0 %v7121_v59  ;;  %3365 = vmatmul.mubr.bf16.gmra.mrb[116].mxu1 %v7122_v4  ;;  %v7135_v13 = vld [vmem:[%s7593_s25 + $0x204] ss:$8 sps:$4 sm:$0xff]  }
 0x133   : > { %v4396_v22 = vadd.f32 %v7772_v0, %v4249_v18  ;;  %1848 = vmatprep.mubr.bf16.mxu0 %v7123_v9  ;;  %3372 = vmatprep.mubr.bf16.mxu1 %v7125_v10  ;;  %v7137_v14 = vld [vmem:[%s7597_s26 + $0x204] ss:$8 sps:$4 sm:$0xff]  }
 0x134   : > { %v4987_v24 = vrot.slane %v4101_v19, 1  ;;  %v7833_v25 = vmax.f32 %v4101_v19, %v4542_v20  ;;  %v4102_v26 = vmax.f32 %v3955_v21, 0.0 }
 0x135   : > { %v4543_v27 = vmax.f32 %v4396_v22, 0.0  ;;  %v1641_v28 = vpop.f32.mrb[12].mxu0  ;;  %v3165_v29 = vpop.f32.mrb[12].mxu1 }
 0x136   : > { %v7837_v32 = vsel %vm4979_vm0, %v4985_v61, %v4987_v24  ;;  %v4989_v33 = vrot.slane %v4102_v26, 1  ;;  %v3803_v34 = vmul.f32 %v7767_v63, %v1641_v28  ;;  %v4250_v35 = vmul.f32 %v7767_v63, %v3165_v29  ;;  %v1643_v36 = vpop.f32.mrb[13].mxu0  ;;  %v3167_v37 = vpop.f32.mrb[13].mxu1 }
 0x137   : > { %v5403_v39 = vmax.f32 %v7818_v6, %v7837_v32  ;;  %v7844_v40 = vmax.f32 %v4102_v26, %v4543_v27  ;;  %v1644_v42 = vpop.f32.mrb[14].mxu0  ;;  %v3168_v43 = vpop.f32.mrb[14].mxu1  ;;  %v7139_v36 = vld [vmem:[%s7593_s25 + $0x200] ss:$8 sps:$4 sm:$0xff]  }
 0x138   : > { %v7849_v46 = vsel %vm4979_vm0, %v4987_v24, %v4989_v33  ;;  %v3956_v48 = vadd.f32 %v7772_v0, %v3803_v34  ;;  %v4397_v49 = vadd.f32 %v7772_v0, %v4250_v35  ;;  %v1645_v50 = vpop.f32.mrb[15].mxu0  ;;  %v3169_v51 = vpop.f32.mrb[15].mxu1 }
 0x139   : > { %v5404_v52 = vmax.f32 %v7833_v25, %v7849_v46  ;;  %v7141_v51 = vld [vmem:[%s7593_s25 + $0x214] ss:$8 sps:$4 sm:$0xff]  }
 0x13a   : > { %v4103_v53 = vmax.f32 %v3956_v48, 0.0  ;;  %v4544_v55 = vmax.f32 %v4397_v49, 0.0  ;;  %1849 = vmatmul.mubr.bf16.gmra.mrb[120].mxu0 %v7127_v30  ;;  %3373 = vmatmul.mubr.bf16.gmra.mrb[120].mxu1 %v7128_v38  ;;  %v7140_v48 = vld [vmem:[%s7597_s26 + $0x200] ss:$8 sps:$4 sm:$0xff]  }
 0x13b   : > { %1856 = vmatprep.mubr.bf16.mxu0 %v7129_v44  ;;  %3380 = vmatprep.mubr.bf16.mxu1 %v7131_v45 }
 0x13c   : > { %v7855_v56 = vrot.slane %v4103_v53, 1  ;;  %v7857_v57 = vmax.f32 %v4103_v53, %v4544_v55  ;;  %v7143_v53 = vld [vmem:[%s7597_s26 + $0x214] ss:$8 sps:$4 sm:$0xff]  }
 0x13d   : > { %v1648_v58 = vpop.f32.mrb[16].mxu0  ;;  %v3172_v59 = vpop.f32.mrb[16].mxu1 }
 0x13e   : > { %v7861_v61 = vsel %vm4979_vm0, %v4989_v33, %v7855_v56  ;;  %v5406_v62 = vmax.f32 %v7857_v57, %v7855_v56  ;;  %v3804_v1 = vmul.f32 %v7767_v63, %v1648_v58  ;;  %v4251_v2 = vmul.f32 %v7767_v63, %v3172_v59  ;;  %v1650_v3 = vpop.f32.mrb[17].mxu0  ;;  %v3174_v4 = vpop.f32.mrb[17].mxu1 }
 0x13f   : > { %v5405_v9 = vmax.f32 %v7844_v40, %v7861_v61  ;;  %v1651_v10 = vpop.f32.mrb[18].mxu0  ;;  %v3175_v12 = vpop.f32.mrb[18].mxu1 }
 0x140   : > { %v3957_v15 = vadd.f32 %v7772_v0, %v3804_v1  ;;  %v4398_v16 = vadd.f32 %v7772_v0, %v4251_v2  ;;  %v3805_v18 = vmul.f32 %v7767_v63, %v1651_v10  ;;  %v4252_v19 = vmul.f32 %v7767_v63, %v3175_v12  ;;  %v1653_v20 = vpop.f32.mrb[19].mxu0  ;;  %v3177_v21 = vpop.f32.mrb[19].mxu1 }
 0x142   : > { %v4104_v22 = vmax.f32 %v3957_v15, 0.0  ;;  %v4545_v24 = vmax.f32 %v4398_v16, 0.0  ;;  %v3958_v26 = vadd.f32 %v7772_v0, %v3805_v18  ;;  %v4399_v27 = vadd.f32 %v7772_v0, %v4252_v19  ;;  %1857 = vmatmul.mubr.bf16.gmra.mrb[124].mxu0 %v7133_v7  ;;  %3381 = vmatmul.mubr.bf16.gmra.mrb[124].mxu1 %v7134_v8 }
 0x143   : > { %1863 = vmatprep.mubr.bf16.mxu0 %v7135_v13  ;;  %3387 = vmatprep.mubr.bf16.mxu1 %v7137_v14 }
 0x144   : > { %v4692_v28 = vmax.f32 %v4104_v22, %v4545_v24  ;;  %v4105_v29 = vmax.f32 %v3958_v26, 0.0  ;;  %v4546_v30 = vmax.f32 %v4399_v27, 0.0  ;;  %v4993_v33 = vrot.slane %v4104_v22, 1  ;;  %v7145_v22 = vld [vmem:[%s7593_s25 + $0x210] ss:$8 sps:$4 sm:$0xff]  }
 0x145   : > { %v1656_v34 = vpop.f32.mrb[20].mxu0  ;;  %v3180_v35 = vpop.f32.mrb[20].mxu1 }
 0x146   : > { %v4994_v37 = vrot.slane %v4105_v29, 1  ;;  %v4693_v38 = vmax.f32 %v4105_v29, %v4546_v30  ;;  %v3806_v42 = vmul.f32 %v7767_v63, %v1656_v34  ;;  %v4253_v43 = vmul.f32 %v7767_v63, %v3180_v35  ;;  %v1658_v44 = vpop.f32.mrb[21].mxu0  ;;  %v3182_v45 = vpop.f32.mrb[21].mxu1  ;;  %v7147_v35 = vld [vmem:[%s7593_s25 + $0x224] ss:$8 sps:$4 sm:$0xff]  }
 0x147   : > { %v1659_v49 = vpop.f32.mrb[22].mxu0  ;;  %v3183_v50 = vpop.f32.mrb[22].mxu1 }
 0x148   : > { %v4995_v55 = vsel %vm4979_vm0, %v4993_v33, %v4994_v37  ;;  %v3959_v58 = vadd.f32 %v7772_v0, %v3806_v42  ;;  %v4400_v59 = vadd.f32 %v7772_v0, %v4253_v43  ;;  %v3807_v1 = vmul.f32 %v7767_v63, %v1659_v49  ;;  %v1661_v2 = vpop.f32.mrb[23].mxu0  ;;  %v3185_v3 = vpop.f32.mrb[23].mxu1 }
 0x149   : > { %v5407_v4 = vmax.f32 %v4692_v28, %v4995_v55  ;;  %v4254_v7 = vmul.f32 %v7767_v63, %v3183_v50  ;;  %v7146_v28 = vld [vmem:[%s7597_s26 + $0x210] ss:$8 sps:$4 sm:$0xff]  }
 0x14a   : > { %v4106_v8 = vmax.f32 %v3959_v58, 0.0  ;;  %v4547_v10 = vmax.f32 %v4400_v59, 0.0  ;;  %v3960_v12 = vadd.f32 %v7772_v0, %v3807_v1  ;;  %1864 = vmatmul.mubr.bf16.gmra.mrb[128].mxu0 %v7139_v36  ;;  %3388 = vmatmul.mubr.bf16.gmra.mrb[128].mxu1 %v7140_v48  ;;  %v7149_v36 = vld [vmem:[%s7597_s26 + $0x224] ss:$8 sps:$4 sm:$0xff]  }
 0x14b   : > { %v7894_v13 = vmax.f32 %v5400_v47, %v5407_v4  ;;  %v4401_v14 = vadd.f32 %v7772_v0, %v4254_v7  ;;  %1871 = vmatprep.mubr.bf16.mxu0 %v7141_v51  ;;  %3395 = vmatprep.mubr.bf16.mxu1 %v7143_v53  ;;  %v7151_v4 = vld [vmem:[%s7593_s25 + $0x220] ss:$8 sps:$4 sm:$0xff]  }
 0x14c   : > { %v4996_v15 = vrot.slane %v4106_v8, 1  ;;  %v4694_v16 = vmax.f32 %v4106_v8, %v4547_v10  ;;  %v4107_v18 = vmax.f32 %v3960_v12, 0.0  ;;  %v7152_v12 = vld [vmem:[%s7597_s26 + $0x220] ss:$8 sps:$4 sm:$0xff]  }
 0x14d   : > { %v4548_v19 = vmax.f32 %v4401_v14, 0.0  ;;  %v1664_v20 = vpop.f32.mrb[24].mxu0  ;;  %v3188_v21 = vpop.f32.mrb[24].mxu1 }
 0x14e   : > { %v4997_v24 = vsel %vm4979_vm0, %v4994_v37, %v4996_v15  ;;  %v4998_v26 = vrot.slane %v4107_v18, 1  ;;  %v3808_v23 = vmul.f32 %v7767_v63, %v1664_v20  ;;  %v4255_v41 = vmul.f32 %v7767_v63, %v3188_v21  ;;  %v1666_v47 = vpop.f32.mrb[25].mxu0  ;;  %v3190_v27 = vpop.f32.mrb[25].mxu1  ;;  %v7155_v20 = vld [vmem:[%s7597_s26 + $0x234] ss:$8 sps:$4 sm:$0xff]  }
 0x14f   : > { %v5408_v29 = vmax.f32 %v4693_v38, %v4997_v24  ;;  %v4695_v30 = vmax.f32 %v4107_v18, %v4548_v19  ;;  %v1667_v33 = vpop.f32.mrb[26].mxu0  ;;  %v3191_v34 = vpop.f32.mrb[26].mxu1  ;;  %v7153_v19 = vld [vmem:[%s7593_s25 + $0x234] ss:$8 sps:$4 sm:$0xff]  }
 0x150   : > { %v4999_v42 = vsel %vm4979_vm0, %v4996_v15, %v4998_v26  ;;  %v3961_v43 = vadd.f32 %v7772_v0, %v3808_v23  ;;  %v4402_v37 = vadd.f32 %v7772_v0, %v4255_v41  ;;  %v3809_v44 = vmul.f32 %v7767_v63, %v1667_v33  ;;  %v1669_v45 = vpop.f32.mrb[27].mxu0  ;;  %v3193_v48 = vpop.f32.mrb[27].mxu1  ;;  %v7157_v33 = vld [vmem:[%s7593_s25 + $0x230] ss:$8 sps:$4 sm:$0xff]  }
 0x151   : > { %v7911_v49 = vmax.f32 %v5401_v5, %v5408_v29  ;;  %v5409_v38 = vmax.f32 %v4694_v16, %v4999_v42  ;;  %v4256_v50 = vmul.f32 %v7767_v63, %v3191_v34  ;;  %v7158_v42 = vld [vmem:[%s7597_s26 + $0x230] ss:$8 sps:$4 sm:$0xff]   ;;  %v7161_v48 = vld [vmem:[%s7597_s26 + $0x244] ss:$8 sps:$4 sm:$0xff]  }
 0x152   : > { %v4108_v51 = vmax.f32 %v3961_v43, 0.0  ;;  %v4549_v53 = vmax.f32 %v4402_v37, 0.0  ;;  %v3962_v55 = vadd.f32 %v7772_v0, %v3809_v44  ;;  %1872 = vmatmul.mubr.bf16.gmra.mrb[132].mxu0 %v7145_v22  ;;  %3396 = vmatmul.mubr.bf16.gmra.mrb[132].mxu1 %v7146_v28  ;;  %v7159_v43 = vld [vmem:[%s7593_s25 + $0x244] ss:$8 sps:$4 sm:$0xff]  }
 0x153   : > { %v7918_v58 = vmax.f32 %v5402_v17, %v5409_v38  ;;  %v4403_v59 = vadd.f32 %v7772_v0, %v4256_v50  ;;  %1879 = vmatprep.mubr.bf16.mxu0 %v7147_v35  ;;  %3403 = vmatprep.mubr.bf16.mxu1 %v7149_v36 }
 0x154   : > { %v5000_v31 = vrot.slane %v4108_v51, 1  ;;  %v4696_v60 = vmax.f32 %v4108_v51, %v4549_v53  ;;  %v4109_v5 = vmax.f32 %v3962_v55, 0.0 }
 0x155   : > { %v4550_v1 = vmax.f32 %v4403_v59, 0.0  ;;  %v1672_v2 = vpop.f32.mrb[28].mxu0  ;;  %v3196_v3 = vpop.f32.mrb[28].mxu1 }
 0x156   : > { %v5001_v7 = vsel %vm4979_vm0, %v4998_v26, %v5000_v31  ;;  %v5002_v8 = vrot.slane %v4109_v5, 1  ;;  %v3810_v54 = vmul.f32 %v7767_v63, %v1672_v2  ;;  %v4257_v11 = vmul.f32 %v7767_v63, %v3196_v3  ;;  %v1674_v17 = vpop.f32.mrb[29].mxu0  ;;  %v3198_v10 = vpop.f32.mrb[29].mxu1 }
 0x157   : > { %v5410_v14 = vmax.f32 %v4695_v30, %v5001_v7  ;;  %v4697_v15 = vmax.f32 %v4109_v5, %v4550_v1  ;;  %v1675_v16 = vpop.f32.mrb[30].mxu0  ;;  %v3199_v18 = vpop.f32.mrb[30].mxu1 }
 0x158   : > { %v5003_v21 = vsel %vm4979_vm0, %v5000_v31, %v5002_v8  ;;  %v3963_v22 = vadd.f32 %v7772_v0, %v3810_v54  ;;  %v4404_v24 = vadd.f32 %v7772_v0, %v4257_v11  ;;  %v1676_v26 = vpop.f32.mrb[31].mxu0  ;;  %v3200_v23 = vpop.f32.mrb[31].mxu1  ;;  %v7167_v18 = vld [vmem:[%s7597_s26 + $0x254] ss:$8 sps:$4 sm:$0xff]  }
 0x159   : > { %v7934_v41 = vmax.f32 %v5403_v39, %v5410_v14  ;;  %v5411_v47 = vmax.f32 %v4696_v60, %v5003_v21 }
 0x15a   : > { %v4110_v27 = vmax.f32 %v3963_v22, 0.0  ;;  %v4551_v28 = vmax.f32 %v4404_v24, 0.0  ;;  %1880 = vmatmul.mubr.bf16.gmra.mrb[136].mxu0 %v7151_v4  ;;  %3404 = vmatmul.mubr.bf16.gmra.mrb[136].mxu1 %v7152_v12  ;;  %v7164_v4 = vld [vmem:[%s7597_s26 + $0x240] ss:$8 sps:$4 sm:$0xff]   ;;  %v7165_v12 = vld [vmem:[%s7593_s25 + $0x254] ss:$8 sps:$4 sm:$0xff]  }
 0x15b   : > { %v7939_v29 = vmax.f32 %v5404_v52, %v5411_v47  ;;  %1887 = vmatprep.mubr.bf16.mxu0 %v7153_v19  ;;  %3411 = vmatprep.mubr.bf16.mxu1 %v7155_v20 }
 0x15c   : > { %v5004_v30 = vrot.slane %v4110_v27, 1  ;;  %v4698_v6 = vmax.f32 %v4110_v27, %v4551_v28 }
 0x15d   : > { %v1679_v32 = vpop.f32.mrb[32].mxu0  ;;  %v3203_v39 = vpop.f32.mrb[32].mxu1 }
 0x15e   : > { %v5005_v34 = vsel %vm4979_vm0, %v5002_v8, %v5004_v30  ;;  %v5413_v35 = vmax.f32 %v4698_v6, %v5004_v30  ;;  %v3811_v36 = vmul.f32 %v7767_v63, %v1679_v32  ;;  %v4258_v25 = vmul.f32 %v7767_v63, %v3203_v39  ;;  %v1681_v46 = vpop.f32.mrb[33].mxu0  ;;  %v3205_v52 = vpop.f32.mrb[33].mxu1 }
 0x15f   : > { %v5412_v37 = vmax.f32 %v4697_v15, %v5005_v34  ;;  %v1682_v44 = vpop.f32.mrb[34].mxu0  ;;  %v3206_v45 = vpop.f32.mrb[34].mxu1  ;;  %v7169_v46 = vld [vmem:[%s7593_s25 + $0x250] ss:$8 sps:$4 sm:$0xff]  }
 0x160   : > { %v7958_v38 = vmax.f32 %v5406_v62, %v5413_v35  ;;  %v3964_v50 = vadd.f32 %v7772_v0, %v3811_v36  ;;  %v4405_v51 = vadd.f32 %v7772_v0, %v4258_v25  ;;  %v3812_v53 = vmul.f32 %v7767_v63, %v1682_v44  ;;  %v1684_v55 = vpop.f32.mrb[35].mxu0  ;;  %v3208_v59 = vpop.f32.mrb[35].mxu1 }
 0x161   : > { %v7966_v31 = vmax.f32 %v5405_v9, %v5412_v37  ;;  %v4259_v60 = vmul.f32 %v7767_v63, %v3206_v45  ;;  %v7163_v9 = vld [vmem:[%s7593_s25 + $0x240] ss:$8 sps:$4 sm:$0xff]   ;;  %v7170_v45 = vld [vmem:[%s7597_s26 + $0x250] ss:$8 sps:$4 sm:$0xff]   ;;  %v7171_v55 = vld [vmem:[%s7593_s25 + $0x264] ss:$8 sps:$4 sm:$0xff]  }
 0x162   : > { %v4111_v56 = vmax.f32 %v3964_v50, 0.0  ;;  %v4552_v57 = vmax.f32 %v4405_v51, 0.0  ;;  %v3965_v62 = vadd.f32 %v7772_v0, %v3812_v53  ;;  %1888 = vmatmul.mubr.bf16.gmra.mrb[140].mxu0 %v7157_v33  ;;  %3412 = vmatmul.mubr.bf16.gmra.mrb[140].mxu1 %v7158_v42  ;;  %v7173_v59 = vld [vmem:[%s7597_s26 + $0x264] ss:$8 sps:$4 sm:$0xff]  }
 0x163   : > { %v4406_v5 = vadd.f32 %v7772_v0, %v4259_v60  ;;  %1894 = vmatprep.mubr.bf16.mxu0 %v7159_v43  ;;  %3418 = vmatprep.mubr.bf16.mxu1 %v7161_v48 }
 0x164   : > { %v4699_v40 = vmax.f32 %v4111_v56, %v4552_v57  ;;  %v4112_v61 = vmax.f32 %v3965_v62, 0.0  ;;  %v5006_v7 = vrot.slane %v4111_v56, 1 }
 0x165   : > { %v4553_v1 = vmax.f32 %v4406_v5, 0.0  ;;  %v1687_v2 = vpop.f32.mrb[36].mxu0  ;;  %v3211_v3 = vpop.f32.mrb[36].mxu1 }
 0x166   : > { %v5007_v8 = vrot.slane %v4112_v61, 1  ;;  %v3813_v54 = vmul.f32 %v7767_v63, %v1687_v2  ;;  %v4260_v11 = vmul.f32 %v7767_v63, %v3211_v3  ;;  %v1689_v17 = vpop.f32.mrb[37].mxu0  ;;  %v3213_v10 = vpop.f32.mrb[37].mxu1 }
 0x167   : > { %v4700_v14 = vmax.f32 %v4112_v61, %v4553_v1  ;;  %v1690_v15 = vpop.f32.mrb[38].mxu0  ;;  %v3214_v16 = vpop.f32.mrb[38].mxu1 }
 0x168   : > { %v5008_v19 = vsel %vm4979_vm0, %v5006_v7, %v5007_v8  ;;  %v3966_v20 = vadd.f32 %v7772_v0, %v3813_v54  ;;  %v4407_v21 = vadd.f32 %v7772_v0, %v4260_v11  ;;  %v3814_v22 = vmul.f32 %v7767_v63, %v1690_v15  ;;  %v1692_v24 = vpop.f32.mrb[39].mxu0  ;;  %v3216_v26 = vpop.f32.mrb[39].mxu1  ;;  %v7175_v15 = vld [vmem:[%s7593_s25 + $0x260] ss:$8 sps:$4 sm:$0xff]  }
 0x169   : > { %v7989_v23 = vmax.f32 %v4699_v40, %v5008_v19  ;;  %v4261_v47 = vmul.f32 %v7767_v63, %v3214_v16 }
 0x16a   : > { %v4113_v27 = vmax.f32 %v3966_v20, 0.0  ;;  %v4554_v28 = vmax.f32 %v4407_v21, 0.0  ;;  %v3967_v30 = vadd.f32 %v7772_v0, %v3814_v22  ;;  %1895 = vmatmul.mubr.bf16.gmra.mrb[144].mxu0 %v7163_v9  ;;  %3419 = vmatmul.mubr.bf16.gmra.mrb[144].mxu1 %v7164_v4  ;;  %v7176_v22 = vld [vmem:[%s7597_s26 + $0x260] ss:$8 sps:$4 sm:$0xff]  }
 0x16b   : > { %v5554_v6 = vmax.f32 %v7894_v13, %v7989_v23  ;;  %v4408_v32 = vadd.f32 %v7772_v0, %v4261_v47  ;;  %1902 = vmatprep.mubr.bf16.mxu0 %v7165_v12  ;;  %3426 = vmatprep.mubr.bf16.mxu1 %v7167_v18 }
 0x16c   : > { %v5009_v39 = vrot.slane %v4113_v27, 1  ;;  %v4701_v33 = vmax.f32 %v4113_v27, %v4554_v28  ;;  %v4114_v34 = vmax.f32 %v3967_v30, 0.0  ;;  %v7177_v28 = vld [vmem:[%s7593_s25 + $0x274] ss:$8 sps:$4 sm:$0xff]  }
 0x16d   : > { %v4555_v35 = vmax.f32 %v4408_v32, 0.0  ;;  %v1695_v36 = vpop.f32.mrb[40].mxu0  ;;  %v3219_v25 = vpop.f32.mrb[40].mxu1  ;;  %v7179_v30 = vld [vmem:[%s7597_s26 + $0x274] ss:$8 sps:$4 sm:$0xff]  }
 0x16e   : > { %v5010_v13 = vsel %vm4979_vm0, %v5007_v8, %v5009_v39  ;;  %v5011_v52 = vrot.slane %v4114_v34, 1  ;;  %v3815_v42 = vmul.f32 %v7767_v63, %v1695_v36  ;;  %v4262_v43 = vmul.f32 %v7767_v63, %v3219_v25  ;;  %v1697_v37 = vpop.f32.mrb[41].mxu0  ;;  %v3221_v44 = vpop.f32.mrb[41].mxu1 }
 0x16f   : > { %v8006_v48 = vmax.f32 %v4700_v14, %v5010_v13  ;;  %v4702_v50 = vmax.f32 %v4114_v34, %v4555_v35  ;;  %v1698_v51 = vpop.f32.mrb[42].mxu0  ;;  %v3222_v53 = vpop.f32.mrb[42].mxu1 }
 0x170   : > { %v5012_v60 = vsel %vm4979_vm0, %v5009_v39, %v5011_v52  ;;  %v3968_v56 = vadd.f32 %v7772_v0, %v3815_v42  ;;  %v4409_v57 = vadd.f32 %v7772_v0, %v4262_v43  ;;  %v3816_v62 = vmul.f32 %v7767_v63, %v1698_v51  ;;  %v1700_v5 = vpop.f32.mrb[43].mxu0  ;;  %v3224_v40 = vpop.f32.mrb[43].mxu1 }
 0x171   : > { %v5555_v61 = vmax.f32 %v7911_v49, %v8006_v48  ;;  %v8016_v9 = vmax.f32 %v4701_v33, %v5012_v60  ;;  %v4263_v1 = vmul.f32 %v7767_v63, %v3222_v53  ;;  %v7185_v5 = vld [vmem:[%s7597_s26 + $0x284] ss:$8 sps:$4 sm:$0xff]  }
 0x172   : > { %v4115_v2 = vmax.f32 %v3968_v56, 0.0  ;;  %v4556_v3 = vmax.f32 %v4409_v57, 0.0  ;;  %v3969_v4 = vadd.f32 %v7772_v0, %v3816_v62  ;;  %1903 = vmatmul.mubr.bf16.gmra.mrb[148].mxu0 %v7169_v46  ;;  %3427 = vmatmul.mubr.bf16.gmra.mrb[148].mxu1 %v7170_v45  ;;  %v7183_v62 = vld [vmem:[%s7593_s25 + $0x284] ss:$8 sps:$4 sm:$0xff]  }
 0x173   : > { %v6737_v7 = vpack.c.bf16 %v5555_v61, %v5554_v6  ;;  %v5556_v49 = vmax.f32 %v7918_v58, %v8016_v9  ;;  %v4410_v8 = vadd.f32 %v7772_v0, %v4263_v1  ;;  %1910 = vmatprep.mubr.bf16.mxu0 %v7171_v55  ;;  %3434 = vmatprep.mubr.bf16.mxu1 %v7173_v59  ;;  %v7182_v59 = vld [vmem:[%s7597_s26 + $0x270] ss:$8 sps:$4 sm:$0xff]  }
 0x174   : > { %v5013_v54 = vrot.slane %v4115_v2, 1  ;;  %v4703_v11 = vmax.f32 %v4115_v2, %v4556_v3  ;;  %v4116_v17 = vmax.f32 %v3969_v4, 0.0 }
 0x175   : > { %6738 = vst [vmem:[%s8022_s27] sm:$0xff] %v6737_v7   ;;  %v4557_v10 = vmax.f32 %v4410_v8, 0.0  ;;  %v1703_v12 = vpop.f32.mrb[44].mxu0  ;;  %v3227_v14 = vpop.f32.mrb[44].mxu1 }
 0x176   : > { %v5014_v16 = vsel %vm4979_vm0, %v5011_v52, %v5013_v54  ;;  %v5015_v18 = vrot.slane %v4116_v17, 1  ;;  %v3817_v58 = vmul.f32 %v7767_v63, %v1703_v12  ;;  %v4264_v19 = vmul.f32 %v7767_v63, %v3227_v14  ;;  %v1705_v20 = vpop.f32.mrb[45].mxu0  ;;  %v3229_v21 = vpop.f32.mrb[45].mxu1 }
 0x177   : > { %v8034_v24 = vmax.f32 %v4702_v50, %v5014_v16  ;;  %v4704_v26 = vmax.f32 %v4116_v17, %v4557_v10  ;;  %v1706_v47 = vpop.f32.mrb[46].mxu0  ;;  %v3230_v27 = vpop.f32.mrb[46].mxu1 }
 0x178   : > { %v5016_v6 = vsel %vm4979_vm0, %v5013_v54, %v5015_v18  ;;  %v3970_v32 = vadd.f32 %v7772_v0, %v3817_v58  ;;  %v4411_v39 = vadd.f32 %v7772_v0, %v4264_v19  ;;  %v1707_v33 = vpop.f32.mrb[47].mxu0  ;;  %v3231_v34 = vpop.f32.mrb[47].mxu1  ;;  %v7188_v47 = vld [vmem:[%s7597_s26 + $0x280] ss:$8 sps:$4 sm:$0xff]  }
 0x179   : > { %v5557_v35 = vmax.f32 %v7934_v41, %v8034_v24  ;;  %v8043_v36 = vmax.f32 %v4703_v11, %v5016_v6  ;;  %v7189_v6 = vld [vmem:[%s7593_s25 + $0x294] ss:$8 sps:$4 sm:$0xff]  }
 0x17a   : > { %v4117_v25 = vmax.f32 %v3970_v32, 0.0  ;;  %v4558_v46 = vmax.f32 %v4411_v39, 0.0  ;;  %1911 = vmatmul.mubr.bf16.gmra.mrb[152].mxu0 %v7175_v15  ;;  %3435 = vmatmul.mubr.bf16.gmra.mrb[152].mxu1 %v7176_v22  ;;  %v7191_v32 = vld [vmem:[%s7597_s26 + $0x294] ss:$8 sps:$4 sm:$0xff]  }
 0x17b   : > { %v6742_v13 = vpack.c.bf16 %v5557_v35, %v5556_v49  ;;  %v5558_v52 = vmax.f32 %v7939_v29, %v8043_v36  ;;  %1918 = vmatprep.mubr.bf16.mxu0 %v7177_v28  ;;  %3442 = vmatprep.mubr.bf16.mxu1 %v7179_v30  ;;  %v7181_v29 = vld [vmem:[%s7593_s25 + $0x270] ss:$8 sps:$4 sm:$0xff]  }
 0x17c   : > { %v5017_v42 = vrot.slane %v4117_v25, 1  ;;  %v4705_v43 = vmax.f32 %v4117_v25, %v4558_v46 }
 0x17d   : > { %6859 = vst [vmem:[%s8022_s27 + $0x8] sm:$0xff] %v6742_v13   ;;  %v1710_v41 = vpop.f32.mrb[48].mxu0  ;;  %v3234_v37 = vpop.f32.mrb[48].mxu1 }
 0x17e   : > { %v5018_v44 = vsel %vm4979_vm0, %v5015_v18, %v5017_v42  ;;  %v8049_v45 = vmax.f32 %v4705_v43, %v5017_v42  ;;  %v3818_v50 = vmul.f32 %v7767_v63, %v1710_v41  ;;  %v4265_v51 = vmul.f32 %v7767_v63, %v3234_v37  ;;  %v1712_v53 = vpop.f32.mrb[49].mxu0  ;;  %v3236_v55 = vpop.f32.mrb[49].mxu1  ;;  %v7187_v18 = vld [vmem:[%s7593_s25 + $0x280] ss:$8 sps:$4 sm:$0xff]  }
 0x17f   : > { %v8055_v60 = vmax.f32 %v4704_v26, %v5018_v44  ;;  %v1713_v56 = vpop.f32.mrb[50].mxu0  ;;  %v3237_v57 = vpop.f32.mrb[50].mxu1 }
 0x180   : > { %v5560_v40 = vmax.f32 %v7958_v38, %v8049_v45  ;;  %v3971_v61 = vadd.f32 %v7772_v0, %v3818_v50  ;;  %v4412_v1 = vadd.f32 %v7772_v0, %v4265_v51  ;;  %v3819_v2 = vmul.f32 %v7767_v63, %v1713_v56  ;;  %v1715_v3 = vpop.f32.mrb[51].mxu0  ;;  %v3239_v4 = vpop.f32.mrb[51].mxu1  ;;  %v7193_v56 = vld [vmem:[%s7593_s25 + $0x290] ss:$8 sps:$4 sm:$0xff]  }
 0x181   : > { %v5559_v7 = vmax.f32 %v7966_v31, %v8055_v60  ;;  %v4266_v49 = vmul.f32 %v7767_v63, %v3237_v57 }
 0x182   : > { %v6670_v8 = vpack.c.bf16 %v5560_v40, %v5560_v40  ;;  %v4118_v54 = vmax.f32 %v3971_v61, 0.0  ;;  %v4559_v11 = vmax.f32 %v4412_v1, 0.0  ;;  %v3972_v38 = vadd.f32 %v7772_v0, %v3819_v2  ;;  %1919 = vmatmul.mubr.bf16.gmra.mrb[156].mxu0 %v7181_v29  ;;  %3443 = vmatmul.mubr.bf16.gmra.mrb[156].mxu1 %v7182_v59  ;;  %v7194_v61 = vld [vmem:[%s7597_s26 + $0x290] ss:$8 sps:$4 sm:$0xff]  }
 0x183   : > { %v6747_v17 = vpack.c.bf16 %v5559_v7, %v5558_v52  ;;  %v4413_v10 = vadd.f32 %v7772_v0, %v4266_v49  ;;  %1925 = vmatprep.mubr.bf16.mxu0 %v7183_v62  ;;  %3449 = vmatprep.mubr.bf16.mxu1 %v7185_v5  ;;  %v7195_v7 = vld [vmem:[%s7593_s25 + $0x2a4] ss:$8 sps:$4 sm:$0xff]  }
 0x184   : > { %5596 = vst [vmem:[%s8022_s27 + $0x18] sm:$0x1] %v6670_v8  ;;  %v4706_v12 = vmax.f32 %v4118_v54, %v4559_v11  ;;  %v4119_v14 = vmax.f32 %v3972_v38, 0.0  ;;  %v5019_v58 = vrot.slane %v4118_v54, 1  ;;  %v7197_v49 = vld [vmem:[%s7597_s26 + $0x2a4] ss:$8 sps:$4 sm:$0xff]  }
 0x185   : > { %6860 = vst [vmem:[%s8022_s27 + $0x10] sm:$0xff] %v6747_v17   ;;  %v4560_v31 = vmax.f32 %v4413_v10, 0.0  ;;  %v1718_v15 = vpop.f32.mrb[52].mxu0  ;;  %v3242_v16 = vpop.f32.mrb[52].mxu1  ;;  %v8098_v54 = vld [vmem:[%s9379_s4] ss:$0 sm:$0xff] }
 0x186   : > { %v5020_v19 = vrot.slane %v4119_v14, 1  ;;  %v3820_v20 = vmul.f32 %v7767_v63, %v1718_v15  ;;  %v4267_v21 = vmul.f32 %v7767_v63, %v3242_v16  ;;  %v1720_v22 = vpop.f32.mrb[53].mxu0  ;;  %v3244_v26 = vpop.f32.mrb[53].mxu1  ;;  %v8105_v38 = vld [vmem:[%s9378_s3] ss:$0 sm:$0xff] }
 0x187   : > { %v4707_v27 = vmax.f32 %v4119_v14, %v4560_v31  ;;  %v1721_v28 = vpop.f32.mrb[54].mxu0  ;;  %v3245_v30 = vpop.f32.mrb[54].mxu1 }
 0x188   : > { %v5021_v39 = vsel %vm4979_vm0, %v5019_v58, %v5020_v19  ;;  %v3973_v33 = vadd.f32 %v7772_v0, %v3820_v20  ;;  %v4414_v34 = vadd.f32 %v7772_v0, %v4267_v21  ;;  %v3821_v35 = vmul.f32 %v7767_v63, %v1721_v28  ;;  %v1723_v25 = vpop.f32.mrb[55].mxu0  ;;  %v3247_v46 = vpop.f32.mrb[55].mxu1  ;;  %v7199_v28 = vld [vmem:[%s7593_s25 + $0x2a0] ss:$8 sps:$4 sm:$0xff]  }
 0x189   : > { %v5421_v13 = vmax.f32 %v4706_v12, %v5021_v39  ;;  %v4268_v52 = vmul.f32 %v7767_v63, %v3245_v30 }
 0x18a   : > { %v4120_v42 = vmax.f32 %v3973_v33, 0.0  ;;  %v4561_v43 = vmax.f32 %v4414_v34, 0.0  ;;  %v3974_v41 = vadd.f32 %v7772_v0, %v3821_v35  ;;  %1926 = vmatmul.mubr.bf16.gmra.mrb[160].mxu0 %v7187_v18  ;;  %3450 = vmatmul.mubr.bf16.gmra.mrb[160].mxu1 %v7188_v47  ;;  %v7200_v34 = vld [vmem:[%s7597_s26 + $0x2a0] ss:$8 sps:$4 sm:$0xff]  }
 0x18b   : > { %v8084_v37 = vmax.f32 %v7989_v23, %v5421_v13  ;;  %v4415_v44 = vadd.f32 %v7772_v0, %v4268_v52  ;;  %1933 = vmatprep.mubr.bf16.mxu0 %v7189_v6  ;;  %3457 = vmatprep.mubr.bf16.mxu1 %v7191_v32  ;;  %v7201_v52 = vld [vmem:[%s7593_s25 + $0x2b4] ss:$8 sps:$4 sm:$0xff]  }
 0x18c   : > { %v5022_v50 = vrot.slane %v4120_v42, 1  ;;  %v4708_v51 = vmax.f32 %v4120_v42, %v4561_v43  ;;  %v4121_v53 = vmax.f32 %v3974_v41, 0.0  ;;  %v7203_v42 = vld [vmem:[%s7597_s26 + $0x2b4] ss:$8 sps:$4 sm:$0xff]  }
 0x18d   : > { %v4562_v55 = vmax.f32 %v4415_v44, 0.0  ;;  %v1726_v29 = vpop.f32.mrb[56].mxu0  ;;  %v3250_v59 = vpop.f32.mrb[56].mxu1 }
 0x18e   : > { %v5023_v57 = vsel %vm4979_vm0, %v5020_v19, %v5022_v50  ;;  %v5024_v62 = vrot.slane %v4121_v53, 1  ;;  %v3822_v23 = vmul.f32 %v7767_v63, %v1726_v29  ;;  %v4269_v5 = vmul.f32 %v7767_v63, %v3250_v59  ;;  %v1728_v0 = vpop.f32.mrb[57].mxu0  ;;  %v3252_v40 = vpop.f32.mrb[57].mxu1 }
 0x18f   : > { %v5422_v1 = vmax.f32 %v4707_v27, %v5023_v57  ;;  %v4709_v2 = vmax.f32 %v4121_v53, %v4562_v55  ;;  %v1729_v3 = vpop.f32.mrb[58].mxu0  ;;  %v3253_v4 = vpop.f32.mrb[58].mxu1 }
 0x190   : > { %v5025_v8 = vsel %vm4979_vm0, %v5022_v50, %v5024_v62  ;;  %v3975_v11 = vadd.f32 %v8098_v54, %v3822_v23  ;;  %v4416_v63 = vadd.f32 %v8098_v54, %v4269_v5  ;;  %v3823_v17 = vmul.f32 %v8105_v38, %v1729_v3  ;;  %v1731_v10 = vpop.f32.mrb[59].mxu0  ;;  %v3255_v12 = vpop.f32.mrb[59].mxu1  ;;  %v7205_v3 = vld [vmem:[%s7593_s25 + $0x2b0] ss:$8 sps:$4 sm:$0xff]  }
 0x191   : > { %v8109_v14 = vmax.f32 %v8006_v48, %v5422_v1  ;;  %v5423_v31 = vmax.f32 %v4708_v51, %v5025_v8  ;;  %v4270_v15 = vmul.f32 %v8105_v38, %v3253_v4  ;;  %v7207_v8 = vld [vmem:[%s7593_s25 + $0x2c4] ss:$8 sps:$4 sm:$0xff]  }
 0x192   : > { %v4122_v16 = vmax.f32 %v3975_v11, 0.0  ;;  %v4563_v18 = vmax.f32 %v4416_v63, 0.0  ;;  %v3976_v58 = vadd.f32 %v8098_v54, %v3823_v17  ;;  %1934 = vmatmul.mubr.bf16.gmra.mrb[164].mxu0 %v7193_v56  ;;  %3458 = vmatmul.mubr.bf16.gmra.mrb[164].mxu1 %v7194_v61  ;;  %v7209_v11 = vld [vmem:[%s7597_s26 + $0x2c4] ss:$8 sps:$4 sm:$0xff]  }
 0x193   : > { %v8114_v19 = vmax.f32 %v8016_v9, %v5423_v31  ;;  %v4417_v20 = vadd.f32 %v8098_v54, %v4270_v15  ;;  %1941 = vmatprep.mubr.bf16.mxu0 %v7195_v7  ;;  %3465 = vmatprep.mubr.bf16.mxu1 %v7197_v49 }
 0x194   : > { %v5026_v48 = vrot.slane %v4122_v16, 1  ;;  %v4710_v21 = vmax.f32 %v4122_v16, %v4563_v18  ;;  %v4123_v22 = vmax.f32 %v3976_v58, 0.0 }
 0x195   : > { %v4564_v26 = vmax.f32 %v4417_v20, 0.0  ;;  %v1734_v47 = vpop.f32.mrb[60].mxu0  ;;  %v3258_v27 = vpop.f32.mrb[60].mxu1 }
 0x196   : > { %v5027_v30 = vsel %vm4979_vm0, %v5024_v62, %v5026_v48  ;;  %v5028_v6 = vrot.slane %v4123_v22, 1  ;;  %v3824_v9 = vmul.f32 %v8105_v38, %v1734_v47  ;;  %v4271_v32 = vmul.f32 %v8105_v38, %v3258_v27  ;;  %v1736_v39 = vpop.f32.mrb[61].mxu0  ;;  %v3260_v33 = vpop.f32.mrb[61].mxu1  ;;  %v7211_v27 = vld [vmem:[%s7593_s25 + $0x2c0] ss:$8 sps:$4 sm:$0xff]  }
 0x197   : > { %v5424_v35 = vmax.f32 %v4709_v2, %v5027_v30  ;;  %v4711_v25 = vmax.f32 %v4123_v22, %v4564_v26  ;;  %v1737_v46 = vpop.f32.mrb[62].mxu0  ;;  %v3261_v13 = vpop.f32.mrb[62].mxu1  ;;  %v7212_v33 = vld [vmem:[%s7597_s26 + $0x2c0] ss:$8 sps:$4 sm:$0xff]  }
 0x198   : > { %v5029_v43 = vsel %vm4979_vm0, %v5026_v48, %v5028_v6  ;;  %v3977_v41 = vadd.f32 %v8098_v54, %v3824_v9  ;;  %v4418_v44 = vadd.f32 %v8098_v54, %v4271_v32  ;;  %v1738_v50 = vpop.f32.mrb[63].mxu0  ;;  %v3262_v51 = vpop.f32.mrb[63].mxu1  ;;  %v7213_v46 = vld [vmem:[%s7593_s25 + $0x2d4] ss:$8 sps:$4 sm:$0xff]  }
 0x199   : > { %v8128_v53 = vmax.f32 %v8034_v24, %v5424_v35  ;;  %v5425_v55 = vmax.f32 %v4710_v21, %v5029_v43  ;;  %v7215_v13 = vld [vmem:[%s7597_s26 + $0x2d4] ss:$8 sps:$4 sm:$0xff]  }
 0x19a   : > { %v4124_v29 = vmax.f32 %v3977_v41, 0.0  ;;  %v4565_v59 = vmax.f32 %v4418_v44, 0.0  ;;  %1942 = vmatmul.mubr.bf16.gmra.mrb[168].mxu0 %v7199_v28  ;;  %3466 = vmatmul.mubr.bf16.gmra.mrb[168].mxu1 %v7200_v34 }
 0x19b   : > { %v8131_v56 = vmax.f32 %v8043_v36, %v5425_v55  ;;  %1949 = vmatprep.mubr.bf16.mxu0 %v7201_v52  ;;  %3473 = vmatprep.mubr.bf16.mxu1 %v7203_v42  ;;  %v7206_v36 = vld [vmem:[%s7597_s26 + $0x2b0] ss:$8 sps:$4 sm:$0xff]  }
 0x19c   : > { %v5030_v57 = vrot.slane %v4124_v29, 1  ;;  %v4712_v62 = vmax.f32 %v4124_v29, %v4565_v59 }
 0x19d   : > { %v1741_v23 = vpop.f32.mrb[64].mxu0  ;;  %v3265_v5 = vpop.f32.mrb[64].mxu1 }
 0x19e   : > { %v5031_v24 = vsel %vm4979_vm0, %v5028_v6, %v5030_v57  ;;  %v5427_v0 = vmax.f32 %v4712_v62, %v5030_v57  ;;  %v3825_v40 = vmul.f32 %v8105_v38, %v1741_v23  ;;  %v4272_v61 = vmul.f32 %v8105_v38, %v3265_v5  ;;  %v1743_v1 = vpop.f32.mrb[65].mxu0  ;;  %v3267_v2 = vpop.f32.mrb[65].mxu1 }
 0x19f   : > { %v5426_v4 = vmax.f32 %v4711_v25, %v5031_v24  ;;  %v1744_v7 = vpop.f32.mrb[66].mxu0  ;;  %v3268_v49 = vpop.f32.mrb[66].mxu1 }
 0x1a0   : > { %v8141_v63 = vmax.f32 %v8049_v45, %v5427_v0  ;;  %v3978_v17 = vadd.f32 %v8098_v54, %v3825_v40  ;;  %v4419_v10 = vadd.f32 %v8098_v54, %v4272_v61  ;;  %v3826_v12 = vmul.f32 %v8105_v38, %v1744_v7  ;;  %v1746_v31 = vpop.f32.mrb[67].mxu0  ;;  %v3270_v15 = vpop.f32.mrb[67].mxu1 }
 0x1a1   : > { %v8147_v16 = vmax.f32 %v8055_v60, %v5426_v4  ;;  %v4273_v18 = vmul.f32 %v8105_v38, %v3268_v49  ;;  %v7219_v15 = vld [vmem:[%s7593_s25 + $0x2e4] ss:$8 sps:$4 sm:$0xff]  }
 0x1a2   : > { %v4125_v58 = vmax.f32 %v3978_v17, 0.0  ;;  %v4566_v20 = vmax.f32 %v4419_v10, 0.0  ;;  %v3979_v48 = vadd.f32 %v8098_v54, %v3826_v12  ;;  %1950 = vmatmul.mubr.bf16.gmra.mrb[172].mxu0 %v7205_v3  ;;  %3474 = vmatmul.mubr.bf16.gmra.mrb[172].mxu1 %v7206_v36  ;;  %v7217_v3 = vld [vmem:[%s7593_s25 + $0x2d0] ss:$8 sps:$4 sm:$0xff]  }
 0x1a3   : > { %v4420_v45 = vadd.f32 %v8098_v54, %v4273_v18  ;;  %1956 = vmatprep.mubr.bf16.mxu0 %v7207_v8  ;;  %3480 = vmatprep.mubr.bf16.mxu1 %v7209_v11  ;;  %v7218_v11 = vld [vmem:[%s7597_s26 + $0x2d0] ss:$8 sps:$4 sm:$0xff]   ;;  %v7221_v18 = vld [vmem:[%s7597_s26 + $0x2e4] ss:$8 sps:$4 sm:$0xff]  }
 0x1a4   : > { %v4713_v21 = vmax.f32 %v4125_v58, %v4566_v20  ;;  %v4126_v22 = vmax.f32 %v3979_v48, 0.0  ;;  %v5032_v28 = vrot.slane %v4125_v58, 1 }
 0x1a5   : > { %v4567_v26 = vmax.f32 %v4420_v45, 0.0  ;;  %v1749_v60 = vpop.f32.mrb[68].mxu0  ;;  %v3273_v47 = vpop.f32.mrb[68].mxu1 }
 0x1a6   : > { %v5033_v30 = vrot.slane %v4126_v22, 1  ;;  %v3827_v6 = vmul.f32 %v8105_v38, %v1749_v60  ;;  %v4274_v9 = vmul.f32 %v8105_v38, %v3273_v47  ;;  %v1751_v32 = vpop.f32.mrb[69].mxu0  ;;  %v3275_v39 = vpop.f32.mrb[69].mxu1 }
 0x1a7   : > { %v4714_v34 = vmax.f32 %v4126_v22, %v4567_v26  ;;  %v1752_v35 = vpop.f32.mrb[70].mxu0  ;;  %v3276_v25 = vpop.f32.mrb[70].mxu1 }
 0x1a8   : > { %v5034_v52 = vsel %vm4979_vm0, %v5032_v28, %v5033_v30  ;;  %v3980_v42 = vadd.f32 %v8098_v54, %v3827_v6  ;;  %v4421_v43 = vadd.f32 %v8098_v54, %v4274_v9  ;;  %v3828_v41 = vmul.f32 %v8105_v38, %v1752_v35  ;;  %v1754_v44 = vpop.f32.mrb[71].mxu0  ;;  %v3278_v50 = vpop.f32.mrb[71].mxu1 }
 0x1a9   : > { %v8162_v51 = vmax.f32 %v4713_v21, %v5034_v52  ;;  %v4275_v55 = vmul.f32 %v8105_v38, %v3276_v25  ;;  %v7224_v44 = vld [vmem:[%s7597_s26 + $0x2e0] ss:$8 sps:$4 sm:$0xff]  }
 0x1aa   : > { %v4127_v29 = vmax.f32 %v3980_v42, 0.0  ;;  %v4568_v59 = vmax.f32 %v4421_v43, 0.0  ;;  %v3981_v57 = vadd.f32 %v8098_v54, %v3828_v41  ;;  %1957 = vmatmul.mubr.bf16.gmra.mrb[176].mxu0 %v7211_v27  ;;  %3481 = vmatmul.mubr.bf16.gmra.mrb[176].mxu1 %v7212_v33 }
 0x1ab   : > { %v5604_v62 = vmax.f32 %v8084_v37, %v8162_v51  ;;  %v4422_v23 = vadd.f32 %v8098_v54, %v4275_v55  ;;  %1964 = vmatprep.mubr.bf16.mxu0 %v7213_v46  ;;  %3488 = vmatprep.mubr.bf16.mxu1 %v7215_v13  ;;  %v7223_v46 = vld [vmem:[%s7593_s25 + $0x2e0] ss:$8 sps:$4 sm:$0xff]  }
 0x1ac   : > { %v5035_v5 = vrot.slane %v4127_v29, 1  ;;  %v4715_v24 = vmax.f32 %v4127_v29, %v4568_v59  ;;  %v4128_v0 = vmax.f32 %v3981_v57, 0.0  ;;  %v7225_v57 = vld [vmem:[%s7593_s25 + $0x2f4] ss:$8 sps:$4 sm:$0xff]  }
 0x1ad   : > { %v6671_v40 = vpack.c.bf16 %v5604_v62, %v5604_v62  ;;  %v4569_v61 = vmax.f32 %v4422_v23, 0.0  ;;  %v1757_v1 = vpop.f32.mrb[72].mxu0  ;;  %v3281_v2 = vpop.f32.mrb[72].mxu1  ;;  %v7227_v62 = vld [vmem:[%s7597_s26 + $0x2f4] ss:$8 sps:$4 sm:$0xff]  }
 0x1ae   : > { %v5036_v36 = vsel %vm4979_vm0, %v5033_v30, %v5035_v5  ;;  %v5037_v4 = vrot.slane %v4128_v0, 1  ;;  %v3829_v37 = vmul.f32 %v8105_v38, %v1757_v1  ;;  %v4276_v7 = vmul.f32 %v8105_v38, %v3281_v2  ;;  %v1759_v49 = vpop.f32.mrb[73].mxu0  ;;  %v3283_v8 = vpop.f32.mrb[73].mxu1 }
 0x1af   : > { %6541 = vst [vmem:[%s8022_s27 + $0x1c] sm:$0xf] %v6671_v40  ;;  %v8175_v17 = vmax.f32 %v4714_v34, %v5036_v36  ;;  %v4716_v10 = vmax.f32 %v4128_v0, %v4569_v61  ;;  %v1760_v12 = vpop.f32.mrb[74].mxu0  ;;  %v3284_v31 = vpop.f32.mrb[74].mxu1 }
 0x1b0   : > { %v5038_v58 = vsel %vm4979_vm0, %v5035_v5, %v5037_v4  ;;  %v3982_v20 = vadd.f32 %v8098_v54, %v3829_v37  ;;  %v4423_v48 = vadd.f32 %v8098_v54, %v4276_v7  ;;  %v3830_v45 = vmul.f32 %v8105_v38, %v1760_v12  ;;  %v1762_v21 = vpop.f32.mrb[75].mxu0  ;;  %v3286_v22 = vpop.f32.mrb[75].mxu1 }
 0x1b1   : > { %v5605_v26 = vmax.f32 %v8109_v14, %v8175_v17  ;;  %v8185_v60 = vmax.f32 %v4715_v24, %v5038_v58  ;;  %v4277_v47 = vmul.f32 %v8105_v38, %v3284_v31  ;;  %v7233_v21 = vld [vmem:[%s7597_s26 + $0x304] ss:$8 sps:$4 sm:$0xff]  }
 0x1b2   : > { %v4129_v27 = vmax.f32 %v3982_v20, 0.0  ;;  %v4570_v28 = vmax.f32 %v4423_v48, 0.0  ;;  %v3983_v30 = vadd.f32 %v8098_v54, %v3830_v45  ;;  %1965 = vmatmul.mubr.bf16.gmra.mrb[180].mxu0 %v7217_v3  ;;  %3489 = vmatmul.mubr.bf16.gmra.mrb[180].mxu1 %v7218_v11  ;;  %v7231_v45 = vld [vmem:[%s7593_s25 + $0x304] ss:$8 sps:$4 sm:$0xff]  }
 0x1b3   : > { %v5606_v6 = vmax.f32 %v8114_v19, %v8185_v60  ;;  %v4424_v9 = vadd.f32 %v8098_v54, %v4277_v47  ;;  %1972 = vmatprep.mubr.bf16.mxu0 %v7219_v15  ;;  %3496 = vmatprep.mubr.bf16.mxu1 %v7221_v18  ;;  %v7229_v15 = vld [vmem:[%s7593_s25 + $0x2f0] ss:$8 sps:$4 sm:$0xff]  }
 0x1b4   : > { %v5039_v14 = vrot.slane %v4129_v27, 1  ;;  %v4717_v32 = vmax.f32 %v4129_v27, %v4570_v28  ;;  %v4130_v39 = vmax.f32 %v3983_v30, 0.0  ;;  %v7230_v18 = vld [vmem:[%s7597_s26 + $0x2f0] ss:$8 sps:$4 sm:$0xff]  }
 0x1b5   : > { %v6752_v33 = vpack.c.bf16 %v5606_v6, %v5605_v26  ;;  %v4571_v34 = vmax.f32 %v4424_v9, 0.0  ;;  %v1765_v35 = vpop.f32.mrb[76].mxu0  ;;  %v3289_v25 = vpop.f32.mrb[76].mxu1 }
 0x1b6   : > { %v5040_v13 = vsel %vm4979_vm0, %v5037_v4, %v5039_v14  ;;  %v5041_v52 = vrot.slane %v4130_v39, 1  ;;  %v3831_v19 = vmul.f32 %v8105_v38, %v1765_v35  ;;  %v4278_v42 = vmul.f32 %v8105_v38, %v3289_v25  ;;  %v1767_v43 = vpop.f32.mrb[77].mxu0  ;;  %v3291_v41 = vpop.f32.mrb[77].mxu1 }
 0x1b7   : > { %6861 = vst [vmem:[%s8022_s27 + $0x20] sm:$0xff] %v6752_v33   ;;  %v8198_v50 = vmax.f32 %v4716_v10, %v5040_v13  ;;  %v4718_v55 = vmax.f32 %v4130_v39, %v4571_v34  ;;  %v1768_v29 = vpop.f32.mrb[78].mxu0  ;;  %v3292_v59 = vpop.f32.mrb[78].mxu1 }
 0x1b8   : > { %v5042_v23 = vsel %vm4979_vm0, %v5039_v14, %v5041_v52  ;;  %v3984_v5 = vadd.f32 %v8098_v54, %v3831_v19  ;;  %v4425_v24 = vadd.f32 %v8098_v54, %v4278_v42  ;;  %v1769_v0 = vpop.f32.mrb[79].mxu0  ;;  %v3293_v40 = vpop.f32.mrb[79].mxu1  ;;  %v7236_v29 = vld [vmem:[%s7597_s26 + $0x300] ss:$8 sps:$4 sm:$0xff]  }
 0x1b9   : > { %v5607_v61 = vmax.f32 %v8128_v53, %v8198_v50  ;;  %v8207_v1 = vmax.f32 %v4717_v32, %v5042_v23  ;;  %v7237_v23 = vld [vmem:[%s7593_s25 + $0x314] ss:$8 sps:$4 sm:$0xff]  }
 0x1ba   : > { %v4131_v2 = vmax.f32 %v3984_v5, 0.0  ;;  %v4572_v3 = vmax.f32 %v4425_v24, 0.0  ;;  %1973 = vmatmul.mubr.bf16.gmra.mrb[184].mxu0 %v7223_v46  ;;  %3497 = vmatmul.mubr.bf16.gmra.mrb[184].mxu1 %v7224_v44  ;;  %v7239_v5 = vld [vmem:[%s7597_s26 + $0x314] ss:$8 sps:$4 sm:$0xff]  }
 0x1bb   : > { %v5608_v36 = vmax.f32 %v8131_v56, %v8207_v1  ;;  %1980 = vmatprep.mubr.bf16.mxu0 %v7225_v57  ;;  %3504 = vmatprep.mubr.bf16.mxu1 %v7227_v62 }
 0x1bc   : > { %v5043_v4 = vrot.slane %v4131_v2, 1  ;;  %v4719_v37 = vmax.f32 %v4131_v2, %v4572_v3 }
 0x1bd   : > { %v6757_v7 = vpack.c.bf16 %v5608_v36, %v5607_v61  ;;  %v1772_v53 = vpop.f32.mrb[80].mxu0  ;;  %v3296_v49 = vpop.f32.mrb[80].mxu1 }
 0x1be   : > { %v5044_v8 = vsel %vm4979_vm0, %v5041_v52, %v5043_v4  ;;  %v8212_v11 = vmax.f32 %v4719_v37, %v5043_v4  ;;  %v3832_v10 = vmul.f32 %v8105_v38, %v1772_v53  ;;  %v4279_v12 = vmul.f32 %v8105_v38, %v3296_v49  ;;  %v1774_v31 = vpop.f32.mrb[81].mxu0  ;;  %v3298_v56 = vpop.f32.mrb[81].mxu1  ;;  %v7235_v52 = vld [vmem:[%s7593_s25 + $0x300] ss:$8 sps:$4 sm:$0xff]  }
 0x1bf   : > { %6862 = vst [vmem:[%s8022_s27 + $0x28] sm:$0xff] %v6757_v7   ;;  %v8219_v58 = vmax.f32 %v4718_v55, %v5044_v8  ;;  %v1775_v20 = vpop.f32.mrb[82].mxu0  ;;  %v3299_v48 = vpop.f32.mrb[82].mxu1 }
 0x1c0   : > { %v5610_v22 = vmax.f32 %v8141_v63, %v8212_v11  ;;  %v3985_v26 = vadd.f32 %v8098_v54, %v3832_v10  ;;  %v4426_v47 = vadd.f32 %v8098_v54, %v4279_v12  ;;  %v3833_v27 = vmul.f32 %v8105_v38, %v1775_v20  ;;  %v1777_v28 = vpop.f32.mrb[83].mxu0  ;;  %v3301_v30 = vpop.f32.mrb[83].mxu1  ;;  %v7241_v20 = vld [vmem:[%s7593_s25 + $0x310] ss:$8 sps:$4 sm:$0xff]  }
 0x1c1   : > { %v5609_v6 = vmax.f32 %v8147_v16, %v8219_v58  ;;  %v4280_v9 = vmul.f32 %v8105_v38, %v3299_v48 }
 0x1c2   : > { %v6677_v14 = vpack.c.bf16 %v5610_v22, %v5610_v22  ;;  %v4132_v32 = vmax.f32 %v3985_v26, 0.0  ;;  %v4573_v39 = vmax.f32 %v4426_v47, 0.0  ;;  %v3986_v63 = vadd.f32 %v8098_v54, %v3833_v27  ;;  %1981 = vmatmul.mubr.bf16.gmra.mrb[188].mxu0 %v7229_v15  ;;  %3505 = vmatmul.mubr.bf16.gmra.mrb[188].mxu1 %v7230_v18  ;;  %v7242_v47 = vld [vmem:[%s7597_s26 + $0x310] ss:$8 sps:$4 sm:$0xff]  }
 0x1c3   : > { %v6676_v33 = vpack.c.bf16 %v5609_v6, %v5609_v6  ;;  %v4427_v34 = vadd.f32 %v8098_v54, %v4280_v9  ;;  %1987 = vmatprep.mubr.bf16.mxu0 %v7231_v45  ;;  %3511 = vmatprep.mubr.bf16.mxu1 %v7233_v21  ;;  %v7243_v9 = vld [vmem:[%s7593_s25 + $0x324] ss:$8 sps:$4 sm:$0xff]  }
 0x1c4   : > { %6547 = vst [vmem:[%s8022_s27 + $0x34] sm:$0x1] %v6677_v14  ;;  %v4720_v35 = vmax.f32 %v4132_v32, %v4573_v39  ;;  %v4133_v25 = vmax.f32 %v3986_v63, 0.0  ;;  %v5045_v19 = vrot.slane %v4132_v32, 1  ;;  %v7245_v14 = vld [vmem:[%s7597_s26 + $0x324] ss:$8 sps:$4 sm:$0xff]  }
 0x1c5   : > { %6546 = vst [vmem:[%s8022_s27 + $0x30] sm:$0xf] %v6676_v33  ;;  %v4574_v16 = vmax.f32 %v4427_v34, 0.0  ;;  %v1780_v46 = vpop.f32.mrb[84].mxu0  ;;  %v3304_v13 = vpop.f32.mrb[84].mxu1 }
 0x1c6   : > { %v5046_v42 = vrot.slane %v4133_v25, 1  ;;  %v3834_v43 = vmul.f32 %v8105_v38, %v1780_v46  ;;  %v4281_v41 = vmul.f32 %v8105_v38, %v3304_v13  ;;  %v1782_v44 = vpop.f32.mrb[85].mxu0  ;;  %v3306_v55 = vpop.f32.mrb[85].mxu1 }
 0x1c7   : > { %v4721_v59 = vmax.f32 %v4133_v25, %v4574_v16  ;;  %v1783_v57 = vpop.f32.mrb[86].mxu0  ;;  %v3307_v62 = vpop.f32.mrb[86].mxu1 }
 0x1c8   : > { %v5047_v24 = vsel %vm4979_vm0, %v5045_v19, %v5046_v42  ;;  %v3987_v0 = vadd.f32 %v8098_v54, %v3834_v43  ;;  %v4428_v40 = vadd.f32 %v8098_v54, %v4281_v41  ;;  %v3835_v61 = vmul.f32 %v8105_v38, %v1783_v57  ;;  %v1785_v2 = vpop.f32.mrb[87].mxu0  ;;  %v3309_v3 = vpop.f32.mrb[87].mxu1  ;;  %v7247_v57 = vld [vmem:[%s7593_s25 + $0x320] ss:$8 sps:$4 sm:$0xff]  }
 0x1c9   : > { %v5435_v36 = vmax.f32 %v4720_v35, %v5047_v24  ;;  %v4282_v4 = vmul.f32 %v8105_v38, %v3307_v62 }
 0x1ca   : > { %v4134_v37 = vmax.f32 %v3987_v0, 0.0  ;;  %v4575_v7 = vmax.f32 %v4428_v40, 0.0  ;;  %v3988_v53 = vadd.f32 %v8098_v54, %v3835_v61  ;;  %1988 = vmatmul.mubr.bf16.gmra.mrb[192].mxu0 %v7235_v52  ;;  %3512 = vmatmul.mubr.bf16.gmra.mrb[192].mxu1 %v7236_v29  ;;  %v7248_v40 = vld [vmem:[%s7597_s26 + $0x320] ss:$8 sps:$4 sm:$0xff]  }
 0x1cb   : > { %v8248_v49 = vmax.f32 %v8162_v51, %v5435_v36  ;;  %v4429_v8 = vadd.f32 %v8098_v54, %v4282_v4  ;;  %1995 = vmatprep.mubr.bf16.mxu0 %v7237_v23  ;;  %3519 = vmatprep.mubr.bf16.mxu1 %v7239_v5  ;;  %v7249_v4 = vld [vmem:[%s7593_s25 + $0x334] ss:$8 sps:$4 sm:$0xff]  }
 0x1cc   : > { %v5048_v10 = vrot.slane %v4134_v37, 1  ;;  %v4722_v12 = vmax.f32 %v4134_v37, %v4575_v7  ;;  %v4135_v31 = vmax.f32 %v3988_v53, 0.0  ;;  %v7251_v37 = vld [vmem:[%s7597_s26 + $0x334] ss:$8 sps:$4 sm:$0xff]  }
 0x1cd   : > { %v4576_v56 = vmax.f32 %v4429_v8, 0.0  ;;  %v1788_v15 = vpop.f32.mrb[88].mxu0  ;;  %v3312_v18 = vpop.f32.mrb[88].mxu1 }
 0x1ce   : > { %v5049_v48 = vsel %vm4979_vm0, %v5046_v42, %v5048_v10  ;;  %v5050_v45 = vrot.slane %v4135_v31, 1  ;;  %v3836_v51 = vmul.f32 %v8105_v38, %v1788_v15  ;;  %v4283_v21 = vmul.f32 %v8105_v38, %v3312_v18  ;;  %v1790_v22 = vpop.f32.mrb[89].mxu0  ;;  %v3314_v26 = vpop.f32.mrb[89].mxu1 }
 0x1cf   : > { %v5436_v27 = vmax.f32 %v4721_v59, %v5049_v48  ;;  %v4723_v28 = vmax.f32 %v4135_v31, %v4576_v56  ;;  %v1791_v30 = vpop.f32.mrb[90].mxu0  ;;  %v3315_v6 = vpop.f32.mrb[90].mxu1 }
 0x1d0   : > { %v5051_v32 = vsel %vm4979_vm0, %v5048_v10, %v5050_v45  ;;  %v3989_v39 = vadd.f32 %v8098_v54, %v3836_v51  ;;  %v4430_v63 = vadd.f32 %v8098_v54, %v4283_v21  ;;  %v3837_v33 = vmul.f32 %v8105_v38, %v1791_v30  ;;  %v1793_v34 = vpop.f32.mrb[91].mxu0  ;;  %v3317_v35 = vpop.f32.mrb[91].mxu1  ;;  %v7253_v30 = vld [vmem:[%s7593_s25 + $0x330] ss:$8 sps:$4 sm:$0xff]  }
 0x1d1   : > { %v8263_v25 = vmax.f32 %v8175_v17, %v5436_v27  ;;  %v5437_v16 = vmax.f32 %v4722_v12, %v5051_v32  ;;  %v4284_v46 = vmul.f32 %v8105_v38, %v3315_v6  ;;  %v7255_v32 = vld [vmem:[%s7593_s25 + $0x344] ss:$8 sps:$4 sm:$0xff]  }
 0x1d2   : > { %v4136_v13 = vmax.f32 %v3989_v39, 0.0  ;;  %v4577_v52 = vmax.f32 %v4430_v63, 0.0  ;;  %v3990_v19 = vadd.f32 %v8098_v54, %v3837_v33  ;;  %1996 = vmatmul.mubr.bf16.gmra.mrb[196].mxu0 %v7241_v20  ;;  %3520 = vmatmul.mubr.bf16.gmra.mrb[196].mxu1 %v7242_v47  ;;  %v7257_v39 = vld [vmem:[%s7597_s26 + $0x344] ss:$8 sps:$4 sm:$0xff]  }
 0x1d3   : > { %v8268_v42 = vmax.f32 %v8185_v60, %v5437_v16  ;;  %v4431_v43 = vadd.f32 %v8098_v54, %v4284_v46  ;;  %2003 = vmatprep.mubr.bf16.mxu0 %v7243_v9  ;;  %3527 = vmatprep.mubr.bf16.mxu1 %v7245_v14 }
 0x1d4   : > { %v5052_v17 = vrot.slane %v4136_v13, 1  ;;  %v4724_v41 = vmax.f32 %v4136_v13, %v4577_v52  ;;  %v4137_v44 = vmax.f32 %v3990_v19, 0.0 }
 0x1d5   : > { %v4578_v55 = vmax.f32 %v4431_v43, 0.0  ;;  %v1796_v29 = vpop.f32.mrb[92].mxu0  ;;  %v3320_v59 = vpop.f32.mrb[92].mxu1 }
 0x1d6   : > { %v5053_v62 = vsel %vm4979_vm0, %v5050_v45, %v5052_v17  ;;  %v5054_v23 = vrot.slane %v4137_v44, 1  ;;  %v3838_v60 = vmul.f32 %v8105_v38, %v1796_v29  ;;  %v4285_v5 = vmul.f32 %v8105_v38, %v3320_v59  ;;  %v1798_v24 = vpop.f32.mrb[93].mxu0  ;;  %v3322_v0 = vpop.f32.mrb[93].mxu1  ;;  %v7259_v59 = vld [vmem:[%s7593_s25 + $0x340] ss:$8 sps:$4 sm:$0xff]  }
 0x1d7   : > { %v5438_v61 = vmax.f32 %v4723_v28, %v5053_v62  ;;  %v4725_v2 = vmax.f32 %v4137_v44, %v4578_v55  ;;  %v1799_v3 = vpop.f32.mrb[94].mxu0  ;;  %v3323_v36 = vpop.f32.mrb[94].mxu1  ;;  %v7260_v0 = vld [vmem:[%s7597_s26 + $0x340] ss:$8 sps:$4 sm:$0xff]  }
 0x1d8   : > { %v5055_v7 = vsel %vm4979_vm0, %v5052_v17, %v5054_v23  ;;  %v3991_v53 = vadd.f32 %v8098_v54, %v3838_v60  ;;  %v4432_v8 = vadd.f32 %v8098_v54, %v4285_v5  ;;  %v1800_v10 = vpop.f32.mrb[95].mxu0  ;;  %v3324_v12 = vpop.f32.mrb[95].mxu1  ;;  %v7261_v3 = vld [vmem:[%s7593_s25 + $0x354] ss:$8 sps:$4 sm:$0xff]  }
 0x1d9   : > { %v8282_v31 = vmax.f32 %v8198_v50, %v5438_v61  ;;  %v5439_v56 = vmax.f32 %v4724_v41, %v5055_v7  ;;  %v7263_v36 = vld [vmem:[%s7597_s26 + $0x354] ss:$8 sps:$4 sm:$0xff]  }
 0x1da   : > { %v4138_v15 = vmax.f32 %v3991_v53, 0.0  ;;  %v4579_v18 = vmax.f32 %v4432_v8, 0.0  ;;  %2004 = vmatmul.mubr.bf16.gmra.mrb[200].mxu0 %v7247_v57  ;;  %3528 = vmatmul.mubr.bf16.gmra.mrb[200].mxu1 %v7248_v40 }
 0x1db   : > { %v8285_v20 = vmax.f32 %v8207_v1, %v5439_v56  ;;  %2011 = vmatprep.mubr.bf16.mxu0 %v7249_v4  ;;  %3535 = vmatprep.mubr.bf16.mxu1 %v7251_v37  ;;  %v7254_v1 = vld [vmem:[%s7597_s26 + $0x330] ss:$8 sps:$4 sm:$0xff]  }
 0x1dc   : > { %v5056_v48 = vrot.slane %v4138_v15, 1  ;;  %v4726_v45 = vmax.f32 %v4138_v15, %v4579_v18 }
 0x1dd   : > { %v1803_v51 = vpop.f32.mrb[96].mxu0  ;;  %v3327_v21 = vpop.f32.mrb[96].mxu1 }
 0x1de   : > { %v5057_v50 = vsel %vm4979_vm0, %v5054_v23, %v5056_v48  ;;  %v5441_v22 = vmax.f32 %v4726_v45, %v5056_v48  ;;  %v3839_v26 = vmul.f32 %v8105_v38, %v1803_v51  ;;  %v4286_v47 = vmul.f32 %v8105_v38, %v3327_v21  ;;  %v1805_v27 = vpop.f32.mrb[97].mxu0  ;;  %v3329_v28 = vpop.f32.mrb[97].mxu1 }
 0x1df   : > { %v5440_v6 = vmax.f32 %v4725_v2, %v5057_v50  ;;  %v1806_v9 = vpop.f32.mrb[98].mxu0  ;;  %v3330_v14 = vpop.f32.mrb[98].mxu1  ;;  %v7265_v28 = vld [vmem:[%s7593_s25 + $0x350] ss:$8 sps:$4 sm:$0xff]  }
 0x1e0   : > { %v8295_v63 = vmax.f32 %v8212_v11, %v5441_v22  ;;  %v3992_v33 = vadd.f32 %v8098_v54, %v3839_v26  ;;  %v4433_v34 = vadd.f32 %v8098_v54, %v4286_v47  ;;  %v3840_v35 = vmul.f32 %v8105_v38, %v1806_v9  ;;  %v1808_v16 = vpop.f32.mrb[99].mxu0  ;;  %v3332_v46 = vpop.f32.mrb[99].mxu1 }
 0x1e1   : > { %v8301_v13 = vmax.f32 %v8219_v58, %v5440_v6  ;;  %v4287_v52 = vmul.f32 %v8105_v38, %v3330_v14  ;;  %v7267_v16 = vld [vmem:[%s7593_s25 + $0x364] ss:$8 sps:$4 sm:$0xff]  }
 0x1e2   : > { %v4139_v19 = vmax.f32 %v3992_v33, 0.0  ;;  %v4580_v43 = vmax.f32 %v4433_v34, 0.0  ;;  %v3993_v17 = vadd.f32 %v8098_v54, %v3840_v35  ;;  %2012 = vmatmul.mubr.bf16.gmra.mrb[204].mxu0 %v7253_v30  ;;  %3536 = vmatmul.mubr.bf16.gmra.mrb[204].mxu1 %v7254_v1  ;;  %v7269_v46 = vld [vmem:[%s7597_s26 + $0x364] ss:$8 sps:$4 sm:$0xff]  }
 0x1e3   : > { %v4434_v11 = vadd.f32 %v8098_v54, %v4287_v52  ;;  %2018 = vmatprep.mubr.bf16.mxu0 %v7255_v32  ;;  %3542 = vmatprep.mubr.bf16.mxu1 %v7257_v39  ;;  %v7266_v32 = vld [vmem:[%s7597_s26 + $0x350] ss:$8 sps:$4 sm:$0xff]  }
 0x1e4   : > { %v4727_v41 = vmax.f32 %v4139_v19, %v4580_v43  ;;  %v4140_v44 = vmax.f32 %v3993_v17, 0.0  ;;  %v5058_v57 = vrot.slane %v4139_v19, 1 }
 0x1e5   : > { %v4581_v55 = vmax.f32 %v4434_v11, 0.0  ;;  %v1811_v58 = vpop.f32.mrb[100].mxu0  ;;  %v3335_v29 = vpop.f32.mrb[100].mxu1 }
 0x1e6   : > { %v5059_v62 = vrot.slane %v4140_v44, 1  ;;  %v3841_v23 = vmul.f32 %v8105_v38, %v1811_v58  ;;  %v4288_v60 = vmul.f32 %v8105_v38, %v3335_v29  ;;  %v1813_v5 = vpop.f32.mrb[101].mxu0  ;;  %v3337_v24 = vpop.f32.mrb[101].mxu1 }
 0x1e7   : > { %v4728_v40 = vmax.f32 %v4140_v44, %v4581_v55  ;;  %v1814_v61 = vpop.f32.mrb[102].mxu0  ;;  %v3338_v2 = vpop.f32.mrb[102].mxu1 }
 0x1e8   : > { %v5060_v4 = vsel %vm4979_vm0, %v5058_v57, %v5059_v62  ;;  %v3994_v37 = vadd.f32 %v8098_v54, %v3841_v23  ;;  %v4435_v7 = vadd.f32 %v8098_v54, %v4288_v60  ;;  %v3842_v53 = vmul.f32 %v8105_v38, %v1814_v61  ;;  %v1816_v8 = vpop.f32.mrb[103].mxu0  ;;  %v3340_v10 = vpop.f32.mrb[103].mxu1 }
 0x1e9   : > { %v8316_v12 = vmax.f32 %v4727_v41, %v5060_v4  ;;  %v4289_v56 = vmul.f32 %v8105_v38, %v3338_v2  ;;  %v7271_v2 = vld [vmem:[%s7593_s25 + $0x360] ss:$8 sps:$4 sm:$0xff]  }
 0x1ea   : > { %v4141_v15 = vmax.f32 %v3994_v37, 0.0  ;;  %v4582_v18 = vmax.f32 %v4435_v7, 0.0  ;;  %v3995_v48 = vadd.f32 %v8098_v54, %v3842_v53  ;;  %2019 = vmatmul.mubr.bf16.gmra.mrb[208].mxu0 %v7259_v59  ;;  %3543 = vmatmul.mubr.bf16.gmra.mrb[208].mxu1 %v7260_v0  ;;  %v7272_v53 = vld [vmem:[%s7597_s26 + $0x360] ss:$8 sps:$4 sm:$0xff]  }
 0x1eb   : > { %v5655_v45 = vmax.f32 %v8248_v49, %v8316_v12  ;;  %v4436_v51 = vadd.f32 %v8098_v54, %v4289_v56  ;;  %2026 = vmatprep.mubr.bf16.mxu0 %v7261_v3  ;;  %3550 = vmatprep.mubr.bf16.mxu1 %v7263_v36 }
 0x1ec   : > { %v5061_v21 = vrot.slane %v4141_v15, 1  ;;  %v4729_v50 = vmax.f32 %v4141_v15, %v4582_v18  ;;  %v4142_v22 = vmax.f32 %v3995_v48, 0.0  ;;  %v7273_v18 = vld [vmem:[%s7593_s25 + $0x374] ss:$8 sps:$4 sm:$0xff]  }
 0x1ed   : > { %v4583_v26 = vmax.f32 %v4436_v51, 0.0  ;;  %v1819_v47 = vpop.f32.mrb[104].mxu0  ;;  %v3343_v27 = vpop.f32.mrb[104].mxu1  ;;  %v7275_v48 = vld [vmem:[%s7597_s26 + $0x374] ss:$8 sps:$4 sm:$0xff]  }
 0x1ee   : > { %v5062_v30 = vsel %vm4979_vm0, %v5059_v62, %v5061_v21  ;;  %v5063_v1 = vrot.slane %v4142_v22, 1  ;;  %v3843_v6 = vmul.f32 %v8105_v38, %v1819_v47  ;;  %v4290_v49 = vmul.f32 %v8105_v38, %v3343_v27  ;;  %v1821_v9 = vpop.f32.mrb[105].mxu0  ;;  %v3345_v14 = vpop.f32.mrb[105].mxu1 }
 0x1ef   : > { %v8328_v39 = vmax.f32 %v4728_v40, %v5062_v30  ;;  %v4730_v33 = vmax.f32 %v4142_v22, %v4583_v26  ;;  %v1822_v34 = vpop.f32.mrb[106].mxu0  ;;  %v3346_v35 = vpop.f32.mrb[106].mxu1 }
 0x1f0   : > { %v5064_v52 = vsel %vm4979_vm0, %v5061_v21, %v5063_v1  ;;  %v3996_v19 = vadd.f32 %v8098_v54, %v3843_v6  ;;  %v4437_v43 = vadd.f32 %v8098_v54, %v4290_v49  ;;  %v3844_v17 = vmul.f32 %v8105_v38, %v1822_v34  ;;  %v1824_v11 = vpop.f32.mrb[107].mxu0  ;;  %v3348_v41 = vpop.f32.mrb[107].mxu1 }
 0x1f1   : > { %v5656_v44 = vmax.f32 %v8263_v25, %v8328_v39  ;;  %v8338_v55 = vmax.f32 %v4729_v50, %v5064_v52  ;;  %v4291_v58 = vmul.f32 %v8105_v38, %v3346_v35  ;;  %v7281_v11 = vld [vmem:[%s7597_s26 + $0x384] ss:$8 sps:$4 sm:$0xff]  }
 0x1f2   : > { %v4143_v29 = vmax.f32 %v3996_v19, 0.0  ;;  %v4584_v59 = vmax.f32 %v4437_v43, 0.0  ;;  %v3997_v57 = vadd.f32 %v8098_v54, %v3844_v17  ;;  %2027 = vmatmul.mubr.bf16.gmra.mrb[212].mxu0 %v7265_v28  ;;  %3551 = vmatmul.mubr.bf16.gmra.mrb[212].mxu1 %v7266_v32  ;;  %v7279_v17 = vld [vmem:[%s7593_s25 + $0x384] ss:$8 sps:$4 sm:$0xff]  }
 0x1f3   : > { %v6762_v62 = vpack.c.bf16 %v5656_v44, %v5655_v45  ;;  %v5657_v23 = vmax.f32 %v8268_v42, %v8338_v55  ;;  %v4438_v60 = vadd.f32 %v8098_v54, %v4291_v58  ;;  %2034 = vmatprep.mubr.bf16.mxu0 %v7267_v16  ;;  %3558 = vmatprep.mubr.bf16.mxu1 %v7269_v46  ;;  %v7278_v46 = vld [vmem:[%s7597_s26 + $0x370] ss:$8 sps:$4 sm:$0xff]  }
 0x1f4   : > { %v5065_v25 = vrot.slane %v4143_v29, 1  ;;  %v4731_v5 = vmax.f32 %v4143_v29, %v4584_v59  ;;  %v4144_v24 = vmax.f32 %v3997_v57, 0.0 }
 0x1f5   : > { %6863 = vst [vmem:[%s8022_s27 + $0x38] sm:$0xff] %v6762_v62   ;;  %v4585_v0 = vmax.f32 %v4438_v60, 0.0  ;;  %v1827_v40 = vpop.f32.mrb[108].mxu0  ;;  %v3351_v61 = vpop.f32.mrb[108].mxu1 }
 0x1f6   : > { %v5066_v3 = vsel %vm4979_vm0, %v5063_v1, %v5065_v25  ;;  %v5067_v36 = vrot.slane %v4144_v24, 1  ;;  %v3845_v42 = vmul.f32 %v8105_v38, %v1827_v40  ;;  %v4292_v4 = vmul.f32 %v8105_v38, %v3351_v61  ;;  %v1829_v37 = vpop.f32.mrb[109].mxu0  ;;  %v3353_v7 = vpop.f32.mrb[109].mxu1 }
 0x1f7   : > { %v8351_v8 = vmax.f32 %v4730_v33, %v5066_v3  ;;  %v4732_v10 = vmax.f32 %v4144_v24, %v4585_v0  ;;  %v1830_v56 = vpop.f32.mrb[110].mxu0  ;;  %v3354_v15 = vpop.f32.mrb[110].mxu1  ;;  %v7283_v3 = vld [vmem:[%s7593_s25 + $0x380] ss:$8 sps:$4 sm:$0xff]  }
 0x1f8   : > { %v5068_v45 = vsel %vm4979_vm0, %v5065_v25, %v5067_v36  ;;  %v3998_v51 = vadd.f32 %v8098_v54, %v3845_v42  ;;  %v4439_v21 = vadd.f32 %v8098_v54, %v4292_v4  ;;  %v1831_v50 = vpop.f32.mrb[111].mxu0  ;;  %v3355_v22 = vpop.f32.mrb[111].mxu1  ;;  %v8397_v4 = vld [vmem:[%s9378_s3] ss:$0 sm:$0xff] }
 0x1f9   : > { %v5658_v26 = vmax.f32 %v8282_v31, %v8351_v8  ;;  %v8360_v47 = vmax.f32 %v4731_v5, %v5068_v45  ;;  %v7284_v56 = vld [vmem:[%s7597_s26 + $0x380] ss:$8 sps:$4 sm:$0xff]   ;;  %v7285_v45 = vld [vmem:[%s7593_s25 + $0x394] ss:$8 sps:$4 sm:$0xff]  }
 0x1fa   : > { %v4145_v27 = vmax.f32 %v3998_v51, 0.0  ;;  %v4586_v28 = vmax.f32 %v4439_v21, 0.0  ;;  %2035 = vmatmul.mubr.bf16.gmra.mrb[216].mxu0 %v7271_v2  ;;  %3559 = vmatmul.mubr.bf16.gmra.mrb[216].mxu1 %v7272_v53  ;;  %v7287_v51 = vld [vmem:[%s7597_s26 + $0x394] ss:$8 sps:$4 sm:$0xff]  }
 0x1fb   : > { %v6767_v30 = vpack.c.bf16 %v5658_v26, %v5657_v23  ;;  %v5659_v1 = vmax.f32 %v8285_v20, %v8360_v47  ;;  %2042 = vmatprep.mubr.bf16.mxu0 %v7273_v18  ;;  %3566 = vmatprep.mubr.bf16.mxu1 %v7275_v48  ;;  %v7277_v20 = vld [vmem:[%s7593_s25 + $0x370] ss:$8 sps:$4 sm:$0xff]  }
 0x1fc   : > { %v5069_v6 = vrot.slane %v4145_v27, 1  ;;  %v4733_v49 = vmax.f32 %v4145_v27, %v4586_v28 }
 0x1fd   : > { %6864 = vst [vmem:[%s8022_s27 + $0x40] sm:$0xff] %v6767_v30   ;;  %v1834_v31 = vpop.f32.mrb[112].mxu0  ;;  %v3358_v9 = vpop.f32.mrb[112].mxu1 }
 0x1fe   : > { %v5070_v14 = vsel %vm4979_vm0, %v5067_v36, %v5069_v6  ;;  %v8366_v32 = vmax.f32 %v4733_v49, %v5069_v6  ;;  %v3846_v33 = vmul.f32 %v8105_v38, %v1834_v31  ;;  %v4293_v34 = vmul.f32 %v8105_v38, %v3358_v9  ;;  %v1836_v35 = vpop.f32.mrb[113].mxu0  ;;  %v3360_v16 = vpop.f32.mrb[113].mxu1 }
 0x1ff   : > { %v8372_v52 = vmax.f32 %v4732_v10, %v5070_v14  ;;  %v1837_v19 = vpop.f32.mrb[114].mxu0  ;;  %v3361_v43 = vpop.f32.mrb[114].mxu1 }
 0x200   : > { %v5661_v41 = vmax.f32 %v8295_v63, %v8366_v32  ;;  %v3999_v44 = vadd.f32 %v8098_v54, %v3846_v33  ;;  %v4440_v58 = vadd.f32 %v8098_v54, %v4293_v34  ;;  %v3847_v29 = vmul.f32 %v8105_v38, %v1837_v19  ;;  %v1839_v59 = vpop.f32.mrb[115].mxu0  ;;  %v3363_v57 = vpop.f32.mrb[115].mxu1  ;;  %v8387_v63 = vld [vmem:[%s9379_s4] ss:$0 sm:$0xff]  ;;  %v7289_v19 = vld [vmem:[%s7593_s25 + $0x390] ss:$8 sps:$4 sm:$0xff]  }
 0x201   : > { %v5660_v62 = vmax.f32 %v8301_v13, %v8372_v52  ;;  %v4294_v23 = vmul.f32 %v8105_v38, %v3361_v43 }
 0x202   : > { %v6684_v60 = vpack.c.bf16 %v5661_v41, %v5661_v41  ;;  %v4146_v25 = vmax.f32 %v3999_v44, 0.0  ;;  %v4587_v5 = vmax.f32 %v4440_v58, 0.0  ;;  %v4000_v54 = vadd.f32 %v8387_v63, %v3847_v29  ;;  %2043 = vmatmul.mubr.bf16.gmra.mrb[220].mxu0 %v7277_v20  ;;  %3567 = vmatmul.mubr.bf16.gmra.mrb[220].mxu1 %v7278_v46  ;;  %v7290_v58 = vld [vmem:[%s7597_s26 + $0x390] ss:$8 sps:$4 sm:$0xff]  }
 0x203   : > { %v6772_v24 = vpack.c.bf16 %v5660_v62, %v5659_v1  ;;  %v4441_v0 = vadd.f32 %v8387_v63, %v4294_v23  ;;  %2049 = vmatprep.mubr.bf16.mxu0 %v7279_v17  ;;  %3573 = vmatprep.mubr.bf16.mxu1 %v7281_v11  ;;  %v7291_v23 = vld [vmem:[%s7593_s25 + $0x3a4] ss:$8 sps:$4 sm:$0xff]  }
 0x204   : > { %6561 = vst [vmem:[%s8022_s27 + $0x50] sm:$0x1] %v6684_v60  ;;  %v4734_v38 = vmax.f32 %v4146_v25, %v4587_v5  ;;  %v4147_v13 = vmax.f32 %v4000_v54, 0.0  ;;  %v5071_v36 = vrot.slane %v4146_v25, 1  ;;  %v7293_v60 = vld [vmem:[%s7597_s26 + $0x3a4] ss:$8 sps:$4 sm:$0xff]  }
 0x205   : > { %6865 = vst [vmem:[%s8022_s27 + $0x48] sm:$0xff] %v6772_v24   ;;  %v4588_v40 = vmax.f32 %v4441_v0, 0.0  ;;  %v1842_v61 = vpop.f32.mrb[116].mxu0  ;;  %v3366_v2 = vpop.f32.mrb[116].mxu1 }
 0x206   : > { %v5072_v42 = vrot.slane %v4147_v13, 1  ;;  %v3848_v37 = vmul.f32 %v8397_v4, %v1842_v61  ;;  %v4295_v7 = vmul.f32 %v8397_v4, %v3366_v2  ;;  %v1844_v53 = vpop.f32.mrb[117].mxu0  ;;  %v3368_v10 = vpop.f32.mrb[117].mxu1 }
 0x207   : > { %v4735_v15 = vmax.f32 %v4147_v13, %v4588_v40  ;;  %v1845_v18 = vpop.f32.mrb[118].mxu0  ;;  %v3369_v48 = vpop.f32.mrb[118].mxu1 }
 0x208   : > { %v5073_v21 = vsel %vm4979_vm0, %v5071_v36, %v5072_v42  ;;  %v4001_v50 = vadd.f32 %v8387_v63, %v3848_v37  ;;  %v4442_v22 = vadd.f32 %v8387_v63, %v4295_v7  ;;  %v3849_v26 = vmul.f32 %v8397_v4, %v1845_v18  ;;  %v1847_v27 = vpop.f32.mrb[119].mxu0  ;;  %v3371_v28 = vpop.f32.mrb[119].mxu1  ;;  %v7295_v18 = vld [vmem:[%s7593_s25 + $0x3a0] ss:$8 sps:$4 sm:$0xff]  }
 0x209   : > { %v5449_v30 = vmax.f32 %v4734_v38, %v5073_v21  ;;  %v4296_v1 = vmul.f32 %v8397_v4, %v3369_v48 }
 0x20a   : > { %v4148_v6 = vmax.f32 %v4001_v50, 0.0  ;;  %v4589_v49 = vmax.f32 %v4442_v22, 0.0  ;;  %v4002_v31 = vadd.f32 %v8387_v63, %v3849_v26  ;;  %2050 = vmatmul.mubr.bf16.gmra.mrb[224].mxu0 %v7283_v3  ;;  %3574 = vmatmul.mubr.bf16.gmra.mrb[224].mxu1 %v7284_v56  ;;  %v7296_v22 = vld [vmem:[%s7597_s26 + $0x3a0] ss:$8 sps:$4 sm:$0xff]  }
 0x20b   : > { %v8411_v9 = vmax.f32 %v8316_v12, %v5449_v30  ;;  %v4443_v14 = vadd.f32 %v8387_v63, %v4296_v1  ;;  %2057 = vmatprep.mubr.bf16.mxu0 %v7285_v45  ;;  %3581 = vmatprep.mubr.bf16.mxu1 %v7287_v51  ;;  %v7297_v1 = vld [vmem:[%s7593_s25 + $0x3b4] ss:$8 sps:$4 sm:$0xff]  }
 0x20c   : > { %v5074_v33 = vrot.slane %v4148_v6, 1  ;;  %v4736_v34 = vmax.f32 %v4148_v6, %v4589_v49  ;;  %v4149_v35 = vmax.f32 %v4002_v31, 0.0  ;;  %v7299_v6 = vld [vmem:[%s7597_s26 + $0x3b4] ss:$8 sps:$4 sm:$0xff]  }
 0x20d   : > { %v4590_v16 = vmax.f32 %v4443_v14, 0.0  ;;  %v1850_v20 = vpop.f32.mrb[120].mxu0  ;;  %v3374_v46 = vpop.f32.mrb[120].mxu1 }
 0x20e   : > { %v5075_v43 = vsel %vm4979_vm0, %v5072_v42, %v5074_v33  ;;  %v5076_v17 = vrot.slane %v4149_v35, 1  ;;  %v3850_v12 = vmul.f32 %v8397_v4, %v1850_v20  ;;  %v4297_v11 = vmul.f32 %v8397_v4, %v3374_v46  ;;  %v1852_v41 = vpop.f32.mrb[121].mxu0  ;;  %v3376_v44 = vpop.f32.mrb[121].mxu1 }
 0x20f   : > { %v5450_v29 = vmax.f32 %v4735_v15, %v5075_v43  ;;  %v4737_v59 = vmax.f32 %v4149_v35, %v4590_v16  ;;  %v1853_v57 = vpop.f32.mrb[122].mxu0  ;;  %v3377_v62 = vpop.f32.mrb[122].mxu1 }
 0x210   : > { %v5077_v25 = vsel %vm4979_vm0, %v5074_v33, %v5076_v17  ;;  %v4003_v5 = vadd.f32 %v8387_v63, %v3850_v12  ;;  %v4444_v54 = vadd.f32 %v8387_v63, %v4297_v11  ;;  %v3851_v24 = vmul.f32 %v8397_v4, %v1853_v57  ;;  %v1855_v0 = vpop.f32.mrb[123].mxu0  ;;  %v3379_v38 = vpop.f32.mrb[123].mxu1  ;;  %v7301_v57 = vld [vmem:[%s7593_s25 + $0x3b0] ss:$8 sps:$4 sm:$0xff]  }
 0x211   : > { %v8426_v13 = vmax.f32 %v8328_v39, %v5450_v29  ;;  %v5451_v40 = vmax.f32 %v4736_v34, %v5077_v25  ;;  %v4298_v61 = vmul.f32 %v8397_v4, %v3377_v62  ;;  %v7303_v25 = vld [vmem:[%s7593_s25 + $0x3c4] ss:$8 sps:$4 sm:$0xff]  }
 0x212   : > { %v4150_v2 = vmax.f32 %v4003_v5, 0.0  ;;  %v4591_v3 = vmax.f32 %v4444_v54, 0.0  ;;  %v4004_v36 = vadd.f32 %v8387_v63, %v3851_v24  ;;  %2058 = vmatmul.mubr.bf16.gmra.mrb[228].mxu0 %v7289_v19  ;;  %3582 = vmatmul.mubr.bf16.gmra.mrb[228].mxu1 %v7290_v58  ;;  %v7305_v5 = vld [vmem:[%s7597_s26 + $0x3c4] ss:$8 sps:$4 sm:$0xff]  }
 0x213   : > { %v8431_v42 = vmax.f32 %v8338_v55, %v5451_v40  ;;  %v4445_v37 = vadd.f32 %v8387_v63, %v4298_v61  ;;  %2065 = vmatprep.mubr.bf16.mxu0 %v7291_v23  ;;  %3589 = vmatprep.mubr.bf16.mxu1 %v7293_v60 }
 0x214   : > { %v5078_v39 = vrot.slane %v4150_v2, 1  ;;  %v4738_v7 = vmax.f32 %v4150_v2, %v4591_v3  ;;  %v4151_v53 = vmax.f32 %v4004_v36, 0.0 }
 0x215   : > { %v4592_v10 = vmax.f32 %v4445_v37, 0.0  ;;  %v1858_v56 = vpop.f32.mrb[124].mxu0  ;;  %v3382_v15 = vpop.f32.mrb[124].mxu1 }
 0x216   : > { %v5079_v48 = vsel %vm4979_vm0, %v5076_v17, %v5078_v39  ;;  %v5080_v45 = vrot.slane %v4151_v53, 1  ;;  %v3852_v55 = vmul.f32 %v8397_v4, %v1858_v56  ;;  %v4299_v51 = vmul.f32 %v8397_v4, %v3382_v15  ;;  %v1860_v21 = vpop.f32.mrb[125].mxu0  ;;  %v3384_v50 = vpop.f32.mrb[125].mxu1  ;;  %v7307_v15 = vld [vmem:[%s7593_s25 + $0x3c0] ss:$8 sps:$4 sm:$0xff]  }
 0x217   : > { %v5452_v26 = vmax.f32 %v4737_v59, %v5079_v48  ;;  %v4739_v27 = vmax.f32 %v4151_v53, %v4592_v10  ;;  %v1861_v28 = vpop.f32.mrb[126].mxu0  ;;  %v3385_v30 = vpop.f32.mrb[126].mxu1  ;;  %v7308_v50 = vld [vmem:[%s7597_s26 + $0x3c0] ss:$8 sps:$4 sm:$0xff]  }
 0x218   : > { %v5081_v49 = vsel %vm4979_vm0, %v5078_v39, %v5080_v45  ;;  %v4005_v31 = vadd.f32 %v8387_v63, %v3852_v55  ;;  %v4446_v14 = vadd.f32 %v8387_v63, %v4299_v51  ;;  %v1862_v33 = vpop.f32.mrb[127].mxu0  ;;  %v3386_v34 = vpop.f32.mrb[127].mxu1  ;;  %v7309_v28 = vld [vmem:[%s7593_s25 + $0x3d4] ss:$8 sps:$4 sm:$0xff]  }
 0x219   : > { %v8445_v35 = vmax.f32 %v8351_v8, %v5452_v26  ;;  %v5453_v16 = vmax.f32 %v4738_v7, %v5081_v49  ;;  %v7311_v30 = vld [vmem:[%s7597_s26 + $0x3d4] ss:$8 sps:$4 sm:$0xff]  }
 0x21a   : > { %v4152_v20 = vmax.f32 %v4005_v31, 0.0  ;;  %v4593_v46 = vmax.f32 %v4446_v14, 0.0  ;;  %2066 = vmatmul.mubr.bf16.gmra.mrb[232].mxu0 %v7295_v18  ;;  %3590 = vmatmul.mubr.bf16.gmra.mrb[232].mxu1 %v7296_v22 }
 0x21b   : > { %v8448_v19 = vmax.f32 %v8360_v47, %v5453_v16  ;;  %2073 = vmatprep.mubr.bf16.mxu0 %v7297_v1  ;;  %3597 = vmatprep.mubr.bf16.mxu1 %v7299_v6  ;;  %v7302_v47 = vld [vmem:[%s7597_s26 + $0x3b0] ss:$8 sps:$4 sm:$0xff]  }
 0x21c   : > { %v5082_v43 = vrot.slane %v4152_v20, 1  ;;  %v4740_v17 = vmax.f32 %v4152_v20, %v4593_v46 }
 0x21d   : > { %v1865_v12 = vpop.f32.mrb[128].mxu0  ;;  %v3389_v11 = vpop.f32.mrb[128].mxu1 }
 0x21e   : > { %v5083_v8 = vsel %vm4979_vm0, %v5080_v45, %v5082_v43  ;;  %v5455_v41 = vmax.f32 %v4740_v17, %v5082_v43  ;;  %v3853_v44 = vmul.f32 %v8397_v4, %v1865_v12  ;;  %v4300_v58 = vmul.f32 %v8397_v4, %v3389_v11  ;;  %v1867_v29 = vpop.f32.mrb[129].mxu0  ;;  %v3391_v59 = vpop.f32.mrb[129].mxu1 }
 0x21f   : > { %v5454_v62 = vmax.f32 %v4739_v27, %v5083_v8  ;;  %v1868_v23 = vpop.f32.mrb[130].mxu0  ;;  %v3392_v60 = vpop.f32.mrb[130].mxu1 }
 0x220   : > { %v8458_v54 = vmax.f32 %v8366_v32, %v5455_v41  ;;  %v4006_v24 = vadd.f32 %v8387_v63, %v3853_v44  ;;  %v4447_v0 = vadd.f32 %v8387_v63, %v4300_v58  ;;  %v3854_v38 = vmul.f32 %v8397_v4, %v1868_v23  ;;  %v1870_v40 = vpop.f32.mrb[131].mxu0  ;;  %v3394_v61 = vpop.f32.mrb[131].mxu1 }
 0x221   : > { %v8464_v2 = vmax.f32 %v8372_v52, %v5454_v62  ;;  %v4301_v3 = vmul.f32 %v8397_v4, %v3392_v60  ;;  %v7315_v61 = vld [vmem:[%s7593_s25 + $0x3e4] ss:$8 sps:$4 sm:$0xff]  }
 0x222   : > { %v4153_v36 = vmax.f32 %v4006_v24, 0.0  ;;  %v4594_v37 = vmax.f32 %v4447_v0, 0.0  ;;  %v4007_v39 = vadd.f32 %v8387_v63, %v3854_v38  ;;  %2074 = vmatmul.mubr.bf16.gmra.mrb[236].mxu0 %v7301_v57  ;;  %3598 = vmatmul.mubr.bf16.gmra.mrb[236].mxu1 %v7302_v47  ;;  %v7313_v57 = vld [vmem:[%s7593_s25 + $0x3d0] ss:$8 sps:$4 sm:$0xff]  }
 0x223   : > { %v4448_v32 = vadd.f32 %v8387_v63, %v4301_v3  ;;  %2080 = vmatprep.mubr.bf16.mxu0 %v7303_v25  ;;  %3604 = vmatprep.mubr.bf16.mxu1 %v7305_v5  ;;  %v7314_v5 = vld [vmem:[%s7597_s26 + $0x3d0] ss:$8 sps:$4 sm:$0xff]   ;;  %v7317_v3 = vld [vmem:[%s7597_s26 + $0x3e4] ss:$8 sps:$4 sm:$0xff]  }
 0x224   : > { %v4741_v7 = vmax.f32 %v4153_v36, %v4594_v37  ;;  %v4154_v53 = vmax.f32 %v4007_v39, 0.0  ;;  %v5084_v18 = vrot.slane %v4153_v36, 1 }
 0x225   : > { %v4595_v10 = vmax.f32 %v4448_v32, 0.0  ;;  %v1873_v52 = vpop.f32.mrb[132].mxu0  ;;  %v3397_v56 = vpop.f32.mrb[132].mxu1 }
 0x226   : > { %v5085_v48 = vrot.slane %v4154_v53, 1  ;;  %v3855_v45 = vmul.f32 %v8397_v4, %v1873_v52  ;;  %v4302_v55 = vmul.f32 %v8397_v4, %v3397_v56  ;;  %v1875_v51 = vpop.f32.mrb[133].mxu0  ;;  %v3399_v21 = vpop.f32.mrb[133].mxu1 }
 0x227   : > { %v4742_v22 = vmax.f32 %v4154_v53, %v4595_v10  ;;  %v1876_v26 = vpop.f32.mrb[134].mxu0  ;;  %v3400_v27 = vpop.f32.mrb[134].mxu1 }
 0x228   : > { %v5086_v1 = vsel %vm4979_vm0, %v5084_v18, %v5085_v48  ;;  %v4008_v6 = vadd.f32 %v8387_v63, %v3855_v45  ;;  %v4449_v49 = vadd.f32 %v8387_v63, %v4302_v55  ;;  %v3856_v31 = vmul.f32 %v8397_v4, %v1876_v26  ;;  %v1878_v14 = vpop.f32.mrb[135].mxu0  ;;  %v3402_v33 = vpop.f32.mrb[135].mxu1 }
 0x229   : > { %v8479_v34 = vmax.f32 %v4741_v7, %v5086_v1  ;;  %v4303_v16 = vmul.f32 %v8397_v4, %v3400_v27  ;;  %v7320_v14 = vld [vmem:[%s7597_s26 + $0x3e0] ss:$8 sps:$4 sm:$0xff]  }
 0x22a   : > { %v4155_v20 = vmax.f32 %v4008_v6, 0.0  ;;  %v4596_v46 = vmax.f32 %v4449_v49, 0.0  ;;  %v4009_v43 = vadd.f32 %v8387_v63, %v3856_v31  ;;  %2081 = vmatmul.mubr.bf16.gmra.mrb[240].mxu0 %v7307_v15  ;;  %3605 = vmatmul.mubr.bf16.gmra.mrb[240].mxu1 %v7308_v50 }
 0x22b   : > { %v5706_v17 = vmax.f32 %v8411_v9, %v8479_v34  ;;  %v4450_v12 = vadd.f32 %v8387_v63, %v4303_v16  ;;  %2088 = vmatprep.mubr.bf16.mxu0 %v7309_v28  ;;  %3612 = vmatprep.mubr.bf16.mxu1 %v7311_v30  ;;  %v7319_v28 = vld [vmem:[%s7593_s25 + $0x3e0] ss:$8 sps:$4 sm:$0xff]  }
 0x22c   : > { %v5087_v11 = vrot.slane %v4155_v20, 1  ;;  %v4743_v8 = vmax.f32 %v4155_v20, %v4596_v46  ;;  %v4156_v41 = vmax.f32 %v4009_v43, 0.0  ;;  %v7321_v43 = vld [vmem:[%s7593_s25 + $0x3f4] ss:$8 sps:$4 sm:$0xff]  }
 0x22d   : > { %v6685_v44 = vpack.c.bf16 %v5706_v17, %v5706_v17  ;;  %v4597_v58 = vmax.f32 %v4450_v12, 0.0  ;;  %v1881_v29 = vpop.f32.mrb[136].mxu0  ;;  %v3405_v59 = vpop.f32.mrb[136].mxu1  ;;  %v7323_v17 = vld [vmem:[%s7597_s26 + $0x3f4] ss:$8 sps:$4 sm:$0xff]  }
 0x22e   : > { %v5088_v47 = vsel %vm4979_vm0, %v5085_v48, %v5087_v11  ;;  %v5089_v62 = vrot.slane %v4156_v41, 1  ;;  %v3857_v9 = vmul.f32 %v8397_v4, %v1881_v29  ;;  %v4304_v23 = vmul.f32 %v8397_v4, %v3405_v59  ;;  %v1883_v60 = vpop.f32.mrb[137].mxu0  ;;  %v3407_v25 = vpop.f32.mrb[137].mxu1 }
 0x22f   : > { %6569 = vst [vmem:[%s8022_s27 + $0x54] sm:$0xf] %v6685_v44  ;;  %v8492_v24 = vmax.f32 %v4742_v22, %v5088_v47  ;;  %v4744_v0 = vmax.f32 %v4156_v41, %v4597_v58  ;;  %v1884_v38 = vpop.f32.mrb[138].mxu0  ;;  %v3408_v40 = vpop.f32.mrb[138].mxu1 }
 0x230   : > { %v5090_v36 = vsel %vm4979_vm0, %v5087_v11, %v5089_v62  ;;  %v4010_v37 = vadd.f32 %v8387_v63, %v3857_v9  ;;  %v4451_v39 = vadd.f32 %v8387_v63, %v4304_v23  ;;  %v3858_v32 = vmul.f32 %v8397_v4, %v1884_v38  ;;  %v1886_v7 = vpop.f32.mrb[139].mxu0  ;;  %v3410_v53 = vpop.f32.mrb[139].mxu1 }
 0x231   : > { %v5707_v10 = vmax.f32 %v8426_v13, %v8492_v24  ;;  %v8502_v52 = vmax.f32 %v4743_v8, %v5090_v36  ;;  %v4305_v56 = vmul.f32 %v8397_v4, %v3408_v40  ;;  %v7332_v7 = vld [vmem:[%s7597_s26 + $0x404] ss:$8 sps:$4 sm:$0xff]  }
 0x232   : > { %v4157_v15 = vmax.f32 %v4010_v37, 0.0  ;;  %v4598_v18 = vmax.f32 %v4451_v39, 0.0  ;;  %v4011_v48 = vadd.f32 %v8387_v63, %v3858_v32  ;;  %2089 = vmatmul.mubr.bf16.gmra.mrb[244].mxu0 %v7313_v57  ;;  %3613 = vmatmul.mubr.bf16.gmra.mrb[244].mxu1 %v7314_v5  ;;  %v7329_v32 = vld [vmem:[%s7593_s25 + $0x404] ss:$8 sps:$4 sm:$0xff]  }
 0x233   : > { %v5708_v45 = vmax.f32 %v8431_v42, %v8502_v52  ;;  %v4452_v55 = vadd.f32 %v8387_v63, %v4305_v56  ;;  %2096 = vmatprep.mubr.bf16.mxu0 %v7315_v61  ;;  %3620 = vmatprep.mubr.bf16.mxu1 %v7317_v3  ;;  %v7325_v61 = vld [vmem:[%s7593_s25 + $0x3f0] ss:$8 sps:$4 sm:$0xff]  }
 0x234   : > { %v5091_v13 = vrot.slane %v4157_v15, 1  ;;  %v4745_v51 = vmax.f32 %v4157_v15, %v4598_v18  ;;  %v4158_v21 = vmax.f32 %v4011_v48, 0.0  ;;  %v7326_v3 = vld [vmem:[%s7597_s26 + $0x3f0] ss:$8 sps:$4 sm:$0xff]  }
 0x235   : > { %v6777_v50 = vpack.c.bf16 %v5708_v45, %v5707_v10  ;;  %v4599_v22 = vmax.f32 %v4452_v55, 0.0  ;;  %v1889_v26 = vpop.f32.mrb[140].mxu0  ;;  %v3413_v27 = vpop.f32.mrb[140].mxu1 }
 0x236   : > { %v5092_v30 = vsel %vm4979_vm0, %v5089_v62, %v5091_v13  ;;  %v5093_v1 = vrot.slane %v4158_v21, 1  ;;  %v3859_v42 = vmul.f32 %v8397_v4, %v1889_v26  ;;  %v4306_v6 = vmul.f32 %v8397_v4, %v3413_v27  ;;  %v1891_v49 = vpop.f32.mrb[141].mxu0  ;;  %v3415_v31 = vpop.f32.mrb[141].mxu1 }
 0x237   : > { %6866 = vst [vmem:[%s8022_s27 + $0x58] sm:$0xff] %v6777_v50   ;;  %v8515_v33 = vmax.f32 %v4744_v0, %v5092_v30  ;;  %v4746_v16 = vmax.f32 %v4158_v21, %v4599_v22  ;;  %v1892_v20 = vpop.f32.mrb[142].mxu0  ;;  %v3416_v46 = vpop.f32.mrb[142].mxu1 }
 0x238   : > { %v5094_v12 = vsel %vm4979_vm0, %v5091_v13, %v5093_v1  ;;  %v4012_v11 = vadd.f32 %v8387_v63, %v3859_v42  ;;  %v4453_v8 = vadd.f32 %v8387_v63, %v4306_v6  ;;  %v1893_v41 = vpop.f32.mrb[143].mxu0  ;;  %v3417_v44 = vpop.f32.mrb[143].mxu1  ;;  %v7330_v20 = vld [vmem:[%s7597_s26 + $0x400] ss:$8 sps:$4 sm:$0xff]  }
 0x239   : > { %v5709_v58 = vmax.f32 %v8445_v35, %v8515_v33  ;;  %v8524_v29 = vmax.f32 %v4745_v51, %v5094_v12  ;;  %v7335_v12 = vld [vmem:[%s7593_s25 + $0x414] ss:$8 sps:$4 sm:$0xff]  }
 0x23a   : > { %v4159_v59 = vmax.f32 %v4012_v11, 0.0  ;;  %v4600_v57 = vmax.f32 %v4453_v8, 0.0  ;;  %2097 = vmatmul.mubr.bf16.gmra.mrb[248].mxu0 %v7319_v28  ;;  %3621 = vmatmul.mubr.bf16.gmra.mrb[248].mxu1 %v7320_v14  ;;  %v7338_v11 = vld [vmem:[%s7597_s26 + $0x414] ss:$8 sps:$4 sm:$0xff]  }
 0x23b   : > { %v5710_v47 = vmax.f32 %v8448_v19, %v8524_v29  ;;  %2104 = vmatprep.mubr.bf16.mxu0 %v7321_v43  ;;  %3628 = vmatprep.mubr.bf16.mxu1 %v7323_v17 }
 0x23c   : > { %v5095_v62 = vrot.slane %v4159_v59, 1  ;;  %v4747_v9 = vmax.f32 %v4159_v59, %v4600_v57 }
 0x23d   : > { %v6782_v23 = vpack.c.bf16 %v5710_v47, %v5709_v58  ;;  %v1896_v35 = vpop.f32.mrb[144].mxu0  ;;  %v3420_v60 = vpop.f32.mrb[144].mxu1 }
 0x23e   : > { %v5096_v25 = vsel %vm4979_vm0, %v5093_v1, %v5095_v62  ;;  %v8529_v5 = vmax.f32 %v4747_v9, %v5095_v62  ;;  %v3860_v0 = vmul.f32 %v8397_v4, %v1896_v35  ;;  %v4307_v38 = vmul.f32 %v8397_v4, %v3420_v60  ;;  %v1898_v40 = vpop.f32.mrb[145].mxu0  ;;  %v3422_v19 = vpop.f32.mrb[145].mxu1  ;;  %v7327_v1 = vld [vmem:[%s7593_s25 + $0x400] ss:$8 sps:$4 sm:$0xff]  }
 0x23f   : > { %6867 = vst [vmem:[%s8022_s27 + $0x60] sm:$0xff] %v6782_v23   ;;  %v8536_v36 = vmax.f32 %v4746_v16, %v5096_v25  ;;  %v1899_v37 = vpop.f32.mrb[146].mxu0  ;;  %v3423_v39 = vpop.f32.mrb[146].mxu1 }
 0x240   : > { %v5712_v53 = vmax.f32 %v8458_v54, %v8529_v5  ;;  %v4013_v10 = vadd.f32 %v8387_v63, %v3860_v0  ;;  %v4454_v56 = vadd.f32 %v8387_v63, %v4307_v38  ;;  %v3861_v15 = vmul.f32 %v8397_v4, %v1899_v37  ;;  %v1901_v18 = vpop.f32.mrb[147].mxu0  ;;  %v3425_v48 = vpop.f32.mrb[147].mxu1  ;;  %v7333_v37 = vld [vmem:[%s7593_s25 + $0x410] ss:$8 sps:$4 sm:$0xff]  }
 0x241   : > { %v5711_v45 = vmax.f32 %v8464_v2, %v8536_v36  ;;  %v4308_v55 = vmul.f32 %v8397_v4, %v3423_v39 }
 0x242   : > { %v6691_v13 = vpack.c.bf16 %v5712_v53, %v5712_v53  ;;  %v4160_v51 = vmax.f32 %v4013_v10, 0.0  ;;  %v4601_v21 = vmax.f32 %v4454_v56, 0.0  ;;  %v4014_v54 = vadd.f32 %v8387_v63, %v3861_v15  ;;  %2105 = vmatmul.mubr.bf16.gmra.mrb[252].mxu0 %v7325_v61  ;;  %3629 = vmatmul.mubr.bf16.gmra.mrb[252].mxu1 %v7326_v3  ;;  %v7336_v56 = vld [vmem:[%s7597_s26 + $0x410] ss:$8 sps:$4 sm:$0xff]  }
 0x243   : > { %v6690_v50 = vpack.c.bf16 %v5711_v45, %v5711_v45  ;;  %v4455_v22 = vadd.f32 %v8387_v63, %v4308_v55  ;;  %2111 = vmatprep.mubr.bf16.mxu0 %v7329_v32  ;;  %3635 = vmatprep.mubr.bf16.mxu1 %v7332_v7  ;;  %v7341_v55 = vld [vmem:[%s7593_s25 + $0x424] ss:$8 sps:$4 sm:$0xff]  }
 0x244   : > { %6575 = vst [vmem:[%s8022_s27 + $0x6c] sm:$0x1] %v6691_v13  ;;  %v4748_v26 = vmax.f32 %v4160_v51, %v4601_v21  ;;  %v4161_v27 = vmax.f32 %v4014_v54, 0.0  ;;  %v5097_v42 = vrot.slane %v4160_v51, 1  ;;  %v7344_v13 = vld [vmem:[%s7597_s26 + $0x424] ss:$8 sps:$4 sm:$0xff]  }
 0x245   : > { %6574 = vst [vmem:[%s8022_s27 + $0x68] sm:$0xf] %v6690_v50  ;;  %v4602_v2 = vmax.f32 %v4455_v22, 0.0  ;;  %v1904_v28 = vpop.f32.mrb[148].mxu0  ;;  %v3428_v30 = vpop.f32.mrb[148].mxu1 }
 0x246   : > { %v5098_v6 = vrot.slane %v4161_v27, 1  ;;  %v3862_v49 = vmul.f32 %v8397_v4, %v1904_v28  ;;  %v4309_v31 = vmul.f32 %v8397_v4, %v3428_v30  ;;  %v1906_v14 = vpop.f32.mrb[149].mxu0  ;;  %v3430_v16 = vpop.f32.mrb[149].mxu1 }
 0x247   : > { %v4749_v46 = vmax.f32 %v4161_v27, %v4602_v2  ;;  %v1907_v43 = vpop.f32.mrb[150].mxu0  ;;  %v3431_v17 = vpop.f32.mrb[150].mxu1 }
 0x248   : > { %v5099_v8 = vsel %vm4979_vm0, %v5097_v42, %v5098_v6  ;;  %v4015_v41 = vadd.f32 %v8387_v63, %v3862_v49  ;;  %v4456_v44 = vadd.f32 %v8387_v63, %v4309_v31  ;;  %v3863_v58 = vmul.f32 %v8397_v4, %v1907_v43  ;;  %v1909_v59 = vpop.f32.mrb[151].mxu0  ;;  %v3433_v57 = vpop.f32.mrb[151].mxu1  ;;  %v7339_v43 = vld [vmem:[%s7593_s25 + $0x420] ss:$8 sps:$4 sm:$0xff]  }
 0x249   : > { %v5463_v47 = vmax.f32 %v4748_v26, %v5099_v8  ;;  %v4310_v62 = vmul.f32 %v8397_v4, %v3431_v17 }
 0x24a   : > { %v4162_v9 = vmax.f32 %v4015_v41, 0.0  ;;  %v4603_v23 = vmax.f32 %v4456_v44, 0.0  ;;  %v4016_v35 = vadd.f32 %v8387_v63, %v3863_v58  ;;  %2112 = vmatmul.mubr.bf16.gmra.mrb[0].mxu0 %v7327_v1  ;;  %3636 = vmatmul.mubr.bf16.gmra.mrb[0].mxu1 %v7330_v20  ;;  %v7342_v44 = vld [vmem:[%s7597_s26 + $0x420] ss:$8 sps:$4 sm:$0xff]  }
 0x24b   : > { %v8565_v60 = vmax.f32 %v8479_v34, %v5463_v47  ;;  %v4457_v25 = vadd.f32 %v8387_v63, %v4310_v62  ;;  %2119 = vmatprep.mubr.bf16.mxu0 %v7335_v12  ;;  %3643 = vmatprep.mubr.bf16.mxu1 %v7338_v11  ;;  %v7347_v62 = vld [vmem:[%s7593_s25 + $0x434] ss:$8 sps:$4 sm:$0xff]  }
 0x24c   : > { %v5100_v0 = vrot.slane %v4162_v9, 1  ;;  %v4750_v38 = vmax.f32 %v4162_v9, %v4603_v23  ;;  %v4163_v40 = vmax.f32 %v4016_v35, 0.0  ;;  %v7350_v9 = vld [vmem:[%s7597_s26 + $0x434] ss:$8 sps:$4 sm:$0xff]  }
 0x24d   : > { %v4604_v19 = vmax.f32 %v4457_v25, 0.0  ;;  %v1912_v61 = vpop.f32.mrb[152].mxu0  ;;  %v3436_v3 = vpop.f32.mrb[152].mxu1 }
 0x24e   : > { %v5101_v39 = vsel %vm4979_vm0, %v5098_v6, %v5100_v0  ;;  %v5102_v32 = vrot.slane %v4163_v40, 1  ;;  %v3864_v34 = vmul.f32 %v8397_v4, %v1912_v61  ;;  %v4311_v7 = vmul.f32 %v8397_v4, %v3436_v3  ;;  %v1914_v53 = vpop.f32.mrb[153].mxu0  ;;  %v3438_v10 = vpop.f32.mrb[153].mxu1 }
 0x24f   : > { %v5464_v15 = vmax.f32 %v4749_v46, %v5101_v39  ;;  %v4751_v18 = vmax.f32 %v4163_v40, %v4604_v19  ;;  %v1915_v48 = vpop.f32.mrb[154].mxu0  ;;  %v3439_v45 = vpop.f32.mrb[154].mxu1 }
 0x250   : > { %v5103_v51 = vsel %vm4979_vm0, %v5100_v0, %v5102_v32  ;;  %v4017_v21 = vadd.f32 %v8387_v63, %v3864_v34  ;;  %v4458_v54 = vadd.f32 %v8387_v63, %v4311_v7  ;;  %v3865_v50 = vmul.f32 %v8397_v4, %v1915_v48  ;;  %v1917_v22 = vpop.f32.mrb[155].mxu0  ;;  %v3441_v26 = vpop.f32.mrb[155].mxu1  ;;  %v7345_v48 = vld [vmem:[%s7593_s25 + $0x430] ss:$8 sps:$4 sm:$0xff]  }
 0x251   : > { %v8580_v27 = vmax.f32 %v8492_v24, %v5464_v15  ;;  %v5465_v2 = vmax.f32 %v4750_v38, %v5103_v51  ;;  %v4312_v28 = vmul.f32 %v8397_v4, %v3439_v45  ;;  %v7353_v51 = vld [vmem:[%s7593_s25 + $0x444] ss:$8 sps:$4 sm:$0xff]  }
 0x252   : > { %v4164_v30 = vmax.f32 %v4017_v21, 0.0  ;;  %v4605_v1 = vmax.f32 %v4458_v54, 0.0  ;;  %v4018_v42 = vadd.f32 %v8387_v63, %v3865_v50  ;;  %2120 = vmatmul.mubr.bf16.gmra.mrb[4].mxu0 %v7333_v37  ;;  %3644 = vmatmul.mubr.bf16.gmra.mrb[4].mxu1 %v7336_v56  ;;  %v7356_v21 = vld [vmem:[%s7597_s26 + $0x444] ss:$8 sps:$4 sm:$0xff]  }
 0x253   : > { %v8585_v6 = vmax.f32 %v8502_v52, %v5465_v2  ;;  %v4459_v49 = vadd.f32 %v8387_v63, %v4312_v28  ;;  %2127 = vmatprep.mubr.bf16.mxu0 %v7341_v55  ;;  %3651 = vmatprep.mubr.bf16.mxu1 %v7344_v13 }
 0x254   : > { %v5104_v24 = vrot.slane %v4164_v30, 1  ;;  %v4752_v31 = vmax.f32 %v4164_v30, %v4605_v1  ;;  %v4165_v14 = vmax.f32 %v4018_v42, 0.0 }
 0x255   : > { %v4606_v16 = vmax.f32 %v4459_v49, 0.0  ;;  %v1920_v20 = vpop.f32.mrb[156].mxu0  ;;  %v3444_v46 = vpop.f32.mrb[156].mxu1 }
 0x256   : > { %v5105_v17 = vsel %vm4979_vm0, %v5102_v32, %v5104_v24  ;;  %v5106_v12 = vrot.slane %v4165_v14, 1  ;;  %v3866_v52 = vmul.f32 %v8397_v4, %v1920_v20  ;;  %v4313_v11 = vmul.f32 %v8397_v4, %v3444_v46  ;;  %v1922_v8 = vpop.f32.mrb[157].mxu0  ;;  %v3446_v41 = vpop.f32.mrb[157].mxu1  ;;  %v7351_v46 = vld [vmem:[%s7593_s25 + $0x440] ss:$8 sps:$4 sm:$0xff]  }
 0x257   : > { %v5466_v58 = vmax.f32 %v4751_v18, %v5105_v17  ;;  %v4753_v59 = vmax.f32 %v4165_v14, %v4606_v16  ;;  %v1923_v57 = vpop.f32.mrb[158].mxu0  ;;  %v3447_v47 = vpop.f32.mrb[158].mxu1  ;;  %v7354_v41 = vld [vmem:[%s7597_s26 + $0x440] ss:$8 sps:$4 sm:$0xff]  }
 0x258   : > { %v5107_v23 = vsel %vm4979_vm0, %v5104_v24, %v5106_v12  ;;  %v4019_v35 = vadd.f32 %v8387_v63, %v3866_v52  ;;  %v4460_v25 = vadd.f32 %v8387_v63, %v4313_v11  ;;  %v1924_v0 = vpop.f32.mrb[159].mxu0  ;;  %v3448_v38 = vpop.f32.mrb[159].mxu1  ;;  %v7359_v57 = vld [vmem:[%s7593_s25 + $0x454] ss:$8 sps:$4 sm:$0xff]  }
 0x259   : > { %v8599_v40 = vmax.f32 %v8515_v33, %v5466_v58  ;;  %v5467_v19 = vmax.f32 %v4752_v31, %v5107_v23  ;;  %v7362_v47 = vld [vmem:[%s7597_s26 + $0x454] ss:$8 sps:$4 sm:$0xff]  }
 0x25a   : > { %v4166_v61 = vmax.f32 %v4019_v35, 0.0  ;;  %v4607_v3 = vmax.f32 %v4460_v25, 0.0  ;;  %2128 = vmatmul.mubr.bf16.gmra.mrb[8].mxu0 %v7339_v43  ;;  %3652 = vmatmul.mubr.bf16.gmra.mrb[8].mxu1 %v7342_v44 }
 0x25b   : > { %v8602_v37 = vmax.f32 %v8524_v29, %v5467_v19  ;;  %2135 = vmatprep.mubr.bf16.mxu0 %v7347_v62  ;;  %3659 = vmatprep.mubr.bf16.mxu1 %v7350_v9  ;;  %v7348_v29 = vld [vmem:[%s7597_s26 + $0x430] ss:$8 sps:$4 sm:$0xff]  }
 0x25c   : > { %v5108_v39 = vrot.slane %v4166_v61, 1  ;;  %v4754_v32 = vmax.f32 %v4166_v61, %v4607_v3 }
 0x25d   : > { %v1927_v34 = vpop.f32.mrb[160].mxu0  ;;  %v3451_v7 = vpop.f32.mrb[160].mxu1 }
 0x25e   : > { %v5109_v33 = vsel %vm4979_vm0, %v5106_v12, %v5108_v39  ;;  %v5469_v53 = vmax.f32 %v4754_v32, %v5108_v39  ;;  %v3867_v10 = vmul.f32 %v8397_v4, %v1927_v34  ;;  %v4314_v56 = vmul.f32 %v8397_v4, %v3451_v7  ;;  %v1929_v15 = vpop.f32.mrb[161].mxu0  ;;  %v3453_v18 = vpop.f32.mrb[161].mxu1 }
 0x25f   : > { %v5468_v45 = vmax.f32 %v4753_v59, %v5109_v33  ;;  %v1930_v55 = vpop.f32.mrb[162].mxu0  ;;  %v3454_v13 = vpop.f32.mrb[162].mxu1  ;;  %v7357_v18 = vld [vmem:[%s7593_s25 + $0x450] ss:$8 sps:$4 sm:$0xff]  }
 0x260   : > { %v8612_v54 = vmax.f32 %v8529_v5, %v5469_v53  ;;  %v4020_v50 = vadd.f32 %v8387_v63, %v3867_v10  ;;  %v4461_v22 = vadd.f32 %v8387_v63, %v4314_v56  ;;  %v3868_v26 = vmul.f32 %v8397_v4, %v1930_v55  ;;  %v1932_v2 = vpop.f32.mrb[163].mxu0  ;;  %v3456_v28 = vpop.f32.mrb[163].mxu1 }
 0x261   : > { %v8618_v30 = vmax.f32 %v8536_v36, %v5468_v45  ;;  %v4315_v1 = vmul.f32 %v8397_v4, %v3454_v13  ;;  %v7365_v2 = vld [vmem:[%s7593_s25 + $0x464] ss:$8 sps:$4 sm:$0xff]  }
 0x262   : > { %v4167_v42 = vmax.f32 %v4020_v50, 0.0  ;;  %v4608_v49 = vmax.f32 %v4461_v22, 0.0  ;;  %v4021_v24 = vadd.f32 %v8387_v63, %v3868_v26  ;;  %2136 = vmatmul.mubr.bf16.gmra.mrb[12].mxu0 %v7345_v48  ;;  %3660 = vmatmul.mubr.bf16.gmra.mrb[12].mxu1 %v7348_v29  ;;  %v7368_v28 = vld [vmem:[%s7597_s26 + $0x464] ss:$8 sps:$4 sm:$0xff]  }
 0x263   : > { %v4462_v5 = vadd.f32 %v8387_v63, %v4315_v1  ;;  %2142 = vmatprep.mubr.bf16.mxu0 %v7353_v51  ;;  %3666 = vmatprep.mubr.bf16.mxu1 %v7356_v21  ;;  %v7360_v51 = vld [vmem:[%s7597_s26 + $0x450] ss:$8 sps:$4 sm:$0xff]  }
 0x264   : > { %v4755_v31 = vmax.f32 %v4167_v42, %v4608_v49  ;;  %v4168_v14 = vmax.f32 %v4021_v24, 0.0  ;;  %v5110_v43 = vrot.slane %v4167_v42, 1 }
 0x265   : > { %v4609_v16 = vmax.f32 %v4462_v5, 0.0  ;;  %v1935_v36 = vpop.f32.mrb[164].mxu0  ;;  %v3459_v20 = vpop.f32.mrb[164].mxu1 }
 0x266   : > { %v5111_v17 = vrot.slane %v4168_v14, 1  ;;  %v3869_v12 = vmul.f32 %v8397_v4, %v1935_v36  ;;  %v4316_v52 = vmul.f32 %v8397_v4, %v3459_v20  ;;  %v1937_v11 = vpop.f32.mrb[165].mxu0  ;;  %v3461_v8 = vpop.f32.mrb[165].mxu1 }
 0x267   : > { %v4756_v44 = vmax.f32 %v4168_v14, %v4609_v16  ;;  %v1938_v58 = vpop.f32.mrb[166].mxu0  ;;  %v3462_v59 = vpop.f32.mrb[166].mxu1 }
 0x268   : > { %v5112_v62 = vsel %vm4979_vm0, %v5110_v43, %v5111_v17  ;;  %v4022_v9 = vadd.f32 %v8387_v63, %v3869_v12  ;;  %v4463_v23 = vadd.f32 %v8387_v63, %v4316_v52  ;;  %v3870_v35 = vmul.f32 %v8397_v4, %v1938_v58  ;;  %v1940_v25 = vpop.f32.mrb[167].mxu0  ;;  %v3464_v0 = vpop.f32.mrb[167].mxu1 }
 0x269   : > { %v8633_v38 = vmax.f32 %v4755_v31, %v5112_v62  ;;  %v4317_v19 = vmul.f32 %v8397_v4, %v3462_v59  ;;  %v7363_v59 = vld [vmem:[%s7593_s25 + $0x460] ss:$8 sps:$4 sm:$0xff]  }
 0x26a   : > { %v4169_v61 = vmax.f32 %v4022_v9, 0.0  ;;  %v4610_v3 = vmax.f32 %v4463_v23, 0.0  ;;  %v4023_v39 = vadd.f32 %v8387_v63, %v3870_v35  ;;  %2143 = vmatmul.mubr.bf16.gmra.mrb[16].mxu0 %v7351_v46  ;;  %3667 = vmatmul.mubr.bf16.gmra.mrb[16].mxu1 %v7354_v41  ;;  %v7366_v23 = vld [vmem:[%s7597_s26 + $0x460] ss:$8 sps:$4 sm:$0xff]  }
 0x26b   : > { %v5757_v32 = vmax.f32 %v8565_v60, %v8633_v38  ;;  %v4464_v34 = vadd.f32 %v8387_v63, %v4317_v19  ;;  %2150 = vmatprep.mubr.bf16.mxu0 %v7359_v57  ;;  %3674 = vmatprep.mubr.bf16.mxu1 %v7362_v47 }
 0x26c   : > { %v5113_v7 = vrot.slane %v4169_v61, 1  ;;  %v4757_v33 = vmax.f32 %v4169_v61, %v4610_v3  ;;  %v4170_v53 = vmax.f32 %v4023_v39, 0.0  ;;  %v7371_v61 = vld [vmem:[%s7593_s25 + $0x474] ss:$8 sps:$4 sm:$0xff]  }
 0x26d   : > { %v4611_v10 = vmax.f32 %v4464_v34, 0.0  ;;  %v1943_v56 = vpop.f32.mrb[168].mxu0  ;;  %v3467_v15 = vpop.f32.mrb[168].mxu1  ;;  %v7374_v3 = vld [vmem:[%s7597_s26 + $0x474] ss:$8 sps:$4 sm:$0xff]  }
 0x26e   : > { %v5114_v48 = vsel %vm4979_vm0, %v5111_v17, %v5113_v7  ;;  %v5115_v29 = vrot.slane %v4170_v53, 1  ;;  %v3871_v45 = vmul.f32 %v8397_v4, %v1943_v56  ;;  %v4318_v60 = vmul.f32 %v8397_v4, %v3467_v15  ;;  %v1945_v55 = vpop.f32.mrb[169].mxu0  ;;  %v3469_v13 = vpop.f32.mrb[169].mxu1 }
 0x26f   : > { %v8645_v21 = vmax.f32 %v4756_v44, %v5114_v48  ;;  %v4758_v50 = vmax.f32 %v4170_v53, %v4611_v10  ;;  %v1946_v22 = vpop.f32.mrb[170].mxu0  ;;  %v3470_v26 = vpop.f32.mrb[170].mxu1 }
 0x270   : > { %v5116_v1 = vsel %vm4979_vm0, %v5113_v7, %v5115_v29  ;;  %v4024_v42 = vadd.f32 %v8387_v63, %v3871_v45  ;;  %v4465_v49 = vadd.f32 %v8387_v63, %v4318_v60  ;;  %v3872_v24 = vmul.f32 %v8397_v4, %v1946_v22  ;;  %v1948_v5 = vpop.f32.mrb[171].mxu0  ;;  %v3472_v31 = vpop.f32.mrb[171].mxu1 }
 0x271   : > { %v5758_v14 = vmax.f32 %v8580_v27, %v8645_v21  ;;  %v8655_v16 = vmax.f32 %v4757_v33, %v5116_v1  ;;  %v4319_v36 = vmul.f32 %v8397_v4, %v3470_v26  ;;  %v7380_v5 = vld [vmem:[%s7597_s26 + $0x484] ss:$8 sps:$4 sm:$0xff]  }
 0x272   : > { %v4171_v20 = vmax.f32 %v4024_v42, 0.0  ;;  %v4612_v46 = vmax.f32 %v4465_v49, 0.0  ;;  %v4025_v43 = vadd.f32 %v8387_v63, %v3872_v24  ;;  %2151 = vmatmul.mubr.bf16.gmra.mrb[20].mxu0 %v7357_v18  ;;  %3675 = vmatmul.mubr.bf16.gmra.mrb[20].mxu1 %v7360_v51  ;;  %v8693_v51 = vld [vmem:[%s9378_s3] ss:$0 sm:$0xff]  ;;  %v7377_v24 = vld [vmem:[%s7593_s25 + $0x484] ss:$8 sps:$4 sm:$0xff]  }
 0x273   : > { %v6787_v17 = vpack.c.bf16 %v5758_v14, %v5757_v32  ;;  %v5759_v12 = vmax.f32 %v8585_v6, %v8655_v16  ;;  %v4466_v52 = vadd.f32 %v8387_v63, %v4319_v36  ;;  %2158 = vmatprep.mubr.bf16.mxu0 %v7365_v2  ;;  %3682 = vmatprep.mubr.bf16.mxu1 %v7368_v28  ;;  %v8676_v32 = vld [vmem:[%s9379_s4] ss:$0 sm:$0xff]  ;;  %v7369_v2 = vld [vmem:[%s7593_s25 + $0x470] ss:$8 sps:$4 sm:$0xff]  }
 0x274   : > { %v5117_v27 = vrot.slane %v4171_v20, 1  ;;  %v4759_v11 = vmax.f32 %v4171_v20, %v4612_v46  ;;  %v4172_v8 = vmax.f32 %v4025_v43, 0.0  ;;  %v7372_v28 = vld [vmem:[%s7597_s26 + $0x470] ss:$8 sps:$4 sm:$0xff]  }
 0x275   : > { %6868 = vst [vmem:[%s8022_s27 + $0x70] sm:$0xff] %v6787_v17   ;;  %v4613_v41 = vmax.f32 %v4466_v52, 0.0  ;;  %v1951_v44 = vpop.f32.mrb[172].mxu0  ;;  %v3475_v58 = vpop.f32.mrb[172].mxu1 }
 0x276   : > { %v5118_v57 = vsel %vm4979_vm0, %v5115_v29, %v5117_v27  ;;  %v5119_v47 = vrot.slane %v4172_v8, 1  ;;  %v3873_v6 = vmul.f32 %v8397_v4, %v1951_v44  ;;  %v4320_v63 = vmul.f32 %v8397_v4, %v3475_v58  ;;  %v1953_v62 = vpop.f32.mrb[173].mxu0  ;;  %v3477_v9 = vpop.f32.mrb[173].mxu1 }
 0x277   : > { %v8668_v35 = vmax.f32 %v4758_v50, %v5118_v57  ;;  %v4760_v25 = vmax.f32 %v4172_v8, %v4613_v41  ;;  %v1954_v0 = vpop.f32.mrb[174].mxu0  ;;  %v3478_v19 = vpop.f32.mrb[174].mxu1 }
 0x278   : > { %v5120_v39 = vsel %vm4979_vm0, %v5117_v27, %v5119_v47  ;;  %v4026_v34 = vadd.f32 %v8676_v32, %v3873_v6  ;;  %v4467_v4 = vadd.f32 %v8676_v32, %v4320_v63  ;;  %v1955_v7 = vpop.f32.mrb[175].mxu0  ;;  %v3479_v33 = vpop.f32.mrb[175].mxu1  ;;  %v7378_v0 = vld [vmem:[%s7597_s26 + $0x480] ss:$8 sps:$4 sm:$0xff]  }
 0x279   : > { %v5760_v53 = vmax.f32 %v8599_v40, %v8668_v35  ;;  %v8682_v10 = vmax.f32 %v4759_v11, %v5120_v39  ;;  %v7383_v39 = vld [vmem:[%s7593_s25 + $0x494] ss:$8 sps:$4 sm:$0xff]  }
 0x27a   : > { %v4173_v56 = vmax.f32 %v4026_v34, 0.0  ;;  %v4614_v15 = vmax.f32 %v4467_v4, 0.0  ;;  %2159 = vmatmul.mubr.bf16.gmra.mrb[24].mxu0 %v7363_v59  ;;  %3683 = vmatmul.mubr.bf16.gmra.mrb[24].mxu1 %v7366_v23  ;;  %v7386_v34 = vld [vmem:[%s7597_s26 + $0x494] ss:$8 sps:$4 sm:$0xff]  }
 0x27b   : > { %v6792_v18 = vpack.c.bf16 %v5760_v53, %v5759_v12  ;;  %v5761_v48 = vmax.f32 %v8602_v37, %v8682_v10  ;;  %2166 = vmatprep.mubr.bf16.mxu0 %v7371_v61  ;;  %3690 = vmatprep.mubr.bf16.mxu1 %v7374_v3 }
 0x27c   : > { %v5121_v29 = vrot.slane %v4173_v56, 1  ;;  %v4761_v45 = vmax.f32 %v4173_v56, %v4614_v15 }
 0x27d   : > { %6869 = vst [vmem:[%s8022_s27 + $0x78] sm:$0xff] %v6792_v18   ;;  %v1958_v40 = vpop.f32.mrb[176].mxu0  ;;  %v3482_v60 = vpop.f32.mrb[176].mxu1 }
 0x27e   : > { %v5122_v55 = vsel %vm4979_vm0, %v5119_v47, %v5121_v29  ;;  %v8688_v13 = vmax.f32 %v4761_v45, %v5121_v29  ;;  %v3874_v37 = vmul.f32 %v8693_v51, %v1958_v40  ;;  %v4321_v50 = vmul.f32 %v8693_v51, %v3482_v60  ;;  %v1960_v22 = vpop.f32.mrb[177].mxu0  ;;  %v3484_v26 = vpop.f32.mrb[177].mxu1  ;;  %v7375_v47 = vld [vmem:[%s7593_s25 + $0x480] ss:$8 sps:$4 sm:$0xff]  }
 0x27f   : > { %v8699_v1 = vmax.f32 %v4760_v25, %v5122_v55  ;;  %v1961_v42 = vpop.f32.mrb[178].mxu0  ;;  %v3485_v49 = vpop.f32.mrb[178].mxu1 }
 0x280   : > { %v5763_v31 = vmax.f32 %v8612_v54, %v8688_v13  ;;  %v4027_v14 = vadd.f32 %v8676_v32, %v3874_v37  ;;  %v4468_v36 = vadd.f32 %v8676_v32, %v4321_v50  ;;  %v3875_v20 = vmul.f32 %v8693_v51, %v1961_v42  ;;  %v1963_v46 = vpop.f32.mrb[179].mxu0  ;;  %v3487_v43 = vpop.f32.mrb[179].mxu1  ;;  %v7381_v42 = vld [vmem:[%s7593_s25 + $0x490] ss:$8 sps:$4 sm:$0xff]  }
 0x281   : > { %v5762_v17 = vmax.f32 %v8618_v30, %v8699_v1  ;;  %v4322_v12 = vmul.f32 %v8693_v51, %v3485_v49 }
 0x282   : > { %v6698_v52 = vpack.c.bf16 %v5763_v31, %v5763_v31  ;;  %v4174_v27 = vmax.f32 %v4027_v14, 0.0  ;;  %v4615_v11 = vmax.f32 %v4468_v36, 0.0  ;;  %v4028_v54 = vadd.f32 %v8676_v32, %v3875_v20  ;;  %2167 = vmatmul.mubr.bf16.gmra.mrb[28].mxu0 %v7369_v2  ;;  %3691 = vmatmul.mubr.bf16.gmra.mrb[28].mxu1 %v7372_v28  ;;  %v7384_v36 = vld [vmem:[%s7597_s26 + $0x490] ss:$8 sps:$4 sm:$0xff]  }
 0x283   : > { %v6797_v8 = vpack.c.bf16 %v5762_v17, %v5761_v48  ;;  %v4469_v41 = vadd.f32 %v8676_v32, %v4322_v12  ;;  %2173 = vmatprep.mubr.bf16.mxu0 %v7377_v24  ;;  %3697 = vmatprep.mubr.bf16.mxu1 %v7380_v5  ;;  %v7389_v12 = vld [vmem:[%s7593_s25 + $0x4a4] ss:$8 sps:$4 sm:$0xff]  }
 0x284   : > { %6589 = vst [vmem:[%s8022_s27 + $0x88] sm:$0x1] %v6698_v52  ;;  %v4762_v44 = vmax.f32 %v4174_v27, %v4615_v11  ;;  %v4175_v58 = vmax.f32 %v4028_v54, 0.0  ;;  %v5123_v6 = vrot.slane %v4174_v27, 1  ;;  %v7392_v52 = vld [vmem:[%s7597_s26 + $0x4a4] ss:$8 sps:$4 sm:$0xff]  }
 0x285   : > { %6870 = vst [vmem:[%s8022_s27 + $0x80] sm:$0xff] %v6797_v8   ;;  %v4616_v30 = vmax.f32 %v4469_v41, 0.0  ;;  %v1966_v59 = vpop.f32.mrb[180].mxu0  ;;  %v3490_v57 = vpop.f32.mrb[180].mxu1 }
 0x286   : > { %v5124_v63 = vrot.slane %v4175_v58, 1  ;;  %v3876_v62 = vmul.f32 %v8693_v51, %v1966_v59  ;;  %v4323_v9 = vmul.f32 %v8693_v51, %v3490_v57  ;;  %v1968_v23 = vpop.f32.mrb[181].mxu0  ;;  %v3492_v25 = vpop.f32.mrb[181].mxu1 }
 0x287   : > { %v4763_v19 = vmax.f32 %v4175_v58, %v4616_v30  ;;  %v1969_v61 = vpop.f32.mrb[182].mxu0  ;;  %v3493_v3 = vpop.f32.mrb[182].mxu1 }
 0x288   : > { %v5125_v4 = vsel %vm4979_vm0, %v5123_v6, %v5124_v63  ;;  %v4029_v7 = vadd.f32 %v8676_v32, %v3876_v62  ;;  %v4470_v33 = vadd.f32 %v8676_v32, %v4323_v9  ;;  %v3877_v53 = vmul.f32 %v8693_v51, %v1969_v61  ;;  %v1971_v56 = vpop.f32.mrb[183].mxu0  ;;  %v3495_v15 = vpop.f32.mrb[183].mxu1  ;;  %v7387_v61 = vld [vmem:[%s7593_s25 + $0x4a0] ss:$8 sps:$4 sm:$0xff]  }
 0x289   : > { %v5477_v18 = vmax.f32 %v4762_v44, %v5125_v4  ;;  %v4324_v48 = vmul.f32 %v8693_v51, %v3493_v3 }
 0x28a   : > { %v4176_v29 = vmax.f32 %v4029_v7, 0.0  ;;  %v4617_v45 = vmax.f32 %v4470_v33, 0.0  ;;  %v4030_v40 = vadd.f32 %v8676_v32, %v3877_v53  ;;  %2174 = vmatmul.mubr.bf16.gmra.mrb[32].mxu0 %v7375_v47  ;;  %3698 = vmatmul.mubr.bf16.gmra.mrb[32].mxu1 %v7378_v0  ;;  %v7390_v33 = vld [vmem:[%s7597_s26 + $0x4a0] ss:$8 sps:$4 sm:$0xff]  }
 0x28b   : > { %v8728_v60 = vmax.f32 %v8633_v38, %v5477_v18  ;;  %v4471_v55 = vadd.f32 %v8676_v32, %v4324_v48  ;;  %2181 = vmatprep.mubr.bf16.mxu0 %v7383_v39  ;;  %3705 = vmatprep.mubr.bf16.mxu1 %v7386_v34  ;;  %v7395_v48 = vld [vmem:[%s7593_s25 + $0x4b4] ss:$8 sps:$4 sm:$0xff]  }
 0x28c   : > { %v5126_v37 = vrot.slane %v4176_v29, 1  ;;  %v4764_v50 = vmax.f32 %v4176_v29, %v4617_v45  ;;  %v4177_v22 = vmax.f32 %v4030_v40, 0.0  ;;  %v7398_v29 = vld [vmem:[%s7597_s26 + $0x4b4] ss:$8 sps:$4 sm:$0xff]  }
 0x28d   : > { %v4618_v26 = vmax.f32 %v4471_v55, 0.0  ;;  %v1974_v2 = vpop.f32.mrb[184].mxu0  ;;  %v3498_v28 = vpop.f32.mrb[184].mxu1 }
 0x28e   : > { %v5127_v49 = vsel %vm4979_vm0, %v5124_v63, %v5126_v37  ;;  %v5128_v24 = vrot.slane %v4177_v22, 1  ;;  %v3878_v38 = vmul.f32 %v8693_v51, %v1974_v2  ;;  %v4325_v5 = vmul.f32 %v8693_v51, %v3498_v28  ;;  %v1976_v31 = vpop.f32.mrb[185].mxu0  ;;  %v3500_v14 = vpop.f32.mrb[185].mxu1 }
 0x28f   : > { %v5478_v20 = vmax.f32 %v4763_v19, %v5127_v49  ;;  %v4765_v46 = vmax.f32 %v4177_v22, %v4618_v26  ;;  %v1977_v43 = vpop.f32.mrb[186].mxu0  ;;  %v3501_v17 = vpop.f32.mrb[186].mxu1 }
 0x290   : > { %v5129_v27 = vsel %vm4979_vm0, %v5126_v37, %v5128_v24  ;;  %v4031_v11 = vadd.f32 %v8676_v32, %v3878_v38  ;;  %v4472_v54 = vadd.f32 %v8676_v32, %v4325_v5  ;;  %v3879_v8 = vmul.f32 %v8693_v51, %v1977_v43  ;;  %v1979_v41 = vpop.f32.mrb[187].mxu0  ;;  %v3503_v44 = vpop.f32.mrb[187].mxu1  ;;  %v7393_v43 = vld [vmem:[%s7593_s25 + $0x4b0] ss:$8 sps:$4 sm:$0xff]  }
 0x291   : > { %v8743_v58 = vmax.f32 %v8645_v21, %v5478_v20  ;;  %v5479_v30 = vmax.f32 %v4764_v50, %v5129_v27  ;;  %v4326_v59 = vmul.f32 %v8693_v51, %v3501_v17  ;;  %v7401_v27 = vld [vmem:[%s7593_s25 + $0x4c4] ss:$8 sps:$4 sm:$0xff]  }
 0x292   : > { %v4178_v57 = vmax.f32 %v4031_v11, 0.0  ;;  %v4619_v47 = vmax.f32 %v4472_v54, 0.0  ;;  %v4032_v6 = vadd.f32 %v8676_v32, %v3879_v8  ;;  %2182 = vmatmul.mubr.bf16.gmra.mrb[36].mxu0 %v7381_v42  ;;  %3706 = vmatmul.mubr.bf16.gmra.mrb[36].mxu1 %v7384_v36  ;;  %v7404_v11 = vld [vmem:[%s7597_s26 + $0x4c4] ss:$8 sps:$4 sm:$0xff]  }
 0x293   : > { %v8748_v63 = vmax.f32 %v8655_v16, %v5479_v30  ;;  %v4473_v62 = vadd.f32 %v8676_v32, %v4326_v59  ;;  %2189 = vmatprep.mubr.bf16.mxu0 %v7389_v12  ;;  %3713 = vmatprep.mubr.bf16.mxu1 %v7392_v52 }
 0x294   : > { %v5130_v21 = vrot.slane %v4178_v57, 1  ;;  %v4766_v9 = vmax.f32 %v4178_v57, %v4619_v47  ;;  %v4179_v23 = vmax.f32 %v4032_v6, 0.0 }
 0x295   : > { %v4620_v25 = vmax.f32 %v4473_v62, 0.0  ;;  %v1982_v0 = vpop.f32.mrb[188].mxu0  ;;  %v3506_v19 = vpop.f32.mrb[188].mxu1 }
 0x296   : > { %v5131_v3 = vsel %vm4979_vm0, %v5128_v24, %v5130_v21  ;;  %v5132_v39 = vrot.slane %v4179_v23, 1  ;;  %v3880_v16 = vmul.f32 %v8693_v51, %v1982_v0  ;;  %v4327_v34 = vmul.f32 %v8693_v51, %v3506_v19  ;;  %v1984_v4 = vpop.f32.mrb[189].mxu0  ;;  %v3508_v7 = vpop.f32.mrb[189].mxu1  ;;  %v7399_v19 = vld [vmem:[%s7593_s25 + $0x4c0] ss:$8 sps:$4 sm:$0xff]  }
 0x297   : > { %v5480_v53 = vmax.f32 %v4765_v46, %v5131_v3  ;;  %v4767_v56 = vmax.f32 %v4179_v23, %v4620_v25  ;;  %v1985_v15 = vpop.f32.mrb[190].mxu0  ;;  %v3509_v18 = vpop.f32.mrb[190].mxu1  ;;  %v7402_v7 = vld [vmem:[%s7597_s26 + $0x4c0] ss:$8 sps:$4 sm:$0xff]  }
 0x298   : > { %v5133_v45 = vsel %vm4979_vm0, %v5130_v21, %v5132_v39  ;;  %v4033_v40 = vadd.f32 %v8676_v32, %v3880_v16  ;;  %v4474_v55 = vadd.f32 %v8676_v32, %v4327_v34  ;;  %v1986_v37 = vpop.f32.mrb[191].mxu0  ;;  %v3510_v50 = vpop.f32.mrb[191].mxu1  ;;  %v7407_v15 = vld [vmem:[%s7593_s25 + $0x4d4] ss:$8 sps:$4 sm:$0xff]  }
 0x299   : > { %v8762_v22 = vmax.f32 %v8668_v35, %v5480_v53  ;;  %v5481_v26 = vmax.f32 %v4766_v9, %v5133_v45  ;;  %v7410_v18 = vld [vmem:[%s7597_s26 + $0x4d4] ss:$8 sps:$4 sm:$0xff]  }
 0x29a   : > { %v4180_v2 = vmax.f32 %v4033_v40, 0.0  ;;  %v4621_v28 = vmax.f32 %v4474_v55, 0.0  ;;  %2190 = vmatmul.mubr.bf16.gmra.mrb[40].mxu0 %v7387_v61  ;;  %3714 = vmatmul.mubr.bf16.gmra.mrb[40].mxu1 %v7390_v33 }
 0x29b   : > { %v8765_v42 = vmax.f32 %v8682_v10, %v5481_v26  ;;  %2197 = vmatprep.mubr.bf16.mxu0 %v7395_v48  ;;  %3721 = vmatprep.mubr.bf16.mxu1 %v7398_v29  ;;  %v7396_v10 = vld [vmem:[%s7597_s26 + $0x4b0] ss:$8 sps:$4 sm:$0xff]  }
 0x29c   : > { %v5134_v49 = vrot.slane %v4180_v2, 1  ;;  %v4768_v24 = vmax.f32 %v4180_v2, %v4621_v28 }
 0x29d   : > { %v1989_v38 = vpop.f32.mrb[192].mxu0  ;;  %v3513_v5 = vpop.f32.mrb[192].mxu1 }
 0x29e   : > { %v5135_v35 = vsel %vm4979_vm0, %v5132_v39, %v5134_v49  ;;  %v5483_v31 = vmax.f32 %v4768_v24, %v5134_v49  ;;  %v3881_v14 = vmul.f32 %v8693_v51, %v1989_v38  ;;  %v4328_v36 = vmul.f32 %v8693_v51, %v3513_v5  ;;  %v1991_v20 = vpop.f32.mrb[193].mxu0  ;;  %v3515_v46 = vpop.f32.mrb[193].mxu1 }
 0x29f   : > { %v5482_v17 = vmax.f32 %v4767_v56, %v5135_v35  ;;  %v1992_v12 = vpop.f32.mrb[194].mxu0  ;;  %v3516_v52 = vpop.f32.mrb[194].mxu1 }
 0x2a0   : > { %v8775_v54 = vmax.f32 %v8688_v13, %v5483_v31  ;;  %v4034_v8 = vadd.f32 %v8676_v32, %v3881_v14  ;;  %v4475_v41 = vadd.f32 %v8676_v32, %v4328_v36  ;;  %v3882_v44 = vmul.f32 %v8693_v51, %v1992_v12  ;;  %v1994_v30 = vpop.f32.mrb[195].mxu0  ;;  %v3518_v59 = vpop.f32.mrb[195].mxu1 }
 0x2a1   : > { %v8781_v57 = vmax.f32 %v8699_v1, %v5482_v17  ;;  %v4329_v47 = vmul.f32 %v8693_v51, %v3516_v52  ;;  %v7413_v59 = vld [vmem:[%s7593_s25 + $0x4e4] ss:$8 sps:$4 sm:$0xff]  }
 0x2a2   : > { %v4181_v6 = vmax.f32 %v4034_v8, 0.0  ;;  %v4622_v62 = vmax.f32 %v4475_v41, 0.0  ;;  %v4035_v21 = vadd.f32 %v8676_v32, %v3882_v44  ;;  %2198 = vmatmul.mubr.bf16.gmra.mrb[44].mxu0 %v7393_v43  ;;  %3722 = vmatmul.mubr.bf16.gmra.mrb[44].mxu1 %v7396_v10  ;;  %v7405_v43 = vld [vmem:[%s7593_s25 + $0x4d0] ss:$8 sps:$4 sm:$0xff]  }
 0x2a3   : > { %v4476_v13 = vadd.f32 %v8676_v32, %v4329_v47  ;;  %2204 = vmatprep.mubr.bf16.mxu0 %v7401_v27  ;;  %3728 = vmatprep.mubr.bf16.mxu1 %v7404_v11  ;;  %v7408_v11 = vld [vmem:[%s7597_s26 + $0x4d0] ss:$8 sps:$4 sm:$0xff]   ;;  %v7416_v47 = vld [vmem:[%s7597_s26 + $0x4e4] ss:$8 sps:$4 sm:$0xff]  }
 0x2a4   : > { %v4769_v9 = vmax.f32 %v4181_v6, %v4622_v62  ;;  %v4182_v23 = vmax.f32 %v4035_v21, 0.0  ;;  %v5136_v61 = vrot.slane %v4181_v6, 1 }
 0x2a5   : > { %v4623_v25 = vmax.f32 %v4476_v13, 0.0  ;;  %v1997_v1 = vpop.f32.mrb[196].mxu0  ;;  %v3521_v0 = vpop.f32.mrb[196].mxu1 }
 0x2a6   : > { %v5137_v3 = vrot.slane %v4182_v23, 1  ;;  %v3883_v39 = vmul.f32 %v8693_v51, %v1997_v1  ;;  %v4330_v16 = vmul.f32 %v8693_v51, %v3521_v0  ;;  %v1999_v34 = vpop.f32.mrb[197].mxu0  ;;  %v3523_v4 = vpop.f32.mrb[197].mxu1 }
 0x2a7   : > { %v4770_v33 = vmax.f32 %v4182_v23, %v4623_v25  ;;  %v2000_v53 = vpop.f32.mrb[198].mxu0  ;;  %v3524_v56 = vpop.f32.mrb[198].mxu1 }
 0x2a8   : > { %v5138_v48 = vsel %vm4979_vm0, %v5136_v61, %v5137_v3  ;;  %v4036_v29 = vadd.f32 %v8676_v32, %v3883_v39  ;;  %v4477_v45 = vadd.f32 %v8676_v32, %v4330_v16  ;;  %v3884_v40 = vmul.f32 %v8693_v51, %v2000_v53  ;;  %v2002_v55 = vpop.f32.mrb[199].mxu0  ;;  %v3526_v37 = vpop.f32.mrb[199].mxu1 }
 0x2a9   : > { %v8796_v50 = vmax.f32 %v4769_v9, %v5138_v48  ;;  %v4331_v26 = vmul.f32 %v8693_v51, %v3524_v56  ;;  %v7414_v55 = vld [vmem:[%s7597_s26 + $0x4e0] ss:$8 sps:$4 sm:$0xff]  }
 0x2aa   : > { %v4183_v2 = vmax.f32 %v4036_v29, 0.0  ;;  %v4624_v28 = vmax.f32 %v4477_v45, 0.0  ;;  %v4037_v49 = vadd.f32 %v8676_v32, %v3884_v40  ;;  %2205 = vmatmul.mubr.bf16.gmra.mrb[48].mxu0 %v7399_v19  ;;  %3729 = vmatmul.mubr.bf16.gmra.mrb[48].mxu1 %v7402_v7 }
 0x2ab   : > { %v5808_v24 = vmax.f32 %v8728_v60, %v8796_v50  ;;  %v4478_v38 = vadd.f32 %v8676_v32, %v4331_v26  ;;  %2212 = vmatprep.mubr.bf16.mxu0 %v7407_v15  ;;  %3736 = vmatprep.mubr.bf16.mxu1 %v7410_v18  ;;  %v7411_v15 = vld [vmem:[%s7593_s25 + $0x4e0] ss:$8 sps:$4 sm:$0xff]  }
 0x2ac   : > { %v5139_v5 = vrot.slane %v4183_v2, 1  ;;  %v4771_v35 = vmax.f32 %v4183_v2, %v4624_v28  ;;  %v4184_v31 = vmax.f32 %v4037_v49, 0.0  ;;  %v7419_v49 = vld [vmem:[%s7593_s25 + $0x4f4] ss:$8 sps:$4 sm:$0xff]  }
 0x2ad   : > { %v6699_v14 = vpack.c.bf16 %v5808_v24, %v5808_v24  ;;  %v4625_v36 = vmax.f32 %v4478_v38, 0.0  ;;  %v2005_v20 = vpop.f32.mrb[200].mxu0  ;;  %v3529_v46 = vpop.f32.mrb[200].mxu1  ;;  %v7422_v24 = vld [vmem:[%s7597_s26 + $0x4f4] ss:$8 sps:$4 sm:$0xff]  }
 0x2ae   : > { %v5140_v10 = vsel %vm4979_vm0, %v5137_v3, %v5139_v5  ;;  %v5141_v17 = vrot.slane %v4184_v31, 1  ;;  %v3885_v60 = vmul.f32 %v8693_v51, %v2005_v20  ;;  %v4332_v12 = vmul.f32 %v8693_v51, %v3529_v46  ;;  %v2007_v52 = vpop.f32.mrb[201].mxu0  ;;  %v3531_v27 = vpop.f32.mrb[201].mxu1 }
 0x2af   : > { %6597 = vst [vmem:[%s8022_s27 + $0x8c] sm:$0xf] %v6699_v14  ;;  %v8809_v8 = vmax.f32 %v4770_v33, %v5140_v10  ;;  %v4772_v41 = vmax.f32 %v4184_v31, %v4625_v36  ;;  %v2008_v44 = vpop.f32.mrb[202].mxu0  ;;  %v3532_v30 = vpop.f32.mrb[202].mxu1 }
 0x2b0   : > { %v5142_v6 = vsel %vm4979_vm0, %v5139_v5, %v5141_v17  ;;  %v4038_v62 = vadd.f32 %v8676_v32, %v3885_v60  ;;  %v4479_v21 = vadd.f32 %v8676_v32, %v4332_v12  ;;  %v3886_v13 = vmul.f32 %v8693_v51, %v2008_v44  ;;  %v2010_v9 = vpop.f32.mrb[203].mxu0  ;;  %v3534_v23 = vpop.f32.mrb[203].mxu1 }
 0x2b1   : > { %v5809_v25 = vmax.f32 %v8743_v58, %v8809_v8  ;;  %v8819_v1 = vmax.f32 %v4771_v35, %v5142_v6  ;;  %v4333_v0 = vmul.f32 %v8693_v51, %v3532_v30  ;;  %v7428_v9 = vld [vmem:[%s7597_s26 + $0x504] ss:$8 sps:$4 sm:$0xff]  }
 0x2b2   : > { %v4185_v19 = vmax.f32 %v4038_v62, 0.0  ;;  %v4626_v61 = vmax.f32 %v4479_v21, 0.0  ;;  %v4039_v3 = vadd.f32 %v8676_v32, %v3886_v13  ;;  %2213 = vmatmul.mubr.bf16.gmra.mrb[52].mxu0 %v7405_v43  ;;  %3737 = vmatmul.mubr.bf16.gmra.mrb[52].mxu1 %v7408_v11  ;;  %v7425_v13 = vld [vmem:[%s7593_s25 + $0x504] ss:$8 sps:$4 sm:$0xff]  }
 0x2b3   : > { %v5810_v39 = vmax.f32 %v8748_v63, %v8819_v1  ;;  %v4480_v16 = vadd.f32 %v8676_v32, %v4333_v0  ;;  %2220 = vmatprep.mubr.bf16.mxu0 %v7413_v59  ;;  %3744 = vmatprep.mubr.bf16.mxu1 %v7416_v47  ;;  %v7417_v59 = vld [vmem:[%s7593_s25 + $0x4f0] ss:$8 sps:$4 sm:$0xff]  }
 0x2b4   : > { %v5143_v58 = vrot.slane %v4185_v19, 1  ;;  %v4773_v34 = vmax.f32 %v4185_v19, %v4626_v61  ;;  %v4186_v4 = vmax.f32 %v4039_v3, 0.0  ;;  %v7420_v47 = vld [vmem:[%s7597_s26 + $0x4f0] ss:$8 sps:$4 sm:$0xff]  }
 0x2b5   : > { %v6802_v7 = vpack.c.bf16 %v5810_v39, %v5809_v25  ;;  %v4627_v33 = vmax.f32 %v4480_v16, 0.0  ;;  %v2013_v53 = vpop.f32.mrb[204].mxu0  ;;  %v3537_v56 = vpop.f32.mrb[204].mxu1 }
 0x2b6   : > { %v5144_v18 = vsel %vm4979_vm0, %v5141_v17, %v5143_v58  ;;  %v5145_v48 = vrot.slane %v4186_v4, 1  ;;  %v3887_v63 = vmul.f32 %v8693_v51, %v2013_v53  ;;  %v4334_v29 = vmul.f32 %v8693_v51, %v3537_v56  ;;  %v2015_v45 = vpop.f32.mrb[205].mxu0  ;;  %v3539_v40 = vpop.f32.mrb[205].mxu1 }
 0x2b7   : > { %6871 = vst [vmem:[%s8022_s27 + $0x90] sm:$0xff] %v6802_v7   ;;  %v8832_v37 = vmax.f32 %v4772_v41, %v5144_v18  ;;  %v4774_v26 = vmax.f32 %v4186_v4, %v4627_v33  ;;  %v2016_v2 = vpop.f32.mrb[206].mxu0  ;;  %v3540_v28 = vpop.f32.mrb[206].mxu1 }
 0x2b8   : > { %v5146_v38 = vsel %vm4979_vm0, %v5143_v58, %v5145_v48  ;;  %v4040_v5 = vadd.f32 %v8676_v32, %v3887_v63  ;;  %v4481_v35 = vadd.f32 %v8676_v32, %v4334_v29  ;;  %v2017_v31 = vpop.f32.mrb[207].mxu0  ;;  %v3541_v14 = vpop.f32.mrb[207].mxu1  ;;  %v7426_v2 = vld [vmem:[%s7597_s26 + $0x500] ss:$8 sps:$4 sm:$0xff]  }
 0x2b9   : > { %v5811_v36 = vmax.f32 %v8762_v22, %v8832_v37  ;;  %v8841_v20 = vmax.f32 %v4773_v34, %v5146_v38  ;;  %v7431_v38 = vld [vmem:[%s7593_s25 + $0x514] ss:$8 sps:$4 sm:$0xff]  }
 0x2ba   : > { %v4187_v46 = vmax.f32 %v4040_v5, 0.0  ;;  %v4628_v43 = vmax.f32 %v4481_v35, 0.0  ;;  %2221 = vmatmul.mubr.bf16.gmra.mrb[56].mxu0 %v7411_v15  ;;  %3745 = vmatmul.mubr.bf16.gmra.mrb[56].mxu1 %v7414_v55  ;;  %v7434_v5 = vld [vmem:[%s7597_s26 + $0x514] ss:$8 sps:$4 sm:$0xff]  }
 0x2bb   : > { %v5812_v10 = vmax.f32 %v8765_v42, %v8841_v20  ;;  %2228 = vmatprep.mubr.bf16.mxu0 %v7419_v49  ;;  %3752 = vmatprep.mubr.bf16.mxu1 %v7422_v24 }
 0x2bc   : > { %v5147_v17 = vrot.slane %v4187_v46, 1  ;;  %v4775_v60 = vmax.f32 %v4187_v46, %v4628_v43 }
 0x2bd   : > { %v6807_v12 = vpack.c.bf16 %v5812_v10, %v5811_v36  ;;  %v2020_v22 = vpop.f32.mrb[208].mxu0  ;;  %v3544_v52 = vpop.f32.mrb[208].mxu1 }
 0x2be   : > { %v5148_v27 = vsel %vm4979_vm0, %v5145_v48, %v5147_v17  ;;  %v8846_v11 = vmax.f32 %v4775_v60, %v5147_v17  ;;  %v3888_v41 = vmul.f32 %v8693_v51, %v2020_v22  ;;  %v4335_v44 = vmul.f32 %v8693_v51, %v3544_v52  ;;  %v2022_v30 = vpop.f32.mrb[209].mxu0  ;;  %v3546_v42 = vpop.f32.mrb[209].mxu1  ;;  %v7423_v48 = vld [vmem:[%s7593_s25 + $0x500] ss:$8 sps:$4 sm:$0xff]  }
 0x2bf   : > { %6872 = vst [vmem:[%s8022_s27 + $0x98] sm:$0xff] %v6807_v12   ;;  %v8853_v6 = vmax.f32 %v4774_v26, %v5148_v27  ;;  %v2023_v62 = vpop.f32.mrb[210].mxu0  ;;  %v3547_v21 = vpop.f32.mrb[210].mxu1 }
 0x2c0   : > { %v5814_v23 = vmax.f32 %v8775_v54, %v8846_v11  ;;  %v4041_v25 = vadd.f32 %v8676_v32, %v3888_v41  ;;  %v4482_v0 = vadd.f32 %v8676_v32, %v4335_v44  ;;  %v3889_v19 = vmul.f32 %v8693_v51, %v2023_v62  ;;  %v2025_v61 = vpop.f32.mrb[211].mxu0  ;;  %v3549_v3 = vpop.f32.mrb[211].mxu1  ;;  %v7429_v62 = vld [vmem:[%s7593_s25 + $0x510] ss:$8 sps:$4 sm:$0xff]  }
 0x2c1   : > { %v5813_v39 = vmax.f32 %v8781_v57, %v8853_v6  ;;  %v4336_v16 = vmul.f32 %v8693_v51, %v3547_v21 }
 0x2c2   : > { %v6705_v58 = vpack.c.bf16 %v5814_v23, %v5814_v23  ;;  %v4188_v34 = vmax.f32 %v4041_v25, 0.0  ;;  %v4629_v4 = vmax.f32 %v4482_v0, 0.0  ;;  %v4042_v54 = vadd.f32 %v8676_v32, %v3889_v19  ;;  %2229 = vmatmul.mubr.bf16.gmra.mrb[60].mxu0 %v7417_v59  ;;  %3753 = vmatmul.mubr.bf16.gmra.mrb[60].mxu1 %v7420_v47  ;;  %v7432_v0 = vld [vmem:[%s7597_s26 + $0x510] ss:$8 sps:$4 sm:$0xff]  }
 0x2c3   : > { %v6704_v7 = vpack.c.bf16 %v5813_v39, %v5813_v39  ;;  %v4483_v33 = vadd.f32 %v8676_v32, %v4336_v16  ;;  %2235 = vmatprep.mubr.bf16.mxu0 %v7425_v13  ;;  %3759 = vmatprep.mubr.bf16.mxu1 %v7428_v9  ;;  %v7437_v16 = vld [vmem:[%s7593_s25 + $0x524] ss:$8 sps:$4 sm:$0xff]  }
 0x2c4   : > { %6603 = vst [vmem:[%s8022_s27 + $0xa4] sm:$0x1] %v6705_v58  ;;  %v4776_v53 = vmax.f32 %v4188_v34, %v4629_v4  ;;  %v4189_v56 = vmax.f32 %v4042_v54, 0.0  ;;  %v5149_v63 = vrot.slane %v4188_v34, 1  ;;  %v7440_v58 = vld [vmem:[%s7597_s26 + $0x524] ss:$8 sps:$4 sm:$0xff]  }
 0x2c5   : > { %6602 = vst [vmem:[%s8022_s27 + $0xa0] sm:$0xf] %v6704_v7  ;;  %v4630_v57 = vmax.f32 %v4483_v33, 0.0  ;;  %v2028_v15 = vpop.f32.mrb[212].mxu0  ;;  %v3552_v18 = vpop.f32.mrb[212].mxu1 }
 0x2c6   : > { %v5150_v29 = vrot.slane %v4189_v56, 1  ;;  %v3890_v45 = vmul.f32 %v8693_v51, %v2028_v15  ;;  %v4337_v40 = vmul.f32 %v8693_v51, %v3552_v18  ;;  %v2030_v55 = vpop.f32.mrb[213].mxu0  ;;  %v3554_v26 = vpop.f32.mrb[213].mxu1 }
 0x2c7   : > { %v4777_v28 = vmax.f32 %v4189_v56, %v4630_v57  ;;  %v2031_v49 = vpop.f32.mrb[214].mxu0  ;;  %v3555_v24 = vpop.f32.mrb[214].mxu1 }
 0x2c8   : > { %v5151_v35 = vsel %vm4979_vm0, %v5149_v63, %v5150_v29  ;;  %v4043_v31 = vadd.f32 %v8676_v32, %v3890_v45  ;;  %v4484_v14 = vadd.f32 %v8676_v32, %v4337_v40  ;;  %v3891_v36 = vmul.f32 %v8693_v51, %v2031_v49  ;;  %v2033_v46 = vpop.f32.mrb[215].mxu0  ;;  %v3557_v43 = vpop.f32.mrb[215].mxu1  ;;  %v7435_v49 = vld [vmem:[%s7593_s25 + $0x520] ss:$8 sps:$4 sm:$0xff]  }
 0x2c9   : > { %v5491_v10 = vmax.f32 %v4776_v53, %v5151_v35  ;;  %v4338_v17 = vmul.f32 %v8693_v51, %v3555_v24 }
 0x2ca   : > { %v4190_v60 = vmax.f32 %v4043_v31, 0.0  ;;  %v4631_v12 = vmax.f32 %v4484_v14, 0.0  ;;  %v4044_v22 = vadd.f32 %v8676_v32, %v3891_v36  ;;  %2236 = vmatmul.mubr.bf16.gmra.mrb[64].mxu0 %v7423_v48  ;;  %3760 = vmatmul.mubr.bf16.gmra.mrb[64].mxu1 %v7426_v2  ;;  %v7438_v14 = vld [vmem:[%s7597_s26 + $0x520] ss:$8 sps:$4 sm:$0xff]  }
 0x2cb   : > { %v8882_v52 = vmax.f32 %v8796_v50, %v5491_v10  ;;  %v4485_v27 = vadd.f32 %v8676_v32, %v4338_v17  ;;  %2243 = vmatprep.mubr.bf16.mxu0 %v7431_v38  ;;  %3767 = vmatprep.mubr.bf16.mxu1 %v7434_v5  ;;  %v7443_v17 = vld [vmem:[%s7593_s25 + $0x534] ss:$8 sps:$4 sm:$0xff]  }
 0x2cc   : > { %v5152_v41 = vrot.slane %v4190_v60, 1  ;;  %v4778_v44 = vmax.f32 %v4190_v60, %v4631_v12  ;;  %v4191_v30 = vmax.f32 %v4044_v22, 0.0  ;;  %v7446_v60 = vld [vmem:[%s7597_s26 + $0x534] ss:$8 sps:$4 sm:$0xff]  }
 0x2cd   : > { %v4632_v42 = vmax.f32 %v4485_v27, 0.0  ;;  %v2036_v59 = vpop.f32.mrb[216].mxu0  ;;  %v3560_v47 = vpop.f32.mrb[216].mxu1 }
 0x2ce   : > { %v5153_v21 = vsel %vm4979_vm0, %v5150_v29, %v5152_v41  ;;  %v5154_v13 = vrot.slane %v4191_v30, 1  ;;  %v3892_v50 = vmul.f32 %v8693_v51, %v2036_v59  ;;  %v4339_v9 = vmul.f32 %v8693_v51, %v3560_v47  ;;  %v2038_v23 = vpop.f32.mrb[217].mxu0  ;;  %v3562_v25 = vpop.f32.mrb[217].mxu1 }
 0x2cf   : > { %v5492_v19 = vmax.f32 %v4777_v28, %v5153_v21  ;;  %v4779_v61 = vmax.f32 %v4191_v30, %v4632_v42  ;;  %v2039_v3 = vpop.f32.mrb[218].mxu0  ;;  %v3563_v39 = vpop.f32.mrb[218].mxu1 }
 0x2d0   : > { %v5155_v34 = vsel %vm4979_vm0, %v5152_v41, %v5154_v13  ;;  %v4045_v4 = vadd.f32 %v8676_v32, %v3892_v50  ;;  %v4486_v54 = vadd.f32 %v8676_v32, %v4339_v9  ;;  %v3893_v7 = vmul.f32 %v8693_v51, %v2039_v3  ;;  %v2041_v33 = vpop.f32.mrb[219].mxu0  ;;  %v3565_v53 = vpop.f32.mrb[219].mxu1  ;;  %v7441_v3 = vld [vmem:[%s7593_s25 + $0x530] ss:$8 sps:$4 sm:$0xff]  }
 0x2d1   : > { %v8897_v56 = vmax.f32 %v8809_v8, %v5492_v19  ;;  %v5493_v57 = vmax.f32 %v4778_v44, %v5155_v34  ;;  %v4340_v15 = vmul.f32 %v8693_v51, %v3563_v39  ;;  %v7444_v39 = vld [vmem:[%s7597_s26 + $0x530] ss:$8 sps:$4 sm:$0xff]  }
 0x2d2   : > { %v4192_v18 = vmax.f32 %v4045_v4, 0.0  ;;  %v4633_v48 = vmax.f32 %v4486_v54, 0.0  ;;  %v4046_v63 = vadd.f32 %v8676_v32, %v3893_v7  ;;  %2244 = vmatmul.mubr.bf16.gmra.mrb[68].mxu0 %v7429_v62  ;;  %3768 = vmatmul.mubr.bf16.gmra.mrb[68].mxu1 %v7432_v0 }
 0x2d3   : > { %v8902_v29 = vmax.f32 %v8819_v1, %v5493_v57  ;;  %v4487_v45 = vadd.f32 %v8676_v32, %v4340_v15  ;;  %2251 = vmatprep.mubr.bf16.mxu0 %v7437_v16  ;;  %3775 = vmatprep.mubr.bf16.mxu1 %v7440_v58 }
 0x2d4   : > { %v5156_v8 = vrot.slane %v4192_v18, 1  ;;  %v4780_v40 = vmax.f32 %v4192_v18, %v4633_v48  ;;  %v4193_v55 = vmax.f32 %v4046_v63, 0.0 }
 0x2d5   : > { %v4634_v26 = vmax.f32 %v4487_v45, 0.0  ;;  %v2044_v2 = vpop.f32.mrb[220].mxu0  ;;  %v3568_v28 = vpop.f32.mrb[220].mxu1 }
 0x2d6   : > { %v5157_v24 = vsel %vm4979_vm0, %v5154_v13, %v5156_v8  ;;  %v5158_v38 = vrot.slane %v4193_v55, 1  ;;  %v3894_v1 = vmul.f32 %v8693_v51, %v2044_v2  ;;  %v4341_v5 = vmul.f32 %v8693_v51, %v3568_v28  ;;  %v2046_v35 = vpop.f32.mrb[221].mxu0  ;;  %v3570_v31 = vpop.f32.mrb[221].mxu1 }
 0x2d7   : > { %v5494_v36 = vmax.f32 %v4779_v61, %v5157_v24  ;;  %v4781_v46 = vmax.f32 %v4193_v55, %v4634_v26  ;;  %v2047_v43 = vpop.f32.mrb[222].mxu0  ;;  %v3571_v10 = vpop.f32.mrb[222].mxu1 }
 0x2d8   : > { %v5159_v12 = vsel %vm4979_vm0, %v5156_v8, %v5158_v38  ;;  %v4047_v22 = vadd.f32 %v8676_v32, %v3894_v1  ;;  %v4488_v27 = vadd.f32 %v8676_v32, %v4341_v5  ;;  %v2048_v41 = vpop.f32.mrb[223].mxu0  ;;  %v3572_v44 = vpop.f32.mrb[223].mxu1 }
 0x2d9   : > { %v8916_v30 = vmax.f32 %v8832_v37, %v5494_v36  ;;  %v5495_v42 = vmax.f32 %v4780_v40, %v5159_v12 }
 0x2da   : > { %v4194_v59 = vmax.f32 %v4047_v22, 0.0  ;;  %v4635_v47 = vmax.f32 %v4488_v27, 0.0  ;;  %2252 = vmatmul.mubr.bf16.gmra.mrb[72].mxu0 %v7435_v49  ;;  %3776 = vmatmul.mubr.bf16.gmra.mrb[72].mxu1 %v7438_v14 }
 0x2db   : > { %v8919_v62 = vmax.f32 %v8841_v20, %v5495_v42  ;;  %2259 = vmatprep.mubr.bf16.mxu0 %v7443_v17  ;;  %3783 = vmatprep.mubr.bf16.mxu1 %v7446_v60 }
 0x2dc   : > { %v5160_v21 = vrot.slane %v4194_v59, 1  ;;  %v4782_v13 = vmax.f32 %v4194_v59, %v4635_v47 }
 0x2dd   : > { %v2051_v50 = vpop.f32.mrb[224].mxu0  ;;  %v3575_v9 = vpop.f32.mrb[224].mxu1 }
 0x2de   : > { %v5161_v23 = vsel %vm4979_vm0, %v5158_v38, %v5160_v21  ;;  %v5497_v37 = vmax.f32 %v4782_v13, %v5160_v21  ;;  %v3895_v25 = vmul.f32 %v8693_v51, %v2051_v50  ;;  %v4342_v0 = vmul.f32 %v8693_v51, %v3575_v9  ;;  %v2053_v19 = vpop.f32.mrb[225].mxu0  ;;  %v3577_v61 = vpop.f32.mrb[225].mxu1 }
 0x2df   : > { %v5496_v16 = vmax.f32 %v4781_v46, %v5161_v23  ;;  %v2054_v20 = vpop.f32.mrb[226].mxu0  ;;  %v3578_v58 = vpop.f32.mrb[226].mxu1 }
 0x2e0   : > { %v8927_v34 = vmax.f32 %v8846_v11, %v5497_v37  ;;  %v4048_v4 = vadd.f32 %v8676_v32, %v3895_v25  ;;  %v4489_v54 = vadd.f32 %v8676_v32, %v4342_v0  ;;  %v3896_v7 = vmul.f32 %v8693_v51, %v2054_v20  ;;  %v2056_v33 = vpop.f32.mrb[227].mxu0  ;;  %v3580_v53 = vpop.f32.mrb[227].mxu1 }
 0x2e1   : > { %v8933_v57 = vmax.f32 %v8853_v6, %v5496_v16  ;;  %v4343_v15 = vmul.f32 %v8693_v51, %v3578_v58  ;;  %v8960_v16 = vld [vmem:[%s9379_s4] ss:$0 sm:$0xff] }
 0x2e2   : > { %v4195_v18 = vmax.f32 %v4048_v4, 0.0  ;;  %v4636_v48 = vmax.f32 %v4489_v54, 0.0  ;;  %v4049_v63 = vadd.f32 %v8676_v32, %v3896_v7  ;;  %2260 = vmatmul.mubr.bf16.gmra.mrb[76].mxu0 %v7441_v3  ;;  %3784 = vmatmul.mubr.bf16.gmra.mrb[76].mxu1 %v7444_v39 }
 0x2e3   : > { %v4490_v11 = vadd.f32 %v8676_v32, %v4343_v15 }
 0x2e4   : > { %v4783_v45 = vmax.f32 %v4195_v18, %v4636_v48  ;;  %v4196_v8 = vmax.f32 %v4049_v63, 0.0  ;;  %v5162_v2 = vrot.slane %v4195_v18, 1 }
 0x2e5   : > { %v4637_v40 = vmax.f32 %v4490_v11, 0.0  ;;  %v2059_v55 = vpop.f32.mrb[228].mxu0  ;;  %v3583_v26 = vpop.f32.mrb[228].mxu1 }
 0x2e6   : > { %v5163_v28 = vrot.slane %v4196_v8, 1  ;;  %v3897_v6 = vmul.f32 %v8693_v51, %v2059_v55  ;;  %v4344_v49 = vmul.f32 %v8693_v51, %v3583_v26  ;;  %v2061_v24 = vpop.f32.mrb[229].mxu0  ;;  %v3585_v38 = vpop.f32.mrb[229].mxu1 }
 0x2e7   : > { %v4784_v1 = vmax.f32 %v4196_v8, %v4637_v40  ;;  %v2062_v5 = vpop.f32.mrb[230].mxu0  ;;  %v3586_v35 = vpop.f32.mrb[230].mxu1 }
 0x2e8   : > { %v5164_v31 = vsel %vm4979_vm0, %v5162_v2, %v5163_v28  ;;  %v4050_v14 = vadd.f32 %v8676_v32, %v3897_v6  ;;  %v4491_v36 = vadd.f32 %v8676_v32, %v4344_v49  ;;  %v3898_v46 = vmul.f32 %v8693_v51, %v2062_v5  ;;  %v2064_v43 = vpop.f32.mrb[231].mxu0  ;;  %v3588_v10 = vpop.f32.mrb[231].mxu1  ;;  %v8979_v49 = vld [vmem:[%s9378_s3] ss:$0 sm:$0xff] }
 0x2e9   : > { %v8944_v17 = vmax.f32 %v4783_v45, %v5164_v31  ;;  %v4345_v60 = vmul.f32 %v8693_v51, %v3586_v35 }
 0x2ea   : > { %v4197_v12 = vmax.f32 %v4050_v14, 0.0  ;;  %v4638_v22 = vmax.f32 %v4491_v36, 0.0  ;;  %v4051_v27 = vadd.f32 %v8676_v32, %v3898_v46 }
 0x2eb   : > { %v5859_v41 = vmax.f32 %v8882_v52, %v8944_v17  ;;  %v4492_v44 = vadd.f32 %v8676_v32, %v4345_v60 }
 0x2ec   : > { %v5165_v42 = vrot.slane %v4197_v12, 1  ;;  %v4785_v59 = vmax.f32 %v4197_v12, %v4638_v22  ;;  %v4198_v47 = vmax.f32 %v4051_v27, 0.0 }
 0x2ed   : > { %v4639_v21 = vmax.f32 %v4492_v44, 0.0  ;;  %v2067_v13 = vpop.f32.mrb[232].mxu0  ;;  %v3591_v50 = vpop.f32.mrb[232].mxu1 }
 0x2ee   : > { %v5166_v9 = vsel %vm4979_vm0, %v5163_v28, %v5165_v42  ;;  %v5167_v23 = vrot.slane %v4198_v47, 1  ;;  %v3899_v37 = vmul.f32 %v8693_v51, %v2067_v13  ;;  %v4346_v25 = vmul.f32 %v8693_v51, %v3591_v50  ;;  %v2069_v0 = vpop.f32.mrb[233].mxu0  ;;  %v3593_v19 = vpop.f32.mrb[233].mxu1 }
 0x2ef   : > { %v8954_v61 = vmax.f32 %v4784_v1, %v5166_v9  ;;  %v4786_v52 = vmax.f32 %v4198_v47, %v4639_v21  ;;  %v2070_v3 = vpop.f32.mrb[234].mxu0  ;;  %v3594_v32 = vpop.f32.mrb[234].mxu1 }
 0x2f0   : > { %v5168_v39 = vsel %vm4979_vm0, %v5165_v42, %v5167_v23  ;;  %v4052_v20 = vadd.f32 %v8960_v16, %v3899_v37  ;;  %v4493_v58 = vadd.f32 %v8960_v16, %v4346_v25  ;;  %v3900_v4 = vmul.f32 %v8693_v51, %v2070_v3  ;;  %v2072_v54 = vpop.f32.mrb[235].mxu0  ;;  %v3596_v7 = vpop.f32.mrb[235].mxu1 }
 0x2f1   : > { %v5860_v33 = vmax.f32 %v8897_v56, %v8954_v61  ;;  %v8967_v53 = vmax.f32 %v4785_v59, %v5168_v39  ;;  %v4347_v15 = vmul.f32 %v8693_v51, %v3594_v32 }
 0x2f2   : > { %v4199_v18 = vmax.f32 %v4052_v20, 0.0  ;;  %v4640_v48 = vmax.f32 %v4493_v58, 0.0  ;;  %v4053_v63 = vadd.f32 %v8960_v16, %v3900_v4 }
 0x2f3   : > { %v6812_v11 = vpack.c.bf16 %v5860_v33, %v5859_v41  ;;  %v5861_v45 = vmax.f32 %v8902_v29, %v8967_v53  ;;  %v4494_v8 = vadd.f32 %v8960_v16, %v4347_v15 }
 0x2f4   : > { %v5169_v40 = vrot.slane %v4199_v18, 1  ;;  %v4787_v55 = vmax.f32 %v4199_v18, %v4640_v48  ;;  %v4200_v26 = vmax.f32 %v4053_v63, 0.0 }
 0x2f5   : > { %6873 = vst [vmem:[%s8022_s27 + $0xa8] sm:$0xff] %v6812_v11   ;;  %v4641_v2 = vmax.f32 %v4494_v8, 0.0  ;;  %v2075_v56 = vpop.f32.mrb[236].mxu0  ;;  %v3599_v28 = vpop.f32.mrb[236].mxu1 }
 0x2f6   : > { %v5170_v6 = vsel %vm4979_vm0, %v5167_v23, %v5169_v40  ;;  %v5171_v51 = vrot.slane %v4200_v26, 1  ;;  %v3901_v24 = vmul.f32 %v8979_v49, %v2075_v56  ;;  %v4348_v29 = vmul.f32 %v8979_v49, %v3599_v28  ;;  %v2077_v38 = vpop.f32.mrb[237].mxu0  ;;  %v3601_v1 = vpop.f32.mrb[237].mxu1 }
 0x2f7   : > { %v8983_v5 = vmax.f32 %v4786_v52, %v5170_v6  ;;  %v4788_v35 = vmax.f32 %v4200_v26, %v4641_v2  ;;  %v2078_v31 = vpop.f32.mrb[238].mxu0  ;;  %v3602_v14 = vpop.f32.mrb[238].mxu1 }
 0x2f8   : > { %v5172_v36 = vsel %vm4979_vm0, %v5169_v40, %v5171_v51  ;;  %v4054_v46 = vadd.f32 %v8960_v16, %v3901_v24  ;;  %v4495_v43 = vadd.f32 %v8960_v16, %v4348_v29  ;;  %v2079_v10 = vpop.f32.mrb[239].mxu0  ;;  %v3603_v60 = vpop.f32.mrb[239].mxu1 }
 0x2f9   : > { %v5862_v12 = vmax.f32 %v8916_v30, %v8983_v5  ;;  %v8990_v22 = vmax.f32 %v4787_v55, %v5172_v36 }
 0x2fa   : > { %v4201_v27 = vmax.f32 %v4054_v46, 0.0  ;;  %v4642_v41 = vmax.f32 %v4495_v43, 0.0 }
 0x2fb   : > { %v6817_v44 = vpack.c.bf16 %v5862_v12, %v5861_v45  ;;  %v5863_v42 = vmax.f32 %v8919_v62, %v8990_v22 }
 0x2fc   : > { %v5173_v59 = vrot.slane %v4201_v27, 1  ;;  %v4789_v47 = vmax.f32 %v4201_v27, %v4642_v41 }
 0x2fd   : > { %6874 = vst [vmem:[%s8022_s27 + $0xb0] sm:$0xff] %v6817_v44   ;;  %v2082_v21 = vpop.f32.mrb[240].mxu0  ;;  %v3606_v13 = vpop.f32.mrb[240].mxu1 }
 0x2fe   : > { %v5174_v50 = vsel %vm4979_vm0, %v5171_v51, %v5173_v59  ;;  %v8996_v9 = vmax.f32 %v4789_v47, %v5173_v59  ;;  %v3902_v23 = vmul.f32 %v8979_v49, %v2082_v21  ;;  %v4349_v30 = vmul.f32 %v8979_v49, %v3606_v13  ;;  %v2084_v37 = vpop.f32.mrb[241].mxu0  ;;  %v3608_v25 = vpop.f32.mrb[241].mxu1 }
 0x2ff   : > { %v9000_v0 = vmax.f32 %v4788_v35, %v5174_v50  ;;  %v2085_v19 = vpop.f32.mrb[242].mxu0  ;;  %v3609_v62 = vpop.f32.mrb[242].mxu1 }
 0x300   : > { %v5865_v52 = vmax.f32 %v8927_v34, %v8996_v9  ;;  %v4055_v3 = vadd.f32 %v8960_v16, %v3902_v23  ;;  %v4496_v32 = vadd.f32 %v8960_v16, %v4349_v30  ;;  %v3903_v39 = vmul.f32 %v8979_v49, %v2085_v19  ;;  %v2087_v20 = vpop.f32.mrb[243].mxu0  ;;  %v3611_v58 = vpop.f32.mrb[243].mxu1 }
 0x301   : > { %v5864_v4 = vmax.f32 %v8933_v57, %v9000_v0  ;;  %v4350_v54 = vmul.f32 %v8979_v49, %v3609_v62 }
 0x302   : > { %v6712_v7 = vpack.c.bf16 %v5865_v52, %v5865_v52  ;;  %v4202_v33 = vmax.f32 %v4055_v3, 0.0  ;;  %v4643_v15 = vmax.f32 %v4496_v32, 0.0  ;;  %v4056_v18 = vadd.f32 %v8960_v16, %v3903_v39 }
 0x303   : > { %v6822_v34 = vpack.c.bf16 %v5864_v4, %v5863_v42  ;;  %v4497_v48 = vadd.f32 %v8960_v16, %v4350_v54 }
 0x304   : > { %6617 = vst [vmem:[%s8022_s27 + $0xc0] sm:$0x1] %v6712_v7  ;;  %v4790_v63 = vmax.f32 %v4202_v33, %v4643_v15  ;;  %v4203_v11 = vmax.f32 %v4056_v18, 0.0  ;;  %v5175_v55 = vrot.slane %v4202_v33, 1 }
 0x305   : > { %6875 = vst [vmem:[%s8022_s27 + $0xb8] sm:$0xff] %v6822_v34   ;;  %v4644_v45 = vmax.f32 %v4497_v48, 0.0  ;;  %v2090_v8 = vpop.f32.mrb[244].mxu0  ;;  %v3614_v40 = vpop.f32.mrb[244].mxu1 }
 0x306   : > { %v5176_v26 = vrot.slane %v4203_v11, 1  ;;  %v3904_v57 = vmul.f32 %v8979_v49, %v2090_v8  ;;  %v4351_v2 = vmul.f32 %v8979_v49, %v3614_v40  ;;  %v2092_v56 = vpop.f32.mrb[245].mxu0  ;;  %v3616_v28 = vpop.f32.mrb[245].mxu1 }
 0x307   : > { %v4791_v6 = vmax.f32 %v4203_v11, %v4644_v45  ;;  %v2093_v51 = vpop.f32.mrb[246].mxu0  ;;  %v3617_v24 = vpop.f32.mrb[246].mxu1 }
 0x308   : > { %v5177_v29 = vsel %vm4979_vm0, %v5175_v55, %v5176_v26  ;;  %v4057_v38 = vadd.f32 %v8960_v16, %v3904_v57  ;;  %v4498_v1 = vadd.f32 %v8960_v16, %v4351_v2  ;;  %v3905_v35 = vmul.f32 %v8979_v49, %v2093_v51  ;;  %v2095_v31 = vpop.f32.mrb[247].mxu0  ;;  %v3619_v14 = vpop.f32.mrb[247].mxu1 }
 0x309   : > { %v5505_v36 = vmax.f32 %v4790_v63, %v5177_v29  ;;  %v4352_v46 = vmul.f32 %v8979_v49, %v3617_v24 }
 0x30a   : > { %v4204_v43 = vmax.f32 %v4057_v38, 0.0  ;;  %v4645_v10 = vmax.f32 %v4498_v1, 0.0  ;;  %v4058_v60 = vadd.f32 %v8960_v16, %v3905_v35 }
 0x30b   : > { %v9023_v12 = vmax.f32 %v8944_v17, %v5505_v36  ;;  %v4499_v27 = vadd.f32 %v8960_v16, %v4352_v46 }
 0x30c   : > { %v5178_v41 = vrot.slane %v4204_v43, 1  ;;  %v4792_v44 = vmax.f32 %v4204_v43, %v4645_v10  ;;  %v4205_v42 = vmax.f32 %v4058_v60, 0.0 }
 0x30d   : > { %v4646_v59 = vmax.f32 %v4499_v27, 0.0  ;;  %v2098_v47 = vpop.f32.mrb[248].mxu0  ;;  %v3622_v21 = vpop.f32.mrb[248].mxu1 }
 0x30e   : > { %v5179_v13 = vsel %vm4979_vm0, %v5176_v26, %v5178_v41  ;;  %v5180_v50 = vrot.slane %v4205_v42, 1  ;;  %v3906_v23 = vmul.f32 %v8979_v49, %v2098_v47  ;;  %v4353_v30 = vmul.f32 %v8979_v49, %v3622_v21  ;;  %v2100_v37 = vpop.f32.mrb[249].mxu0  ;;  %v3624_v25 = vpop.f32.mrb[249].mxu1 }
 0x30f   : > { %v5506_v19 = vmax.f32 %v4791_v6, %v5179_v13  ;;  %v4793_v17 = vmax.f32 %v4205_v42, %v4646_v59  ;;  %v2101_v62 = vpop.f32.mrb[250].mxu0  ;;  %v3625_v52 = vpop.f32.mrb[250].mxu1 }
 0x310   : > { %v5181_v3 = vsel %vm4979_vm0, %v5178_v41, %v5180_v50  ;;  %v4059_v32 = vadd.f32 %v8960_v16, %v3906_v23  ;;  %v4500_v39 = vadd.f32 %v8960_v16, %v4353_v30  ;;  %v3907_v20 = vmul.f32 %v8979_v49, %v2101_v62  ;;  %v2103_v58 = vpop.f32.mrb[251].mxu0  ;;  %v3627_v4 = vpop.f32.mrb[251].mxu1 }
 0x311   : > { %v9034_v54 = vmax.f32 %v8954_v61, %v5506_v19  ;;  %v5507_v7 = vmax.f32 %v4792_v44, %v5181_v3  ;;  %v4354_v33 = vmul.f32 %v8979_v49, %v3625_v52 }
 0x312   : > { %v4206_v15 = vmax.f32 %v4059_v32, 0.0  ;;  %v4647_v18 = vmax.f32 %v4500_v39, 0.0  ;;  %v4060_v34 = vadd.f32 %v8960_v16, %v3907_v20 }
 0x313   : > { %v9039_v48 = vmax.f32 %v8967_v53, %v5507_v7  ;;  %v4501_v63 = vadd.f32 %v8960_v16, %v4354_v33 }
 0x314   : > { %v5182_v11 = vrot.slane %v4206_v15, 1  ;;  %v4794_v45 = vmax.f32 %v4206_v15, %v4647_v18  ;;  %v4207_v8 = vmax.f32 %v4060_v34, 0.0 }
 0x315   : > { %v4648_v40 = vmax.f32 %v4501_v63, 0.0  ;;  %v2106_v55 = vpop.f32.mrb[252].mxu0  ;;  %v3630_v26 = vpop.f32.mrb[252].mxu1 }
 0x316   : > { %v5183_v61 = vsel %vm4979_vm0, %v5180_v50, %v5182_v11  ;;  %v5184_v57 = vrot.slane %v4207_v8, 1  ;;  %v3908_v2 = vmul.f32 %v8979_v49, %v2106_v55  ;;  %v4355_v56 = vmul.f32 %v8979_v49, %v3630_v26  ;;  %v2108_v28 = vpop.f32.mrb[253].mxu0  ;;  %v3632_v6 = vpop.f32.mrb[253].mxu1 }
 0x317   : > { %v5508_v51 = vmax.f32 %v4793_v17, %v5183_v61  ;;  %v4795_v53 = vmax.f32 %v4207_v8, %v4648_v40  ;;  %v2109_v24 = vpop.f32.mrb[254].mxu0  ;;  %v3633_v29 = vpop.f32.mrb[254].mxu1 }
 0x318   : > { %v5185_v38 = vsel %vm4979_vm0, %v5182_v11, %v5184_v57  ;;  %v4061_v1 = vadd.f32 %v8960_v16, %v3908_v2  ;;  %v4502_v35 = vadd.f32 %v8960_v16, %v4355_v56  ;;  %v2110_v31 = vpop.f32.mrb[255].mxu0  ;;  %v3634_v14 = vpop.f32.mrb[255].mxu1 }
 0x319   : > { %v9049_v36 = vmax.f32 %v8983_v5, %v5508_v51  ;;  %v5509_v46 = vmax.f32 %v4794_v45, %v5185_v38 }
 0x31a   : > { %v4208_v43 = vmax.f32 %v4061_v1, 0.0  ;;  %v4649_v10 = vmax.f32 %v4502_v35, 0.0 }
 0x31b   : > { %v9052_v60 = vmax.f32 %v8990_v22, %v5509_v46 }
 0x31c   : > { %v5186_v27 = vrot.slane %v4208_v43, 1  ;;  %v4796_v41 = vmax.f32 %v4208_v43, %v4649_v10 }
 0x31d   : > { %v2113_v44 = vpop.f32.mrb[0].mxu0  ;;  %v3637_v42 = vpop.f32.mrb[0].mxu1 }
 0x31e   : > { %v5187_v59 = vsel %vm4979_vm0, %v5184_v57, %v5186_v27  ;;  %v5511_v47 = vmax.f32 %v4796_v41, %v5186_v27  ;;  %v3909_v21 = vmul.f32 %v8979_v49, %v2113_v44  ;;  %v4356_v13 = vmul.f32 %v8979_v49, %v3637_v42  ;;  %v2115_v50 = vpop.f32.mrb[1].mxu0  ;;  %v3639_v5 = vpop.f32.mrb[1].mxu1 }
 0x31f   : > { %v5510_v23 = vmax.f32 %v4795_v53, %v5187_v59  ;;  %v2116_v30 = vpop.f32.mrb[2].mxu0  ;;  %v3640_v37 = vpop.f32.mrb[2].mxu1 }
 0x320   : > { %v9058_v25 = vmax.f32 %v8996_v9, %v5511_v47  ;;  %v4062_v22 = vadd.f32 %v8960_v16, %v3909_v21  ;;  %v4503_v19 = vadd.f32 %v8960_v16, %v4356_v13  ;;  %v3910_v17 = vmul.f32 %v8979_v49, %v2116_v30  ;;  %v2118_v62 = vpop.f32.mrb[3].mxu0  ;;  %v3642_v52 = vpop.f32.mrb[3].mxu1 }
 0x321   : > { %v9064_v3 = vmax.f32 %v9000_v0, %v5510_v23  ;;  %v4357_v32 = vmul.f32 %v8979_v49, %v3640_v37 }
 0x322   : > { %v4209_v39 = vmax.f32 %v4062_v22, 0.0  ;;  %v4650_v20 = vmax.f32 %v4503_v19, 0.0  ;;  %v4063_v58 = vadd.f32 %v8960_v16, %v3910_v17 }
 0x323   : > { %v4504_v9 = vadd.f32 %v8960_v16, %v4357_v32 }
 0x324   : > { %v4797_v4 = vmax.f32 %v4209_v39, %v4650_v20  ;;  %v4210_v7 = vmax.f32 %v4063_v58, 0.0  ;;  %v5188_v34 = vrot.slane %v4209_v39, 1 }
 0x325   : > { %v4651_v33 = vmax.f32 %v4504_v9, 0.0  ;;  %v2121_v15 = vpop.f32.mrb[4].mxu0  ;;  %v3645_v18 = vpop.f32.mrb[4].mxu1 }
 0x326   : > { %v5189_v63 = vrot.slane %v4210_v7, 1  ;;  %v3911_v11 = vmul.f32 %v8979_v49, %v2121_v15  ;;  %v4358_v0 = vmul.f32 %v8979_v49, %v3645_v18  ;;  %v2123_v45 = vpop.f32.mrb[5].mxu0  ;;  %v3647_v8 = vpop.f32.mrb[5].mxu1 }
 0x327   : > { %v4798_v40 = vmax.f32 %v4210_v7, %v4651_v33  ;;  %v2124_v55 = vpop.f32.mrb[6].mxu0  ;;  %v3648_v26 = vpop.f32.mrb[6].mxu1 }
 0x328   : > { %v5190_v61 = vsel %vm4979_vm0, %v5188_v34, %v5189_v63  ;;  %v4064_v57 = vadd.f32 %v8960_v16, %v3911_v11  ;;  %v4505_v2 = vadd.f32 %v8960_v16, %v4358_v0  ;;  %v3912_v56 = vmul.f32 %v8979_v49, %v2124_v55  ;;  %v2126_v28 = vpop.f32.mrb[7].mxu0  ;;  %v3650_v6 = vpop.f32.mrb[7].mxu1 }
 0x329   : > { %v9075_v51 = vmax.f32 %v4797_v4, %v5190_v61  ;;  %v4359_v53 = vmul.f32 %v8979_v49, %v3648_v26 }
 0x32a   : > { %v4211_v24 = vmax.f32 %v4064_v57, 0.0  ;;  %v4652_v29 = vmax.f32 %v4505_v2, 0.0  ;;  %v4065_v38 = vadd.f32 %v8960_v16, %v3912_v56 }
 0x32b   : > { %v5910_v1 = vmax.f32 %v9023_v12, %v9075_v51  ;;  %v4506_v35 = vadd.f32 %v8960_v16, %v4359_v53 }
 0x32c   : > { %v5191_v31 = vrot.slane %v4211_v24, 1  ;;  %v4799_v14 = vmax.f32 %v4211_v24, %v4652_v29  ;;  %v4212_v46 = vmax.f32 %v4065_v38, 0.0 }
 0x32d   : > { %v6713_v43 = vpack.c.bf16 %v5910_v1, %v5910_v1  ;;  %v4653_v10 = vmax.f32 %v4506_v35, 0.0  ;;  %v2129_v27 = vpop.f32.mrb[8].mxu0  ;;  %v3653_v41 = vpop.f32.mrb[8].mxu1 }
 0x32e   : > { %v5192_v44 = vsel %vm4979_vm0, %v5189_v63, %v5191_v31  ;;  %v5193_v42 = vrot.slane %v4212_v46, 1  ;;  %v3913_v59 = vmul.f32 %v8979_v49, %v2129_v27  ;;  %v4360_v47 = vmul.f32 %v8979_v49, %v3653_v41  ;;  %v2131_v21 = vpop.f32.mrb[9].mxu0  ;;  %v3655_v13 = vpop.f32.mrb[9].mxu1 }
 0x32f   : > { %6625 = vst [vmem:[%s8022_s27 + $0xc4] sm:$0xf] %v6713_v43  ;;  %v9086_v12 = vmax.f32 %v4798_v40, %v5192_v44  ;;  %v4800_v50 = vmax.f32 %v4212_v46, %v4653_v10  ;;  %v2132_v5 = vpop.f32.mrb[10].mxu0  ;;  %v3656_v23 = vpop.f32.mrb[10].mxu1 }
 0x330   : > { %v5194_v30 = vsel %vm4979_vm0, %v5191_v31, %v5193_v42  ;;  %v4066_v37 = vadd.f32 %v8960_v16, %v3913_v59  ;;  %v4507_v22 = vadd.f32 %v8960_v16, %v4360_v47  ;;  %v3914_v19 = vmul.f32 %v8979_v49, %v2132_v5  ;;  %v2134_v17 = vpop.f32.mrb[11].mxu0  ;;  %v3658_v62 = vpop.f32.mrb[11].mxu1 }
 0x331   : > { %v5911_v52 = vmax.f32 %v9034_v54, %v9086_v12  ;;  %v9094_v32 = vmax.f32 %v4799_v14, %v5194_v30  ;;  %v4361_v39 = vmul.f32 %v8979_v49, %v3656_v23 }
 0x332   : > { %v4213_v20 = vmax.f32 %v4066_v37, 0.0  ;;  %v4654_v58 = vmax.f32 %v4507_v22, 0.0  ;;  %v4067_v9 = vadd.f32 %v8960_v16, %v3914_v19 }
 0x333   : > { %v5912_v4 = vmax.f32 %v9039_v48, %v9094_v32  ;;  %v4508_v7 = vadd.f32 %v8960_v16, %v4361_v39 }
 0x334   : > { %v5195_v33 = vrot.slane %v4213_v20, 1  ;;  %v4801_v15 = vmax.f32 %v4213_v20, %v4654_v58  ;;  %v4214_v18 = vmax.f32 %v4067_v9, 0.0 }
 0x335   : > { %v6827_v34 = vpack.c.bf16 %v5912_v4, %v5911_v52  ;;  %v4655_v63 = vmax.f32 %v4508_v7, 0.0  ;;  %v2137_v54 = vpop.f32.mrb[12].mxu0  ;;  %v3661_v11 = vpop.f32.mrb[12].mxu1 }
 0x336   : > { %v5196_v0 = vsel %vm4979_vm0, %v5193_v42, %v5195_v33  ;;  %v5197_v45 = vrot.slane %v4214_v18, 1  ;;  %v3915_v8 = vmul.f32 %v8979_v49, %v2137_v54  ;;  %v4362_v40 = vmul.f32 %v8979_v49, %v3661_v11  ;;  %v2139_v55 = vpop.f32.mrb[13].mxu0  ;;  %v3663_v26 = vpop.f32.mrb[13].mxu1 }
 0x337   : > { %6876 = vst [vmem:[%s8022_s27 + $0xc8] sm:$0xff] %v6827_v34   ;;  %v9105_v48 = vmax.f32 %v4800_v50, %v5196_v0  ;;  %v4802_v61 = vmax.f32 %v4214_v18, %v4655_v63  ;;  %v2140_v57 = vpop.f32.mrb[14].mxu0  ;;  %v3664_v2 = vpop.f32.mrb[14].mxu1 }
 0x338   : > { %v5198_v56 = vsel %vm4979_vm0, %v5195_v33, %v5197_v45  ;;  %v4068_v28 = vadd.f32 %v8960_v16, %v3915_v8  ;;  %v4509_v6 = vadd.f32 %v8960_v16, %v4362_v40  ;;  %v2141_v53 = vpop.f32.mrb[15].mxu0  ;;  %v3665_v24 = vpop.f32.mrb[15].mxu1 }
 0x339   : > { %v5913_v29 = vmax.f32 %v9049_v36, %v9105_v48  ;;  %v9112_v38 = vmax.f32 %v4801_v15, %v5198_v56 }
 0x33a   : > { %v4215_v1 = vmax.f32 %v4068_v28, 0.0  ;;  %v4656_v35 = vmax.f32 %v4509_v6, 0.0 }
 0x33b   : > { %v5914_v31 = vmax.f32 %v9052_v60, %v9112_v38 }
 0x33c   : > { %v5199_v14 = vrot.slane %v4215_v1, 1  ;;  %v4803_v46 = vmax.f32 %v4215_v1, %v4656_v35 }
 0x33d   : > { %v6832_v43 = vpack.c.bf16 %v5914_v31, %v5913_v29  ;;  %v2144_v10 = vpop.f32.mrb[16].mxu0  ;;  %v3668_v27 = vpop.f32.mrb[16].mxu1 }
 0x33e   : > { %v5200_v41 = vsel %vm4979_vm0, %v5197_v45, %v5199_v14  ;;  %v9117_v44 = vmax.f32 %v4803_v46, %v5199_v14  ;;  %v3916_v42 = vmul.f32 %v8979_v49, %v2144_v10  ;;  %v4363_v36 = vmul.f32 %v8979_v49, %v3668_v27  ;;  %v2146_v59 = vpop.f32.mrb[17].mxu0  ;;  %v3670_v47 = vpop.f32.mrb[17].mxu1 }
 0x33f   : > { %6877 = vst [vmem:[%s8022_s27 + $0xd0] sm:$0xff] %v6832_v43   ;;  %v9122_v21 = vmax.f32 %v4802_v61, %v5200_v41  ;;  %v2147_v13 = vpop.f32.mrb[18].mxu0  ;;  %v3671_v60 = vpop.f32.mrb[18].mxu1 }
 0x340   : > { %v5916_v50 = vmax.f32 %v9058_v25, %v9117_v44  ;;  %v4069_v5 = vadd.f32 %v8960_v16, %v3916_v42  ;;  %v4510_v23 = vadd.f32 %v8960_v16, %v4363_v36  ;;  %v3917_v30 = vmul.f32 %v8979_v49, %v2147_v13  ;;  %v2149_v37 = vpop.f32.mrb[19].mxu0  ;;  %v3673_v22 = vpop.f32.mrb[19].mxu1 }
 0x341   : > { %v5915_v19 = vmax.f32 %v9064_v3, %v9122_v21  ;;  %v4364_v17 = vmul.f32 %v8979_v49, %v3671_v60 }
 0x342   : > { %v6719_v62 = vpack.c.bf16 %v5916_v50, %v5916_v50  ;;  %v4216_v52 = vmax.f32 %v4069_v5, 0.0  ;;  %v4657_v39 = vmax.f32 %v4510_v23, 0.0  ;;  %v4070_v20 = vadd.f32 %v8960_v16, %v3917_v30 }
 0x343   : > { %v6718_v25 = vpack.c.bf16 %v5915_v19, %v5915_v19  ;;  %v4511_v58 = vadd.f32 %v8960_v16, %v4364_v17 }
 0x344   : > { %6631 = vst [vmem:[%s8022_s27 + $0xdc] sm:$0x1] %v6719_v62  ;;  %v4804_v9 = vmax.f32 %v4216_v52, %v4657_v39  ;;  %v4217_v4 = vmax.f32 %v4070_v20, 0.0  ;;  %v5201_v18 = vrot.slane %v4216_v52, 1 }
 0x345   : > { %6630 = vst [vmem:[%s8022_s27 + $0xd8] sm:$0xf] %v6718_v25  ;;  %v4658_v7 = vmax.f32 %v4511_v58, 0.0  ;;  %v2152_v33 = vpop.f32.mrb[20].mxu0  ;;  %v3676_v15 = vpop.f32.mrb[20].mxu1 }
 0x346   : > { %v5202_v34 = vrot.slane %v4217_v4, 1  ;;  %v3918_v3 = vmul.f32 %v8979_v49, %v2152_v33  ;;  %v4365_v63 = vmul.f32 %v8979_v49, %v3676_v15  ;;  %v2154_v54 = vpop.f32.mrb[21].mxu0  ;;  %v3678_v11 = vpop.f32.mrb[21].mxu1 }
 0x347   : > { %v4805_v0 = vmax.f32 %v4217_v4, %v4658_v7  ;;  %v2155_v45 = vpop.f32.mrb[22].mxu0  ;;  %v3679_v8 = vpop.f32.mrb[22].mxu1 }
 0x348   : > { %v5203_v40 = vsel %vm4979_vm0, %v5201_v18, %v5202_v34  ;;  %v4071_v55 = vadd.f32 %v8960_v16, %v3918_v3  ;;  %v4512_v26 = vadd.f32 %v8960_v16, %v4365_v63  ;;  %v3919_v61 = vmul.f32 %v8979_v49, %v2155_v45  ;;  %v2157_v57 = vpop.f32.mrb[23].mxu0  ;;  %v3681_v2 = vpop.f32.mrb[23].mxu1 }
 0x349   : > { %v5519_v56 = vmax.f32 %v4804_v9, %v5203_v40  ;;  %v4366_v28 = vmul.f32 %v8979_v49, %v3679_v8 }
 0x34a   : > { %v4218_v6 = vmax.f32 %v4071_v55, 0.0  ;;  %v4659_v53 = vmax.f32 %v4512_v26, 0.0  ;;  %v4072_v24 = vadd.f32 %v8960_v16, %v3919_v61 }
 0x34b   : > { %v9145_v29 = vmax.f32 %v9075_v51, %v5519_v56  ;;  %v4513_v1 = vadd.f32 %v8960_v16, %v4366_v28 }
 0x34c   : > { %v5204_v35 = vrot.slane %v4218_v6, 1  ;;  %v4806_v31 = vmax.f32 %v4218_v6, %v4659_v53  ;;  %v4219_v14 = vmax.f32 %v4072_v24, 0.0 }
 0x34d   : > { %v4660_v46 = vmax.f32 %v4513_v1, 0.0  ;;  %v2160_v43 = vpop.f32.mrb[24].mxu0  ;;  %v3684_v10 = vpop.f32.mrb[24].mxu1 }
 0x34e   : > { %v5205_v27 = vsel %vm4979_vm0, %v5202_v34, %v5204_v35  ;;  %v5206_v41 = vrot.slane %v4219_v14, 1  ;;  %v3920_v42 = vmul.f32 %v8979_v49, %v2160_v43  ;;  %v4367_v36 = vmul.f32 %v8979_v49, %v3684_v10  ;;  %v2162_v59 = vpop.f32.mrb[25].mxu0  ;;  %v3686_v47 = vpop.f32.mrb[25].mxu1 }
 0x34f   : > { %v5520_v13 = vmax.f32 %v4805_v0, %v5205_v27  ;;  %v4807_v51 = vmax.f32 %v4219_v14, %v4660_v46  ;;  %v2163_v60 = vpop.f32.mrb[26].mxu0  ;;  %v3687_v50 = vpop.f32.mrb[26].mxu1 }
 0x350   : > { %v5207_v5 = vsel %vm4979_vm0, %v5204_v35, %v5206_v41  ;;  %v4073_v23 = vadd.f32 %v8960_v16, %v3920_v42  ;;  %v4514_v30 = vadd.f32 %v8960_v16, %v4367_v36  ;;  %v3921_v37 = vmul.f32 %v8979_v49, %v2163_v60  ;;  %v2165_v22 = vpop.f32.mrb[27].mxu0  ;;  %v3689_v19 = vpop.f32.mrb[27].mxu1 }
 0x351   : > { %v9156_v17 = vmax.f32 %v9086_v12, %v5520_v13  ;;  %v5521_v62 = vmax.f32 %v4806_v31, %v5207_v5  ;;  %v4368_v52 = vmul.f32 %v8979_v49, %v3687_v50 }
 0x352   : > { %v4220_v39 = vmax.f32 %v4073_v23, 0.0  ;;  %v4661_v20 = vmax.f32 %v4514_v30, 0.0  ;;  %v4074_v25 = vadd.f32 %v8960_v16, %v3921_v37 }
 0x353   : > { %v9161_v58 = vmax.f32 %v9094_v32, %v5521_v62  ;;  %v4515_v9 = vadd.f32 %v8960_v16, %v4368_v52 }
 0x354   : > { %v5208_v4 = vrot.slane %v4220_v39, 1  ;;  %v4808_v7 = vmax.f32 %v4220_v39, %v4661_v20  ;;  %v4221_v33 = vmax.f32 %v4074_v25, 0.0 }
 0x355   : > { %v4662_v15 = vmax.f32 %v4515_v9, 0.0  ;;  %v2168_v18 = vpop.f32.mrb[28].mxu0  ;;  %v3692_v34 = vpop.f32.mrb[28].mxu1 }
 0x356   : > { %v5209_v12 = vsel %vm4979_vm0, %v5206_v41, %v5208_v4  ;;  %v5210_v3 = vrot.slane %v4221_v33, 1  ;;  %v3922_v63 = vmul.f32 %v8979_v49, %v2168_v18  ;;  %v4369_v54 = vmul.f32 %v8979_v49, %v3692_v34  ;;  %v2170_v11 = vpop.f32.mrb[29].mxu0  ;;  %v3694_v0 = vpop.f32.mrb[29].mxu1 }
 0x357   : > { %v5522_v45 = vmax.f32 %v4807_v51, %v5209_v12  ;;  %v4809_v32 = vmax.f32 %v4221_v33, %v4662_v15  ;;  %v2171_v8 = vpop.f32.mrb[30].mxu0  ;;  %v3695_v40 = vpop.f32.mrb[30].mxu1 }
 0x358   : > { %v5211_v55 = vsel %vm4979_vm0, %v5208_v4, %v5210_v3  ;;  %v4075_v26 = vadd.f32 %v8960_v16, %v3922_v63  ;;  %v4516_v61 = vadd.f32 %v8960_v16, %v4369_v54  ;;  %v2172_v57 = vpop.f32.mrb[31].mxu0  ;;  %v3696_v2 = vpop.f32.mrb[31].mxu1 }
 0x359   : > { %v9171_v56 = vmax.f32 %v9105_v48, %v5522_v45  ;;  %v5523_v28 = vmax.f32 %v4808_v7, %v5211_v55 }
 0x35a   : > { %v4222_v6 = vmax.f32 %v4075_v26, 0.0  ;;  %v4663_v53 = vmax.f32 %v4516_v61, 0.0 }
 0x35b   : > { %v9174_v24 = vmax.f32 %v9112_v38, %v5523_v28 }
 0x35c   : > { %v5212_v1 = vrot.slane %v4222_v6, 1  ;;  %v4810_v35 = vmax.f32 %v4222_v6, %v4663_v53 }
 0x35d   : > { %v2175_v31 = vpop.f32.mrb[32].mxu0  ;;  %v3699_v14 = vpop.f32.mrb[32].mxu1 }
 0x35e   : > { %v5213_v46 = vsel %vm4979_vm0, %v5210_v3, %v5212_v1  ;;  %v5525_v43 = vmax.f32 %v4810_v35, %v5212_v1  ;;  %v3923_v10 = vmul.f32 %v8979_v49, %v2175_v31  ;;  %v4370_v27 = vmul.f32 %v8979_v49, %v3699_v14  ;;  %v2177_v41 = vpop.f32.mrb[33].mxu0  ;;  %v3701_v48 = vpop.f32.mrb[33].mxu1 }
 0x35f   : > { %v5524_v42 = vmax.f32 %v4809_v32, %v5213_v46  ;;  %v2178_v36 = vpop.f32.mrb[34].mxu0  ;;  %v3702_v59 = vpop.f32.mrb[34].mxu1 }
 0x360   : > { %v9180_v47 = vmax.f32 %v9117_v44, %v5525_v43  ;;  %v4076_v38 = vadd.f32 %v8960_v16, %v3923_v10  ;;  %v4517_v13 = vadd.f32 %v8960_v16, %v4370_v27  ;;  %v3924_v51 = vmul.f32 %v8979_v49, %v2178_v36  ;;  %v2180_v60 = vpop.f32.mrb[35].mxu0  ;;  %v3704_v50 = vpop.f32.mrb[35].mxu1 }
 0x361   : > { %v9186_v5 = vmax.f32 %v9122_v21, %v5524_v42  ;;  %v4371_v23 = vmul.f32 %v8979_v49, %v3702_v59 }
 0x362   : > { %v4223_v30 = vmax.f32 %v4076_v38, 0.0  ;;  %v4664_v37 = vmax.f32 %v4517_v13, 0.0  ;;  %v4077_v22 = vadd.f32 %v8960_v16, %v3924_v51 }
 0x363   : > { %v4518_v44 = vadd.f32 %v8960_v16, %v4371_v23 }
 0x364   : > { %v4811_v19 = vmax.f32 %v4223_v30, %v4664_v37  ;;  %v4224_v62 = vmax.f32 %v4077_v22, 0.0  ;;  %v5214_v25 = vrot.slane %v4223_v30, 1 }
 0x365   : > { %v4665_v52 = vmax.f32 %v4518_v44, 0.0  ;;  %v2183_v39 = vpop.f32.mrb[36].mxu0  ;;  %v3707_v20 = vpop.f32.mrb[36].mxu1 }
 0x366   : > { %v5215_v9 = vrot.slane %v4224_v62, 1  ;;  %v3925_v4 = vmul.f32 %v8979_v49, %v2183_v39  ;;  %v4372_v21 = vmul.f32 %v8979_v49, %v3707_v20  ;;  %v2185_v7 = vpop.f32.mrb[37].mxu0  ;;  %v3709_v33 = vpop.f32.mrb[37].mxu1 }
 0x367   : > { %v4812_v15 = vmax.f32 %v4224_v62, %v4665_v52  ;;  %v2186_v18 = vpop.f32.mrb[38].mxu0  ;;  %v3710_v34 = vpop.f32.mrb[38].mxu1 }
 0x368   : > { %v5216_v12 = vsel %vm4979_vm0, %v5214_v25, %v5215_v9  ;;  %v4078_v3 = vadd.f32 %v8960_v16, %v3925_v4  ;;  %v4519_v63 = vadd.f32 %v8960_v16, %v4372_v21  ;;  %v3926_v54 = vmul.f32 %v8979_v49, %v2186_v18  ;;  %v2188_v11 = vpop.f32.mrb[39].mxu0  ;;  %v3712_v0 = vpop.f32.mrb[39].mxu1 }
 0x369   : > { %v9197_v45 = vmax.f32 %v4811_v19, %v5216_v12  ;;  %v4373_v32 = vmul.f32 %v8979_v49, %v3710_v34 }
 0x36a   : > { %v4225_v8 = vmax.f32 %v4078_v3, 0.0  ;;  %v4666_v40 = vmax.f32 %v4519_v63, 0.0  ;;  %v4079_v55 = vadd.f32 %v8960_v16, %v3926_v54 }
 0x36b   : > { %v5961_v26 = vmax.f32 %v9145_v29, %v9197_v45  ;;  %v4520_v61 = vadd.f32 %v8960_v16, %v4373_v32 }
 0x36c   : > { %v5217_v57 = vrot.slane %v4225_v8, 1  ;;  %v4813_v2 = vmax.f32 %v4225_v8, %v4666_v40  ;;  %v4226_v28 = vmax.f32 %v4079_v55, 0.0 }
 0x36d   : > { %v4667_v6 = vmax.f32 %v4520_v61, 0.0  ;;  %v2191_v53 = vpop.f32.mrb[40].mxu0  ;;  %v3715_v1 = vpop.f32.mrb[40].mxu1 }
 0x36e   : > { %v5218_v35 = vsel %vm4979_vm0, %v5215_v9, %v5217_v57  ;;  %v5219_v31 = vrot.slane %v4226_v28, 1  ;;  %v3927_v14 = vmul.f32 %v8979_v49, %v2191_v53  ;;  %v4374_v46 = vmul.f32 %v8979_v49, %v3715_v1  ;;  %v2193_v43 = vpop.f32.mrb[41].mxu0  ;;  %v3717_v10 = vpop.f32.mrb[41].mxu1 }
 0x36f   : > { %v9207_v27 = vmax.f32 %v4812_v15, %v5218_v35  ;;  %v4814_v29 = vmax.f32 %v4226_v28, %v4667_v6  ;;  %v2194_v41 = vpop.f32.mrb[42].mxu0  ;;  %v3718_v48 = vpop.f32.mrb[42].mxu1 }
 0x370   : > { %v5220_v42 = vsel %vm4979_vm0, %v5217_v57, %v5219_v31  ;;  %v4080_v36 = vadd.f32 %v8960_v16, %v3927_v14  ;;  %v4521_v59 = vadd.f32 %v8960_v16, %v4374_v46  ;;  %v3928_v38 = vmul.f32 %v8979_v49, %v2194_v41  ;;  %v2196_v13 = vpop.f32.mrb[43].mxu0  ;;  %v3720_v51 = vpop.f32.mrb[43].mxu1 }
 0x371   : > { %v5962_v60 = vmax.f32 %v9156_v17, %v9207_v27  ;;  %v9215_v50 = vmax.f32 %v4813_v2, %v5220_v42  ;;  %v4375_v23 = vmul.f32 %v8979_v49, %v3718_v48 }
 0x372   : > { %v4227_v30 = vmax.f32 %v4080_v36, 0.0  ;;  %v4668_v37 = vmax.f32 %v4521_v59, 0.0  ;;  %v4081_v22 = vadd.f32 %v8960_v16, %v3928_v38 }
 0x373   : > { %v6837_v44 = vpack.c.bf16 %v5962_v60, %v5961_v26  ;;  %v5963_v19 = vmax.f32 %v9161_v58, %v9215_v50  ;;  %v4522_v62 = vadd.f32 %v8960_v16, %v4375_v23 }
 0x374   : > { %v5221_v52 = vrot.slane %v4227_v30, 1  ;;  %v4815_v39 = vmax.f32 %v4227_v30, %v4668_v37  ;;  %v4228_v20 = vmax.f32 %v4081_v22, 0.0 }
 0x375   : > { %6878 = vst [vmem:[%s8022_s27 + $0xe0] sm:$0xff] %v6837_v44   ;;  %v4669_v25 = vmax.f32 %v4522_v62, 0.0  ;;  %v2199_v17 = vpop.f32.mrb[44].mxu0  ;;  %v3723_v9 = vpop.f32.mrb[44].mxu1 }
 0x376   : > { %v5222_v4 = vsel %vm4979_vm0, %v5219_v31, %v5221_v52  ;;  %v5223_v21 = vrot.slane %v4228_v20, 1  ;;  %v3929_v7 = vmul.f32 %v8979_v49, %v2199_v17  ;;  %v4376_v33 = vmul.f32 %v8979_v49, %v3723_v9  ;;  %v2201_v15 = vpop.f32.mrb[45].mxu0  ;;  %v3725_v18 = vpop.f32.mrb[45].mxu1 }
 0x377   : > { %v9226_v34 = vmax.f32 %v4814_v29, %v5222_v4  ;;  %v4816_v58 = vmax.f32 %v4228_v20, %v4669_v25  ;;  %v2202_v12 = vpop.f32.mrb[46].mxu0  ;;  %v3726_v3 = vpop.f32.mrb[46].mxu1 }
 0x378   : > { %v5224_v63 = vsel %vm4979_vm0, %v5221_v52, %v5223_v21  ;;  %v4082_v54 = vadd.f32 %v8960_v16, %v3929_v7  ;;  %v4523_v11 = vadd.f32 %v8960_v16, %v4376_v33  ;;  %v2203_v0 = vpop.f32.mrb[47].mxu0  ;;  %v3727_v32 = vpop.f32.mrb[47].mxu1 }
 0x379   : > { %v5964_v8 = vmax.f32 %v9171_v56, %v9226_v34  ;;  %v9233_v40 = vmax.f32 %v4815_v39, %v5224_v63 }
 0x37a   : > { %v4229_v55 = vmax.f32 %v4082_v54, 0.0  ;;  %v4670_v26 = vmax.f32 %v4523_v11, 0.0 }
 0x37b   : > { %v6842_v61 = vpack.c.bf16 %v5964_v8, %v5963_v19  ;;  %v5965_v57 = vmax.f32 %v9174_v24, %v9233_v40 }
 0x37c   : > { %v5225_v2 = vrot.slane %v4229_v55, 1  ;;  %v4817_v28 = vmax.f32 %v4229_v55, %v4670_v26 }
 0x37d   : > { %6879 = vst [vmem:[%s8022_s27 + $0xe8] sm:$0xff] %v6842_v61   ;;  %v2206_v6 = vpop.f32.mrb[48].mxu0  ;;  %v3730_v53 = vpop.f32.mrb[48].mxu1 }
 0x37e   : > { %v5226_v1 = vsel %vm4979_vm0, %v5223_v21, %v5225_v2  ;;  %v9239_v35 = vmax.f32 %v4817_v28, %v5225_v2  ;;  %v3930_v31 = vmul.f32 %v8979_v49, %v2206_v6  ;;  %v4377_v56 = vmul.f32 %v8979_v49, %v3730_v53  ;;  %v2208_v14 = vpop.f32.mrb[49].mxu0  ;;  %v3732_v46 = vpop.f32.mrb[49].mxu1 }
 0x37f   : > { %v9243_v43 = vmax.f32 %v4816_v58, %v5226_v1  ;;  %v2209_v10 = vpop.f32.mrb[50].mxu0  ;;  %v3733_v29 = vpop.f32.mrb[50].mxu1  ;;  %v9270_v58 = vld [vmem:[%s9378_s3] ss:$0 sm:$0xff] }
 0x380   : > { %v5967_v24 = vmax.f32 %v9180_v47, %v9239_v35  ;;  %v4083_v41 = vadd.f32 %v8960_v16, %v3930_v31  ;;  %v4524_v48 = vadd.f32 %v8960_v16, %v4377_v56  ;;  %v3931_v42 = vmul.f32 %v8979_v49, %v2209_v10  ;;  %v2211_v36 = vpop.f32.mrb[51].mxu0  ;;  %v3735_v59 = vpop.f32.mrb[51].mxu1  ;;  %v9256_v47 = vld [vmem:[%s9379_s4] ss:$0 sm:$0xff] }
 0x381   : > { %v5966_v38 = vmax.f32 %v9186_v5, %v9243_v43  ;;  %v4378_v13 = vmul.f32 %v8979_v49, %v3733_v29 }
 0x382   : > { %v6726_v51 = vpack.c.bf16 %v5967_v24, %v5967_v24  ;;  %v4230_v60 = vmax.f32 %v4083_v41, 0.0  ;;  %v4671_v23 = vmax.f32 %v4524_v48, 0.0  ;;  %v4084_v16 = vadd.f32 %v9256_v47, %v3931_v42 }
 0x383   : > { %v6847_v30 = vpack.c.bf16 %v5966_v38, %v5965_v57  ;;  %v4525_v37 = vadd.f32 %v9256_v47, %v4378_v13 }
 0x384   : > { %6645 = vst [vmem:[%s8022_s27 + $0xf8] sm:$0x1] %v6726_v51  ;;  %v4818_v22 = vmax.f32 %v4230_v60, %v4671_v23  ;;  %v4231_v44 = vmax.f32 %v4084_v16, 0.0  ;;  %v5227_v52 = vrot.slane %v4230_v60, 1 }
 0x385   : > { %6880 = vst [vmem:[%s8022_s27 + $0xf0] sm:$0xff] %v6847_v30   ;;  %v4672_v5 = vmax.f32 %v4525_v37, 0.0  ;;  %v2214_v19 = vpop.f32.mrb[52].mxu0  ;;  %v3738_v62 = vpop.f32.mrb[52].mxu1 }
 0x386   : > { %v5228_v39 = vrot.slane %v4231_v44, 1  ;;  %v3932_v20 = vmul.f32 %v8979_v49, %v2214_v19  ;;  %v4379_v25 = vmul.f32 %v8979_v49, %v3738_v62  ;;  %v2216_v17 = vpop.f32.mrb[53].mxu0  ;;  %v3740_v9 = vpop.f32.mrb[53].mxu1 }
 0x387   : > { %v4819_v4 = vmax.f32 %v4231_v44, %v4672_v5  ;;  %v2217_v21 = vpop.f32.mrb[54].mxu0  ;;  %v3741_v7 = vpop.f32.mrb[54].mxu1 }
 0x388   : > { %v5229_v33 = vsel %vm4979_vm0, %v5227_v52, %v5228_v39  ;;  %v4085_v15 = vadd.f32 %v9256_v47, %v3932_v20  ;;  %v4526_v18 = vadd.f32 %v9256_v47, %v4379_v25  ;;  %v3933_v12 = vmul.f32 %v9270_v58, %v2217_v21  ;;  %v2219_v3 = vpop.f32.mrb[55].mxu0  ;;  %v3743_v49 = vpop.f32.mrb[55].mxu1 }
 0x389   : > { %v5533_v63 = vmax.f32 %v4818_v22, %v5229_v33  ;;  %v4380_v54 = vmul.f32 %v9270_v58, %v3741_v7 }
 0x38a   : > { %v4232_v11 = vmax.f32 %v4085_v15, 0.0  ;;  %v4673_v0 = vmax.f32 %v4526_v18, 0.0  ;;  %v4086_v32 = vadd.f32 %v9256_v47, %v3933_v12 }
 0x38b   : > { %v9276_v8 = vmax.f32 %v9197_v45, %v5533_v63  ;;  %v4527_v55 = vadd.f32 %v9256_v47, %v4380_v54 }
 0x38c   : > { %v5230_v26 = vrot.slane %v4232_v11, 1  ;;  %v4820_v61 = vmax.f32 %v4232_v11, %v4673_v0  ;;  %v4233_v57 = vmax.f32 %v4086_v32, 0.0 }
 0x38d   : > { %v4674_v2 = vmax.f32 %v4527_v55, 0.0  ;;  %v2222_v28 = vpop.f32.mrb[56].mxu0  ;;  %v3746_v6 = vpop.f32.mrb[56].mxu1 }
 0x38e   : > { %v5231_v53 = vsel %vm4979_vm0, %v5228_v39, %v5230_v26  ;;  %v5232_v1 = vrot.slane %v4233_v57, 1  ;;  %v3934_v31 = vmul.f32 %v9270_v58, %v2222_v28  ;;  %v4381_v56 = vmul.f32 %v9270_v58, %v3746_v6  ;;  %v2224_v14 = vpop.f32.mrb[57].mxu0  ;;  %v3748_v46 = vpop.f32.mrb[57].mxu1 }
 0x38f   : > { %v5534_v10 = vmax.f32 %v4819_v4, %v5231_v53  ;;  %v4821_v45 = vmax.f32 %v4233_v57, %v4674_v2  ;;  %v2225_v29 = vpop.f32.mrb[58].mxu0  ;;  %v3749_v24 = vpop.f32.mrb[58].mxu1 }
 0x390   : > { %v5233_v41 = vsel %vm4979_vm0, %v5230_v26, %v5232_v1  ;;  %v4087_v48 = vadd.f32 %v9256_v47, %v3934_v31  ;;  %v4528_v42 = vadd.f32 %v9256_v47, %v4381_v56  ;;  %v3935_v36 = vmul.f32 %v9270_v58, %v2225_v29  ;;  %v2227_v59 = vpop.f32.mrb[59].mxu0  ;;  %v3751_v38 = vpop.f32.mrb[59].mxu1 }
 0x391   : > { %v9287_v13 = vmax.f32 %v9207_v27, %v5534_v10  ;;  %v5535_v51 = vmax.f32 %v4820_v61, %v5233_v41  ;;  %v4382_v60 = vmul.f32 %v9270_v58, %v3749_v24 }
 0x392   : > { %v4234_v23 = vmax.f32 %v4087_v48, 0.0  ;;  %v4675_v16 = vmax.f32 %v4528_v42, 0.0  ;;  %v4088_v30 = vadd.f32 %v9256_v47, %v3935_v36 }
 0x393   : > { %v9292_v37 = vmax.f32 %v9215_v50, %v5535_v51  ;;  %v4529_v22 = vadd.f32 %v9256_v47, %v4382_v60 }
 0x394   : > { %v5234_v44 = vrot.slane %v4234_v23, 1  ;;  %v4822_v5 = vmax.f32 %v4234_v23, %v4675_v16  ;;  %v4235_v19 = vmax.f32 %v4088_v30, 0.0 }
 0x395   : > { %v4676_v62 = vmax.f32 %v4529_v22, 0.0  ;;  %v2230_v52 = vpop.f32.mrb[60].mxu0  ;;  %v3754_v39 = vpop.f32.mrb[60].mxu1 }
 0x396   : > { %v5235_v27 = vsel %vm4979_vm0, %v5232_v1, %v5234_v44  ;;  %v5236_v20 = vrot.slane %v4235_v19, 1  ;;  %v3936_v25 = vmul.f32 %v9270_v58, %v2230_v52  ;;  %v4383_v17 = vmul.f32 %v9270_v58, %v3754_v39  ;;  %v2232_v9 = vpop.f32.mrb[61].mxu0  ;;  %v3756_v4 = vpop.f32.mrb[61].mxu1 }
 0x397   : > { %v5536_v21 = vmax.f32 %v4821_v45, %v5235_v27  ;;  %v4823_v50 = vmax.f32 %v4235_v19, %v4676_v62  ;;  %v2233_v7 = vpop.f32.mrb[62].mxu0  ;;  %v3757_v33 = vpop.f32.mrb[62].mxu1 }
 0x398   : > { %v5237_v15 = vsel %vm4979_vm0, %v5234_v44, %v5236_v20  ;;  %v4089_v18 = vadd.f32 %v9256_v47, %v3936_v25  ;;  %v4530_v12 = vadd.f32 %v9256_v47, %v4383_v17  ;;  %v2234_v3 = vpop.f32.mrb[63].mxu0  ;;  %v3758_v49 = vpop.f32.mrb[63].mxu1 }
 0x399   : > { %v9302_v63 = vmax.f32 %v9226_v34, %v5536_v21  ;;  %v5537_v54 = vmax.f32 %v4822_v5, %v5237_v15 }
 0x39a   : > { %v4236_v11 = vmax.f32 %v4089_v18, 0.0  ;;  %v4677_v0 = vmax.f32 %v4530_v12, 0.0 }
 0x39b   : > { %v9305_v32 = vmax.f32 %v9233_v40, %v5537_v54 }
 0x39c   : > { %v5238_v55 = vrot.slane %v4236_v11, 1  ;;  %v4824_v26 = vmax.f32 %v4236_v11, %v4677_v0 }
 0x39d   : > { %v2237_v61 = vpop.f32.mrb[64].mxu0  ;;  %v3761_v57 = vpop.f32.mrb[64].mxu1 }
 0x39e   : > { %v5239_v2 = vsel %vm4979_vm0, %v5236_v20, %v5238_v55  ;;  %v5539_v28 = vmax.f32 %v4824_v26, %v5238_v55  ;;  %v3937_v6 = vmul.f32 %v9270_v58, %v2237_v61  ;;  %v4384_v53 = vmul.f32 %v9270_v58, %v3761_v57  ;;  %v2239_v1 = vpop.f32.mrb[65].mxu0  ;;  %v3763_v34 = vpop.f32.mrb[65].mxu1 }
 0x39f   : > { %v5538_v31 = vmax.f32 %v4823_v50, %v5239_v2  ;;  %v2240_v56 = vpop.f32.mrb[66].mxu0  ;;  %v3764_v14 = vpop.f32.mrb[66].mxu1 }
 0x3a0   : > { %v9311_v46 = vmax.f32 %v9239_v35, %v5539_v28  ;;  %v4090_v40 = vadd.f32 %v9256_v47, %v3937_v6  ;;  %v4531_v10 = vadd.f32 %v9256_v47, %v4384_v53  ;;  %v3938_v45 = vmul.f32 %v9270_v58, %v2240_v56  ;;  %v2242_v29 = vpop.f32.mrb[67].mxu0  ;;  %v3766_v24 = vpop.f32.mrb[67].mxu1 }
 0x3a1   : > { %v9317_v41 = vmax.f32 %v9243_v43, %v5538_v31  ;;  %v4385_v48 = vmul.f32 %v9270_v58, %v3764_v14 }
 0x3a2   : > { %v4237_v42 = vmax.f32 %v4090_v40, 0.0  ;;  %v4678_v36 = vmax.f32 %v4531_v10, 0.0  ;;  %v4091_v59 = vadd.f32 %v9256_v47, %v3938_v45 }
 0x3a3   : > { %v4532_v35 = vadd.f32 %v9256_v47, %v4385_v48 }
 0x3a4   : > { %v4825_v38 = vmax.f32 %v4237_v42, %v4678_v36  ;;  %v4238_v51 = vmax.f32 %v4091_v59, 0.0  ;;  %v5240_v30 = vrot.slane %v4237_v42, 1 }
 0x3a5   : > { %v4679_v60 = vmax.f32 %v4532_v35, 0.0  ;;  %v2245_v23 = vpop.f32.mrb[68].mxu0  ;;  %v3769_v16 = vpop.f32.mrb[68].mxu1 }
 0x3a6   : > { %v5241_v22 = vrot.slane %v4238_v51, 1  ;;  %v3939_v44 = vmul.f32 %v9270_v58, %v2245_v23  ;;  %v4386_v43 = vmul.f32 %v9270_v58, %v3769_v16  ;;  %v2247_v5 = vpop.f32.mrb[69].mxu0  ;;  %v3771_v19 = vpop.f32.mrb[69].mxu1 }
 0x3a7   : > { %v4826_v62 = vmax.f32 %v4238_v51, %v4679_v60  ;;  %v2248_v52 = vpop.f32.mrb[70].mxu0  ;;  %v3772_v39 = vpop.f32.mrb[70].mxu1 }
 0x3a8   : > { %v5242_v27 = vsel %vm4979_vm0, %v5240_v30, %v5241_v22  ;;  %v4092_v20 = vadd.f32 %v9256_v47, %v3939_v44  ;;  %v4533_v25 = vadd.f32 %v9256_v47, %v4386_v43  ;;  %v3940_v17 = vmul.f32 %v9270_v58, %v2248_v52  ;;  %v2250_v9 = vpop.f32.mrb[71].mxu0  ;;  %v3774_v4 = vpop.f32.mrb[71].mxu1 }
 0x3a9   : > { %v5540_v21 = vmax.f32 %v4825_v38, %v5242_v27  ;;  %v4387_v50 = vmul.f32 %v9270_v58, %v3772_v39 }
 0x3aa   : > { %v4239_v7 = vmax.f32 %v4092_v20, 0.0  ;;  %v4680_v33 = vmax.f32 %v4533_v25, 0.0  ;;  %v4093_v15 = vadd.f32 %v9256_v47, %v3940_v17 }
 0x3ab   : > { %v6012_v18 = vmax.f32 %v9276_v8, %v5540_v21  ;;  %v4534_v12 = vadd.f32 %v9256_v47, %v4387_v50 }
 0x3ac   : > { %v5243_v3 = vrot.slane %v4239_v7, 1  ;;  %v4827_v49 = vmax.f32 %v4239_v7, %v4680_v33  ;;  %v4240_v54 = vmax.f32 %v4093_v15, 0.0 }
 0x3ad   : > { %v6727_v11 = vpack.c.bf16 %v6012_v18, %v6012_v18  ;;  %v4681_v0 = vmax.f32 %v4534_v12, 0.0  ;;  %v2253_v55 = vpop.f32.mrb[72].mxu0  ;;  %v3777_v26 = vpop.f32.mrb[72].mxu1 }
 0x3ae   : > { %v5244_v61 = vsel %vm4979_vm0, %v5241_v22, %v5243_v3  ;;  %v5245_v57 = vrot.slane %v4240_v54, 1  ;;  %v3941_v2 = vmul.f32 %v9270_v58, %v2253_v55  ;;  %v4388_v28 = vmul.f32 %v9270_v58, %v3777_v26  ;;  %v2255_v6 = vpop.f32.mrb[73].mxu0  ;;  %v3779_v53 = vpop.f32.mrb[73].mxu1 }
 0x3af   : > { %6653 = vst [vmem:[%s8022_s27 + $0xfc] sm:$0xf] %v6727_v11  ;;  %v5541_v8 = vmax.f32 %v4826_v62, %v5244_v61  ;;  %v4828_v1 = vmax.f32 %v4240_v54, %v4681_v0  ;;  %v2256_v34 = vpop.f32.mrb[74].mxu0  ;;  %v3780_v31 = vpop.f32.mrb[74].mxu1 }
 0x3b0   : > { %v5246_v56 = vsel %vm4979_vm0, %v5243_v3, %v5245_v57  ;;  %v4094_v14 = vadd.f32 %v9256_v47, %v3941_v2  ;;  %v4535_v40 = vadd.f32 %v9256_v47, %v4388_v28  ;;  %v3942_v10 = vmul.f32 %v9270_v58, %v2256_v34  ;;  %v2258_v45 = vpop.f32.mrb[75].mxu0  ;;  %v3782_v29 = vpop.f32.mrb[75].mxu1 }
 0x3b1   : > { %v6013_v24 = vmax.f32 %v9287_v13, %v5541_v8  ;;  %v5542_v48 = vmax.f32 %v4827_v49, %v5246_v56  ;;  %v4389_v42 = vmul.f32 %v9270_v58, %v3780_v31 }
 0x3b2   : > { %v4241_v36 = vmax.f32 %v4094_v14, 0.0  ;;  %v4682_v59 = vmax.f32 %v4535_v40, 0.0  ;;  %v4095_v35 = vadd.f32 %v9256_v47, %v3942_v10 }
 0x3b3   : > { %v6014_v38 = vmax.f32 %v9292_v37, %v5542_v48  ;;  %v4536_v51 = vadd.f32 %v9256_v47, %v4389_v42 }
 0x3b4   : > { %v5247_v60 = vrot.slane %v4241_v36, 1  ;;  %v4829_v23 = vmax.f32 %v4241_v36, %v4682_v59  ;;  %v4242_v16 = vmax.f32 %v4095_v35, 0.0 }
 0x3b5   : > { %v6852_v30 = vpack.c.bf16 %v6014_v38, %v6013_v24  ;;  %v4683_v22 = vmax.f32 %v4536_v51, 0.0  ;;  %v2261_v44 = vpop.f32.mrb[76].mxu0  ;;  %v3785_v43 = vpop.f32.mrb[76].mxu1 }
 0x3b6   : > { %v5248_v13 = vsel %vm4979_vm0, %v5245_v57, %v5247_v60  ;;  %v5249_v5 = vrot.slane %v4242_v16, 1  ;;  %v3943_v19 = vmul.f32 %v9270_v58, %v2261_v44  ;;  %v4390_v62 = vmul.f32 %v9270_v58, %v3785_v43  ;;  %v2263_v52 = vpop.f32.mrb[77].mxu0  ;;  %v3787_v39 = vpop.f32.mrb[77].mxu1 }
 0x3b7   : > { %6881 = vst [vmem:[%s8022_s27 + $0x100] sm:$0xff] %v6852_v30   ;;  %v5543_v37 = vmax.f32 %v4828_v1, %v5248_v13  ;;  %v4830_v27 = vmax.f32 %v4242_v16, %v4683_v22  ;;  %v2264_v20 = vpop.f32.mrb[78].mxu0  ;;  %v3788_v25 = vpop.f32.mrb[78].mxu1 }
 0x3b8   : > { %v5250_v17 = vsel %vm4979_vm0, %v5247_v60, %v5249_v5  ;;  %v4096_v9 = vadd.f32 %v9256_v47, %v3943_v19  ;;  %v4537_v4 = vadd.f32 %v9256_v47, %v4390_v62  ;;  %v2265_v21 = vpop.f32.mrb[79].mxu0  ;;  %v3789_v50 = vpop.f32.mrb[79].mxu1 }
 0x3b9   : > { %v6015_v7 = vmax.f32 %v9302_v63, %v5543_v37  ;;  %v5544_v58 = vmax.f32 %v4829_v23, %v5250_v17 }
 0x3ba   : > { %v4243_v33 = vmax.f32 %v4096_v9, 0.0  ;;  %v4684_v15 = vmax.f32 %v4537_v4, 0.0 }
 0x3bb   : > { %v6016_v18 = vmax.f32 %v9305_v32, %v5544_v58 }
 0x3bc   : > { %v5251_v12 = vrot.slane %v4243_v33, 1  ;;  %v4831_v3 = vmax.f32 %v4243_v33, %v4684_v15 }
 0x3bd   : > { %v6857_v49 = vpack.c.bf16 %v6016_v18, %v6015_v7 }
 0x3be   : > { %v5252_v54 = vsel %vm4979_vm0, %v5249_v5, %v5251_v12  ;;  %v5546_v11 = vmax.f32 %v4831_v3, %v5251_v12 }
 0x3bf   : > { %6882 = vst [vmem:[%s8022_s27 + $0x108] sm:$0xff] %v6857_v49   ;;  %v5545_v0 = vmax.f32 %v4830_v27, %v5252_v54 }
 0x3c0   : > { %v6018_v47 = vmax.f32 %v9311_v46, %v5546_v11 }
 0x3c1   : > { %v6017_v55 = vmax.f32 %v9317_v41, %v5545_v0 }
 0x3c2   : > { %v6733_v63 = vpack.c.bf16 %v6018_v47, %v6018_v47 }
 0x3c3   : > { %v6732_v26 = vpack.c.bf16 %v6017_v55, %v6017_v55 }
 0x3c4   : > { %6659 = vst [vmem:[%s8022_s27 + $0x114] sm:$0x1] %v6733_v63 }
 0x3c5   : > { %6658 = vst [vmem:[%s8022_s27 + $0x110] sm:$0xf] %v6732_v26 }
 0x3c6 PF: > { %s15_s22 = sadd.s32 1, %s7495_s22   ;;  %s9382_s18 = smov %s7487_s20 }
 0x3c7   : > { %p12_p7 = scmp.ge.s32.totalorder %s15_s22, 12   ;;  %s9383_s19 = smov %s7491_s21 }
 0x3c8   : > { %s9384_s20 = smov %s9387_s23  ;;  %s9385_s21 = smov %s9391_s24 }
 0x3c9   :  { %14 = sbr.rel (!%p12_p7) target bundleno = 3 (0x3), region = 84 }

// kernel: vggf2_face_forward.6
= control target key start
LH: loop header
LB: loop body
LE: loop exit
PB: predicated region body
PF: predicated region fallthrough
CT: control target
= control target key end

     0   :  { %s4359_s18 = smov 0   ;;  %s4361_s19 = smov 0   ;;  %s5041_s0 = inlined_call_operand.vmem [shape: bf16[2,24,16,512], index: 0, kind: input, shape index: {}]   ;;  %s5042_s1 = inlined_call_operand.vmem [shape: bf16[2,24,16,512], index: 1, kind: input, shape index: {}]   ;;  %s5043_s2 = inlined_call_operand.vmem [shape: bf16[512,128], index: 2, kind: input, shape index: {}]   ;;  %s5044_s3 = inlined_call_operand.vmem [shape: f32[1,128], index: 3, kind: input, shape index: {}]   ;;  %s5045_s4 = inlined_call_operand.vmem [shape: f32[1,128], index: 4, kind: input, shape index: {}]   ;;  %s5046_s5 = inlined_call_operand.vmem [shape: bf16[2,12,12,128], index: 5, kind: output, shape index: {}]  }
   0x1   :  { %s4363_s20 = smov 0  }
   0x2 LB: > { %s27_s21 = sadd.s32 1, %s4322_s19  ;;  %p3461_p0 = scmp.ge.s32.totalorder %s4326_s20, 1  ;;  %s4326_s20 = sphi %s4363_s20, %s15_s20   ;;  %s4322_s19 = sphi %s4361_s19, %s5048_s19   ;;  %s4318_s18 = sphi %s4359_s18, %s5047_s18  }
   0x3   : > { %p29_p1 = scmp.ge.s32.totalorder %s27_s21, 2  ;;  %p211_p2 = scmp.lt.s32.totalorder %s4326_s20, 3 }
   0x5   : > { %s5050_s21 = smov (%p29_p1, %s27_s21), 0  ;;  %p212_p3 = pnand %p3461_p0, %p211_p2 }
   0x6   : > { %v3982_v0 = vld [vmem:[%s5043_s2] sm:$0xff] (!%p212_p3)   ;;  %v4328_v1 = vmov (!%p212_p3), 0   ;;  %v3983_v2 = vld [vmem:[%s5043_s2 + $0x8] sm:$0xff] (!%p212_p3)   ;;  %p249_p4 = scmp.lt.s32.totalorder (!%p212_p3), %s4318_s18, 1  ;;  %v3984_v3 = vld [vmem:[%s5043_s2 + $0x10] sm:$0xff] (!%p212_p3)   ;;  %vm2935_vm0 = vcmask (!%p212_p3), 1046528  }
   0x7   : > { %215 = sbr.rel (%p212_p3) target bundleno = 678 (0x2a6), region = 40  ;;  %1207 = vmatprep.subr.bf16.mxu0 (!%p212_p3), %v4328_v1  ;;  %2137 = vmatprep.subr.bf16.mxu1 (!%p212_p3), %v4328_v1  ;;  %v3985_v4 = vld [vmem:[%s5043_s2 + $0x18] sm:$0xff] (!%p212_p3)   ;;  %v3986_v5 = vld [vmem:[%s5043_s2 + $0x20] sm:$0xff] (!%p212_p3)   ;;  %v3987_v7 = vld [vmem:[%s5043_s2 + $0x28] sm:$0xff] (!%p212_p3)   ;;  %vm3056_vm1 = vcmask (!%p212_p3), 1042432  }
   0x8   : > { %1208 = vmatpush1.bf16.msra.mxu0 (!%p212_p3), %v3982_v0  ;;  %2138 = vmatpush1.bf16.msra.mxu1 (!%p212_p3), %v3982_v0  ;;  %v3988_v9 = vld [vmem:[%s5043_s2 + $0x30] sm:$0xff] (!%p212_p3)   ;;  %v3989_v10 = vld [vmem:[%s5043_s2 + $0x38] sm:$0xff] (!%p212_p3)   ;;  %v3990_v11 = vld [vmem:[%s5043_s2 + $0x40] sm:$0xff] (!%p212_p3)  }
   0x9   : > { %1209 = vmatprep.subr.bf16.mxu0 (!%p212_p3), %v4328_v1  ;;  %2139 = vmatprep.subr.bf16.mxu1 (!%p212_p3), %v4328_v1  ;;  %v3991_v12 = vld [vmem:[%s5043_s2 + $0x48] sm:$0xff] (!%p212_p3)   ;;  %v3992_v13 = vld [vmem:[%s5043_s2 + $0x50] sm:$0xff] (!%p212_p3)   ;;  %v3993_v14 = vld [vmem:[%s5043_s2 + $0x58] sm:$0xff] (!%p212_p3)  }
   0xa   : > { %v3994_v15 = vld [vmem:[%s5043_s2 + $0x60] sm:$0xff] (!%p212_p3)   ;;  %v3995_v16 = vld [vmem:[%s5043_s2 + $0x68] sm:$0xff] (!%p212_p3)   ;;  %v3996_v17 = vld [vmem:[%s5043_s2 + $0x70] sm:$0xff] (!%p212_p3)  }
   0xb   : > { %v3997_v18 = vld [vmem:[%s5043_s2 + $0x78] sm:$0xff] (!%p212_p3)   ;;  %v4004_v21 = vld [vmem:[%s5043_s2 + $0x80] sm:$0xff] (!%p212_p3)   ;;  %v4011_v24 = vld [vmem:[%s5043_s2 + $0x88] sm:$0xff] (!%p212_p3)  }
   0xc   : > { %1210 = vmatpush1.bf16.msra.mxu0 (!%p212_p3), %v3983_v2  ;;  %2140 = vmatpush1.bf16.msra.mxu1 (!%p212_p3), %v3983_v2  ;;  %v4024_v29 = vld [vmem:[%s5043_s2 + $0x90] sm:$0xff] (!%p212_p3)   ;;  %v4031_v31 = vld [vmem:[%s5043_s2 + $0x98] sm:$0xff] (!%p212_p3)   ;;  %v4044_v35 = vld [vmem:[%s5043_s2 + $0xa0] sm:$0xff] (!%p212_p3)  }
   0xd   : > { %1211 = vmatprep.subr.bf16.mxu0 (!%p212_p3), %v4328_v1  ;;  %2141 = vmatprep.subr.bf16.mxu1 (!%p212_p3), %v4328_v1  ;;  %v4051_v36 = vld [vmem:[%s5043_s2 + $0xa8] sm:$0xff] (!%p212_p3)   ;;  %v4064_v41 = vld [vmem:[%s5043_s2 + $0xb0] sm:$0xff] (!%p212_p3)   ;;  %v4071_v42 = vld [vmem:[%s5043_s2 + $0xb8] sm:$0xff] (!%p212_p3)  }
   0xe   : > { %s5052_s18 = smov (!%p249_p4, %s4318_s18), 1  ;;  %v4084_v47 = vld [vmem:[%s5043_s2 + $0xc0] sm:$0xff]   ;;  %v4091_v48 = vld [vmem:[%s5043_s2 + $0xc8] sm:$0xff]   ;;  %v4104_v53 = vld [vmem:[%s5043_s2 + $0xd0] sm:$0xff]  }
   0xf   : > { %s3955_s30 = smul.u32 768, %s5052_s18  ;;  %v4111_v54 = vld [vmem:[%s5043_s2 + $0xd8] sm:$0xff]   ;;  %v4124_v59 = vld [vmem:[%s5043_s2 + $0xe0] sm:$0xff]   ;;  %v4131_v60 = vld [vmem:[%s5043_s2 + $0xe8] sm:$0xff]  }
  0x10   : > { %1212 = vmatpush1.bf16.msra.mxu0 %v3984_v3  ;;  %2142 = vmatpush1.bf16.msra.mxu1 %v3984_v3  ;;  %v4144_v2 = vld [vmem:[%s5043_s2 + $0xf0] sm:$0xff]   ;;  %v4151_v3 = vld [vmem:[%s5043_s2 + $0xf8] sm:$0xff]  }
  0x11   : > { %1213 = vmatprep.subr.bf16.mxu0 %v4328_v1  ;;  %2143 = vmatprep.subr.bf16.mxu1 %v4328_v1  ;;  %s4406_s10 = scalar_lea.vmem %s5041_s0, %s3955_s30  ;;  %s4413_s13 = scalar_lea.vmem %s5042_s1, %s3955_s30 }
  0x12   : > { %v4000_v6 = vld [vmem:[%s4406_s10 + $0x4] ss:$16 sps:$4 sm:$0xff]   ;;  %v3998_v19 = vld [vmem:[%s4406_s10] ss:$16 sps:$4 sm:$0xff]  }
  0x13   : > { %v4003_v8 = vld [vmem:[%s4413_s13 + $0x4] ss:$16 sps:$4 sm:$0xff]   ;;  %1239 = vmatprep.mubr.bf16.mxu0 %v4000_v6  ;;  %v4001_v20 = vld [vmem:[%s4413_s13] ss:$16 sps:$4 sm:$0xff]  }
  0x14   : > { %1214 = vmatpush1.bf16.msra.mxu0 %v3985_v4  ;;  %2144 = vmatpush1.bf16.msra.mxu1 %v3985_v4  ;;  %v4005_v22 = vld [vmem:[%s4406_s10 + $0x24] ss:$16 sps:$4 sm:$0xff]   ;;  %v4009_v25 = vld [vmem:[%s4406_s10 + $0x20] ss:$16 sps:$4 sm:$0xff]  }
  0x15   : > { %1215 = vmatprep.subr.bf16.mxu0 %v4328_v1  ;;  %2145 = vmatprep.subr.bf16.mxu1 %v4328_v1  ;;  %v4007_v23 = vld [vmem:[%s4413_s13 + $0x24] ss:$16 sps:$4 sm:$0xff]   ;;  %v4010_v26 = vld [vmem:[%s4413_s13 + $0x20] ss:$16 sps:$4 sm:$0xff]  }
  0x16   : > { %2169 = vmatprep.mubr.bf16.mxu1 %v4003_v8  ;;  %v4012_v27 = vld [vmem:[%s4406_s10 + $0x44] ss:$16 sps:$4 sm:$0xff]   ;;  %v4016_v30 = vld [vmem:[%s4406_s10 + $0x40] ss:$16 sps:$4 sm:$0xff]  }
  0x17   : > { %v4014_v28 = vld [vmem:[%s4413_s13 + $0x44] ss:$16 sps:$4 sm:$0xff]   ;;  %v4017_v32 = vld [vmem:[%s4413_s13 + $0x40] ss:$16 sps:$4 sm:$0xff]  }
  0x18   : > { %1216 = vmatpush1.bf16.msra.mxu0 %v3986_v5  ;;  %2146 = vmatpush1.bf16.msra.mxu1 %v3986_v5  ;;  %v4018_v33 = vld [vmem:[%s4406_s10 + $0x64] ss:$16 sps:$4 sm:$0xff]   ;;  %v4022_v37 = vld [vmem:[%s4406_s10 + $0x60] ss:$16 sps:$4 sm:$0xff]  }
  0x19   : > { %1217 = vmatprep.subr.bf16.mxu0 %v4328_v1  ;;  %2147 = vmatprep.subr.bf16.mxu1 %v4328_v1  ;;  %v4020_v34 = vld [vmem:[%s4413_s13 + $0x64] ss:$16 sps:$4 sm:$0xff]   ;;  %v4023_v38 = vld [vmem:[%s4413_s13 + $0x60] ss:$16 sps:$4 sm:$0xff]  }
  0x1a   : > { %v4025_v39 = vld [vmem:[%s4406_s10 + $0x84] ss:$16 sps:$4 sm:$0xff]   ;;  %v4029_v43 = vld [vmem:[%s4406_s10 + $0x80] ss:$16 sps:$4 sm:$0xff]  }
  0x1b   : > { %v4027_v40 = vld [vmem:[%s4413_s13 + $0x84] ss:$16 sps:$4 sm:$0xff]   ;;  %v4030_v44 = vld [vmem:[%s4413_s13 + $0x80] ss:$16 sps:$4 sm:$0xff]  }
  0x1c   : > { %1218 = vmatpush1.bf16.msra.mxu0 %v3987_v7  ;;  %2148 = vmatpush1.bf16.msra.mxu1 %v3987_v7  ;;  %v4032_v45 = vld [vmem:[%s4406_s10 + $0xa4] ss:$16 sps:$4 sm:$0xff]   ;;  %v4036_v49 = vld [vmem:[%s4406_s10 + $0xa0] ss:$16 sps:$4 sm:$0xff]  }
  0x1d   : > { %1219 = vmatprep.subr.bf16.mxu0 %v4328_v1  ;;  %2149 = vmatprep.subr.bf16.mxu1 %v4328_v1  ;;  %v4034_v46 = vld [vmem:[%s4413_s13 + $0xa4] ss:$16 sps:$4 sm:$0xff]   ;;  %v4037_v50 = vld [vmem:[%s4413_s13 + $0xa0] ss:$16 sps:$4 sm:$0xff]  }
  0x1e   : > { %v4038_v51 = vld [vmem:[%s4406_s10 + $0xc4] ss:$16 sps:$4 sm:$0xff]   ;;  %v4042_v55 = vld [vmem:[%s4406_s10 + $0xc0] ss:$16 sps:$4 sm:$0xff]  }
  0x1f   : > { %v4040_v52 = vld [vmem:[%s4413_s13 + $0xc4] ss:$16 sps:$4 sm:$0xff]   ;;  %v4043_v56 = vld [vmem:[%s4413_s13 + $0xc0] ss:$16 sps:$4 sm:$0xff]  }
  0x20   : > { %1220 = vmatpush1.bf16.msra.mxu0 %v3988_v9  ;;  %2150 = vmatpush1.bf16.msra.mxu1 %v3988_v9  ;;  %v4045_v57 = vld [vmem:[%s4406_s10 + $0xe4] ss:$16 sps:$4 sm:$0xff]   ;;  %v4049_v61 = vld [vmem:[%s4406_s10 + $0xe0] ss:$16 sps:$4 sm:$0xff]  }
  0x21   : > { %1221 = vmatprep.subr.bf16.mxu0 %v4328_v1  ;;  %2151 = vmatprep.subr.bf16.mxu1 %v4328_v1  ;;  %v4047_v58 = vld [vmem:[%s4413_s13 + $0xe4] ss:$16 sps:$4 sm:$0xff]   ;;  %v4050_v62 = vld [vmem:[%s4413_s13 + $0xe0] ss:$16 sps:$4 sm:$0xff]  }
  0x22   : > { %v4052_v63 = vld [vmem:[%s4406_s10 + $0x104] ss:$16 sps:$4 sm:$0xff]   ;;  %v4056_v4 = vld [vmem:[%s4406_s10 + $0x100] ss:$16 sps:$4 sm:$0xff]  }
  0x23   : > { %v4054_v0 = vld [vmem:[%s4413_s13 + $0x104] ss:$16 sps:$4 sm:$0xff]   ;;  %v4057_v5 = vld [vmem:[%s4413_s13 + $0x100] ss:$16 sps:$4 sm:$0xff]  }
  0x24   : > { %1222 = vmatpush1.bf16.msra.mxu0 %v3989_v10  ;;  %2152 = vmatpush1.bf16.msra.mxu1 %v3989_v10  ;;  %v4058_v6 = vld [vmem:[%s4406_s10 + $0x124] ss:$16 sps:$4 sm:$0xff]   ;;  %v4062_v8 = vld [vmem:[%s4406_s10 + $0x120] ss:$16 sps:$4 sm:$0xff]  }
  0x25   : > { %1223 = vmatprep.subr.bf16.mxu0 %v4328_v1  ;;  %2153 = vmatprep.subr.bf16.mxu1 %v4328_v1  ;;  %v4060_v7 = vld [vmem:[%s4413_s13 + $0x124] ss:$16 sps:$4 sm:$0xff]   ;;  %v4063_v9 = vld [vmem:[%s4413_s13 + $0x120] ss:$16 sps:$4 sm:$0xff]  }
  0x26   : > { %v4065_v10 = vld [vmem:[%s4406_s10 + $0x144] ss:$16 sps:$4 sm:$0xff]  }
  0x28   : > { %1224 = vmatpush1.bf16.msra.mxu0 %v3990_v11  ;;  %2154 = vmatpush1.bf16.msra.mxu1 %v3990_v11  ;;  %v4067_v11 = vld [vmem:[%s4413_s13 + $0x144] ss:$16 sps:$4 sm:$0xff]  }
  0x29   : > { %1225 = vmatprep.subr.bf16.mxu0 %v4328_v1  ;;  %2155 = vmatprep.subr.bf16.mxu1 %v4328_v1 }
  0x2c   : > { %1226 = vmatpush1.bf16.msra.mxu0 %v3991_v12  ;;  %2156 = vmatpush1.bf16.msra.mxu1 %v3991_v12  ;;  %v4070_v12 = vld [vmem:[%s4413_s13 + $0x140] ss:$16 sps:$4 sm:$0xff]  }
  0x2d   : > { %1227 = vmatprep.subr.bf16.mxu0 %v4328_v1  ;;  %2157 = vmatprep.subr.bf16.mxu1 %v4328_v1 }
  0x30   : > { %1228 = vmatpush1.bf16.msra.mxu0 %v3992_v13  ;;  %2158 = vmatpush1.bf16.msra.mxu1 %v3992_v13  ;;  %v4072_v13 = vld [vmem:[%s4406_s10 + $0x164] ss:$16 sps:$4 sm:$0xff]  }
  0x31   : > { %1229 = vmatprep.subr.bf16.mxu0 %v4328_v1  ;;  %2159 = vmatprep.subr.bf16.mxu1 %v4328_v1 }
  0x34   : > { %1230 = vmatpush1.bf16.msra.mxu0 %v3993_v14  ;;  %2160 = vmatpush1.bf16.msra.mxu1 %v3993_v14  ;;  %v4074_v14 = vld [vmem:[%s4413_s13 + $0x164] ss:$16 sps:$4 sm:$0xff]  }
  0x35   : > { %1231 = vmatprep.subr.bf16.mxu0 %v4328_v1  ;;  %2161 = vmatprep.subr.bf16.mxu1 %v4328_v1 }
  0x38   : > { %1232 = vmatpush1.bf16.msra.mxu0 %v3994_v15  ;;  %2162 = vmatpush1.bf16.msra.mxu1 %v3994_v15  ;;  %v4076_v15 = vld [vmem:[%s4406_s10 + $0x160] ss:$16 sps:$4 sm:$0xff]  }
  0x39   : > { %1233 = vmatprep.subr.bf16.mxu0 %v4328_v1  ;;  %2163 = vmatprep.subr.bf16.mxu1 %v4328_v1 }
  0x3c   : > { %1234 = vmatpush1.bf16.msra.mxu0 %v3995_v16  ;;  %2164 = vmatpush1.bf16.msra.mxu1 %v3995_v16  ;;  %v4077_v16 = vld [vmem:[%s4413_s13 + $0x160] ss:$16 sps:$4 sm:$0xff]  }
  0x3d   : > { %1235 = vmatprep.subr.bf16.mxu0 %v4328_v1  ;;  %2165 = vmatprep.subr.bf16.mxu1 %v4328_v1 }
  0x40   : > { %1236 = vmatpush1.bf16.msra.mxu0 %v3996_v17  ;;  %2166 = vmatpush1.bf16.msra.mxu1 %v3996_v17  ;;  %v4078_v17 = vld [vmem:[%s4406_s10 + $0x184] ss:$16 sps:$4 sm:$0xff]  }
  0x41   : > { %1237 = vmatprep.subr.bf16.mxu0 %v4328_v1  ;;  %2167 = vmatprep.subr.bf16.mxu1 %v4328_v1 }
  0x44   : > { %1238 = vmatpush1.bf16.msra.mxu0 %v3997_v18  ;;  %2168 = vmatpush1.bf16.msra.mxu1 %v3997_v18  ;;  %v4080_v18 = vld [vmem:[%s4413_s13 + $0x184] ss:$16 sps:$4 sm:$0xff]  }
  0x45   : > { %1432 = vmatprep.subr.bf16.mxu0 %v4328_v1  ;;  %2362 = vmatprep.subr.bf16.mxu1 %v4328_v1 }
  0x47   : > { %1240 = vmatmul.mubr.bf16.vlgmr.msra.gmra.mrb[0].mxu0 %v3998_v19  ;;  %2170 = vmatmul.mubr.bf16.vlgmr.msra.gmra.mrb[0].mxu1 %v4001_v20  ;;  %v4082_v19 = vld [vmem:[%s4406_s10 + $0x180] ss:$16 sps:$4 sm:$0xff]  }
  0x48   : > { %1433 = vmatpush1.bf16.msra.mxu0 %v4004_v21  ;;  %2363 = vmatpush1.bf16.msra.mxu1 %v4004_v21  ;;  %v4083_v20 = vld [vmem:[%s4413_s13 + $0x180] ss:$16 sps:$4 sm:$0xff]   ;;  %v4085_v21 = vld [vmem:[%s4406_s10 + $0x1a4] ss:$16 sps:$4 sm:$0xff]  }
  0x49   : > { %1247 = vmatprep.mubr.bf16.mxu0 %v4005_v22  ;;  %2177 = vmatprep.mubr.bf16.mxu1 %v4007_v23  ;;  %v4087_v22 = vld [vmem:[%s4413_s13 + $0x1a4] ss:$16 sps:$4 sm:$0xff]   ;;  %v4089_v23 = vld [vmem:[%s4406_s10 + $0x1a0] ss:$16 sps:$4 sm:$0xff]  }
  0x4a   : > { %1434 = vmatprep.subr.bf16.mxu0 %v4328_v1  ;;  %2364 = vmatprep.subr.bf16.mxu1 %v4328_v1 }
  0x4c   : > { %1435 = vmatpush1.bf16.msra.mxu0 %v4011_v24  ;;  %2365 = vmatpush1.bf16.msra.mxu1 %v4011_v24  ;;  %v4090_v24 = vld [vmem:[%s4413_s13 + $0x1a0] ss:$16 sps:$4 sm:$0xff]  }
  0x4d   : > { %1436 = vmatprep.subr.bf16.mxu0 %v4328_v1  ;;  %2366 = vmatprep.subr.bf16.mxu1 %v4328_v1 }
  0x4f   : > { %1248 = vmatmul.mubr.bf16.gmra.mrb[4].mxu0 %v4009_v25  ;;  %2178 = vmatmul.mubr.bf16.gmra.mrb[4].mxu1 %v4010_v26  ;;  %v4092_v25 = vld [vmem:[%s4406_s10 + $0x1c4] ss:$16 sps:$4 sm:$0xff]  }
  0x50   : > { %1255 = vmatprep.mubr.bf16.mxu0 %v4012_v27  ;;  %2185 = vmatprep.mubr.bf16.mxu1 %v4014_v28  ;;  %v4094_v26 = vld [vmem:[%s4413_s13 + $0x1c4] ss:$16 sps:$4 sm:$0xff]   ;;  %v4096_v27 = vld [vmem:[%s4406_s10 + $0x1c0] ss:$16 sps:$4 sm:$0xff]  }
  0x51   : > { %1437 = vmatpush1.bf16.msra.mxu0 %v4024_v29  ;;  %2367 = vmatpush1.bf16.msra.mxu1 %v4024_v29  ;;  %v4097_v28 = vld [vmem:[%s4413_s13 + $0x1c0] ss:$16 sps:$4 sm:$0xff]   ;;  %v4098_v29 = vld [vmem:[%s4406_s10 + $0x1e4] ss:$16 sps:$4 sm:$0xff]  }
  0x52   : > { %1438 = vmatprep.subr.bf16.mxu0 %v4328_v1  ;;  %2368 = vmatprep.subr.bf16.mxu1 %v4328_v1 }
  0x55   : > { %1439 = vmatpush1.bf16.msra.mxu0 %v4031_v31  ;;  %2369 = vmatpush1.bf16.msra.mxu1 %v4031_v31  ;;  %v4102_v31 = vld [vmem:[%s4406_s10 + $0x1e0] ss:$16 sps:$4 sm:$0xff]  }
  0x56   : > { %1440 = vmatprep.subr.bf16.mxu0 %v4328_v1  ;;  %2370 = vmatprep.subr.bf16.mxu1 %v4328_v1 }
  0x57   : > { %1256 = vmatmul.mubr.bf16.gmra.mrb[8].mxu0 %v4016_v30  ;;  %2186 = vmatmul.mubr.bf16.gmra.mrb[8].mxu1 %v4017_v32  ;;  %v4100_v30 = vld [vmem:[%s4413_s13 + $0x1e4] ss:$16 sps:$4 sm:$0xff]   ;;  %v4103_v32 = vld [vmem:[%s4413_s13 + $0x1e0] ss:$16 sps:$4 sm:$0xff]  }
  0x58   : > { %1263 = vmatprep.mubr.bf16.mxu0 %v4018_v33  ;;  %2193 = vmatprep.mubr.bf16.mxu1 %v4020_v34  ;;  %v4105_v33 = vld [vmem:[%s4406_s10 + $0x204] ss:$16 sps:$4 sm:$0xff]  }
  0x59   : > { %1441 = vmatpush1.bf16.msra.mxu0 %v4044_v35  ;;  %2371 = vmatpush1.bf16.msra.mxu1 %v4044_v35  ;;  %v4107_v34 = vld [vmem:[%s4413_s13 + $0x204] ss:$16 sps:$4 sm:$0xff]   ;;  %v4109_v35 = vld [vmem:[%s4406_s10 + $0x200] ss:$16 sps:$4 sm:$0xff]  }
  0x5a   : > { %1442 = vmatprep.subr.bf16.mxu0 %v4328_v1  ;;  %2372 = vmatprep.subr.bf16.mxu1 %v4328_v1 }
  0x5d   : > { %1443 = vmatpush1.bf16.msra.mxu0 %v4051_v36  ;;  %2373 = vmatpush1.bf16.msra.mxu1 %v4051_v36  ;;  %v4110_v36 = vld [vmem:[%s4413_s13 + $0x200] ss:$16 sps:$4 sm:$0xff]  }
  0x5e   : > { %1444 = vmatprep.subr.bf16.mxu0 %v4328_v1  ;;  %2374 = vmatprep.subr.bf16.mxu1 %v4328_v1 }
  0x5f   : > { %1264 = vmatmul.mubr.bf16.gmra.mrb[12].mxu0 %v4022_v37  ;;  %2194 = vmatmul.mubr.bf16.gmra.mrb[12].mxu1 %v4023_v38  ;;  %v4112_v37 = vld [vmem:[%s4406_s10 + $0x224] ss:$16 sps:$4 sm:$0xff]  }
  0x60   : > { %1271 = vmatprep.mubr.bf16.mxu0 %v4025_v39  ;;  %2201 = vmatprep.mubr.bf16.mxu1 %v4027_v40  ;;  %v4114_v38 = vld [vmem:[%s4413_s13 + $0x224] ss:$16 sps:$4 sm:$0xff]   ;;  %v4116_v39 = vld [vmem:[%s4406_s10 + $0x220] ss:$16 sps:$4 sm:$0xff]  }
  0x61   : > { %1445 = vmatpush1.bf16.msra.mxu0 %v4064_v41  ;;  %2375 = vmatpush1.bf16.msra.mxu1 %v4064_v41  ;;  %v4117_v40 = vld [vmem:[%s4413_s13 + $0x220] ss:$16 sps:$4 sm:$0xff]   ;;  %v4118_v41 = vld [vmem:[%s4406_s10 + $0x244] ss:$16 sps:$4 sm:$0xff]  }
  0x62   : > { %1446 = vmatprep.subr.bf16.mxu0 %v4328_v1  ;;  %2376 = vmatprep.subr.bf16.mxu1 %v4328_v1 }
  0x65   : > { %1447 = vmatpush1.bf16.msra.mxu0 %v4071_v42  ;;  %2377 = vmatpush1.bf16.msra.mxu1 %v4071_v42  ;;  %v4120_v42 = vld [vmem:[%s4413_s13 + $0x244] ss:$16 sps:$4 sm:$0xff]  }
  0x66   : > { %1448 = vmatprep.subr.bf16.mxu0 %v4328_v1  ;;  %2378 = vmatprep.subr.bf16.mxu1 %v4328_v1 }
  0x67   : > { %1272 = vmatmul.mubr.bf16.gmra.mrb[16].mxu0 %v4029_v43  ;;  %2202 = vmatmul.mubr.bf16.gmra.mrb[16].mxu1 %v4030_v44  ;;  %v4122_v43 = vld [vmem:[%s4406_s10 + $0x240] ss:$16 sps:$4 sm:$0xff]  }
  0x68   : > { %1279 = vmatprep.mubr.bf16.mxu0 %v4032_v45  ;;  %2209 = vmatprep.mubr.bf16.mxu1 %v4034_v46  ;;  %v4123_v44 = vld [vmem:[%s4413_s13 + $0x240] ss:$16 sps:$4 sm:$0xff]   ;;  %v4125_v45 = vld [vmem:[%s4406_s10 + $0x264] ss:$16 sps:$4 sm:$0xff]  }
  0x69   : > { %1449 = vmatpush1.bf16.msra.mxu0 %v4084_v47  ;;  %2379 = vmatpush1.bf16.msra.mxu1 %v4084_v47  ;;  %v4127_v46 = vld [vmem:[%s4413_s13 + $0x264] ss:$16 sps:$4 sm:$0xff]   ;;  %v4129_v47 = vld [vmem:[%s4406_s10 + $0x260] ss:$16 sps:$4 sm:$0xff]  }
  0x6a   : > { %1450 = vmatprep.subr.bf16.mxu0 %v4328_v1  ;;  %2380 = vmatprep.subr.bf16.mxu1 %v4328_v1 }
  0x6d   : > { %1451 = vmatpush1.bf16.msra.mxu0 %v4091_v48  ;;  %2381 = vmatpush1.bf16.msra.mxu1 %v4091_v48  ;;  %v4130_v48 = vld [vmem:[%s4413_s13 + $0x260] ss:$16 sps:$4 sm:$0xff]  }
  0x6e   : > { %1452 = vmatprep.subr.bf16.mxu0 %v4328_v1  ;;  %2382 = vmatprep.subr.bf16.mxu1 %v4328_v1 }
  0x6f   : > { %1280 = vmatmul.mubr.bf16.gmra.mrb[20].mxu0 %v4036_v49  ;;  %2210 = vmatmul.mubr.bf16.gmra.mrb[20].mxu1 %v4037_v50  ;;  %v4132_v49 = vld [vmem:[%s4406_s10 + $0x284] ss:$16 sps:$4 sm:$0xff]  }
  0x70   : > { %1287 = vmatprep.mubr.bf16.mxu0 %v4038_v51  ;;  %2217 = vmatprep.mubr.bf16.mxu1 %v4040_v52  ;;  %v4134_v50 = vld [vmem:[%s4413_s13 + $0x284] ss:$16 sps:$4 sm:$0xff]   ;;  %v4136_v51 = vld [vmem:[%s4406_s10 + $0x280] ss:$16 sps:$4 sm:$0xff]  }
  0x71   : > { %1453 = vmatpush1.bf16.msra.mxu0 %v4104_v53  ;;  %2383 = vmatpush1.bf16.msra.mxu1 %v4104_v53  ;;  %v4137_v52 = vld [vmem:[%s4413_s13 + $0x280] ss:$16 sps:$4 sm:$0xff]   ;;  %v4138_v53 = vld [vmem:[%s4406_s10 + $0x2a4] ss:$16 sps:$4 sm:$0xff]  }
  0x72   : > { %1454 = vmatprep.subr.bf16.mxu0 %v4328_v1  ;;  %2384 = vmatprep.subr.bf16.mxu1 %v4328_v1 }
  0x75   : > { %1455 = vmatpush1.bf16.msra.mxu0 %v4111_v54  ;;  %2385 = vmatpush1.bf16.msra.mxu1 %v4111_v54  ;;  %v4140_v54 = vld [vmem:[%s4413_s13 + $0x2a4] ss:$16 sps:$4 sm:$0xff]  }
  0x76   : > { %1456 = vmatprep.subr.bf16.mxu0 %v4328_v1  ;;  %2386 = vmatprep.subr.bf16.mxu1 %v4328_v1 }
  0x77   : > { %1288 = vmatmul.mubr.bf16.gmra.mrb[24].mxu0 %v4042_v55  ;;  %2218 = vmatmul.mubr.bf16.gmra.mrb[24].mxu1 %v4043_v56  ;;  %v4142_v55 = vld [vmem:[%s4406_s10 + $0x2a0] ss:$16 sps:$4 sm:$0xff]  }
  0x78   : > { %1295 = vmatprep.mubr.bf16.mxu0 %v4045_v57  ;;  %2225 = vmatprep.mubr.bf16.mxu1 %v4047_v58  ;;  %v4143_v56 = vld [vmem:[%s4413_s13 + $0x2a0] ss:$16 sps:$4 sm:$0xff]   ;;  %v4145_v57 = vld [vmem:[%s4406_s10 + $0x2c4] ss:$16 sps:$4 sm:$0xff]  }
  0x79   : > { %1457 = vmatpush1.bf16.msra.mxu0 %v4124_v59  ;;  %2387 = vmatpush1.bf16.msra.mxu1 %v4124_v59  ;;  %v4147_v58 = vld [vmem:[%s4413_s13 + $0x2c4] ss:$16 sps:$4 sm:$0xff]   ;;  %v4149_v59 = vld [vmem:[%s4406_s10 + $0x2c0] ss:$16 sps:$4 sm:$0xff]  }
  0x7a   : > { %1458 = vmatprep.subr.bf16.mxu0 %v4328_v1  ;;  %2388 = vmatprep.subr.bf16.mxu1 %v4328_v1 }
  0x7d   : > { %1459 = vmatpush1.bf16.msra.mxu0 %v4131_v60  ;;  %2389 = vmatpush1.bf16.msra.mxu1 %v4131_v60  ;;  %v4150_v60 = vld [vmem:[%s4413_s13 + $0x2c0] ss:$16 sps:$4 sm:$0xff]  }
  0x7e   : > { %1460 = vmatprep.subr.bf16.mxu0 %v4328_v1  ;;  %2390 = vmatprep.subr.bf16.mxu1 %v4328_v1 }
  0x7f   : > { %1296 = vmatmul.mubr.bf16.gmra.mrb[28].mxu0 %v4049_v61  ;;  %2226 = vmatmul.mubr.bf16.gmra.mrb[28].mxu1 %v4050_v62  ;;  %v4152_v61 = vld [vmem:[%s4406_s10 + $0x2e4] ss:$16 sps:$4 sm:$0xff]  }
  0x80   : > { %1303 = vmatprep.mubr.bf16.mxu0 %v4052_v63  ;;  %2233 = vmatprep.mubr.bf16.mxu1 %v4054_v0  ;;  %v4154_v62 = vld [vmem:[%s4413_s13 + $0x2e4] ss:$16 sps:$4 sm:$0xff]   ;;  %v4156_v63 = vld [vmem:[%s4406_s10 + $0x2e0] ss:$16 sps:$4 sm:$0xff]  }
  0x81   : > { %1461 = vmatpush1.bf16.msra.mxu0 %v4144_v2  ;;  %2391 = vmatpush1.bf16.msra.mxu1 %v4144_v2  ;;  %v4157_v0 = vld [vmem:[%s4413_s13 + $0x2e0] ss:$16 sps:$4 sm:$0xff]   ;;  %v4160_v2 = vld [vmem:[%s4406_s10 + $0xc] ss:$16 sps:$4 sm:$0xff]  }
  0x82   : > { %1462 = vmatprep.subr.bf16.mxu0 %v4328_v1  ;;  %2392 = vmatprep.subr.bf16.mxu1 %v4328_v1  ;;  %v4069_v1 = vld [vmem:[%s4406_s10 + $0x140] ss:$16 sps:$4 sm:$0xff]  }
  0x85   : > { %1463 = vmatpush1.bf16.msra.mxu0 %v4151_v3  ;;  %2393 = vmatpush1.bf16.msra.mxu1 %v4151_v3  ;;  %v4163_v3 = vld [vmem:[%s4413_s13 + $0xc] ss:$16 sps:$4 sm:$0xff]  }
  0x87   : > { %1304 = vmatmul.mubr.bf16.gmra.mrb[32].mxu0 %v4056_v4  ;;  %2234 = vmatmul.mubr.bf16.gmra.mrb[32].mxu1 %v4057_v5  ;;  %v4158_v4 = vld [vmem:[%s4406_s10 + $0x8] ss:$16 sps:$4 sm:$0xff]  }
  0x88   : > { %1311 = vmatprep.mubr.bf16.mxu0 %v4058_v6  ;;  %2241 = vmatprep.mubr.bf16.mxu1 %v4060_v7  ;;  %v4161_v5 = vld [vmem:[%s4413_s13 + $0x8] ss:$16 sps:$4 sm:$0xff]   ;;  %v4164_v6 = vld [vmem:[%s4406_s10 + $0x2c] ss:$16 sps:$4 sm:$0xff]  }
  0x89   : > { %v4166_v7 = vld [vmem:[%s4413_s13 + $0x2c] ss:$16 sps:$4 sm:$0xff]  }
  0x8f   : > { %1312 = vmatmul.mubr.bf16.gmra.mrb[36].mxu0 %v4062_v8  ;;  %2242 = vmatmul.mubr.bf16.gmra.mrb[36].mxu1 %v4063_v9  ;;  %v4168_v8 = vld [vmem:[%s4406_s10 + $0x28] ss:$16 sps:$4 sm:$0xff]  }
  0x90   : > { %1319 = vmatprep.mubr.bf16.mxu0 %v4065_v10  ;;  %2249 = vmatprep.mubr.bf16.mxu1 %v4067_v11  ;;  %v4169_v9 = vld [vmem:[%s4413_s13 + $0x28] ss:$16 sps:$4 sm:$0xff]   ;;  %v4170_v10 = vld [vmem:[%s4406_s10 + $0x4c] ss:$16 sps:$4 sm:$0xff]  }
  0x91   : > { %v4172_v11 = vld [vmem:[%s4413_s13 + $0x4c] ss:$16 sps:$4 sm:$0xff]  }
  0x97   : > { %1320 = vmatmul.mubr.bf16.gmra.mrb[40].mxu0 %v4069_v1  ;;  %2250 = vmatmul.mubr.bf16.gmra.mrb[40].mxu1 %v4070_v12  ;;  %v4174_v1 = vld [vmem:[%s4406_s10 + $0x48] ss:$16 sps:$4 sm:$0xff]  }
  0x98   : > { %1327 = vmatprep.mubr.bf16.mxu0 %v4072_v13  ;;  %2257 = vmatprep.mubr.bf16.mxu1 %v4074_v14  ;;  %v4175_v12 = vld [vmem:[%s4413_s13 + $0x48] ss:$16 sps:$4 sm:$0xff]   ;;  %v4176_v13 = vld [vmem:[%s4406_s10 + $0x6c] ss:$16 sps:$4 sm:$0xff]  }
  0x99   : > { %v4178_v14 = vld [vmem:[%s4413_s13 + $0x6c] ss:$16 sps:$4 sm:$0xff]  }
  0x9f   : > { %1328 = vmatmul.mubr.bf16.gmra.mrb[44].mxu0 %v4076_v15  ;;  %2258 = vmatmul.mubr.bf16.gmra.mrb[44].mxu1 %v4077_v16  ;;  %v4180_v15 = vld [vmem:[%s4406_s10 + $0x68] ss:$16 sps:$4 sm:$0xff]  }
  0xa0   : > { %1335 = vmatprep.mubr.bf16.mxu0 %v4078_v17  ;;  %2265 = vmatprep.mubr.bf16.mxu1 %v4080_v18  ;;  %v4181_v16 = vld [vmem:[%s4413_s13 + $0x68] ss:$16 sps:$4 sm:$0xff]   ;;  %v4182_v17 = vld [vmem:[%s4406_s10 + $0x8c] ss:$16 sps:$4 sm:$0xff]  }
  0xa1   : > { %v4184_v18 = vld [vmem:[%s4413_s13 + $0x8c] ss:$16 sps:$4 sm:$0xff]  }
  0xa7   : > { %1336 = vmatmul.mubr.bf16.gmra.mrb[48].mxu0 %v4082_v19  ;;  %2266 = vmatmul.mubr.bf16.gmra.mrb[48].mxu1 %v4083_v20  ;;  %v4186_v19 = vld [vmem:[%s4406_s10 + $0x88] ss:$16 sps:$4 sm:$0xff]  }
  0xa8   : > { %1343 = vmatprep.mubr.bf16.mxu0 %v4085_v21  ;;  %2273 = vmatprep.mubr.bf16.mxu1 %v4087_v22  ;;  %v4187_v20 = vld [vmem:[%s4413_s13 + $0x88] ss:$16 sps:$4 sm:$0xff]   ;;  %v4188_v21 = vld [vmem:[%s4406_s10 + $0xac] ss:$16 sps:$4 sm:$0xff]  }
  0xa9   : > { %v4190_v22 = vld [vmem:[%s4413_s13 + $0xac] ss:$16 sps:$4 sm:$0xff]  }
  0xaf   : > { %1344 = vmatmul.mubr.bf16.gmra.mrb[52].mxu0 %v4089_v23  ;;  %2274 = vmatmul.mubr.bf16.gmra.mrb[52].mxu1 %v4090_v24  ;;  %v4192_v23 = vld [vmem:[%s4406_s10 + $0xa8] ss:$16 sps:$4 sm:$0xff]  }
  0xb0   : > { %1351 = vmatprep.mubr.bf16.mxu0 %v4092_v25  ;;  %2281 = vmatprep.mubr.bf16.mxu1 %v4094_v26  ;;  %v4193_v24 = vld [vmem:[%s4413_s13 + $0xa8] ss:$16 sps:$4 sm:$0xff]   ;;  %v4194_v25 = vld [vmem:[%s4406_s10 + $0xcc] ss:$16 sps:$4 sm:$0xff]  }
  0xb1   : > { %v4196_v26 = vld [vmem:[%s4413_s13 + $0xcc] ss:$16 sps:$4 sm:$0xff]  }
  0xb7   : > { %1352 = vmatmul.mubr.bf16.gmra.mrb[56].mxu0 %v4096_v27  ;;  %2282 = vmatmul.mubr.bf16.gmra.mrb[56].mxu1 %v4097_v28  ;;  %v4198_v27 = vld [vmem:[%s4406_s10 + $0xc8] ss:$16 sps:$4 sm:$0xff]  }
  0xb8   : > { %1359 = vmatprep.mubr.bf16.mxu0 %v4098_v29  ;;  %2289 = vmatprep.mubr.bf16.mxu1 %v4100_v30  ;;  %v4199_v28 = vld [vmem:[%s4413_s13 + $0xc8] ss:$16 sps:$4 sm:$0xff]   ;;  %v4200_v29 = vld [vmem:[%s4406_s10 + $0xec] ss:$16 sps:$4 sm:$0xff]  }
  0xb9   : > { %v4202_v30 = vld [vmem:[%s4413_s13 + $0xec] ss:$16 sps:$4 sm:$0xff]  }
  0xbf   : > { %1360 = vmatmul.mubr.bf16.gmra.mrb[60].mxu0 %v4102_v31  ;;  %2290 = vmatmul.mubr.bf16.gmra.mrb[60].mxu1 %v4103_v32  ;;  %v4204_v31 = vld [vmem:[%s4406_s10 + $0xe8] ss:$16 sps:$4 sm:$0xff]  }
  0xc0   : > { %1367 = vmatprep.mubr.bf16.mxu0 %v4105_v33  ;;  %2297 = vmatprep.mubr.bf16.mxu1 %v4107_v34  ;;  %v4205_v32 = vld [vmem:[%s4413_s13 + $0xe8] ss:$16 sps:$4 sm:$0xff]   ;;  %v4206_v33 = vld [vmem:[%s4406_s10 + $0x10c] ss:$16 sps:$4 sm:$0xff]  }
  0xc1   : > { %v4208_v34 = vld [vmem:[%s4413_s13 + $0x10c] ss:$16 sps:$4 sm:$0xff]  }
  0xc7   : > { %1368 = vmatmul.mubr.bf16.gmra.mrb[64].mxu0 %v4109_v35  ;;  %2298 = vmatmul.mubr.bf16.gmra.mrb[64].mxu1 %v4110_v36  ;;  %v4210_v35 = vld [vmem:[%s4406_s10 + $0x108] ss:$16 sps:$4 sm:$0xff]  }
  0xc8   : > { %1375 = vmatprep.mubr.bf16.mxu0 %v4112_v37  ;;  %2305 = vmatprep.mubr.bf16.mxu1 %v4114_v38  ;;  %v4211_v36 = vld [vmem:[%s4413_s13 + $0x108] ss:$16 sps:$4 sm:$0xff]   ;;  %v4212_v37 = vld [vmem:[%s4406_s10 + $0x12c] ss:$16 sps:$4 sm:$0xff]  }
  0xc9   : > { %v4214_v38 = vld [vmem:[%s4413_s13 + $0x12c] ss:$16 sps:$4 sm:$0xff]  }
  0xcf   : > { %1376 = vmatmul.mubr.bf16.gmra.mrb[68].mxu0 %v4116_v39  ;;  %2306 = vmatmul.mubr.bf16.gmra.mrb[68].mxu1 %v4117_v40  ;;  %v4216_v39 = vld [vmem:[%s4406_s10 + $0x128] ss:$16 sps:$4 sm:$0xff]  }
  0xd0   : > { %1383 = vmatprep.mubr.bf16.mxu0 %v4118_v41  ;;  %2313 = vmatprep.mubr.bf16.mxu1 %v4120_v42  ;;  %v4217_v40 = vld [vmem:[%s4413_s13 + $0x128] ss:$16 sps:$4 sm:$0xff]   ;;  %v4218_v41 = vld [vmem:[%s4406_s10 + $0x14c] ss:$16 sps:$4 sm:$0xff]  }
  0xd1   : > { %v4220_v42 = vld [vmem:[%s4413_s13 + $0x14c] ss:$16 sps:$4 sm:$0xff]  }
  0xd7   : > { %1384 = vmatmul.mubr.bf16.gmra.mrb[72].mxu0 %v4122_v43  ;;  %2314 = vmatmul.mubr.bf16.gmra.mrb[72].mxu1 %v4123_v44  ;;  %v4222_v43 = vld [vmem:[%s4406_s10 + $0x148] ss:$16 sps:$4 sm:$0xff]  }
  0xd8   : > { %1391 = vmatprep.mubr.bf16.mxu0 %v4125_v45  ;;  %2321 = vmatprep.mubr.bf16.mxu1 %v4127_v46  ;;  %v4223_v44 = vld [vmem:[%s4413_s13 + $0x148] ss:$16 sps:$4 sm:$0xff]   ;;  %v4224_v45 = vld [vmem:[%s4406_s10 + $0x16c] ss:$16 sps:$4 sm:$0xff]  }
  0xd9   : > { %v4226_v46 = vld [vmem:[%s4413_s13 + $0x16c] ss:$16 sps:$4 sm:$0xff]  }
  0xdf   : > { %1392 = vmatmul.mubr.bf16.gmra.mrb[76].mxu0 %v4129_v47  ;;  %2322 = vmatmul.mubr.bf16.gmra.mrb[76].mxu1 %v4130_v48  ;;  %v4228_v47 = vld [vmem:[%s4406_s10 + $0x168] ss:$16 sps:$4 sm:$0xff]  }
  0xe0   : > { %1399 = vmatprep.mubr.bf16.mxu0 %v4132_v49  ;;  %2329 = vmatprep.mubr.bf16.mxu1 %v4134_v50  ;;  %v4229_v48 = vld [vmem:[%s4413_s13 + $0x168] ss:$16 sps:$4 sm:$0xff]   ;;  %v4230_v49 = vld [vmem:[%s4406_s10 + $0x18c] ss:$16 sps:$4 sm:$0xff]  }
  0xe1   : > { %v4232_v50 = vld [vmem:[%s4413_s13 + $0x18c] ss:$16 sps:$4 sm:$0xff]  }
  0xe7   : > { %1400 = vmatmul.mubr.bf16.gmra.mrb[80].mxu0 %v4136_v51  ;;  %2330 = vmatmul.mubr.bf16.gmra.mrb[80].mxu1 %v4137_v52  ;;  %v4234_v51 = vld [vmem:[%s4406_s10 + $0x188] ss:$16 sps:$4 sm:$0xff]  }
  0xe8   : > { %1407 = vmatprep.mubr.bf16.mxu0 %v4138_v53  ;;  %2337 = vmatprep.mubr.bf16.mxu1 %v4140_v54  ;;  %v4235_v52 = vld [vmem:[%s4413_s13 + $0x188] ss:$16 sps:$4 sm:$0xff]   ;;  %v4236_v53 = vld [vmem:[%s4406_s10 + $0x1ac] ss:$16 sps:$4 sm:$0xff]  }
  0xe9   : > { %v4238_v54 = vld [vmem:[%s4413_s13 + $0x1ac] ss:$16 sps:$4 sm:$0xff]  }
  0xef   : > { %1408 = vmatmul.mubr.bf16.gmra.mrb[84].mxu0 %v4142_v55  ;;  %2338 = vmatmul.mubr.bf16.gmra.mrb[84].mxu1 %v4143_v56  ;;  %v4240_v55 = vld [vmem:[%s4406_s10 + $0x1a8] ss:$16 sps:$4 sm:$0xff]  }
  0xf0   : > { %1415 = vmatprep.mubr.bf16.mxu0 %v4145_v57  ;;  %2345 = vmatprep.mubr.bf16.mxu1 %v4147_v58  ;;  %v4241_v56 = vld [vmem:[%s4413_s13 + $0x1a8] ss:$16 sps:$4 sm:$0xff]   ;;  %v4242_v57 = vld [vmem:[%s4406_s10 + $0x1cc] ss:$16 sps:$4 sm:$0xff]  }
  0xf1   : > { %v4244_v58 = vld [vmem:[%s4413_s13 + $0x1cc] ss:$16 sps:$4 sm:$0xff]  }
  0xf7   : > { %1416 = vmatmul.mubr.bf16.gmra.mrb[88].mxu0 %v4149_v59  ;;  %2346 = vmatmul.mubr.bf16.gmra.mrb[88].mxu1 %v4150_v60  ;;  %v4246_v59 = vld [vmem:[%s4406_s10 + $0x1c8] ss:$16 sps:$4 sm:$0xff]  }
  0xf8   : > { %1423 = vmatprep.mubr.bf16.mxu0 %v4152_v61  ;;  %2353 = vmatprep.mubr.bf16.mxu1 %v4154_v62  ;;  %v4247_v60 = vld [vmem:[%s4413_s13 + $0x1c8] ss:$16 sps:$4 sm:$0xff]   ;;  %v4248_v61 = vld [vmem:[%s4406_s10 + $0x1ec] ss:$16 sps:$4 sm:$0xff]  }
  0xf9   : > { %v4250_v62 = vld [vmem:[%s4413_s13 + $0x1ec] ss:$16 sps:$4 sm:$0xff]  }
  0xff   : > { %1424 = vmatmul.mubr.bf16.gmra.mrb[92].mxu0 %v4156_v63  ;;  %2354 = vmatmul.mubr.bf16.gmra.mrb[92].mxu1 %v4157_v0  ;;  %v4252_v63 = vld [vmem:[%s4406_s10 + $0x1e8] ss:$16 sps:$4 sm:$0xff]  }
 0x100   : > { %1464 = vmatprep.mubr.bf16.mxu0 %v4160_v2  ;;  %2394 = vmatprep.mubr.bf16.mxu1 %v4163_v3  ;;  %v4253_v0 = vld [vmem:[%s4413_s13 + $0x1e8] ss:$16 sps:$4 sm:$0xff]   ;;  %v4254_v2 = vld [vmem:[%s4406_s10 + $0x20c] ss:$16 sps:$4 sm:$0xff]  }
 0x101   : > { %v4256_v3 = vld [vmem:[%s4413_s13 + $0x20c] ss:$16 sps:$4 sm:$0xff]  }
 0x107   : > { %1465 = vmatmul.mubr.bf16.vlgmr.msra.gmra.mrb[0].mxu0 %v4158_v4  ;;  %2395 = vmatmul.mubr.bf16.vlgmr.msra.gmra.mrb[0].mxu1 %v4161_v5  ;;  %v4258_v4 = vld [vmem:[%s4406_s10 + $0x208] ss:$16 sps:$4 sm:$0xff]  }
 0x108   : > { %1472 = vmatprep.mubr.bf16.mxu0 %v4164_v6  ;;  %2402 = vmatprep.mubr.bf16.mxu1 %v4166_v7  ;;  %v4259_v5 = vld [vmem:[%s4413_s13 + $0x208] ss:$16 sps:$4 sm:$0xff]   ;;  %v4260_v6 = vld [vmem:[%s4406_s10 + $0x22c] ss:$16 sps:$4 sm:$0xff]  }
 0x109   : > { %v4262_v7 = vld [vmem:[%s4413_s13 + $0x22c] ss:$16 sps:$4 sm:$0xff]  }
 0x10f   : > { %1473 = vmatmul.mubr.bf16.gmra.mrb[4].mxu0 %v4168_v8  ;;  %2403 = vmatmul.mubr.bf16.gmra.mrb[4].mxu1 %v4169_v9  ;;  %v4264_v8 = vld [vmem:[%s4406_s10 + $0x228] ss:$16 sps:$4 sm:$0xff]  }
 0x110   : > { %1480 = vmatprep.mubr.bf16.mxu0 %v4170_v10  ;;  %2410 = vmatprep.mubr.bf16.mxu1 %v4172_v11  ;;  %v4265_v9 = vld [vmem:[%s4413_s13 + $0x228] ss:$16 sps:$4 sm:$0xff]   ;;  %v4266_v10 = vld [vmem:[%s4406_s10 + $0x24c] ss:$16 sps:$4 sm:$0xff]  }
 0x111   : > { %v4268_v11 = vld [vmem:[%s4413_s13 + $0x24c] ss:$16 sps:$4 sm:$0xff]  }
 0x117   : > { %1481 = vmatmul.mubr.bf16.gmra.mrb[8].mxu0 %v4174_v1  ;;  %2411 = vmatmul.mubr.bf16.gmra.mrb[8].mxu1 %v4175_v12  ;;  %v4270_v1 = vld [vmem:[%s4406_s10 + $0x248] ss:$16 sps:$4 sm:$0xff]  }
 0x118   : > { %1488 = vmatprep.mubr.bf16.mxu0 %v4176_v13  ;;  %2418 = vmatprep.mubr.bf16.mxu1 %v4178_v14  ;;  %v4271_v12 = vld [vmem:[%s4413_s13 + $0x248] ss:$16 sps:$4 sm:$0xff]   ;;  %v4272_v13 = vld [vmem:[%s4406_s10 + $0x26c] ss:$16 sps:$4 sm:$0xff]  }
 0x119   : > { %v4274_v14 = vld [vmem:[%s4413_s13 + $0x26c] ss:$16 sps:$4 sm:$0xff]  }
 0x11f   : > { %1489 = vmatmul.mubr.bf16.gmra.mrb[12].mxu0 %v4180_v15  ;;  %2419 = vmatmul.mubr.bf16.gmra.mrb[12].mxu1 %v4181_v16  ;;  %v4276_v15 = vld [vmem:[%s4406_s10 + $0x268] ss:$16 sps:$4 sm:$0xff]  }
 0x120   : > { %1496 = vmatprep.mubr.bf16.mxu0 %v4182_v17  ;;  %2426 = vmatprep.mubr.bf16.mxu1 %v4184_v18  ;;  %v4277_v16 = vld [vmem:[%s4413_s13 + $0x268] ss:$16 sps:$4 sm:$0xff]   ;;  %v4278_v17 = vld [vmem:[%s4406_s10 + $0x28c] ss:$16 sps:$4 sm:$0xff]  }
 0x121   : > { %v4280_v18 = vld [vmem:[%s4413_s13 + $0x28c] ss:$16 sps:$4 sm:$0xff]  }
 0x127   : > { %1497 = vmatmul.mubr.bf16.gmra.mrb[16].mxu0 %v4186_v19  ;;  %2427 = vmatmul.mubr.bf16.gmra.mrb[16].mxu1 %v4187_v20  ;;  %v4282_v19 = vld [vmem:[%s4406_s10 + $0x288] ss:$16 sps:$4 sm:$0xff]  }
 0x128   : > { %1504 = vmatprep.mubr.bf16.mxu0 %v4188_v21  ;;  %2434 = vmatprep.mubr.bf16.mxu1 %v4190_v22  ;;  %v4283_v20 = vld [vmem:[%s4413_s13 + $0x288] ss:$16 sps:$4 sm:$0xff]   ;;  %v4284_v21 = vld [vmem:[%s4406_s10 + $0x2ac] ss:$16 sps:$4 sm:$0xff]  }
 0x129   : > { %v4286_v22 = vld [vmem:[%s4413_s13 + $0x2ac] ss:$16 sps:$4 sm:$0xff]  }
 0x12f   : > { %1505 = vmatmul.mubr.bf16.gmra.mrb[20].mxu0 %v4192_v23  ;;  %2435 = vmatmul.mubr.bf16.gmra.mrb[20].mxu1 %v4193_v24  ;;  %v4288_v23 = vld [vmem:[%s4406_s10 + $0x2a8] ss:$16 sps:$4 sm:$0xff]  }
 0x130   : > { %1512 = vmatprep.mubr.bf16.mxu0 %v4194_v25  ;;  %2442 = vmatprep.mubr.bf16.mxu1 %v4196_v26  ;;  %v4289_v24 = vld [vmem:[%s4413_s13 + $0x2a8] ss:$16 sps:$4 sm:$0xff]   ;;  %v4290_v25 = vld [vmem:[%s4406_s10 + $0x2cc] ss:$16 sps:$4 sm:$0xff]  }
 0x131   : > { %v4292_v26 = vld [vmem:[%s4413_s13 + $0x2cc] ss:$16 sps:$4 sm:$0xff]  }
 0x137   : > { %1513 = vmatmul.mubr.bf16.gmra.mrb[24].mxu0 %v4198_v27  ;;  %2443 = vmatmul.mubr.bf16.gmra.mrb[24].mxu1 %v4199_v28  ;;  %v4294_v27 = vld [vmem:[%s4406_s10 + $0x2c8] ss:$16 sps:$4 sm:$0xff]  }
 0x138   : > { %1520 = vmatprep.mubr.bf16.mxu0 %v4200_v29  ;;  %2450 = vmatprep.mubr.bf16.mxu1 %v4202_v30  ;;  %v4295_v28 = vld [vmem:[%s4413_s13 + $0x2c8] ss:$16 sps:$4 sm:$0xff]   ;;  %v4296_v29 = vld [vmem:[%s4406_s10 + $0x2ec] ss:$16 sps:$4 sm:$0xff]  }
 0x139   : > { %v4298_v30 = vld [vmem:[%s4413_s13 + $0x2ec] ss:$16 sps:$4 sm:$0xff]  }
 0x13f   : > { %1521 = vmatmul.mubr.bf16.gmra.mrb[28].mxu0 %v4204_v31  ;;  %2451 = vmatmul.mubr.bf16.gmra.mrb[28].mxu1 %v4205_v32  ;;  %v4300_v31 = vld [vmem:[%s4406_s10 + $0x2e8] ss:$16 sps:$4 sm:$0xff]   ;;  %s3956_s10 = smul.u32 96, %s5052_s18 }
 0x140   : > { %1528 = vmatprep.mubr.bf16.mxu0 %v4206_v33  ;;  %2458 = vmatprep.mubr.bf16.mxu1 %v4208_v34  ;;  %v4301_v32 = vld [vmem:[%s4413_s13 + $0x2e8] ss:$16 sps:$4 sm:$0xff]   ;;  %v4745_v33 = vld [vmem:[%s5044_s3] ss:$0 sm:$0xff] }
 0x141   : > { %v4750_v34 = vld [vmem:[%s5045_s4] ss:$0 sm:$0xff]  ;;  %s4794_s16 = scalar_lea.vmem %s5046_s5, %s3956_s10 }
 0x147   : > { %1529 = vmatmul.mubr.bf16.gmra.mrb[32].mxu0 %v4210_v35  ;;  %2459 = vmatmul.mubr.bf16.gmra.mrb[32].mxu1 %v4211_v36 }
 0x148   : > { %1536 = vmatprep.mubr.bf16.mxu0 %v4212_v37  ;;  %2466 = vmatprep.mubr.bf16.mxu1 %v4214_v38 }
 0x14f   : > { %1537 = vmatmul.mubr.bf16.gmra.mrb[36].mxu0 %v4216_v39  ;;  %2467 = vmatmul.mubr.bf16.gmra.mrb[36].mxu1 %v4217_v40 }
 0x150   : > { %1544 = vmatprep.mubr.bf16.mxu0 %v4218_v41  ;;  %2474 = vmatprep.mubr.bf16.mxu1 %v4220_v42 }
 0x157   : > { %1545 = vmatmul.mubr.bf16.gmra.mrb[40].mxu0 %v4222_v43  ;;  %2475 = vmatmul.mubr.bf16.gmra.mrb[40].mxu1 %v4223_v44 }
 0x158   : > { %1552 = vmatprep.mubr.bf16.mxu0 %v4224_v45  ;;  %2482 = vmatprep.mubr.bf16.mxu1 %v4226_v46 }
 0x15f   : > { %1553 = vmatmul.mubr.bf16.gmra.mrb[44].mxu0 %v4228_v47  ;;  %2483 = vmatmul.mubr.bf16.gmra.mrb[44].mxu1 %v4229_v48 }
 0x160   : > { %1560 = vmatprep.mubr.bf16.mxu0 %v4230_v49  ;;  %2490 = vmatprep.mubr.bf16.mxu1 %v4232_v50 }
 0x167   : > { %1561 = vmatmul.mubr.bf16.gmra.mrb[48].mxu0 %v4234_v51  ;;  %2491 = vmatmul.mubr.bf16.gmra.mrb[48].mxu1 %v4235_v52 }
 0x168   : > { %1568 = vmatprep.mubr.bf16.mxu0 %v4236_v53  ;;  %2498 = vmatprep.mubr.bf16.mxu1 %v4238_v54 }
 0x16f   : > { %1569 = vmatmul.mubr.bf16.gmra.mrb[52].mxu0 %v4240_v55  ;;  %2499 = vmatmul.mubr.bf16.gmra.mrb[52].mxu1 %v4241_v56 }
 0x170   : > { %1576 = vmatprep.mubr.bf16.mxu0 %v4242_v57  ;;  %2506 = vmatprep.mubr.bf16.mxu1 %v4244_v58 }
 0x177   : > { %1577 = vmatmul.mubr.bf16.gmra.mrb[56].mxu0 %v4246_v59  ;;  %2507 = vmatmul.mubr.bf16.gmra.mrb[56].mxu1 %v4247_v60 }
 0x178   : > { %1584 = vmatprep.mubr.bf16.mxu0 %v4248_v61  ;;  %2514 = vmatprep.mubr.bf16.mxu1 %v4250_v62 }
 0x17f   : > { %1585 = vmatmul.mubr.bf16.gmra.mrb[60].mxu0 %v4252_v63  ;;  %2515 = vmatmul.mubr.bf16.gmra.mrb[60].mxu1 %v4253_v0 }
 0x180   : > { %1592 = vmatprep.mubr.bf16.mxu0 %v4254_v2  ;;  %2522 = vmatprep.mubr.bf16.mxu1 %v4256_v3 }
 0x187   : > { %1593 = vmatmul.mubr.bf16.gmra.mrb[64].mxu0 %v4258_v4  ;;  %2523 = vmatmul.mubr.bf16.gmra.mrb[64].mxu1 %v4259_v5 }
 0x188   : > { %1600 = vmatprep.mubr.bf16.mxu0 %v4260_v6  ;;  %2530 = vmatprep.mubr.bf16.mxu1 %v4262_v7 }
 0x18f   : > { %1601 = vmatmul.mubr.bf16.gmra.mrb[68].mxu0 %v4264_v8  ;;  %2531 = vmatmul.mubr.bf16.gmra.mrb[68].mxu1 %v4265_v9 }
 0x190   : > { %1608 = vmatprep.mubr.bf16.mxu0 %v4266_v10  ;;  %2538 = vmatprep.mubr.bf16.mxu1 %v4268_v11 }
 0x197   : > { %1609 = vmatmul.mubr.bf16.gmra.mrb[72].mxu0 %v4270_v1  ;;  %2539 = vmatmul.mubr.bf16.gmra.mrb[72].mxu1 %v4271_v12 }
 0x198   : > { %1616 = vmatprep.mubr.bf16.mxu0 %v4272_v13  ;;  %2546 = vmatprep.mubr.bf16.mxu1 %v4274_v14 }
 0x19f   : > { %1617 = vmatmul.mubr.bf16.gmra.mrb[76].mxu0 %v4276_v15  ;;  %2547 = vmatmul.mubr.bf16.gmra.mrb[76].mxu1 %v4277_v16 }
 0x1a0   : > { %1624 = vmatprep.mubr.bf16.mxu0 %v4278_v17  ;;  %2554 = vmatprep.mubr.bf16.mxu1 %v4280_v18 }
 0x1a7   : > { %1625 = vmatmul.mubr.bf16.gmra.mrb[80].mxu0 %v4282_v19  ;;  %2555 = vmatmul.mubr.bf16.gmra.mrb[80].mxu1 %v4283_v20 }
 0x1a8   : > { %1632 = vmatprep.mubr.bf16.mxu0 %v4284_v21  ;;  %2562 = vmatprep.mubr.bf16.mxu1 %v4286_v22 }
 0x1af   : > { %1633 = vmatmul.mubr.bf16.gmra.mrb[84].mxu0 %v4288_v23  ;;  %2563 = vmatmul.mubr.bf16.gmra.mrb[84].mxu1 %v4289_v24 }
 0x1b0   : > { %1640 = vmatprep.mubr.bf16.mxu0 %v4290_v25  ;;  %2570 = vmatprep.mubr.bf16.mxu1 %v4292_v26 }
 0x1b7   : > { %1641 = vmatmul.mubr.bf16.gmra.mrb[88].mxu0 %v4294_v27  ;;  %2571 = vmatmul.mubr.bf16.gmra.mrb[88].mxu1 %v4295_v28 }
 0x1b8   : > { %1648 = vmatprep.mubr.bf16.mxu0 %v4296_v29  ;;  %2578 = vmatprep.mubr.bf16.mxu1 %v4298_v30 }
 0x1bf   : > { %1649 = vmatmul.mubr.bf16.gmra.mrb[92].mxu0 %v4300_v31  ;;  %2579 = vmatmul.mubr.bf16.gmra.mrb[92].mxu1 %v4301_v32 }
 0x1da   : > { %v1466_v35 = vpop.f32.mrb[0].mxu0  ;;  %v2396_v36 = vpop.f32.mrb[0].mxu1 }
 0x1db   : > { %v2593_v37 = vmul.f32 %v4745_v33, %v1466_v35  ;;  %v2743_v38 = vmul.f32 %v4745_v33, %v2396_v36  ;;  %v1468_v39 = vpop.f32.mrb[1].mxu0  ;;  %v2398_v40 = vpop.f32.mrb[1].mxu1 }
 0x1dc   : > { %v1469_v41 = vpop.f32.mrb[2].mxu0  ;;  %v2399_v42 = vpop.f32.mrb[2].mxu1 }
 0x1dd   : > { %v2647_v43 = vadd.f32 %v4750_v34, %v2593_v37  ;;  %v2791_v44 = vadd.f32 %v4750_v34, %v2743_v38  ;;  %v2594_v45 = vmul.f32 %v4745_v33, %v1469_v41  ;;  %v2744_v46 = vmul.f32 %v4745_v33, %v2399_v42  ;;  %v1471_v47 = vpop.f32.mrb[3].mxu0  ;;  %v2401_v48 = vpop.f32.mrb[3].mxu1 }
 0x1df   : > { %v2695_v49 = vmax.f32 %v2647_v43, 0.0  ;;  %v2839_v50 = vmax.f32 %v2791_v44, 0.0  ;;  %v2648_v51 = vadd.f32 %v4750_v34, %v2594_v45  ;;  %v2792_v52 = vadd.f32 %v4750_v34, %v2744_v46 }
 0x1e1   : > { %v3081_v53 = vmax.f32 %v2695_v49, %v2839_v50  ;;  %v2696_v54 = vmax.f32 %v2648_v51, 0.0  ;;  %v2840_v55 = vmax.f32 %v2792_v52, 0.0  ;;  %v2936_v56 = vrot.slane %v2695_v49, 1 }
 0x1e2   : > { %v1474_v57 = vpop.f32.mrb[4].mxu0  ;;  %v2404_v58 = vpop.f32.mrb[4].mxu1 }
 0x1e3   : > { %v2937_v59 = vrot.slane %v2696_v54, 1  ;;  %v3082_v60 = vmax.f32 %v2696_v54, %v2840_v55  ;;  %v2595_v61 = vmul.f32 %v4745_v33, %v1474_v57  ;;  %v2745_v62 = vmul.f32 %v4745_v33, %v2404_v58  ;;  %v1476_v63 = vpop.f32.mrb[5].mxu0  ;;  %v2406_v0 = vpop.f32.mrb[5].mxu1 }
 0x1e4   : > { %v1477_v2 = vpop.f32.mrb[6].mxu0  ;;  %v2407_v3 = vpop.f32.mrb[6].mxu1 }
 0x1e5   : > { %v2938_v4 = vsel %vm2935_vm0, %v2936_v56, %v2937_v59  ;;  %v3057_v5 = vsel %vm3056_vm1, %v2937_v59, 0.0  ;;  %v2649_v6 = vadd.f32 %v4750_v34, %v2595_v61  ;;  %v2793_v7 = vadd.f32 %v4750_v34, %v2745_v62  ;;  %v1479_v8 = vpop.f32.mrb[7].mxu0  ;;  %v2409_v9 = vpop.f32.mrb[7].mxu1 }
 0x1e6   : > { %v3129_v10 = vmax.f32 %v3081_v53, %v2938_v4  ;;  %v3130_v11 = vmax.f32 %v3082_v60, %v3057_v5  ;;  %v2596_v1 = vmul.f32 %v4745_v33, %v1477_v2  ;;  %v2746_v12 = vmul.f32 %v4745_v33, %v2407_v3 }
 0x1e7   : > { %v2697_v13 = vmax.f32 %v2649_v6, 0.0  ;;  %v2841_v14 = vmax.f32 %v2793_v7, 0.0 }
 0x1e8   : > { %v2650_v15 = vadd.f32 %v4750_v34, %v2596_v1  ;;  %v2794_v16 = vadd.f32 %v4750_v34, %v2746_v12 }
 0x1e9   : > { %v3083_v17 = vmax.f32 %v2697_v13, %v2841_v14  ;;  %v2939_v26 = vrot.slane %v2697_v13, 1 }
 0x1ea   : > { %v2698_v18 = vmax.f32 %v2650_v15, 0.0  ;;  %v2842_v19 = vmax.f32 %v2794_v16, 0.0  ;;  %v1482_v20 = vpop.f32.mrb[8].mxu0  ;;  %v2412_v21 = vpop.f32.mrb[8].mxu1 }
 0x1eb   : > { %v2597_v22 = vmul.f32 %v4745_v33, %v1482_v20  ;;  %v2747_v23 = vmul.f32 %v4745_v33, %v2412_v21  ;;  %v1484_v24 = vpop.f32.mrb[9].mxu0  ;;  %v2414_v25 = vpop.f32.mrb[9].mxu1 }
 0x1ec   : > { %v2940_v27 = vrot.slane %v2698_v18, 1  ;;  %v3084_v28 = vmax.f32 %v2698_v18, %v2842_v19  ;;  %v1485_v29 = vpop.f32.mrb[10].mxu0  ;;  %v2415_v30 = vpop.f32.mrb[10].mxu1 }
 0x1ed   : > { %v2651_v31 = vadd.f32 %v4750_v34, %v2597_v22  ;;  %v2795_v32 = vadd.f32 %v4750_v34, %v2747_v23  ;;  %v2598_v35 = vmul.f32 %v4745_v33, %v1485_v29  ;;  %v2748_v36 = vmul.f32 %v4745_v33, %v2415_v30  ;;  %v1487_v37 = vpop.f32.mrb[11].mxu0  ;;  %v2417_v38 = vpop.f32.mrb[11].mxu1 }
 0x1ee   : > { %v2941_v39 = vsel %vm2935_vm0, %v2939_v26, %v2940_v27  ;;  %v3058_v40 = vsel %vm3056_vm1, %v2940_v27, 0.0 }
 0x1ef   : > { %v3131_v41 = vmax.f32 %v3083_v17, %v2941_v39  ;;  %v3132_v42 = vmax.f32 %v3084_v28, %v3058_v40  ;;  %v2699_v43 = vmax.f32 %v2651_v31, 0.0  ;;  %v2843_v44 = vmax.f32 %v2795_v32, 0.0 }
 0x1f0   : > { %v2652_v45 = vadd.f32 %v4750_v34, %v2598_v35  ;;  %v2796_v46 = vadd.f32 %v4750_v34, %v2748_v36 }
 0x1f1   : > { %v3177_v47 = vmax.f32 %v3129_v10, %v3131_v41  ;;  %v3178_v48 = vmax.f32 %v3130_v11, %v3132_v42  ;;  %v3085_v49 = vmax.f32 %v2699_v43, %v2843_v44  ;;  %v2942_v58 = vrot.slane %v2699_v43, 1 }
 0x1f2   : > { %v2700_v50 = vmax.f32 %v2652_v45, 0.0  ;;  %v2844_v51 = vmax.f32 %v2796_v46, 0.0  ;;  %v1490_v52 = vpop.f32.mrb[12].mxu0  ;;  %v2420_v53 = vpop.f32.mrb[12].mxu1 }
 0x1f3   : > { %v2599_v54 = vmul.f32 %v4745_v33, %v1490_v52  ;;  %v2749_v55 = vmul.f32 %v4745_v33, %v2420_v53  ;;  %v1492_v56 = vpop.f32.mrb[13].mxu0  ;;  %v2422_v57 = vpop.f32.mrb[13].mxu1 }
 0x1f4   : > { %v2943_v59 = vrot.slane %v2700_v50, 1  ;;  %v3086_v60 = vmax.f32 %v2700_v50, %v2844_v51  ;;  %v1493_v61 = vpop.f32.mrb[14].mxu0  ;;  %v2423_v62 = vpop.f32.mrb[14].mxu1 }
 0x1f5   : > { %v2653_v63 = vadd.f32 %v4750_v34, %v2599_v54  ;;  %v2797_v0 = vadd.f32 %v4750_v34, %v2749_v55  ;;  %v2600_v2 = vmul.f32 %v4745_v33, %v1493_v61  ;;  %v2750_v3 = vmul.f32 %v4745_v33, %v2423_v62  ;;  %v1495_v4 = vpop.f32.mrb[15].mxu0  ;;  %v2425_v5 = vpop.f32.mrb[15].mxu1 }
 0x1f6   : > { %v2944_v6 = vsel %vm2935_vm0, %v2942_v58, %v2943_v59  ;;  %v3059_v7 = vsel %vm3056_vm1, %v2943_v59, 0.0 }
 0x1f7   : > { %v3133_v8 = vmax.f32 %v3085_v49, %v2944_v6  ;;  %v3134_v9 = vmax.f32 %v3086_v60, %v3059_v7  ;;  %v2701_v10 = vmax.f32 %v2653_v63, 0.0  ;;  %v2845_v11 = vmax.f32 %v2797_v0, 0.0 }
 0x1f8   : > { %v2654_v1 = vadd.f32 %v4750_v34, %v2600_v2  ;;  %v2798_v12 = vadd.f32 %v4750_v34, %v2750_v3 }
 0x1f9   : > { %v3179_v13 = vmax.f32 %v3177_v47, %v3133_v8  ;;  %v3180_v14 = vmax.f32 %v3178_v48, %v3134_v9  ;;  %v3087_v15 = vmax.f32 %v2701_v10, %v2845_v11  ;;  %v2945_v26 = vrot.slane %v2701_v10, 1 }
 0x1fa   : > { %v2702_v16 = vmax.f32 %v2654_v1, 0.0  ;;  %v2846_v17 = vmax.f32 %v2798_v12, 0.0  ;;  %v1498_v18 = vpop.f32.mrb[16].mxu0  ;;  %v2428_v19 = vpop.f32.mrb[16].mxu1 }
 0x1fb   : > { %v3739_v20 = vpack.c.bf16 %v3179_v13, %v3179_v13  ;;  %v3740_v21 = vpack.c.bf16 %v3180_v14, %v3180_v14  ;;  %v2601_v22 = vmul.f32 %v4745_v33, %v1498_v18  ;;  %v2751_v23 = vmul.f32 %v4745_v33, %v2428_v19  ;;  %v1500_v24 = vpop.f32.mrb[17].mxu0  ;;  %v2430_v25 = vpop.f32.mrb[17].mxu1 }
 0x1fc   : > { %v2946_v27 = vrot.slane %v2702_v16, 1  ;;  %v3088_v28 = vmax.f32 %v2702_v16, %v2846_v17  ;;  %v1501_v29 = vpop.f32.mrb[18].mxu0  ;;  %v2431_v30 = vpop.f32.mrb[18].mxu1 }
 0x1fd   : > { %3189 = vst [vmem:[%s4794_s16] sm:$0xf] %v3739_v20  ;;  %3190 = vst [vmem:[%s4794_s16 + $0x4] sm:$0x3] %v3740_v21  ;;  %v2655_v31 = vadd.f32 %v4750_v34, %v2601_v22  ;;  %v2799_v32 = vadd.f32 %v4750_v34, %v2751_v23  ;;  %v2602_v35 = vmul.f32 %v4745_v33, %v1501_v29  ;;  %v1503_v37 = vpop.f32.mrb[19].mxu0  ;;  %v2433_v38 = vpop.f32.mrb[19].mxu1 }
 0x1fe   : > { %v2752_v36 = vmul.f32 %v4745_v33, %v2431_v30  ;;  %v2947_v39 = vsel %vm2935_vm0, %v2945_v26, %v2946_v27  ;;  %v3060_v40 = vsel %vm3056_vm1, %v2946_v27, 0.0 }
 0x1ff   : > { %v3135_v41 = vmax.f32 %v3087_v15, %v2947_v39  ;;  %v3136_v42 = vmax.f32 %v3088_v28, %v3060_v40  ;;  %v2703_v43 = vmax.f32 %v2655_v31, 0.0  ;;  %v2847_v44 = vmax.f32 %v2799_v32, 0.0 }
 0x200   : > { %v2656_v45 = vadd.f32 %v4750_v34, %v2602_v35  ;;  %v2800_v46 = vadd.f32 %v4750_v34, %v2752_v36 }
 0x201   : > { %v3191_v47 = vmax.f32 %v3133_v8, %v3135_v41  ;;  %v3192_v48 = vmax.f32 %v3134_v9, %v3136_v42  ;;  %v3089_v49 = vmax.f32 %v2703_v43, %v2847_v44  ;;  %v2948_v58 = vrot.slane %v2703_v43, 1 }
 0x202   : > { %v2704_v50 = vmax.f32 %v2656_v45, 0.0  ;;  %v2848_v51 = vmax.f32 %v2800_v46, 0.0  ;;  %v1506_v52 = vpop.f32.mrb[20].mxu0  ;;  %v2436_v53 = vpop.f32.mrb[20].mxu1 }
 0x203   : > { %v2603_v54 = vmul.f32 %v4745_v33, %v1506_v52  ;;  %v2753_v55 = vmul.f32 %v4745_v33, %v2436_v53  ;;  %v1508_v56 = vpop.f32.mrb[21].mxu0  ;;  %v2438_v57 = vpop.f32.mrb[21].mxu1 }
 0x204   : > { %v2949_v59 = vrot.slane %v2704_v50, 1  ;;  %v3090_v60 = vmax.f32 %v2704_v50, %v2848_v51  ;;  %v1509_v61 = vpop.f32.mrb[22].mxu0  ;;  %v2439_v62 = vpop.f32.mrb[22].mxu1 }
 0x205   : > { %v2657_v63 = vadd.f32 %v4750_v34, %v2603_v54  ;;  %v2801_v0 = vadd.f32 %v4750_v34, %v2753_v55  ;;  %v2604_v2 = vmul.f32 %v4745_v33, %v1509_v61  ;;  %v2754_v3 = vmul.f32 %v4745_v33, %v2439_v62  ;;  %v1511_v4 = vpop.f32.mrb[23].mxu0  ;;  %v2441_v5 = vpop.f32.mrb[23].mxu1 }
 0x206   : > { %v2950_v6 = vsel %vm2935_vm0, %v2948_v58, %v2949_v59  ;;  %v3061_v7 = vsel %vm3056_vm1, %v2949_v59, 0.0 }
 0x207   : > { %v3137_v8 = vmax.f32 %v3089_v49, %v2950_v6  ;;  %v3138_v9 = vmax.f32 %v3090_v60, %v3061_v7  ;;  %v2705_v10 = vmax.f32 %v2657_v63, 0.0  ;;  %v2849_v11 = vmax.f32 %v2801_v0, 0.0 }
 0x208   : > { %v2658_v1 = vadd.f32 %v4750_v34, %v2604_v2  ;;  %v2802_v12 = vadd.f32 %v4750_v34, %v2754_v3 }
 0x209   : > { %v3193_v13 = vmax.f32 %v3191_v47, %v3137_v8  ;;  %v3194_v14 = vmax.f32 %v3192_v48, %v3138_v9  ;;  %v3091_v15 = vmax.f32 %v2705_v10, %v2849_v11  ;;  %v2951_v26 = vrot.slane %v2705_v10, 1 }
 0x20a   : > { %v2706_v16 = vmax.f32 %v2658_v1, 0.0  ;;  %v2850_v17 = vmax.f32 %v2802_v12, 0.0  ;;  %v1514_v18 = vpop.f32.mrb[24].mxu0  ;;  %v2444_v19 = vpop.f32.mrb[24].mxu1 }
 0x20b   : > { %v3741_v20 = vpack.c.bf16 %v3193_v13, %v3193_v13  ;;  %v3742_v21 = vpack.c.bf16 %v3194_v14, %v3194_v14  ;;  %v2605_v22 = vmul.f32 %v4745_v33, %v1514_v18  ;;  %v2755_v23 = vmul.f32 %v4745_v33, %v2444_v19  ;;  %v1516_v24 = vpop.f32.mrb[25].mxu0  ;;  %v2446_v25 = vpop.f32.mrb[25].mxu1 }
 0x20c   : > { %v2952_v27 = vrot.slane %v2706_v16, 1  ;;  %v3092_v28 = vmax.f32 %v2706_v16, %v2850_v17  ;;  %v1517_v29 = vpop.f32.mrb[26].mxu0  ;;  %v2447_v30 = vpop.f32.mrb[26].mxu1 }
 0x20d   : > { %3695 = vst [vmem:[%s4794_s16 + $0x8] sm:$0xf] %v3741_v20  ;;  %3696 = vst [vmem:[%s4794_s16 + $0xc] sm:$0x3] %v3742_v21  ;;  %v2659_v31 = vadd.f32 %v4750_v34, %v2605_v22  ;;  %v2803_v32 = vadd.f32 %v4750_v34, %v2755_v23  ;;  %v2606_v35 = vmul.f32 %v4745_v33, %v1517_v29  ;;  %v1519_v37 = vpop.f32.mrb[27].mxu0  ;;  %v2449_v38 = vpop.f32.mrb[27].mxu1 }
 0x20e   : > { %v2756_v36 = vmul.f32 %v4745_v33, %v2447_v30  ;;  %v2953_v39 = vsel %vm2935_vm0, %v2951_v26, %v2952_v27  ;;  %v3062_v40 = vsel %vm3056_vm1, %v2952_v27, 0.0 }
 0x20f   : > { %v3139_v41 = vmax.f32 %v3091_v15, %v2953_v39  ;;  %v3140_v42 = vmax.f32 %v3092_v28, %v3062_v40  ;;  %v2707_v43 = vmax.f32 %v2659_v31, 0.0  ;;  %v2851_v44 = vmax.f32 %v2803_v32, 0.0 }
 0x210   : > { %v2660_v45 = vadd.f32 %v4750_v34, %v2606_v35  ;;  %v2804_v46 = vadd.f32 %v4750_v34, %v2756_v36 }
 0x211   : > { %v3206_v47 = vmax.f32 %v3137_v8, %v3139_v41  ;;  %v3207_v48 = vmax.f32 %v3138_v9, %v3140_v42  ;;  %v3093_v49 = vmax.f32 %v2707_v43, %v2851_v44  ;;  %v2954_v58 = vrot.slane %v2707_v43, 1 }
 0x212   : > { %v2708_v50 = vmax.f32 %v2660_v45, 0.0  ;;  %v2852_v51 = vmax.f32 %v2804_v46, 0.0  ;;  %v1522_v52 = vpop.f32.mrb[28].mxu0  ;;  %v2452_v53 = vpop.f32.mrb[28].mxu1 }
 0x213   : > { %v2607_v54 = vmul.f32 %v4745_v33, %v1522_v52  ;;  %v2757_v55 = vmul.f32 %v4745_v33, %v2452_v53  ;;  %v1524_v56 = vpop.f32.mrb[29].mxu0  ;;  %v2454_v57 = vpop.f32.mrb[29].mxu1 }
 0x214   : > { %v2955_v59 = vrot.slane %v2708_v50, 1  ;;  %v3094_v60 = vmax.f32 %v2708_v50, %v2852_v51  ;;  %v1525_v61 = vpop.f32.mrb[30].mxu0  ;;  %v2455_v62 = vpop.f32.mrb[30].mxu1 }
 0x215   : > { %v2661_v63 = vadd.f32 %v4750_v34, %v2607_v54  ;;  %v2805_v0 = vadd.f32 %v4750_v34, %v2757_v55  ;;  %v2608_v2 = vmul.f32 %v4745_v33, %v1525_v61  ;;  %v2758_v3 = vmul.f32 %v4745_v33, %v2455_v62  ;;  %v1527_v4 = vpop.f32.mrb[31].mxu0  ;;  %v2457_v5 = vpop.f32.mrb[31].mxu1 }
 0x216   : > { %v2956_v6 = vsel %vm2935_vm0, %v2954_v58, %v2955_v59  ;;  %v3063_v7 = vsel %vm3056_vm1, %v2955_v59, 0.0 }
 0x217   : > { %v3141_v8 = vmax.f32 %v3093_v49, %v2956_v6  ;;  %v3142_v9 = vmax.f32 %v3094_v60, %v3063_v7  ;;  %v2709_v10 = vmax.f32 %v2661_v63, 0.0  ;;  %v2853_v11 = vmax.f32 %v2805_v0, 0.0 }
 0x218   : > { %v2662_v1 = vadd.f32 %v4750_v34, %v2608_v2  ;;  %v2806_v12 = vadd.f32 %v4750_v34, %v2758_v3 }
 0x219   : > { %v3208_v13 = vmax.f32 %v3206_v47, %v3141_v8  ;;  %v3209_v14 = vmax.f32 %v3207_v48, %v3142_v9  ;;  %v3095_v15 = vmax.f32 %v2709_v10, %v2853_v11  ;;  %v2957_v26 = vrot.slane %v2709_v10, 1 }
 0x21a   : > { %v2710_v16 = vmax.f32 %v2662_v1, 0.0  ;;  %v2854_v17 = vmax.f32 %v2806_v12, 0.0  ;;  %v1530_v18 = vpop.f32.mrb[32].mxu0  ;;  %v2460_v19 = vpop.f32.mrb[32].mxu1 }
 0x21b   : > { %v3743_v20 = vpack.c.bf16 %v3208_v13, %v3208_v13  ;;  %v3744_v21 = vpack.c.bf16 %v3209_v14, %v3209_v14  ;;  %v2609_v22 = vmul.f32 %v4745_v33, %v1530_v18  ;;  %v2759_v23 = vmul.f32 %v4745_v33, %v2460_v19  ;;  %v1532_v24 = vpop.f32.mrb[33].mxu0  ;;  %v2462_v25 = vpop.f32.mrb[33].mxu1 }
 0x21c   : > { %v2958_v27 = vrot.slane %v2710_v16, 1  ;;  %v3096_v28 = vmax.f32 %v2710_v16, %v2854_v17  ;;  %v1533_v29 = vpop.f32.mrb[34].mxu0  ;;  %v2463_v30 = vpop.f32.mrb[34].mxu1 }
 0x21d   : > { %3699 = vst [vmem:[%s4794_s16 + $0x10] sm:$0xf] %v3743_v20  ;;  %3700 = vst [vmem:[%s4794_s16 + $0x14] sm:$0x3] %v3744_v21  ;;  %v2663_v31 = vadd.f32 %v4750_v34, %v2609_v22  ;;  %v2807_v32 = vadd.f32 %v4750_v34, %v2759_v23  ;;  %v2610_v35 = vmul.f32 %v4745_v33, %v1533_v29  ;;  %v1535_v37 = vpop.f32.mrb[35].mxu0  ;;  %v2465_v38 = vpop.f32.mrb[35].mxu1 }
 0x21e   : > { %v2760_v36 = vmul.f32 %v4745_v33, %v2463_v30  ;;  %v2959_v39 = vsel %vm2935_vm0, %v2957_v26, %v2958_v27  ;;  %v3064_v40 = vsel %vm3056_vm1, %v2958_v27, 0.0 }
 0x21f   : > { %v3143_v41 = vmax.f32 %v3095_v15, %v2959_v39  ;;  %v3144_v42 = vmax.f32 %v3096_v28, %v3064_v40  ;;  %v2711_v43 = vmax.f32 %v2663_v31, 0.0  ;;  %v2855_v44 = vmax.f32 %v2807_v32, 0.0 }
 0x220   : > { %v2664_v45 = vadd.f32 %v4750_v34, %v2610_v35  ;;  %v2808_v46 = vadd.f32 %v4750_v34, %v2760_v36 }
 0x221   : > { %v3221_v47 = vmax.f32 %v3141_v8, %v3143_v41  ;;  %v3222_v48 = vmax.f32 %v3142_v9, %v3144_v42  ;;  %v3097_v49 = vmax.f32 %v2711_v43, %v2855_v44  ;;  %v2960_v58 = vrot.slane %v2711_v43, 1 }
 0x222   : > { %v2712_v50 = vmax.f32 %v2664_v45, 0.0  ;;  %v2856_v51 = vmax.f32 %v2808_v46, 0.0  ;;  %v1538_v52 = vpop.f32.mrb[36].mxu0  ;;  %v2468_v53 = vpop.f32.mrb[36].mxu1 }
 0x223   : > { %v2611_v54 = vmul.f32 %v4745_v33, %v1538_v52  ;;  %v2761_v55 = vmul.f32 %v4745_v33, %v2468_v53  ;;  %v1540_v56 = vpop.f32.mrb[37].mxu0  ;;  %v2470_v57 = vpop.f32.mrb[37].mxu1 }
 0x224   : > { %v2961_v59 = vrot.slane %v2712_v50, 1  ;;  %v3098_v60 = vmax.f32 %v2712_v50, %v2856_v51  ;;  %v1541_v61 = vpop.f32.mrb[38].mxu0  ;;  %v2471_v62 = vpop.f32.mrb[38].mxu1 }
 0x225   : > { %v2665_v63 = vadd.f32 %v4750_v34, %v2611_v54  ;;  %v2809_v0 = vadd.f32 %v4750_v34, %v2761_v55  ;;  %v2612_v2 = vmul.f32 %v4745_v33, %v1541_v61  ;;  %v2762_v3 = vmul.f32 %v4745_v33, %v2471_v62  ;;  %v1543_v4 = vpop.f32.mrb[39].mxu0  ;;  %v2473_v5 = vpop.f32.mrb[39].mxu1 }
 0x226   : > { %v2962_v6 = vsel %vm2935_vm0, %v2960_v58, %v2961_v59  ;;  %v3065_v7 = vsel %vm3056_vm1, %v2961_v59, 0.0 }
 0x227   : > { %v3145_v8 = vmax.f32 %v3097_v49, %v2962_v6  ;;  %v3146_v9 = vmax.f32 %v3098_v60, %v3065_v7  ;;  %v2713_v10 = vmax.f32 %v2665_v63, 0.0  ;;  %v2857_v11 = vmax.f32 %v2809_v0, 0.0 }
 0x228   : > { %v2666_v1 = vadd.f32 %v4750_v34, %v2612_v2  ;;  %v2810_v12 = vadd.f32 %v4750_v34, %v2762_v3 }
 0x229   : > { %v3223_v13 = vmax.f32 %v3221_v47, %v3145_v8  ;;  %v3224_v14 = vmax.f32 %v3222_v48, %v3146_v9  ;;  %v3099_v15 = vmax.f32 %v2713_v10, %v2857_v11  ;;  %v2963_v26 = vrot.slane %v2713_v10, 1 }
 0x22a   : > { %v2714_v16 = vmax.f32 %v2666_v1, 0.0  ;;  %v2858_v17 = vmax.f32 %v2810_v12, 0.0  ;;  %v1546_v18 = vpop.f32.mrb[40].mxu0  ;;  %v2476_v19 = vpop.f32.mrb[40].mxu1 }
 0x22b   : > { %v3745_v20 = vpack.c.bf16 %v3223_v13, %v3223_v13  ;;  %v3746_v21 = vpack.c.bf16 %v3224_v14, %v3224_v14  ;;  %v2613_v22 = vmul.f32 %v4745_v33, %v1546_v18  ;;  %v2763_v23 = vmul.f32 %v4745_v33, %v2476_v19  ;;  %v1548_v24 = vpop.f32.mrb[41].mxu0  ;;  %v2478_v25 = vpop.f32.mrb[41].mxu1 }
 0x22c   : > { %v2964_v27 = vrot.slane %v2714_v16, 1  ;;  %v3100_v28 = vmax.f32 %v2714_v16, %v2858_v17  ;;  %v1549_v29 = vpop.f32.mrb[42].mxu0  ;;  %v2479_v30 = vpop.f32.mrb[42].mxu1 }
 0x22d   : > { %3703 = vst [vmem:[%s4794_s16 + $0x18] sm:$0xf] %v3745_v20  ;;  %3704 = vst [vmem:[%s4794_s16 + $0x1c] sm:$0x3] %v3746_v21  ;;  %v2667_v31 = vadd.f32 %v4750_v34, %v2613_v22  ;;  %v2811_v32 = vadd.f32 %v4750_v34, %v2763_v23  ;;  %v2614_v35 = vmul.f32 %v4745_v33, %v1549_v29  ;;  %v1551_v37 = vpop.f32.mrb[43].mxu0  ;;  %v2481_v38 = vpop.f32.mrb[43].mxu1 }
 0x22e   : > { %v2764_v36 = vmul.f32 %v4745_v33, %v2479_v30  ;;  %v2965_v39 = vsel %vm2935_vm0, %v2963_v26, %v2964_v27  ;;  %v3066_v40 = vsel %vm3056_vm1, %v2964_v27, 0.0 }
 0x22f   : > { %v3147_v41 = vmax.f32 %v3099_v15, %v2965_v39  ;;  %v3148_v42 = vmax.f32 %v3100_v28, %v3066_v40  ;;  %v2715_v43 = vmax.f32 %v2667_v31, 0.0  ;;  %v2859_v44 = vmax.f32 %v2811_v32, 0.0 }
 0x230   : > { %v2668_v45 = vadd.f32 %v4750_v34, %v2614_v35  ;;  %v2812_v46 = vadd.f32 %v4750_v34, %v2764_v36 }
 0x231   : > { %v3236_v47 = vmax.f32 %v3145_v8, %v3147_v41  ;;  %v3237_v48 = vmax.f32 %v3146_v9, %v3148_v42  ;;  %v3101_v49 = vmax.f32 %v2715_v43, %v2859_v44  ;;  %v2966_v58 = vrot.slane %v2715_v43, 1 }
 0x232   : > { %v2716_v50 = vmax.f32 %v2668_v45, 0.0  ;;  %v2860_v51 = vmax.f32 %v2812_v46, 0.0  ;;  %v1554_v52 = vpop.f32.mrb[44].mxu0  ;;  %v2484_v53 = vpop.f32.mrb[44].mxu1 }
 0x233   : > { %v2615_v54 = vmul.f32 %v4745_v33, %v1554_v52  ;;  %v2765_v55 = vmul.f32 %v4745_v33, %v2484_v53  ;;  %v1556_v56 = vpop.f32.mrb[45].mxu0  ;;  %v2486_v57 = vpop.f32.mrb[45].mxu1 }
 0x234   : > { %v2967_v59 = vrot.slane %v2716_v50, 1  ;;  %v3102_v60 = vmax.f32 %v2716_v50, %v2860_v51  ;;  %v1557_v61 = vpop.f32.mrb[46].mxu0  ;;  %v2487_v62 = vpop.f32.mrb[46].mxu1 }
 0x235   : > { %v2669_v63 = vadd.f32 %v4750_v34, %v2615_v54  ;;  %v2813_v0 = vadd.f32 %v4750_v34, %v2765_v55  ;;  %v2616_v2 = vmul.f32 %v4745_v33, %v1557_v61  ;;  %v2766_v3 = vmul.f32 %v4745_v33, %v2487_v62  ;;  %v1559_v4 = vpop.f32.mrb[47].mxu0  ;;  %v2489_v5 = vpop.f32.mrb[47].mxu1 }
 0x236   : > { %v2968_v6 = vsel %vm2935_vm0, %v2966_v58, %v2967_v59  ;;  %v3067_v7 = vsel %vm3056_vm1, %v2967_v59, 0.0 }
 0x237   : > { %v3149_v8 = vmax.f32 %v3101_v49, %v2968_v6  ;;  %v3150_v9 = vmax.f32 %v3102_v60, %v3067_v7  ;;  %v2717_v10 = vmax.f32 %v2669_v63, 0.0  ;;  %v2861_v11 = vmax.f32 %v2813_v0, 0.0 }
 0x238   : > { %v2670_v1 = vadd.f32 %v4750_v34, %v2616_v2  ;;  %v2814_v12 = vadd.f32 %v4750_v34, %v2766_v3 }
 0x239   : > { %v3238_v13 = vmax.f32 %v3236_v47, %v3149_v8  ;;  %v3239_v14 = vmax.f32 %v3237_v48, %v3150_v9  ;;  %v3103_v15 = vmax.f32 %v2717_v10, %v2861_v11  ;;  %v2969_v26 = vrot.slane %v2717_v10, 1 }
 0x23a   : > { %v2718_v16 = vmax.f32 %v2670_v1, 0.0  ;;  %v2862_v17 = vmax.f32 %v2814_v12, 0.0  ;;  %v1562_v18 = vpop.f32.mrb[48].mxu0  ;;  %v2492_v19 = vpop.f32.mrb[48].mxu1 }
 0x23b   : > { %v3747_v20 = vpack.c.bf16 %v3238_v13, %v3238_v13  ;;  %v3748_v21 = vpack.c.bf16 %v3239_v14, %v3239_v14  ;;  %v2617_v22 = vmul.f32 %v4745_v33, %v1562_v18  ;;  %v2767_v23 = vmul.f32 %v4745_v33, %v2492_v19  ;;  %v1564_v24 = vpop.f32.mrb[49].mxu0  ;;  %v2494_v25 = vpop.f32.mrb[49].mxu1 }
 0x23c   : > { %v2970_v27 = vrot.slane %v2718_v16, 1  ;;  %v3104_v28 = vmax.f32 %v2718_v16, %v2862_v17  ;;  %v1565_v29 = vpop.f32.mrb[50].mxu0  ;;  %v2495_v30 = vpop.f32.mrb[50].mxu1 }
 0x23d   : > { %3707 = vst [vmem:[%s4794_s16 + $0x20] sm:$0xf] %v3747_v20  ;;  %3708 = vst [vmem:[%s4794_s16 + $0x24] sm:$0x3] %v3748_v21  ;;  %v2671_v31 = vadd.f32 %v4750_v34, %v2617_v22  ;;  %v2815_v32 = vadd.f32 %v4750_v34, %v2767_v23  ;;  %v2618_v35 = vmul.f32 %v4745_v33, %v1565_v29  ;;  %v1567_v37 = vpop.f32.mrb[51].mxu0  ;;  %v2497_v38 = vpop.f32.mrb[51].mxu1 }
 0x23e   : > { %v2768_v36 = vmul.f32 %v4745_v33, %v2495_v30  ;;  %v2971_v39 = vsel %vm2935_vm0, %v2969_v26, %v2970_v27  ;;  %v3068_v40 = vsel %vm3056_vm1, %v2970_v27, 0.0 }
 0x23f   : > { %v3151_v41 = vmax.f32 %v3103_v15, %v2971_v39  ;;  %v3152_v42 = vmax.f32 %v3104_v28, %v3068_v40  ;;  %v2719_v43 = vmax.f32 %v2671_v31, 0.0  ;;  %v2863_v44 = vmax.f32 %v2815_v32, 0.0 }
 0x240   : > { %v2672_v45 = vadd.f32 %v4750_v34, %v2618_v35  ;;  %v2816_v46 = vadd.f32 %v4750_v34, %v2768_v36 }
 0x241   : > { %v3251_v47 = vmax.f32 %v3149_v8, %v3151_v41  ;;  %v3252_v48 = vmax.f32 %v3150_v9, %v3152_v42  ;;  %v3105_v49 = vmax.f32 %v2719_v43, %v2863_v44  ;;  %v2972_v58 = vrot.slane %v2719_v43, 1 }
 0x242   : > { %v2720_v50 = vmax.f32 %v2672_v45, 0.0  ;;  %v2864_v51 = vmax.f32 %v2816_v46, 0.0  ;;  %v1570_v52 = vpop.f32.mrb[52].mxu0  ;;  %v2500_v53 = vpop.f32.mrb[52].mxu1 }
 0x243   : > { %v2619_v54 = vmul.f32 %v4745_v33, %v1570_v52  ;;  %v2769_v55 = vmul.f32 %v4745_v33, %v2500_v53  ;;  %v1572_v56 = vpop.f32.mrb[53].mxu0  ;;  %v2502_v57 = vpop.f32.mrb[53].mxu1 }
 0x244   : > { %v2973_v59 = vrot.slane %v2720_v50, 1  ;;  %v3106_v60 = vmax.f32 %v2720_v50, %v2864_v51  ;;  %v1573_v61 = vpop.f32.mrb[54].mxu0  ;;  %v2503_v62 = vpop.f32.mrb[54].mxu1 }
 0x245   : > { %v2673_v63 = vadd.f32 %v4750_v34, %v2619_v54  ;;  %v2817_v0 = vadd.f32 %v4750_v34, %v2769_v55  ;;  %v2620_v2 = vmul.f32 %v4745_v33, %v1573_v61  ;;  %v2770_v3 = vmul.f32 %v4745_v33, %v2503_v62  ;;  %v1575_v4 = vpop.f32.mrb[55].mxu0  ;;  %v2505_v5 = vpop.f32.mrb[55].mxu1 }
 0x246   : > { %v2974_v6 = vsel %vm2935_vm0, %v2972_v58, %v2973_v59  ;;  %v3069_v7 = vsel %vm3056_vm1, %v2973_v59, 0.0 }
 0x247   : > { %v3153_v8 = vmax.f32 %v3105_v49, %v2974_v6  ;;  %v3154_v9 = vmax.f32 %v3106_v60, %v3069_v7  ;;  %v2721_v10 = vmax.f32 %v2673_v63, 0.0  ;;  %v2865_v11 = vmax.f32 %v2817_v0, 0.0 }
 0x248   : > { %v2674_v1 = vadd.f32 %v4750_v34, %v2620_v2  ;;  %v2818_v12 = vadd.f32 %v4750_v34, %v2770_v3 }
 0x249   : > { %v3253_v13 = vmax.f32 %v3251_v47, %v3153_v8  ;;  %v3254_v14 = vmax.f32 %v3252_v48, %v3154_v9  ;;  %v3107_v15 = vmax.f32 %v2721_v10, %v2865_v11  ;;  %v2975_v26 = vrot.slane %v2721_v10, 1 }
 0x24a   : > { %v2722_v16 = vmax.f32 %v2674_v1, 0.0  ;;  %v2866_v17 = vmax.f32 %v2818_v12, 0.0  ;;  %v1578_v18 = vpop.f32.mrb[56].mxu0  ;;  %v2508_v19 = vpop.f32.mrb[56].mxu1 }
 0x24b   : > { %v3749_v20 = vpack.c.bf16 %v3253_v13, %v3253_v13  ;;  %v3750_v21 = vpack.c.bf16 %v3254_v14, %v3254_v14  ;;  %v2621_v22 = vmul.f32 %v4745_v33, %v1578_v18  ;;  %v2771_v23 = vmul.f32 %v4745_v33, %v2508_v19  ;;  %v1580_v24 = vpop.f32.mrb[57].mxu0  ;;  %v2510_v25 = vpop.f32.mrb[57].mxu1 }
 0x24c   : > { %v2976_v27 = vrot.slane %v2722_v16, 1  ;;  %v3108_v28 = vmax.f32 %v2722_v16, %v2866_v17  ;;  %v1581_v29 = vpop.f32.mrb[58].mxu0  ;;  %v2511_v30 = vpop.f32.mrb[58].mxu1 }
 0x24d   : > { %3711 = vst [vmem:[%s4794_s16 + $0x28] sm:$0xf] %v3749_v20  ;;  %3712 = vst [vmem:[%s4794_s16 + $0x2c] sm:$0x3] %v3750_v21  ;;  %v2675_v31 = vadd.f32 %v4750_v34, %v2621_v22  ;;  %v2819_v32 = vadd.f32 %v4750_v34, %v2771_v23  ;;  %v2622_v35 = vmul.f32 %v4745_v33, %v1581_v29  ;;  %v1583_v37 = vpop.f32.mrb[59].mxu0  ;;  %v2513_v38 = vpop.f32.mrb[59].mxu1 }
 0x24e   : > { %v2772_v36 = vmul.f32 %v4745_v33, %v2511_v30  ;;  %v2977_v39 = vsel %vm2935_vm0, %v2975_v26, %v2976_v27  ;;  %v3070_v40 = vsel %vm3056_vm1, %v2976_v27, 0.0  ;;  %v4935_v30 = vld [vmem:[%s5045_s4] ss:$0 sm:$0xff] }
 0x24f   : > { %v3155_v41 = vmax.f32 %v3107_v15, %v2977_v39  ;;  %v3156_v42 = vmax.f32 %v3108_v28, %v3070_v40  ;;  %v2723_v43 = vmax.f32 %v2675_v31, 0.0  ;;  %v2867_v44 = vmax.f32 %v2819_v32, 0.0 }
 0x250   : > { %v2676_v45 = vadd.f32 %v4750_v34, %v2622_v35  ;;  %v2820_v46 = vadd.f32 %v4750_v34, %v2772_v36 }
 0x251   : > { %v3266_v47 = vmax.f32 %v3153_v8, %v3155_v41  ;;  %v3267_v48 = vmax.f32 %v3154_v9, %v3156_v42  ;;  %v3109_v49 = vmax.f32 %v2723_v43, %v2867_v44  ;;  %v2978_v58 = vrot.slane %v2723_v43, 1 }
 0x252   : > { %v2724_v50 = vmax.f32 %v2676_v45, 0.0  ;;  %v2868_v51 = vmax.f32 %v2820_v46, 0.0  ;;  %v1586_v52 = vpop.f32.mrb[60].mxu0  ;;  %v2516_v53 = vpop.f32.mrb[60].mxu1 }
 0x253   : > { %v2623_v54 = vmul.f32 %v4745_v33, %v1586_v52  ;;  %v2773_v55 = vmul.f32 %v4745_v33, %v2516_v53  ;;  %v1588_v56 = vpop.f32.mrb[61].mxu0  ;;  %v2518_v57 = vpop.f32.mrb[61].mxu1 }
 0x254   : > { %v2979_v59 = vrot.slane %v2724_v50, 1  ;;  %v3110_v60 = vmax.f32 %v2724_v50, %v2868_v51  ;;  %v1589_v61 = vpop.f32.mrb[62].mxu0  ;;  %v2519_v62 = vpop.f32.mrb[62].mxu1 }
 0x255   : > { %v2677_v63 = vadd.f32 %v4750_v34, %v2623_v54  ;;  %v2821_v0 = vadd.f32 %v4750_v34, %v2773_v55  ;;  %v2624_v2 = vmul.f32 %v4745_v33, %v1589_v61  ;;  %v2774_v3 = vmul.f32 %v4745_v33, %v2519_v62  ;;  %v1591_v4 = vpop.f32.mrb[63].mxu0  ;;  %v2521_v5 = vpop.f32.mrb[63].mxu1 }
 0x256   : > { %v2980_v6 = vsel %vm2935_vm0, %v2978_v58, %v2979_v59  ;;  %v3071_v7 = vsel %vm3056_vm1, %v2979_v59, 0.0 }
 0x257   : > { %v3157_v8 = vmax.f32 %v3109_v49, %v2980_v6  ;;  %v3158_v9 = vmax.f32 %v3110_v60, %v3071_v7  ;;  %v2725_v10 = vmax.f32 %v2677_v63, 0.0  ;;  %v2869_v11 = vmax.f32 %v2821_v0, 0.0 }
 0x258   : > { %v2678_v1 = vadd.f32 %v4750_v34, %v2624_v2  ;;  %v2822_v12 = vadd.f32 %v4750_v34, %v2774_v3 }
 0x259   : > { %v3268_v13 = vmax.f32 %v3266_v47, %v3157_v8  ;;  %v3269_v14 = vmax.f32 %v3267_v48, %v3158_v9  ;;  %v3111_v15 = vmax.f32 %v2725_v10, %v2869_v11  ;;  %v2981_v26 = vrot.slane %v2725_v10, 1 }
 0x25a   : > { %v2726_v16 = vmax.f32 %v2678_v1, 0.0  ;;  %v2870_v17 = vmax.f32 %v2822_v12, 0.0  ;;  %v1594_v18 = vpop.f32.mrb[64].mxu0  ;;  %v2524_v19 = vpop.f32.mrb[64].mxu1 }
 0x25b   : > { %v3751_v20 = vpack.c.bf16 %v3268_v13, %v3268_v13  ;;  %v3752_v21 = vpack.c.bf16 %v3269_v14, %v3269_v14  ;;  %v2625_v22 = vmul.f32 %v4745_v33, %v1594_v18  ;;  %v2775_v23 = vmul.f32 %v4745_v33, %v2524_v19  ;;  %v1596_v24 = vpop.f32.mrb[65].mxu0  ;;  %v2526_v25 = vpop.f32.mrb[65].mxu1  ;;  %v4942_v33 = vld [vmem:[%s5044_s3] ss:$0 sm:$0xff] }
 0x25c   : > { %v2982_v27 = vrot.slane %v2726_v16, 1  ;;  %v3112_v34 = vmax.f32 %v2726_v16, %v2870_v17  ;;  %v1597_v28 = vpop.f32.mrb[66].mxu0  ;;  %v2527_v29 = vpop.f32.mrb[66].mxu1 }
 0x25d   : > { %3715 = vst [vmem:[%s4794_s16 + $0x30] sm:$0xf] %v3751_v20  ;;  %3716 = vst [vmem:[%s4794_s16 + $0x34] sm:$0x3] %v3752_v21  ;;  %v2679_v31 = vadd.f32 %v4935_v30, %v2625_v22  ;;  %v2823_v32 = vadd.f32 %v4935_v30, %v2775_v23  ;;  %v2626_v35 = vmul.f32 %v4942_v33, %v1597_v28  ;;  %v1599_v37 = vpop.f32.mrb[67].mxu0  ;;  %v2529_v38 = vpop.f32.mrb[67].mxu1 }
 0x25e   : > { %v2776_v36 = vmul.f32 %v4942_v33, %v2527_v29  ;;  %v2983_v39 = vsel %vm2935_vm0, %v2981_v26, %v2982_v27  ;;  %v3072_v40 = vsel %vm3056_vm1, %v2982_v27, 0.0 }
 0x25f   : > { %v3159_v41 = vmax.f32 %v3111_v15, %v2983_v39  ;;  %v3160_v42 = vmax.f32 %v3112_v34, %v3072_v40  ;;  %v2727_v43 = vmax.f32 %v2679_v31, 0.0  ;;  %v2871_v44 = vmax.f32 %v2823_v32, 0.0 }
 0x260   : > { %v2680_v45 = vadd.f32 %v4935_v30, %v2626_v35  ;;  %v2824_v46 = vadd.f32 %v4935_v30, %v2776_v36 }
 0x261   : > { %v3281_v47 = vmax.f32 %v3157_v8, %v3159_v41  ;;  %v3282_v48 = vmax.f32 %v3158_v9, %v3160_v42  ;;  %v3113_v49 = vmax.f32 %v2727_v43, %v2871_v44  ;;  %v2984_v58 = vrot.slane %v2727_v43, 1 }
 0x262   : > { %v2728_v50 = vmax.f32 %v2680_v45, 0.0  ;;  %v2872_v51 = vmax.f32 %v2824_v46, 0.0  ;;  %v1602_v52 = vpop.f32.mrb[68].mxu0  ;;  %v2532_v53 = vpop.f32.mrb[68].mxu1 }
 0x263   : > { %v2627_v54 = vmul.f32 %v4942_v33, %v1602_v52  ;;  %v2777_v55 = vmul.f32 %v4942_v33, %v2532_v53  ;;  %v1604_v56 = vpop.f32.mrb[69].mxu0  ;;  %v2534_v57 = vpop.f32.mrb[69].mxu1 }
 0x264   : > { %v2985_v59 = vrot.slane %v2728_v50, 1  ;;  %v3114_v60 = vmax.f32 %v2728_v50, %v2872_v51  ;;  %v1605_v61 = vpop.f32.mrb[70].mxu0  ;;  %v2535_v62 = vpop.f32.mrb[70].mxu1 }
 0x265   : > { %v2681_v63 = vadd.f32 %v4935_v30, %v2627_v54  ;;  %v2825_v0 = vadd.f32 %v4935_v30, %v2777_v55  ;;  %v2628_v2 = vmul.f32 %v4942_v33, %v1605_v61  ;;  %v2778_v3 = vmul.f32 %v4942_v33, %v2535_v62  ;;  %v1607_v4 = vpop.f32.mrb[71].mxu0  ;;  %v2537_v5 = vpop.f32.mrb[71].mxu1 }
 0x266   : > { %v2986_v6 = vsel %vm2935_vm0, %v2984_v58, %v2985_v59  ;;  %v3073_v7 = vsel %vm3056_vm1, %v2985_v59, 0.0 }
 0x267   : > { %v3161_v8 = vmax.f32 %v3113_v49, %v2986_v6  ;;  %v3162_v9 = vmax.f32 %v3114_v60, %v3073_v7  ;;  %v2729_v10 = vmax.f32 %v2681_v63, 0.0  ;;  %v2873_v11 = vmax.f32 %v2825_v0, 0.0 }
 0x268   : > { %v2682_v1 = vadd.f32 %v4935_v30, %v2628_v2  ;;  %v2826_v12 = vadd.f32 %v4935_v30, %v2778_v3 }
 0x269   : > { %v3283_v13 = vmax.f32 %v3281_v47, %v3161_v8  ;;  %v3284_v14 = vmax.f32 %v3282_v48, %v3162_v9  ;;  %v3115_v15 = vmax.f32 %v2729_v10, %v2873_v11  ;;  %v2987_v26 = vrot.slane %v2729_v10, 1 }
 0x26a   : > { %v2730_v16 = vmax.f32 %v2682_v1, 0.0  ;;  %v2874_v17 = vmax.f32 %v2826_v12, 0.0  ;;  %v1610_v18 = vpop.f32.mrb[72].mxu0  ;;  %v2540_v19 = vpop.f32.mrb[72].mxu1 }
 0x26b   : > { %v3753_v20 = vpack.c.bf16 %v3283_v13, %v3283_v13  ;;  %v3754_v21 = vpack.c.bf16 %v3284_v14, %v3284_v14  ;;  %v2629_v22 = vmul.f32 %v4942_v33, %v1610_v18  ;;  %v2779_v23 = vmul.f32 %v4942_v33, %v2540_v19  ;;  %v1612_v24 = vpop.f32.mrb[73].mxu0  ;;  %v2542_v25 = vpop.f32.mrb[73].mxu1 }
 0x26c   : > { %v2988_v27 = vrot.slane %v2730_v16, 1  ;;  %v3116_v34 = vmax.f32 %v2730_v16, %v2874_v17  ;;  %v1613_v28 = vpop.f32.mrb[74].mxu0  ;;  %v2543_v29 = vpop.f32.mrb[74].mxu1 }
 0x26d   : > { %3719 = vst [vmem:[%s4794_s16 + $0x38] sm:$0xf] %v3753_v20  ;;  %3720 = vst [vmem:[%s4794_s16 + $0x3c] sm:$0x3] %v3754_v21  ;;  %v2683_v31 = vadd.f32 %v4935_v30, %v2629_v22  ;;  %v2827_v32 = vadd.f32 %v4935_v30, %v2779_v23  ;;  %v2630_v35 = vmul.f32 %v4942_v33, %v1613_v28  ;;  %v1615_v37 = vpop.f32.mrb[75].mxu0  ;;  %v2545_v38 = vpop.f32.mrb[75].mxu1 }
 0x26e   : > { %v2780_v36 = vmul.f32 %v4942_v33, %v2543_v29  ;;  %v2989_v39 = vsel %vm2935_vm0, %v2987_v26, %v2988_v27  ;;  %v3074_v40 = vsel %vm3056_vm1, %v2988_v27, 0.0 }
 0x26f   : > { %v3163_v41 = vmax.f32 %v3115_v15, %v2989_v39  ;;  %v3164_v42 = vmax.f32 %v3116_v34, %v3074_v40  ;;  %v2731_v43 = vmax.f32 %v2683_v31, 0.0  ;;  %v2875_v44 = vmax.f32 %v2827_v32, 0.0 }
 0x270   : > { %v2684_v45 = vadd.f32 %v4935_v30, %v2630_v35  ;;  %v2828_v46 = vadd.f32 %v4935_v30, %v2780_v36 }
 0x271   : > { %v3296_v47 = vmax.f32 %v3161_v8, %v3163_v41  ;;  %v3297_v48 = vmax.f32 %v3162_v9, %v3164_v42  ;;  %v3117_v49 = vmax.f32 %v2731_v43, %v2875_v44  ;;  %v2990_v58 = vrot.slane %v2731_v43, 1 }
 0x272   : > { %v2732_v50 = vmax.f32 %v2684_v45, 0.0  ;;  %v2876_v51 = vmax.f32 %v2828_v46, 0.0  ;;  %v1618_v52 = vpop.f32.mrb[76].mxu0  ;;  %v2548_v53 = vpop.f32.mrb[76].mxu1 }
 0x273   : > { %v2631_v54 = vmul.f32 %v4942_v33, %v1618_v52  ;;  %v2781_v55 = vmul.f32 %v4942_v33, %v2548_v53  ;;  %v1620_v56 = vpop.f32.mrb[77].mxu0  ;;  %v2550_v57 = vpop.f32.mrb[77].mxu1 }
 0x274   : > { %v2991_v59 = vrot.slane %v2732_v50, 1  ;;  %v3118_v60 = vmax.f32 %v2732_v50, %v2876_v51  ;;  %v1621_v61 = vpop.f32.mrb[78].mxu0  ;;  %v2551_v62 = vpop.f32.mrb[78].mxu1 }
 0x275   : > { %v2685_v63 = vadd.f32 %v4935_v30, %v2631_v54  ;;  %v2829_v0 = vadd.f32 %v4935_v30, %v2781_v55  ;;  %v2632_v2 = vmul.f32 %v4942_v33, %v1621_v61  ;;  %v2782_v3 = vmul.f32 %v4942_v33, %v2551_v62  ;;  %v1623_v4 = vpop.f32.mrb[79].mxu0  ;;  %v2553_v5 = vpop.f32.mrb[79].mxu1 }
 0x276   : > { %v2992_v6 = vsel %vm2935_vm0, %v2990_v58, %v2991_v59  ;;  %v3075_v7 = vsel %vm3056_vm1, %v2991_v59, 0.0 }
 0x277   : > { %v3165_v8 = vmax.f32 %v3117_v49, %v2992_v6  ;;  %v3166_v9 = vmax.f32 %v3118_v60, %v3075_v7  ;;  %v2733_v10 = vmax.f32 %v2685_v63, 0.0  ;;  %v2877_v11 = vmax.f32 %v2829_v0, 0.0 }
 0x278   : > { %v2686_v1 = vadd.f32 %v4935_v30, %v2632_v2  ;;  %v2830_v12 = vadd.f32 %v4935_v30, %v2782_v3 }
 0x279   : > { %v3298_v13 = vmax.f32 %v3296_v47, %v3165_v8  ;;  %v3299_v14 = vmax.f32 %v3297_v48, %v3166_v9  ;;  %v3119_v15 = vmax.f32 %v2733_v10, %v2877_v11  ;;  %v2993_v26 = vrot.slane %v2733_v10, 1 }
 0x27a   : > { %v2734_v16 = vmax.f32 %v2686_v1, 0.0  ;;  %v2878_v17 = vmax.f32 %v2830_v12, 0.0  ;;  %v1626_v18 = vpop.f32.mrb[80].mxu0  ;;  %v2556_v19 = vpop.f32.mrb[80].mxu1 }
 0x27b   : > { %v3755_v20 = vpack.c.bf16 %v3298_v13, %v3298_v13  ;;  %v3756_v21 = vpack.c.bf16 %v3299_v14, %v3299_v14  ;;  %v2633_v22 = vmul.f32 %v4942_v33, %v1626_v18  ;;  %v2783_v23 = vmul.f32 %v4942_v33, %v2556_v19  ;;  %v1628_v24 = vpop.f32.mrb[81].mxu0  ;;  %v2558_v25 = vpop.f32.mrb[81].mxu1 }
 0x27c   : > { %v2994_v27 = vrot.slane %v2734_v16, 1  ;;  %v3120_v34 = vmax.f32 %v2734_v16, %v2878_v17  ;;  %v1629_v28 = vpop.f32.mrb[82].mxu0  ;;  %v2559_v29 = vpop.f32.mrb[82].mxu1 }
 0x27d   : > { %3723 = vst [vmem:[%s4794_s16 + $0x40] sm:$0xf] %v3755_v20  ;;  %3724 = vst [vmem:[%s4794_s16 + $0x44] sm:$0x3] %v3756_v21  ;;  %v2687_v31 = vadd.f32 %v4935_v30, %v2633_v22  ;;  %v2831_v32 = vadd.f32 %v4935_v30, %v2783_v23  ;;  %v2634_v35 = vmul.f32 %v4942_v33, %v1629_v28  ;;  %v1631_v37 = vpop.f32.mrb[83].mxu0  ;;  %v2561_v38 = vpop.f32.mrb[83].mxu1 }
 0x27e   : > { %v2784_v36 = vmul.f32 %v4942_v33, %v2559_v29  ;;  %v2995_v39 = vsel %vm2935_vm0, %v2993_v26, %v2994_v27  ;;  %v3076_v40 = vsel %vm3056_vm1, %v2994_v27, 0.0 }
 0x27f   : > { %v3167_v41 = vmax.f32 %v3119_v15, %v2995_v39  ;;  %v3168_v42 = vmax.f32 %v3120_v34, %v3076_v40  ;;  %v2735_v43 = vmax.f32 %v2687_v31, 0.0  ;;  %v2879_v44 = vmax.f32 %v2831_v32, 0.0 }
 0x280   : > { %v2688_v45 = vadd.f32 %v4935_v30, %v2634_v35  ;;  %v2832_v46 = vadd.f32 %v4935_v30, %v2784_v36 }
 0x281   : > { %v3311_v47 = vmax.f32 %v3165_v8, %v3167_v41  ;;  %v3312_v48 = vmax.f32 %v3166_v9, %v3168_v42  ;;  %v3121_v49 = vmax.f32 %v2735_v43, %v2879_v44  ;;  %v2996_v58 = vrot.slane %v2735_v43, 1 }
 0x282   : > { %v2736_v50 = vmax.f32 %v2688_v45, 0.0  ;;  %v2880_v51 = vmax.f32 %v2832_v46, 0.0  ;;  %v1634_v52 = vpop.f32.mrb[84].mxu0  ;;  %v2564_v53 = vpop.f32.mrb[84].mxu1 }
 0x283   : > { %v2635_v54 = vmul.f32 %v4942_v33, %v1634_v52  ;;  %v2785_v55 = vmul.f32 %v4942_v33, %v2564_v53  ;;  %v1636_v56 = vpop.f32.mrb[85].mxu0  ;;  %v2566_v57 = vpop.f32.mrb[85].mxu1 }
 0x284   : > { %v2997_v59 = vrot.slane %v2736_v50, 1  ;;  %v3122_v60 = vmax.f32 %v2736_v50, %v2880_v51  ;;  %v1637_v61 = vpop.f32.mrb[86].mxu0  ;;  %v2567_v62 = vpop.f32.mrb[86].mxu1 }
 0x285   : > { %v2689_v63 = vadd.f32 %v4935_v30, %v2635_v54  ;;  %v2833_v0 = vadd.f32 %v4935_v30, %v2785_v55  ;;  %v2636_v2 = vmul.f32 %v4942_v33, %v1637_v61  ;;  %v2786_v3 = vmul.f32 %v4942_v33, %v2567_v62  ;;  %v1639_v4 = vpop.f32.mrb[87].mxu0  ;;  %v2569_v5 = vpop.f32.mrb[87].mxu1 }
 0x286   : > { %v2998_v6 = vsel %vm2935_vm0, %v2996_v58, %v2997_v59  ;;  %v3077_v7 = vsel %vm3056_vm1, %v2997_v59, 0.0 }
 0x287   : > { %v3169_v8 = vmax.f32 %v3121_v49, %v2998_v6  ;;  %v3170_v9 = vmax.f32 %v3122_v60, %v3077_v7  ;;  %v2737_v10 = vmax.f32 %v2689_v63, 0.0  ;;  %v2881_v11 = vmax.f32 %v2833_v0, 0.0 }
 0x288   : > { %v2690_v1 = vadd.f32 %v4935_v30, %v2636_v2  ;;  %v2834_v12 = vadd.f32 %v4935_v30, %v2786_v3 }
 0x289   : > { %v3313_v13 = vmax.f32 %v3311_v47, %v3169_v8  ;;  %v3314_v14 = vmax.f32 %v3312_v48, %v3170_v9  ;;  %v3123_v15 = vmax.f32 %v2737_v10, %v2881_v11  ;;  %v2999_v26 = vrot.slane %v2737_v10, 1 }
 0x28a   : > { %v2738_v16 = vmax.f32 %v2690_v1, 0.0  ;;  %v2882_v17 = vmax.f32 %v2834_v12, 0.0  ;;  %v1642_v18 = vpop.f32.mrb[88].mxu0  ;;  %v2572_v19 = vpop.f32.mrb[88].mxu1 }
 0x28b   : > { %v3757_v20 = vpack.c.bf16 %v3313_v13, %v3313_v13  ;;  %v3758_v21 = vpack.c.bf16 %v3314_v14, %v3314_v14  ;;  %v2637_v22 = vmul.f32 %v4942_v33, %v1642_v18  ;;  %v2787_v23 = vmul.f32 %v4942_v33, %v2572_v19  ;;  %v1644_v24 = vpop.f32.mrb[89].mxu0  ;;  %v2574_v25 = vpop.f32.mrb[89].mxu1 }
 0x28c   : > { %v3000_v27 = vrot.slane %v2738_v16, 1  ;;  %v3124_v34 = vmax.f32 %v2738_v16, %v2882_v17  ;;  %v1645_v28 = vpop.f32.mrb[90].mxu0  ;;  %v2575_v29 = vpop.f32.mrb[90].mxu1 }
 0x28d   : > { %3727 = vst [vmem:[%s4794_s16 + $0x48] sm:$0xf] %v3757_v20  ;;  %3728 = vst [vmem:[%s4794_s16 + $0x4c] sm:$0x3] %v3758_v21  ;;  %v2691_v31 = vadd.f32 %v4935_v30, %v2637_v22  ;;  %v2835_v32 = vadd.f32 %v4935_v30, %v2787_v23  ;;  %v2638_v35 = vmul.f32 %v4942_v33, %v1645_v28  ;;  %v1647_v37 = vpop.f32.mrb[91].mxu0  ;;  %v2577_v38 = vpop.f32.mrb[91].mxu1 }
 0x28e   : > { %v2788_v36 = vmul.f32 %v4942_v33, %v2575_v29  ;;  %v3001_v39 = vsel %vm2935_vm0, %v2999_v26, %v3000_v27  ;;  %v3078_v40 = vsel %vm3056_vm1, %v3000_v27, 0.0 }
 0x28f   : > { %v3171_v41 = vmax.f32 %v3123_v15, %v3001_v39  ;;  %v3172_v42 = vmax.f32 %v3124_v34, %v3078_v40  ;;  %v2739_v43 = vmax.f32 %v2691_v31, 0.0  ;;  %v2883_v44 = vmax.f32 %v2835_v32, 0.0 }
 0x290   : > { %v2692_v45 = vadd.f32 %v4935_v30, %v2638_v35  ;;  %v2836_v46 = vadd.f32 %v4935_v30, %v2788_v36 }
 0x291   : > { %v3326_v47 = vmax.f32 %v3169_v8, %v3171_v41  ;;  %v3327_v48 = vmax.f32 %v3170_v9, %v3172_v42  ;;  %v3125_v49 = vmax.f32 %v2739_v43, %v2883_v44  ;;  %v3002_v58 = vrot.slane %v2739_v43, 1 }
 0x292   : > { %v2740_v50 = vmax.f32 %v2692_v45, 0.0  ;;  %v2884_v51 = vmax.f32 %v2836_v46, 0.0  ;;  %v1650_v52 = vpop.f32.mrb[92].mxu0  ;;  %v2580_v53 = vpop.f32.mrb[92].mxu1 }
 0x293   : > { %v2639_v54 = vmul.f32 %v4942_v33, %v1650_v52  ;;  %v2789_v55 = vmul.f32 %v4942_v33, %v2580_v53  ;;  %v1652_v56 = vpop.f32.mrb[93].mxu0  ;;  %v2582_v57 = vpop.f32.mrb[93].mxu1 }
 0x294   : > { %v3003_v59 = vrot.slane %v2740_v50, 1  ;;  %v3126_v60 = vmax.f32 %v2740_v50, %v2884_v51  ;;  %v1653_v61 = vpop.f32.mrb[94].mxu0  ;;  %v2583_v62 = vpop.f32.mrb[94].mxu1 }
 0x295   : > { %v2693_v63 = vadd.f32 %v4935_v30, %v2639_v54  ;;  %v2837_v0 = vadd.f32 %v4935_v30, %v2789_v55  ;;  %v2640_v2 = vmul.f32 %v4942_v33, %v1653_v61  ;;  %v2790_v3 = vmul.f32 %v4942_v33, %v2583_v62  ;;  %v1655_v4 = vpop.f32.mrb[95].mxu0  ;;  %v2585_v5 = vpop.f32.mrb[95].mxu1 }
 0x296   : > { %v3004_v6 = vsel %vm2935_vm0, %v3002_v58, %v3003_v59  ;;  %v3079_v7 = vsel %vm3056_vm1, %v3003_v59, 0.0 }
 0x297   : > { %v3173_v8 = vmax.f32 %v3125_v49, %v3004_v6  ;;  %v3174_v9 = vmax.f32 %v3126_v60, %v3079_v7  ;;  %v2741_v10 = vmax.f32 %v2693_v63, 0.0  ;;  %v2885_v11 = vmax.f32 %v2837_v0, 0.0 }
 0x298   : > { %v2694_v1 = vadd.f32 %v4935_v30, %v2640_v2  ;;  %v2838_v12 = vadd.f32 %v4935_v30, %v2790_v3 }
 0x299   : > { %v3328_v13 = vmax.f32 %v3326_v47, %v3173_v8  ;;  %v3329_v14 = vmax.f32 %v3327_v48, %v3174_v9  ;;  %v3127_v15 = vmax.f32 %v2741_v10, %v2885_v11  ;;  %v3005_v19 = vrot.slane %v2741_v10, 1 }
 0x29a   : > { %v2742_v33 = vmax.f32 %v2694_v1, 0.0  ;;  %v2886_v16 = vmax.f32 %v2838_v12, 0.0 }
 0x29b   : > { %v3759_v17 = vpack.c.bf16 %v3328_v13, %v3328_v13  ;;  %v3760_v18 = vpack.c.bf16 %v3329_v14, %v3329_v14 }
 0x29c   : > { %v3006_v20 = vrot.slane %v2742_v33, 1  ;;  %v3128_v21 = vmax.f32 %v2742_v33, %v2886_v16 }
 0x29d   : > { %3731 = vst [vmem:[%s4794_s16 + $0x50] sm:$0xf] %v3759_v17  ;;  %3732 = vst [vmem:[%s4794_s16 + $0x54] sm:$0x3] %v3760_v18 }
 0x29e   : > { %v3007_v22 = vsel %vm2935_vm0, %v3005_v19, %v3006_v20  ;;  %v3080_v23 = vsel %vm3056_vm1, %v3006_v20, 0.0 }
 0x29f   : > { %v3175_v24 = vmax.f32 %v3127_v15, %v3007_v22  ;;  %v3176_v30 = vmax.f32 %v3128_v21, %v3080_v23 }
 0x2a1   : > { %v3341_v25 = vmax.f32 %v3173_v8, %v3175_v24  ;;  %v3342_v26 = vmax.f32 %v3174_v9, %v3176_v30 }
 0x2a3   : > { %v3761_v27 = vpack.c.bf16 %v3341_v25, %v3341_v25  ;;  %v3762_v34 = vpack.c.bf16 %v3342_v26, %v3342_v26 }
 0x2a5   : > { %3735 = vst [vmem:[%s4794_s16 + $0x58] sm:$0xf] %v3761_v27  ;;  %3736 = vst [vmem:[%s4794_s16 + $0x5c] sm:$0x3] %v3762_v34 }
 0x2a6 PF: > { %s15_s20 = sadd.s32 1, %s4326_s20   ;;  %s5047_s18 = smov %s4322_s19 }
 0x2a7   : > { %p12_p5 = scmp.ge.s32.totalorder %s15_s20, 4   ;;  %s5048_s19 = smov %s5050_s21 }
 0x2a9   :  { %14 = sbr.rel (!%p12_p5) target bundleno = 2 (0x2), region = 86 }

// kernel: vggf2_face_forward.7
= control target key start
LH: loop header
LB: loop body
LE: loop exit
PB: predicated region body
PF: predicated region fallthrough
CT: control target
= control target key end

     0   :  { %s1532_s15 = smov 0   ;;  %s1793_s0 = inlined_call_operand.vmem [shape: bf16[2,12,16,384], index: 0, kind: input, shape index: {}]   ;;  %s1794_s1 = inlined_call_operand.vmem [shape: bf16[384,128], index: 1, kind: input, shape index: {}]   ;;  %s1795_s2 = inlined_call_operand.vmem [shape: f32[1,128], index: 2, kind: input, shape index: {}]   ;;  %s1796_s3 = inlined_call_operand.vmem [shape: f32[1,128], index: 3, kind: input, shape index: {}]   ;;  %s1797_s4 = inlined_call_operand.vmem [shape: bf16[2,12,12,128], index: 4, kind: output, shape index: {}]  }
   0x1 LB: > { %s1150_s16 = sadd.s32 4294967295, %s1505_s15   ;;  %p1154_p0 = scmp.ge.s32.totalorder %s1505_s15, 1  ;;  %s1505_s15 = sphi %s1532_s15, %s14_s15  }
   0x2   : > { %p162_p1 = scmp.lt.s32.totalorder %s1505_s15, 3 }
   0x4   : > { %p163_p2 = pnand %p1154_p0, %p162_p1 }
   0x5   : > { %v1427_v0 = vld [vmem:[%s1794_s1 + $0x40] sm:$0xff] (!%p163_p2)   ;;  %v1430_v3 = vld [vmem:[%s1794_s1 + $0x48] sm:$0xff] (!%p163_p2)   ;;  %v1433_v6 = vld [vmem:[%s1794_s1 + $0x50] sm:$0xff] (!%p163_p2)   ;;  %p188_p3 = scmp.lt.s32.totalorder (!%p163_p2), %s1150_s16, 1 }
   0x6   : > { %166 = sbr.rel (%p163_p2) target bundleno = 354 (0x162), region = 36  ;;  %v1428_v1 = vld [vmem:[%s1794_s1] sm:$0xff] (!%p163_p2)   ;;  %1269 = vmatprep.subr.bf16.mxu0 (!%p163_p2), %v1427_v0  ;;  %v1431_v4 = vld [vmem:[%s1794_s1 + $0x8] sm:$0xff] (!%p163_p2)   ;;  %v1434_v7 = vld [vmem:[%s1794_s1 + $0x10] sm:$0xff] (!%p163_p2)  }
   0x7   : > { %v1429_v2 = vld [vmem:[%s1794_s1 + $0x80] sm:$0xff] (!%p163_p2)   ;;  %1270 = vmatpush3.bf16.msra.mxu0 (!%p163_p2), %v1428_v1  ;;  %v1432_v5 = vld [vmem:[%s1794_s1 + $0x88] sm:$0xff] (!%p163_p2)   ;;  %v1435_v8 = vld [vmem:[%s1794_s1 + $0x90] sm:$0xff] (!%p163_p2)  }
   0x8   : > { %1377 = vmatprep.subr.bf16.mxu1 (!%p163_p2), %v1429_v2  ;;  %1271 = vmatprep.subr.bf16.mxu0 (!%p163_p2), %v1430_v3  ;;  %v1436_v9 = vld [vmem:[%s1794_s1 + $0x58] sm:$0xff] (!%p163_p2)   ;;  %v1439_v12 = vld [vmem:[%s1794_s1 + $0x60] sm:$0xff] (!%p163_p2)   ;;  %v1442_v15 = vld [vmem:[%s1794_s1 + $0x68] sm:$0xff] (!%p163_p2)  }
   0x9   : > { %1378 = vmatpush3.bf16.msra.mxu1 (!%p163_p2), %v1429_v2  ;;  %v1437_v10 = vld [vmem:[%s1794_s1 + $0x18] sm:$0xff] (!%p163_p2)   ;;  %v1441_v13 = vld [vmem:[%s1794_s1 + $0xa0] sm:$0xff] (!%p163_p2)   ;;  %v1444_v16 = vld [vmem:[%s1794_s1 + $0xa8] sm:$0xff] (!%p163_p2)  }
   0xa   : > { %1379 = vmatprep.subr.bf16.mxu1 (!%p163_p2), %v1432_v5  ;;  %v1438_v11 = vld [vmem:[%s1794_s1 + $0x98] sm:$0xff] (!%p163_p2)   ;;  %v1440_v14 = vld [vmem:[%s1794_s1 + $0x20] sm:$0xff] (!%p163_p2)   ;;  %v1443_v17 = vld [vmem:[%s1794_s1 + $0x28] sm:$0xff] (!%p163_p2)  }
   0xb   : > { %1272 = vmatpush3.bf16.msra.mxu0 (!%p163_p2), %v1431_v4  ;;  %v1445_v18 = vld [vmem:[%s1794_s1 + $0x70] sm:$0xff] (!%p163_p2)   ;;  %v1448_v21 = vld [vmem:[%s1794_s1 + $0x78] sm:$0xff] (!%p163_p2)   ;;  %v1663_v3 = vld [vmem:[%s1795_s2] ss:$0 sm:$0xff] (!%p163_p2) }
   0xc   : > { %1273 = vmatprep.subr.bf16.mxu0 (!%p163_p2), %v1433_v6  ;;  %v1446_v19 = vld [vmem:[%s1794_s1 + $0x30] sm:$0xff] (!%p163_p2)   ;;  %v1450_v22 = vld [vmem:[%s1794_s1 + $0xb8] sm:$0xff] (!%p163_p2)  }
   0xd   : > { %1380 = vmatpush3.bf16.msra.mxu1 %v1432_v5  ;;  %s1799_s16 = smov (!%p188_p3, %s1150_s16), 1  ;;  %v1447_v20 = vld [vmem:[%s1794_s1 + $0xb0] sm:$0xff]   ;;  %v1449_v25 = vld [vmem:[%s1794_s1 + $0x38] sm:$0xff]  }
   0xe   : > { %1381 = vmatprep.subr.bf16.mxu1 %v1435_v8  ;;  %s1417_s27 = smul.u32 288, %s1799_s16 }
   0xf   : > { %1274 = vmatpush3.bf16.msra.mxu0 %v1434_v7  ;;  %v1668_v7 = vld [vmem:[%s1796_s3] ss:$0 sm:$0xff]  ;;  %s1418_s25 = smul.u32 96, %s1799_s16 }
  0x10   : > { %1275 = vmatprep.subr.bf16.mxu0 %v1436_v9  ;;  %s1613_s12 = scalar_lea.vmem %s1793_s0, %s1417_s27 }
  0x11   : > { %1382 = vmatpush3.bf16.msra.mxu1 %v1435_v8  ;;  %v1453_v23 = vld [vmem:[%s1613_s12 + $0x4] ss:$12 sps:$4 sm:$0xff]   ;;  %v1454_v24 = vld [vmem:[%s1613_s12 + $0x8] ss:$12 sps:$4 sm:$0xff]   ;;  %v1451_v26 = vld [vmem:[%s1613_s12] ss:$12 sps:$4 sm:$0xff]   ;;  %s1678_s28 = scalar_lea.vmem %s1797_s4, %s1418_s25 }
  0x12   : > { %1383 = vmatprep.subr.bf16.mxu1 %v1438_v11  ;;  %663 = vmatprep.mubr.bf16.mxu0 %v1453_v23  ;;  %v1456_v27 = vld [vmem:[%s1613_s12 + $0x1c] ss:$12 sps:$4 sm:$0xff]   ;;  %v1455_v28 = vld [vmem:[%s1613_s12 + $0x20] ss:$12 sps:$4 sm:$0xff]   ;;  %v1462_v29 = vld [vmem:[%s1613_s12 + $0x38] ss:$12 sps:$4 sm:$0xff]  }
  0x13   : > { %1276 = vmatpush3.bf16.msra.mxu0 %v1437_v10  ;;  %1393 = vmatprep.mubr.bf16.mxu1 %v1454_v24  ;;  %v1458_v30 = vld [vmem:[%s1613_s12 + $0x18] ss:$12 sps:$4 sm:$0xff]   ;;  %v1459_v31 = vld [vmem:[%s1613_s12 + $0x34] ss:$12 sps:$4 sm:$0xff]   ;;  %v1463_v32 = vld [vmem:[%s1613_s12 + $0x50] ss:$12 sps:$4 sm:$0xff]  }
  0x14   : > { %1277 = vmatprep.subr.bf16.mxu0 %v1439_v12  ;;  %v1470_v33 = vld [vmem:[%s1613_s12 + $0x68] ss:$12 sps:$4 sm:$0xff]   ;;  %v1461_v34 = vld [vmem:[%s1613_s12 + $0x30] ss:$12 sps:$4 sm:$0xff]   ;;  %v1464_v35 = vld [vmem:[%s1613_s12 + $0x4c] ss:$12 sps:$4 sm:$0xff]  }
  0x15   : > { %1384 = vmatpush3.bf16.msra.mxu1 %v1438_v11  ;;  %v1471_v36 = vld [vmem:[%s1613_s12 + $0x80] ss:$12 sps:$4 sm:$0xff]   ;;  %v1478_v37 = vld [vmem:[%s1613_s12 + $0x98] ss:$12 sps:$4 sm:$0xff]   ;;  %v1466_v38 = vld [vmem:[%s1613_s12 + $0x48] ss:$12 sps:$4 sm:$0xff]  }
  0x16   : > { %1385 = vmatprep.subr.bf16.mxu1 %v1441_v13  ;;  %v1467_v39 = vld [vmem:[%s1613_s12 + $0x64] ss:$12 sps:$4 sm:$0xff]   ;;  %v1486_v41 = vld [vmem:[%s1613_s12 + $0xc8] ss:$12 sps:$4 sm:$0xff]   ;;  %v1469_v42 = vld [vmem:[%s1613_s12 + $0x60] ss:$12 sps:$4 sm:$0xff]  }
  0x17   : > { %1278 = vmatpush3.bf16.msra.mxu0 %v1440_v14  ;;  %v1479_v40 = vld [vmem:[%s1613_s12 + $0xb0] ss:$12 sps:$4 sm:$0xff]   ;;  %v1487_v44 = vld [vmem:[%s1613_s12 + $0xe0] ss:$12 sps:$4 sm:$0xff]   ;;  %v1494_v45 = vld [vmem:[%s1613_s12 + $0xf8] ss:$12 sps:$4 sm:$0xff]  }
  0x18   : > { %1279 = vmatprep.subr.bf16.mxu0 %v1442_v15  ;;  %v1472_v43 = vld [vmem:[%s1613_s12 + $0x7c] ss:$12 sps:$4 sm:$0xff]   ;;  %v1474_v46 = vld [vmem:[%s1613_s12 + $0x78] ss:$12 sps:$4 sm:$0xff]   ;;  %v1475_v47 = vld [vmem:[%s1613_s12 + $0x94] ss:$12 sps:$4 sm:$0xff]  }
  0x19   : > { %1386 = vmatpush3.bf16.msra.mxu1 %v1441_v13  ;;  %v1495_v48 = vld [vmem:[%s1613_s12 + $0x110] ss:$12 sps:$4 sm:$0xff]   ;;  %v1480_v50 = vld [vmem:[%s1613_s12 + $0xac] ss:$12 sps:$4 sm:$0xff]   ;;  %v1482_v51 = vld [vmem:[%s1613_s12 + $0xa8] ss:$12 sps:$4 sm:$0xff]  }
  0x1a   : > { %1387 = vmatprep.subr.bf16.mxu1 %v1444_v16  ;;  %v1477_v49 = vld [vmem:[%s1613_s12 + $0x90] ss:$12 sps:$4 sm:$0xff]   ;;  %v1485_v53 = vld [vmem:[%s1613_s12 + $0xc0] ss:$12 sps:$4 sm:$0xff]   ;;  %v1490_v55 = vld [vmem:[%s1613_s12 + $0xd8] ss:$12 sps:$4 sm:$0xff]  }
  0x1b   : > { %1280 = vmatpush3.bf16.msra.mxu0 %v1443_v17  ;;  %v1483_v52 = vld [vmem:[%s1613_s12 + $0xc4] ss:$12 sps:$4 sm:$0xff]   ;;  %v1488_v54 = vld [vmem:[%s1613_s12 + $0xdc] ss:$12 sps:$4 sm:$0xff]   ;;  %v1491_v56 = vld [vmem:[%s1613_s12 + $0xf4] ss:$12 sps:$4 sm:$0xff]  }
  0x1c   : > { %1281 = vmatprep.subr.bf16.mxu0 %v1445_v18  ;;  %v1493_v57 = vld [vmem:[%s1613_s12 + $0xf0] ss:$12 sps:$4 sm:$0xff]   ;;  %v1496_v58 = vld [vmem:[%s1613_s12 + $0x10c] ss:$12 sps:$4 sm:$0xff]   ;;  %v1498_v59 = vld [vmem:[%s1613_s12 + $0x108] ss:$12 sps:$4 sm:$0xff]  }
  0x1d   : > { %1388 = vmatpush3.bf16.msra.mxu1 %v1444_v16 }
  0x1e   : > { %1389 = vmatprep.subr.bf16.mxu1 %v1447_v20 }
  0x1f   : > { %1282 = vmatpush3.bf16.msra.mxu0 %v1446_v19 }
  0x20   : > { %1283 = vmatprep.subr.bf16.mxu0 %v1448_v21 }
  0x21   : > { %1390 = vmatpush3.bf16.msra.mxu1 %v1447_v20 }
  0x22   : > { %1391 = vmatprep.subr.bf16.mxu1 %v1450_v22 }
  0x23   : > { %1284 = vmatpush3.bf16.msra.mxu0 %v1449_v25 }
  0x25   : > { %1392 = vmatpush3.bf16.msra.mxu1 %v1450_v22 }
  0x26   : > { %664 = vmatmul.mubr.bf16.vlgmr.msra.gmra.mrb[0].mxu0 %v1451_v26 }
  0x27   : > { %671 = vmatprep.mubr.bf16.mxu0 %v1456_v27 }
  0x28   : > { %1394 = vmatmul.mubr.bf16.vlgmr.msra.gmra.mrb[0].mxu1 %v1455_v28 }
  0x29   : > { %1397 = vmatprep.mubr.bf16.mxu1 %v1462_v29 }
  0x2e   : > { %672 = vmatmul.mubr.bf16.gmra.mrb[4].mxu0 %v1458_v30 }
  0x2f   : > { %679 = vmatprep.mubr.bf16.mxu0 %v1459_v31 }
  0x30   : > { %1398 = vmatmul.mubr.bf16.gmra.mrb[4].mxu1 %v1463_v32 }
  0x31   : > { %1401 = vmatprep.mubr.bf16.mxu1 %v1470_v33 }
  0x36   : > { %680 = vmatmul.mubr.bf16.gmra.mrb[8].mxu0 %v1461_v34 }
  0x37   : > { %687 = vmatprep.mubr.bf16.mxu0 %v1464_v35 }
  0x38   : > { %1402 = vmatmul.mubr.bf16.gmra.mrb[8].mxu1 %v1471_v36 }
  0x39   : > { %1405 = vmatprep.mubr.bf16.mxu1 %v1478_v37 }
  0x3e   : > { %688 = vmatmul.mubr.bf16.gmra.mrb[12].mxu0 %v1466_v38 }
  0x3f   : > { %695 = vmatprep.mubr.bf16.mxu0 %v1467_v39 }
  0x40   : > { %1406 = vmatmul.mubr.bf16.gmra.mrb[12].mxu1 %v1479_v40 }
  0x41   : > { %1409 = vmatprep.mubr.bf16.mxu1 %v1486_v41 }
  0x46   : > { %696 = vmatmul.mubr.bf16.gmra.mrb[16].mxu0 %v1469_v42 }
  0x47   : > { %703 = vmatprep.mubr.bf16.mxu0 %v1472_v43 }
  0x48   : > { %1410 = vmatmul.mubr.bf16.gmra.mrb[16].mxu1 %v1487_v44 }
  0x49   : > { %1413 = vmatprep.mubr.bf16.mxu1 %v1494_v45 }
  0x4e   : > { %704 = vmatmul.mubr.bf16.gmra.mrb[20].mxu0 %v1474_v46 }
  0x4f   : > { %711 = vmatprep.mubr.bf16.mxu0 %v1475_v47 }
  0x50   : > { %1414 = vmatmul.mubr.bf16.gmra.mrb[20].mxu1 %v1495_v48 }
  0x56   : > { %712 = vmatmul.mubr.bf16.gmra.mrb[24].mxu0 %v1477_v49 }
  0x57   : > { %719 = vmatprep.mubr.bf16.mxu0 %v1480_v50 }
  0x5e   : > { %720 = vmatmul.mubr.bf16.gmra.mrb[28].mxu0 %v1482_v51 }
  0x5f   : > { %727 = vmatprep.mubr.bf16.mxu0 %v1483_v52 }
  0x66   : > { %728 = vmatmul.mubr.bf16.gmra.mrb[32].mxu0 %v1485_v53 }
  0x67   : > { %735 = vmatprep.mubr.bf16.mxu0 %v1488_v54 }
  0x6e   : > { %736 = vmatmul.mubr.bf16.gmra.mrb[36].mxu0 %v1490_v55 }
  0x6f   : > { %743 = vmatprep.mubr.bf16.mxu0 %v1491_v56 }
  0x76   : > { %744 = vmatmul.mubr.bf16.gmra.mrb[40].mxu0 %v1493_v57 }
  0x77   : > { %751 = vmatprep.mubr.bf16.mxu0 %v1496_v58 }
  0x7e   : > { %752 = vmatmul.mubr.bf16.gmra.mrb[44].mxu0 %v1498_v59 }
  0xf9   : > { %v1285_v60 = vpop.f32.mrb[0].mxu0 }
  0xfa   : > { %v1286_v61 = vpop.f32.mrb[1].mxu0 }
  0xfb   : > { %v1287_v62 = vadd.f32 %v1286_v61, %v1285_v60  ;;  %v1288_v63 = vpop.f32.mrb[2].mxu0  ;;  %v1395_v0 = vpop.f32.mrb[0].mxu1 }
  0xfc   : > { %v1289_v1 = vpop.f32.mrb[3].mxu0  ;;  %v794_v2 = vpop.f32.mrb[1].mxu1 }
  0xfd   : > { %v1290_v4 = vadd.f32 %v1289_v1, %v1288_v63  ;;  %v795_v5 = vadd.f32 %v1287_v62, %v794_v2  ;;  %v1396_v6 = vpop.f32.mrb[2].mxu1 }
  0xfe   : > { %v797_v8 = vpop.f32.mrb[3].mxu1 }
  0xff   : > { %v896_v9 = vmul.f32 %v1663_v3, %v795_v5  ;;  %v798_v10 = vadd.f32 %v1290_v4, %v797_v8 }
 0x101   : > { %v927_v11 = vadd.f32 %v1668_v7, %v896_v9  ;;  %v897_v12 = vmul.f32 %v1663_v3, %v798_v10  ;;  %v1291_v13 = vpop.f32.mrb[4].mxu0 }
 0x102   : > { %v1292_v14 = vpop.f32.mrb[5].mxu0 }
 0x103   : > { %v951_v15 = vmax.f32 %v927_v11, 0.0  ;;  %v928_v16 = vadd.f32 %v1668_v7, %v897_v12  ;;  %v1293_v17 = vadd.f32 %v1292_v14, %v1291_v13  ;;  %v1294_v18 = vpop.f32.mrb[6].mxu0  ;;  %v1399_v19 = vpop.f32.mrb[4].mxu1 }
 0x104   : > { %v1295_v20 = vpop.f32.mrb[7].mxu0  ;;  %v810_v21 = vpop.f32.mrb[5].mxu1 }
 0x105   : > { %v1245_v22 = vpack.c.bf16 %v951_v15, %v951_v15  ;;  %v952_v23 = vmax.f32 %v928_v16, 0.0  ;;  %v803_v24 = vadd.f32 %v1395_v0, %v1293_v17  ;;  %v1296_v25 = vadd.f32 %v1295_v20, %v1294_v18  ;;  %v1400_v26 = vpop.f32.mrb[6].mxu1 }
 0x106   : > { %v813_v27 = vpop.f32.mrb[7].mxu1 }
 0x107   : > { %1071 = vst [vmem:[%s1678_s28] sm:$0xf] %v1245_v22  ;;  %v1246_v28 = vpack.c.bf16 %v952_v23, %v952_v23  ;;  %v898_v29 = vmul.f32 %v1663_v3, %v803_v24  ;;  %v806_v30 = vadd.f32 %v1396_v6, %v1296_v25 }
 0x109   : > { %1072 = vst [vmem:[%s1678_s28 + $0x4] sm:$0x3] %v1246_v28  ;;  %v929_v31 = vadd.f32 %v1668_v7, %v898_v29  ;;  %v899_v32 = vmul.f32 %v1663_v3, %v806_v30  ;;  %v1297_v33 = vpop.f32.mrb[8].mxu0 }
 0x10a   : > { %v1298_v34 = vpop.f32.mrb[9].mxu0 }
 0x10b   : > { %v953_v35 = vmax.f32 %v929_v31, 0.0  ;;  %v930_v36 = vadd.f32 %v1668_v7, %v899_v32  ;;  %v1299_v37 = vadd.f32 %v1298_v34, %v1297_v33  ;;  %v1300_v38 = vpop.f32.mrb[10].mxu0  ;;  %v1686_v39 = vpop.f32.mrb[8].mxu1 }
 0x10c   : > { %v1301_v40 = vpop.f32.mrb[11].mxu0  ;;  %v826_v41 = vpop.f32.mrb[9].mxu1 }
 0x10d   : > { %v1247_v42 = vpack.c.bf16 %v953_v35, %v953_v35  ;;  %v954_v43 = vmax.f32 %v930_v36, 0.0  ;;  %v1302_v44 = vadd.f32 %v1301_v40, %v1300_v38  ;;  %v811_v45 = vadd.f32 %v1299_v37, %v810_v21  ;;  %v1688_v46 = vpop.f32.mrb[10].mxu1 }
 0x10e   : > { %v829_v47 = vpop.f32.mrb[11].mxu1 }
 0x10f   : > { %1073 = vst [vmem:[%s1678_s28 + $0x8] sm:$0xf] %v1247_v42  ;;  %v1248_v48 = vpack.c.bf16 %v954_v43, %v954_v43  ;;  %v900_v49 = vmul.f32 %v1663_v3, %v811_v45  ;;  %v814_v50 = vadd.f32 %v1302_v44, %v813_v27 }
 0x111   : > { %1074 = vst [vmem:[%s1678_s28 + $0xc] sm:$0x3] %v1248_v48  ;;  %v931_v51 = vadd.f32 %v1668_v7, %v900_v49  ;;  %v901_v52 = vmul.f32 %v1663_v3, %v814_v50  ;;  %v1303_v53 = vpop.f32.mrb[12].mxu0 }
 0x112   : > { %v1304_v54 = vpop.f32.mrb[13].mxu0 }
 0x113   : > { %v955_v55 = vmax.f32 %v931_v51, 0.0  ;;  %v932_v56 = vadd.f32 %v1668_v7, %v901_v52  ;;  %v1305_v57 = vadd.f32 %v1304_v54, %v1303_v53  ;;  %v1306_v58 = vpop.f32.mrb[14].mxu0  ;;  %v1696_v59 = vpop.f32.mrb[12].mxu1 }
 0x114   : > { %v1307_v60 = vpop.f32.mrb[15].mxu0  ;;  %v1698_v61 = vpop.f32.mrb[13].mxu1 }
 0x115   : > { %v1249_v62 = vpack.c.bf16 %v955_v55, %v955_v55  ;;  %v956_v63 = vmax.f32 %v932_v56, 0.0  ;;  %v819_v0 = vadd.f32 %v1399_v19, %v1305_v57  ;;  %v1308_v1 = vadd.f32 %v1307_v60, %v1306_v58  ;;  %v1700_v2 = vpop.f32.mrb[14].mxu1 }
 0x116   : > { %v1702_v4 = vpop.f32.mrb[15].mxu1 }
 0x117   : > { %1075 = vst [vmem:[%s1678_s28 + $0x10] sm:$0xf] %v1249_v62  ;;  %v1250_v5 = vpack.c.bf16 %v956_v63, %v956_v63  ;;  %v902_v6 = vmul.f32 %v1663_v3, %v819_v0  ;;  %v822_v8 = vadd.f32 %v1400_v26, %v1308_v1 }
 0x119   : > { %1076 = vst [vmem:[%s1678_s28 + $0x14] sm:$0x3] %v1250_v5  ;;  %v933_v9 = vadd.f32 %v1668_v7, %v902_v6  ;;  %v903_v10 = vmul.f32 %v1663_v3, %v822_v8  ;;  %v1309_v11 = vpop.f32.mrb[16].mxu0 }
 0x11a   : > { %v1310_v12 = vpop.f32.mrb[17].mxu0 }
 0x11b   : > { %v957_v13 = vmax.f32 %v933_v9, 0.0  ;;  %v934_v14 = vadd.f32 %v1668_v7, %v903_v10  ;;  %v1311_v15 = vadd.f32 %v1310_v12, %v1309_v11  ;;  %v1312_v16 = vpop.f32.mrb[18].mxu0  ;;  %v1710_v17 = vpop.f32.mrb[16].mxu1 }
 0x11c   : > { %v1313_v18 = vpop.f32.mrb[19].mxu0  ;;  %v1712_v19 = vpop.f32.mrb[17].mxu1 }
 0x11d   : > { %v1251_v20 = vpack.c.bf16 %v957_v13, %v957_v13  ;;  %v958_v21 = vmax.f32 %v934_v14, 0.0  ;;  %v1314_v22 = vadd.f32 %v1313_v18, %v1312_v16  ;;  %v827_v23 = vadd.f32 %v1311_v15, %v826_v41  ;;  %v1714_v24 = vpop.f32.mrb[18].mxu1 }
 0x11e   : > { %v1716_v25 = vpop.f32.mrb[19].mxu1 }
 0x11f   : > { %1077 = vst [vmem:[%s1678_s28 + $0x18] sm:$0xf] %v1251_v20  ;;  %v1252_v26 = vpack.c.bf16 %v958_v21, %v958_v21  ;;  %v904_v27 = vmul.f32 %v1663_v3, %v827_v23  ;;  %v830_v28 = vadd.f32 %v1314_v22, %v829_v47 }
 0x121   : > { %1078 = vst [vmem:[%s1678_s28 + $0x1c] sm:$0x3] %v1252_v26  ;;  %v935_v29 = vadd.f32 %v1668_v7, %v904_v27  ;;  %v905_v30 = vmul.f32 %v1663_v3, %v830_v28  ;;  %v1315_v31 = vpop.f32.mrb[20].mxu0 }
 0x122   : > { %v1316_v32 = vpop.f32.mrb[21].mxu0 }
 0x123   : > { %v959_v33 = vmax.f32 %v935_v29, 0.0  ;;  %v936_v34 = vadd.f32 %v1668_v7, %v905_v30  ;;  %v1317_v35 = vadd.f32 %v1316_v32, %v1315_v31  ;;  %v1318_v36 = vpop.f32.mrb[22].mxu0  ;;  %v1724_v37 = vpop.f32.mrb[20].mxu1 }
 0x124   : > { %v1319_v38 = vpop.f32.mrb[23].mxu0  ;;  %v1726_v40 = vpop.f32.mrb[21].mxu1 }
 0x125   : > { %v1253_v41 = vpack.c.bf16 %v959_v33, %v959_v33  ;;  %v960_v42 = vmax.f32 %v936_v34, 0.0  ;;  %v835_v43 = vadd.f32 %v1686_v39, %v1317_v35  ;;  %v1320_v44 = vadd.f32 %v1319_v38, %v1318_v36  ;;  %v1729_v45 = vpop.f32.mrb[22].mxu1 }
 0x126   : > { %v1731_v47 = vpop.f32.mrb[23].mxu1 }
 0x127   : > { %1079 = vst [vmem:[%s1678_s28 + $0x20] sm:$0xf] %v1253_v41  ;;  %v1254_v48 = vpack.c.bf16 %v960_v42, %v960_v42  ;;  %v906_v49 = vmul.f32 %v1663_v3, %v835_v43  ;;  %v838_v50 = vadd.f32 %v1688_v46, %v1320_v44 }
 0x129   : > { %1080 = vst [vmem:[%s1678_s28 + $0x24] sm:$0x3] %v1254_v48  ;;  %v937_v51 = vadd.f32 %v1668_v7, %v906_v49  ;;  %v907_v52 = vmul.f32 %v1663_v3, %v838_v50  ;;  %v1321_v53 = vpop.f32.mrb[24].mxu0 }
 0x12a   : > { %v1322_v39 = vpop.f32.mrb[25].mxu0 }
 0x12b   : > { %v961_v54 = vmax.f32 %v937_v51, 0.0  ;;  %v938_v55 = vadd.f32 %v1668_v7, %v907_v52  ;;  %v1323_v56 = vadd.f32 %v1322_v39, %v1321_v53  ;;  %v1324_v57 = vpop.f32.mrb[26].mxu0 }
 0x12c   : > { %v1325_v58 = vpop.f32.mrb[27].mxu0 }
 0x12d   : > { %v1255_v60 = vpack.c.bf16 %v961_v54, %v961_v54  ;;  %v962_v62 = vmax.f32 %v938_v55, 0.0  ;;  %v1326_v63 = vadd.f32 %v1325_v58, %v1324_v57  ;;  %v843_v0 = vadd.f32 %v1323_v56, %v1698_v61 }
 0x12f   : > { %1081 = vst [vmem:[%s1678_s28 + $0x28] sm:$0xf] %v1255_v60  ;;  %v1256_v46 = vpack.c.bf16 %v962_v62, %v962_v62  ;;  %v908_v1 = vmul.f32 %v1663_v3, %v843_v0  ;;  %v846_v5 = vadd.f32 %v1326_v63, %v1702_v4 }
 0x131   : > { %1082 = vst [vmem:[%s1678_s28 + $0x2c] sm:$0x3] %v1256_v46  ;;  %v939_v6 = vadd.f32 %v1668_v7, %v908_v1  ;;  %v909_v8 = vmul.f32 %v1663_v3, %v846_v5  ;;  %v1327_v9 = vpop.f32.mrb[28].mxu0 }
 0x132   : > { %v1328_v10 = vpop.f32.mrb[29].mxu0 }
 0x133   : > { %v963_v11 = vmax.f32 %v939_v6, 0.0  ;;  %v940_v12 = vadd.f32 %v1668_v7, %v909_v8  ;;  %v1329_v13 = vadd.f32 %v1328_v10, %v1327_v9  ;;  %v1330_v61 = vpop.f32.mrb[30].mxu0 }
 0x134   : > { %v1331_v14 = vpop.f32.mrb[31].mxu0 }
 0x135   : > { %v1257_v15 = vpack.c.bf16 %v963_v11, %v963_v11  ;;  %v964_v16 = vmax.f32 %v940_v12, 0.0  ;;  %v851_v18 = vadd.f32 %v1696_v59, %v1329_v13  ;;  %v1332_v20 = vadd.f32 %v1331_v14, %v1330_v61 }
 0x137   : > { %1083 = vst [vmem:[%s1678_s28 + $0x30] sm:$0xf] %v1257_v15  ;;  %v1258_v4 = vpack.c.bf16 %v964_v16, %v964_v16  ;;  %v910_v21 = vmul.f32 %v1663_v3, %v851_v18  ;;  %v854_v22 = vadd.f32 %v1700_v2, %v1332_v20 }
 0x139   : > { %1084 = vst [vmem:[%s1678_s28 + $0x34] sm:$0x3] %v1258_v4  ;;  %v941_v23 = vadd.f32 %v1668_v7, %v910_v21  ;;  %v911_v26 = vmul.f32 %v1663_v3, %v854_v22  ;;  %v1333_v27 = vpop.f32.mrb[32].mxu0 }
 0x13a   : > { %v1334_v28 = vpop.f32.mrb[33].mxu0 }
 0x13b   : > { %v965_v29 = vmax.f32 %v941_v23, 0.0  ;;  %v942_v30 = vadd.f32 %v1668_v7, %v911_v26  ;;  %v1335_v59 = vadd.f32 %v1334_v28, %v1333_v27  ;;  %v1336_v31 = vpop.f32.mrb[34].mxu0 }
 0x13c   : > { %v1337_v32 = vpop.f32.mrb[35].mxu0 }
 0x13d   : > { %v1259_v33 = vpack.c.bf16 %v965_v29, %v965_v29  ;;  %v966_v34 = vmax.f32 %v942_v30, 0.0  ;;  %v1338_v35 = vadd.f32 %v1337_v32, %v1336_v31  ;;  %v859_v36 = vadd.f32 %v1335_v59, %v1712_v19 }
 0x13f   : > { %1085 = vst [vmem:[%s1678_s28 + $0x38] sm:$0xf] %v1259_v33  ;;  %v1260_v2 = vpack.c.bf16 %v966_v34, %v966_v34  ;;  %v912_v38 = vmul.f32 %v1663_v3, %v859_v36  ;;  %v862_v41 = vadd.f32 %v1338_v35, %v1716_v25 }
 0x141   : > { %1086 = vst [vmem:[%s1678_s28 + $0x3c] sm:$0x3] %v1260_v2  ;;  %v943_v42 = vadd.f32 %v1668_v7, %v912_v38  ;;  %v913_v43 = vmul.f32 %v1663_v3, %v862_v41  ;;  %v1339_v44 = vpop.f32.mrb[36].mxu0 }
 0x142   : > { %v1340_v48 = vpop.f32.mrb[37].mxu0 }
 0x143   : > { %v967_v49 = vmax.f32 %v943_v42, 0.0  ;;  %v944_v50 = vadd.f32 %v1668_v7, %v913_v43  ;;  %v1341_v51 = vadd.f32 %v1340_v48, %v1339_v44  ;;  %v1342_v19 = vpop.f32.mrb[38].mxu0 }
 0x144   : > { %v1343_v52 = vpop.f32.mrb[39].mxu0 }
 0x145   : > { %v1261_v53 = vpack.c.bf16 %v967_v49, %v967_v49  ;;  %v968_v39 = vmax.f32 %v944_v50, 0.0  ;;  %v867_v54 = vadd.f32 %v1710_v17, %v1341_v51  ;;  %v1344_v55 = vadd.f32 %v1343_v52, %v1342_v19 }
 0x147   : > { %1087 = vst [vmem:[%s1678_s28 + $0x40] sm:$0xf] %v1261_v53  ;;  %v1262_v25 = vpack.c.bf16 %v968_v39, %v968_v39  ;;  %v914_v56 = vmul.f32 %v1663_v3, %v867_v54  ;;  %v870_v57 = vadd.f32 %v1714_v24, %v1344_v55 }
 0x149   : > { %1088 = vst [vmem:[%s1678_s28 + $0x44] sm:$0x3] %v1262_v25  ;;  %v945_v58 = vadd.f32 %v1668_v7, %v914_v56  ;;  %v915_v60 = vmul.f32 %v1663_v3, %v870_v57  ;;  %v1345_v62 = vpop.f32.mrb[40].mxu0 }
 0x14a   : > { %v1346_v63 = vpop.f32.mrb[41].mxu0 }
 0x14b   : > { %v969_v0 = vmax.f32 %v945_v58, 0.0  ;;  %v946_v46 = vadd.f32 %v1668_v7, %v915_v60  ;;  %v1347_v17 = vadd.f32 %v1346_v63, %v1345_v62  ;;  %v1348_v1 = vpop.f32.mrb[42].mxu0 }
 0x14c   : > { %v1349_v5 = vpop.f32.mrb[43].mxu0 }
 0x14d   : > { %v1263_v6 = vpack.c.bf16 %v969_v0, %v969_v0  ;;  %v970_v8 = vmax.f32 %v946_v46, 0.0  ;;  %v1350_v9 = vadd.f32 %v1349_v5, %v1348_v1  ;;  %v875_v10 = vadd.f32 %v1347_v17, %v1726_v40 }
 0x14f   : > { %1089 = vst [vmem:[%s1678_s28 + $0x48] sm:$0xf] %v1263_v6  ;;  %v1264_v24 = vpack.c.bf16 %v970_v8, %v970_v8  ;;  %v916_v11 = vmul.f32 %v1663_v3, %v875_v10  ;;  %v878_v12 = vadd.f32 %v1350_v9, %v1731_v47 }
 0x151   : > { %1090 = vst [vmem:[%s1678_s28 + $0x4c] sm:$0x3] %v1264_v24  ;;  %v947_v13 = vadd.f32 %v1668_v7, %v916_v11  ;;  %v917_v61 = vmul.f32 %v1663_v3, %v878_v12  ;;  %v1351_v14 = vpop.f32.mrb[44].mxu0 }
 0x152   : > { %v1352_v15 = vpop.f32.mrb[45].mxu0 }
 0x153   : > { %v971_v16 = vmax.f32 %v947_v13, 0.0  ;;  %v948_v18 = vadd.f32 %v1668_v7, %v917_v61  ;;  %v1353_v20 = vadd.f32 %v1352_v15, %v1351_v14  ;;  %v1354_v40 = vpop.f32.mrb[46].mxu0 }
 0x154   : > { %v1355_v4 = vpop.f32.mrb[47].mxu0 }
 0x155   : > { %v1265_v21 = vpack.c.bf16 %v971_v16, %v971_v16  ;;  %v972_v22 = vmax.f32 %v948_v18, 0.0  ;;  %v883_v47 = vadd.f32 %v1724_v37, %v1353_v20  ;;  %v1356_v23 = vadd.f32 %v1355_v4, %v1354_v40 }
 0x157   : > { %1091 = vst [vmem:[%s1678_s28 + $0x50] sm:$0xf] %v1265_v21  ;;  %v1266_v26 = vpack.c.bf16 %v972_v22, %v972_v22  ;;  %v918_v27 = vmul.f32 %v1663_v3, %v883_v47  ;;  %v886_v28 = vadd.f32 %v1729_v45, %v1356_v23 }
 0x159   : > { %1092 = vst [vmem:[%s1678_s28 + $0x54] sm:$0x3] %v1266_v26  ;;  %v949_v29 = vadd.f32 %v1668_v7, %v918_v27  ;;  %v919_v30 = vmul.f32 %v1663_v3, %v886_v28 }
 0x15b   : > { %v973_v59 = vmax.f32 %v949_v29, 0.0  ;;  %v950_v31 = vadd.f32 %v1668_v7, %v919_v30 }
 0x15d   : > { %v1267_v32 = vpack.c.bf16 %v973_v59, %v973_v59  ;;  %v974_v33 = vmax.f32 %v950_v31, 0.0 }
 0x15f   : > { %1093 = vst [vmem:[%s1678_s28 + $0x58] sm:$0xf] %v1267_v32  ;;  %v1268_v34 = vpack.c.bf16 %v974_v33, %v974_v33 }
 0x161   : > { %1094 = vst [vmem:[%s1678_s28 + $0x5c] sm:$0x3] %v1268_v34 }
 0x162 PF: > { %s14_s15 = sadd.s32 1, %s1505_s15  }
 0x163   : > { %p11_p4 = scmp.ge.s32.totalorder %s14_s15, 4  }
 0x165   :  { %13 = sbr.rel (!%p11_p4) target bundleno = 1 (0x1), region = 66 }

// kernel: vggf2_face_forward.8
= control target key start
LH: loop header
LB: loop body
LE: loop exit
PB: predicated region body
PF: predicated region fallthrough
CT: control target
= control target key end

     0   :  { %s2129_s15 = smov 0   ;;  %s2492_s0 = inlined_call_operand.vmem [shape: bf16[2,12,16,640], index: 0, kind: input, shape index: {}]   ;;  %s2493_s1 = inlined_call_operand.vmem [shape: bf16[640,128], index: 1, kind: input, shape index: {}]   ;;  %s2494_s2 = inlined_call_operand.vmem [shape: f32[1,128], index: 2, kind: input, shape index: {}]   ;;  %s2495_s3 = inlined_call_operand.vmem [shape: f32[1,128], index: 3, kind: input, shape index: {}]   ;;  %s2496_s4 = inlined_call_operand.vmem [shape: bf16[2,12,12,128], index: 4, kind: output, shape index: {}]  }
   0x1 LB: > { %s1551_s16 = sadd.s32 4294967295, %s2102_s15   ;;  %p1555_p0 = scmp.ge.s32.totalorder %s2102_s15, 1  ;;  %s2102_s15 = sphi %s2129_s15, %s14_s15  }
   0x2   : > { %p162_p1 = scmp.lt.s32.totalorder %s2102_s15, 3 }
   0x4   : > { %p163_p2 = pnand %p1555_p0, %p162_p1 }
   0x5   : > { %v1972_v0 = vld [vmem:[%s2493_s1 + $0x40] sm:$0xff] (!%p163_p2)   ;;  %v1976_v4 = vld [vmem:[%s2493_s1 + $0x48] sm:$0xff] (!%p163_p2)   ;;  %v1980_v8 = vld [vmem:[%s2493_s1 + $0x50] sm:$0xff] (!%p163_p2)   ;;  %p188_p3 = scmp.lt.s32.totalorder (!%p163_p2), %s1551_s16, 1 }
   0x6   : > { %166 = sbr.rel (%p163_p2) target bundleno = 384 (0x180), region = 36  ;;  %v1973_v1 = vld [vmem:[%s2493_s1 + $0xc0] sm:$0xff] (!%p163_p2)   ;;  %1710 = vmatprep.subr.bf16.mxu0 (!%p163_p2), %v1972_v0  ;;  %v1977_v5 = vld [vmem:[%s2493_s1 + $0xc8] sm:$0xff] (!%p163_p2)   ;;  %v1981_v9 = vld [vmem:[%s2493_s1 + $0xd0] sm:$0xff] (!%p163_p2)  }
   0x7   : > { %v1974_v2 = vld [vmem:[%s2493_s1] sm:$0xff] (!%p163_p2)   ;;  %1798 = vmatprep.subr.bf16.mxu1 (!%p163_p2), %v1973_v1  ;;  %v1978_v6 = vld [vmem:[%s2493_s1 + $0x8] sm:$0xff] (!%p163_p2)   ;;  %v1982_v10 = vld [vmem:[%s2493_s1 + $0x10] sm:$0xff] (!%p163_p2)  }
   0x8   : > { %v1975_v3 = vld [vmem:[%s2493_s1 + $0x80] sm:$0xff] (!%p163_p2)   ;;  %1711 = vmatpush3.bf16.msra.mxu0 (!%p163_p2), %v1974_v2  ;;  %v1979_v7 = vld [vmem:[%s2493_s1 + $0x88] sm:$0xff] (!%p163_p2)   ;;  %v1983_v11 = vld [vmem:[%s2493_s1 + $0x90] sm:$0xff] (!%p163_p2)  }
   0x9   : > { %1799 = vmatpush3.bf16.msra.mxu1 (!%p163_p2), %v1975_v3  ;;  %1712 = vmatprep.subr.bf16.mxu0 (!%p163_p2), %v1976_v4  ;;  %v1984_v12 = vld [vmem:[%s2493_s1 + $0x58] sm:$0xff] (!%p163_p2)   ;;  %v1988_v16 = vld [vmem:[%s2493_s1 + $0x60] sm:$0xff] (!%p163_p2)   ;;  %v1992_v20 = vld [vmem:[%s2493_s1 + $0x68] sm:$0xff] (!%p163_p2)  }
   0xa   : > { %1800 = vmatprep.subr.bf16.mxu1 (!%p163_p2), %v1977_v5  ;;  %v1985_v13 = vld [vmem:[%s2493_s1 + $0xd8] sm:$0xff] (!%p163_p2)   ;;  %v1989_v17 = vld [vmem:[%s2493_s1 + $0xe0] sm:$0xff] (!%p163_p2)   ;;  %v1993_v21 = vld [vmem:[%s2493_s1 + $0xe8] sm:$0xff] (!%p163_p2)  }
   0xb   : > { %v1986_v14 = vld [vmem:[%s2493_s1 + $0x18] sm:$0xff] (!%p163_p2)   ;;  %v1990_v18 = vld [vmem:[%s2493_s1 + $0x20] sm:$0xff] (!%p163_p2)   ;;  %v1994_v22 = vld [vmem:[%s2493_s1 + $0x28] sm:$0xff] (!%p163_p2)  }
   0xc   : > { %1713 = vmatpush3.bf16.msra.mxu0 (!%p163_p2), %v1978_v6  ;;  %v1987_v15 = vld [vmem:[%s2493_s1 + $0x98] sm:$0xff] (!%p163_p2)   ;;  %v1991_v19 = vld [vmem:[%s2493_s1 + $0xa0] sm:$0xff] (!%p163_p2)   ;;  %v1995_v23 = vld [vmem:[%s2493_s1 + $0xa8] sm:$0xff] (!%p163_p2)  }
   0xd   : > { %1801 = vmatpush3.bf16.msra.mxu1 %v1979_v7  ;;  %1714 = vmatprep.subr.bf16.mxu0 %v1980_v8  ;;  %s2498_s16 = smov (!%p188_p3, %s1551_s16), 1  ;;  %v1996_v24 = vld [vmem:[%s2493_s1 + $0x70] sm:$0xff]   ;;  %v2000_v28 = vld [vmem:[%s2493_s1 + $0x78] sm:$0xff]   ;;  %v2010_v36 = vld [vmem:[%s2493_s1 + $0x100] sm:$0xff]  }
   0xe   : > { %1802 = vmatprep.subr.bf16.mxu1 %v1981_v9  ;;  %v1997_v25 = vld [vmem:[%s2493_s1 + $0xf0] sm:$0xff]   ;;  %s1962_s21 = smul.u32 480, %s2498_s16  ;;  %v2001_v29 = vld [vmem:[%s2493_s1 + $0xf8] sm:$0xff]   ;;  %v2017_v39 = vld [vmem:[%s2493_s1 + $0x108] sm:$0xff]  }
   0xf   : > { %v1998_v26 = vld [vmem:[%s2493_s1 + $0x30] sm:$0xff]   ;;  %v2002_v30 = vld [vmem:[%s2493_s1 + $0x38] sm:$0xff]   ;;  %v2050_v50 = vld [vmem:[%s2493_s1 + $0x120] sm:$0xff]   ;;  %s1963_s7 = smul.u32 96, %s2498_s16 }
  0x10   : > { %1715 = vmatpush3.bf16.msra.mxu0 %v1982_v10  ;;  %v1999_v27 = vld [vmem:[%s2493_s1 + $0xb0] sm:$0xff]   ;;  %s2237_s6 = scalar_lea.vmem %s2492_s0, %s1962_s21  ;;  %v2003_v31 = vld [vmem:[%s2493_s1 + $0xb8] sm:$0xff]   ;;  %v2057_v55 = vld [vmem:[%s2493_s1 + $0x128] sm:$0xff]  }
  0x11   : > { %1803 = vmatpush3.bf16.msra.mxu1 %v1983_v11  ;;  %1716 = vmatprep.subr.bf16.mxu0 %v1984_v12  ;;  %v2004_v32 = vld [vmem:[%s2237_s6] ss:$20 sps:$4 sm:$0xff]   ;;  %v2006_v33 = vld [vmem:[%s2237_s6 + $0x4] ss:$20 sps:$4 sm:$0xff]   ;;  %v2007_v34 = vld [vmem:[%s2237_s6 + $0x8] ss:$20 sps:$4 sm:$0xff]   ;;  %s2412_s9 = scalar_lea.vmem %s2496_s4, %s1963_s7 }
  0x12   : > { %1804 = vmatprep.subr.bf16.mxu1 %v1985_v13  ;;  %v2009_v35 = vld [vmem:[%s2237_s6 + $0xc] ss:$20 sps:$4 sm:$0xff]   ;;  %935 = vmatprep.mubr.bf16.mxu0 %v2006_v33  ;;  %v2013_v38 = vld [vmem:[%s2237_s6 + $0x34] ss:$20 sps:$4 sm:$0xff]   ;;  %v2016_v41 = vld [vmem:[%s2237_s6 + $0x30] ss:$20 sps:$4 sm:$0xff]  }
  0x13   : > { %1064 = vmatprep.mubr.bf16.mxu1 %v2009_v35  ;;  %v2011_v37 = vld [vmem:[%s2237_s6 + $0x2c] ss:$20 sps:$4 sm:$0xff]   ;;  %v2015_v40 = vld [vmem:[%s2237_s6 + $0x28] ss:$20 sps:$4 sm:$0xff]   ;;  %v2030_v44 = vld [vmem:[%s2493_s1 + $0x110] sm:$0xff]  }
  0x14   : > { %1717 = vmatpush3.bf16.msra.mxu0 %v1986_v14  ;;  %v2018_v42 = vld [vmem:[%s2237_s6 + $0x54] ss:$20 sps:$4 sm:$0xff]   ;;  %v2020_v43 = vld [vmem:[%s2237_s6 + $0x5c] ss:$20 sps:$4 sm:$0xff]   ;;  %v2023_v46 = vld [vmem:[%s2237_s6 + $0x58] ss:$20 sps:$4 sm:$0xff]  }
  0x15   : > { %1805 = vmatpush3.bf16.msra.mxu1 %v1987_v15  ;;  %1718 = vmatprep.subr.bf16.mxu0 %v1988_v16  ;;  %v2022_v45 = vld [vmem:[%s2237_s6 + $0x50] ss:$20 sps:$4 sm:$0xff]   ;;  %v2037_v48 = vld [vmem:[%s2493_s1 + $0x118] sm:$0xff]   ;;  %v2029_v52 = vld [vmem:[%s2237_s6 + $0x80] ss:$20 sps:$4 sm:$0xff]  }
  0x16   : > { %1806 = vmatprep.subr.bf16.mxu1 %v1989_v17  ;;  %v2024_v47 = vld [vmem:[%s2237_s6 + $0x7c] ss:$20 sps:$4 sm:$0xff]   ;;  %v2026_v49 = vld [vmem:[%s2237_s6 + $0x84] ss:$20 sps:$4 sm:$0xff]   ;;  %v2033_v54 = vld [vmem:[%s2237_s6 + $0xac] ss:$20 sps:$4 sm:$0xff]  }
  0x17   : > { %v2028_v51 = vld [vmem:[%s2237_s6 + $0x78] ss:$20 sps:$4 sm:$0xff]   ;;  %v2035_v56 = vld [vmem:[%s2237_s6 + $0xa0] ss:$20 sps:$4 sm:$0xff]   ;;  %v2036_v57 = vld [vmem:[%s2237_s6 + $0xa8] ss:$20 sps:$4 sm:$0xff]  }
  0x18   : > { %1719 = vmatpush3.bf16.msra.mxu0 %v1990_v18  ;;  %v2031_v53 = vld [vmem:[%s2237_s6 + $0xa4] ss:$20 sps:$4 sm:$0xff]   ;;  %v2038_v58 = vld [vmem:[%s2237_s6 + $0xcc] ss:$20 sps:$4 sm:$0xff]   ;;  %v2070_v59 = vld [vmem:[%s2493_s1 + $0x130] sm:$0xff]  }
  0x19   : > { %1807 = vmatpush3.bf16.msra.mxu1 %v1991_v19  ;;  %1720 = vmatprep.subr.bf16.mxu0 %v1992_v20  ;;  %v2040_v60 = vld [vmem:[%s2237_s6 + $0xd4] ss:$20 sps:$4 sm:$0xff]   ;;  %v2077_v61 = vld [vmem:[%s2493_s1 + $0x138] sm:$0xff]   ;;  %v2043_v63 = vld [vmem:[%s2237_s6 + $0xd0] ss:$20 sps:$4 sm:$0xff]  }
  0x1a   : > { %1808 = vmatprep.subr.bf16.mxu1 %v1993_v21  ;;  %v2042_v62 = vld [vmem:[%s2237_s6 + $0xc8] ss:$20 sps:$4 sm:$0xff]   ;;  %v2048_v2 = vld [vmem:[%s2237_s6 + $0xf0] ss:$20 sps:$4 sm:$0xff]   ;;  %v2049_v3 = vld [vmem:[%s2237_s6 + $0xf8] ss:$20 sps:$4 sm:$0xff]  }
  0x1b   : > { %v2044_v0 = vld [vmem:[%s2237_s6 + $0xf4] ss:$20 sps:$4 sm:$0xff]   ;;  %v2046_v1 = vld [vmem:[%s2237_s6 + $0xfc] ss:$20 sps:$4 sm:$0xff]   ;;  %v2053_v5 = vld [vmem:[%s2237_s6 + $0x124] ss:$20 sps:$4 sm:$0xff]  }
  0x1c   : > { %1721 = vmatpush3.bf16.msra.mxu0 %v1994_v22  ;;  %v2051_v4 = vld [vmem:[%s2237_s6 + $0x11c] ss:$20 sps:$4 sm:$0xff]   ;;  %v2055_v6 = vld [vmem:[%s2237_s6 + $0x118] ss:$20 sps:$4 sm:$0xff]   ;;  %v2056_v7 = vld [vmem:[%s2237_s6 + $0x120] ss:$20 sps:$4 sm:$0xff]  }
  0x1d   : > { %1809 = vmatpush3.bf16.msra.mxu1 %v1995_v23  ;;  %1722 = vmatprep.subr.bf16.mxu0 %v1996_v24  ;;  %v2058_v8 = vld [vmem:[%s2237_s6 + $0x144] ss:$20 sps:$4 sm:$0xff]   ;;  %v2060_v9 = vld [vmem:[%s2237_s6 + $0x14c] ss:$20 sps:$4 sm:$0xff]   ;;  %v2063_v11 = vld [vmem:[%s2237_s6 + $0x148] ss:$20 sps:$4 sm:$0xff]  }
  0x1e   : > { %1810 = vmatprep.subr.bf16.mxu1 %v1997_v25  ;;  %v2062_v10 = vld [vmem:[%s2237_s6 + $0x140] ss:$20 sps:$4 sm:$0xff]   ;;  %v2068_v14 = vld [vmem:[%s2237_s6 + $0x168] ss:$20 sps:$4 sm:$0xff]   ;;  %v2069_v15 = vld [vmem:[%s2237_s6 + $0x170] ss:$20 sps:$4 sm:$0xff]  }
  0x1f   : > { %v2064_v12 = vld [vmem:[%s2237_s6 + $0x16c] ss:$20 sps:$4 sm:$0xff]   ;;  %v2066_v13 = vld [vmem:[%s2237_s6 + $0x174] ss:$20 sps:$4 sm:$0xff]   ;;  %v2073_v17 = vld [vmem:[%s2237_s6 + $0x19c] ss:$20 sps:$4 sm:$0xff]  }
  0x20   : > { %1723 = vmatpush3.bf16.msra.mxu0 %v1998_v26  ;;  %v2071_v16 = vld [vmem:[%s2237_s6 + $0x194] ss:$20 sps:$4 sm:$0xff]   ;;  %v2075_v18 = vld [vmem:[%s2237_s6 + $0x190] ss:$20 sps:$4 sm:$0xff]   ;;  %v2076_v19 = vld [vmem:[%s2237_s6 + $0x198] ss:$20 sps:$4 sm:$0xff]  }
  0x21   : > { %1811 = vmatpush3.bf16.msra.mxu1 %v1999_v27  ;;  %1724 = vmatprep.subr.bf16.mxu0 %v2000_v28  ;;  %v2078_v20 = vld [vmem:[%s2237_s6 + $0x1bc] ss:$20 sps:$4 sm:$0xff]   ;;  %v2080_v21 = vld [vmem:[%s2237_s6 + $0x1c4] ss:$20 sps:$4 sm:$0xff]   ;;  %v2083_v23 = vld [vmem:[%s2237_s6 + $0x1c0] ss:$20 sps:$4 sm:$0xff]  }
  0x22   : > { %1812 = vmatprep.subr.bf16.mxu1 %v2001_v29  ;;  %v2082_v22 = vld [vmem:[%s2237_s6 + $0x1b8] ss:$20 sps:$4 sm:$0xff]   ;;  %v2084_v24 = vld [vmem:[%s2237_s6 + $0x10] ss:$20 sps:$4 sm:$0xff]   ;;  %v2085_v25 = vld [vmem:[%s2237_s6 + $0x100] ss:$20 sps:$4 sm:$0xff]  }
  0x23   : > { %v2086_v26 = vld [vmem:[%s2237_s6 + $0x38] ss:$20 sps:$4 sm:$0xff]   ;;  %v2087_v27 = vld [vmem:[%s2237_s6 + $0x128] ss:$20 sps:$4 sm:$0xff]   ;;  %v2088_v28 = vld [vmem:[%s2237_s6 + $0x60] ss:$20 sps:$4 sm:$0xff]  }
  0x24   : > { %1725 = vmatpush3.bf16.msra.mxu0 %v2002_v30  ;;  %v2089_v29 = vld [vmem:[%s2237_s6 + $0x150] ss:$20 sps:$4 sm:$0xff]   ;;  %v2090_v30 = vld [vmem:[%s2237_s6 + $0x88] ss:$20 sps:$4 sm:$0xff]   ;;  %v2093_v33 = vld [vmem:[%s2237_s6 + $0x1a0] ss:$20 sps:$4 sm:$0xff]  }
  0x25   : > { %1813 = vmatpush3.bf16.msra.mxu1 %v2003_v31  ;;  %1906 = vmatprep.subr.bf16.mxu0 %v2010_v36  ;;  %v2091_v31 = vld [vmem:[%s2237_s6 + $0x178] ss:$20 sps:$4 sm:$0xff]   ;;  %v2095_v35 = vld [vmem:[%s2237_s6 + $0x1c8] ss:$20 sps:$4 sm:$0xff]  }
  0x26   : > { %1946 = vmatprep.subr.bf16.mxu1 %v2010_v36 }
  0x27   : > { %936 = vmatmul.mubr.bf16.vlgmr.msra.gmra.mrb[0].mxu0 %v2004_v32  ;;  %v2092_v32 = vld [vmem:[%s2237_s6 + $0xb0] ss:$20 sps:$4 sm:$0xff]  }
  0x28   : > { %1065 = vmatmul.mubr.bf16.vlgmr.msra.gmra.mrb[0].mxu1 %v2007_v34  ;;  %1907 = vmatpush3.bf16.msra.mxu0 %v2010_v36  ;;  %v2094_v34 = vld [vmem:[%s2237_s6 + $0xd8] ss:$20 sps:$4 sm:$0xff]  }
  0x29   : > { %1954 = vmatpush3.bf16.msra.mxu1 %v2010_v36  ;;  %943 = vmatprep.mubr.bf16.mxu0 %v2011_v37 }
  0x2a   : > { %1072 = vmatprep.mubr.bf16.mxu1 %v2013_v38  ;;  %1908 = vmatprep.subr.bf16.mxu0 %v2017_v39 }
  0x2b   : > { %1947 = vmatprep.subr.bf16.mxu1 %v2017_v39 }
  0x2c   : > { %1909 = vmatpush3.bf16.msra.mxu0 %v2017_v39 }
  0x2d   : > { %1955 = vmatpush3.bf16.msra.mxu1 %v2017_v39  ;;  %1910 = vmatprep.subr.bf16.mxu0 %v2030_v44 }
  0x2e   : > { %1948 = vmatprep.subr.bf16.mxu1 %v2030_v44 }
  0x2f   : > { %944 = vmatmul.mubr.bf16.gmra.mrb[4].mxu0 %v2015_v40 }
  0x30   : > { %1073 = vmatmul.mubr.bf16.gmra.mrb[4].mxu1 %v2016_v41  ;;  %951 = vmatprep.mubr.bf16.mxu0 %v2018_v42 }
  0x31   : > { %1080 = vmatprep.mubr.bf16.mxu1 %v2020_v43  ;;  %1911 = vmatpush3.bf16.msra.mxu0 %v2030_v44 }
  0x32   : > { %1956 = vmatpush3.bf16.msra.mxu1 %v2030_v44  ;;  %1912 = vmatprep.subr.bf16.mxu0 %v2037_v48 }
  0x33   : > { %1949 = vmatprep.subr.bf16.mxu1 %v2037_v48 }
  0x35   : > { %1913 = vmatpush3.bf16.msra.mxu0 %v2037_v48 }
  0x36   : > { %1957 = vmatpush3.bf16.msra.mxu1 %v2037_v48  ;;  %1914 = vmatprep.subr.bf16.mxu0 %v2050_v50 }
  0x37   : > { %952 = vmatmul.mubr.bf16.gmra.mrb[8].mxu0 %v2022_v45  ;;  %1950 = vmatprep.subr.bf16.mxu1 %v2050_v50 }
  0x38   : > { %1081 = vmatmul.mubr.bf16.gmra.mrb[8].mxu1 %v2023_v46  ;;  %959 = vmatprep.mubr.bf16.mxu0 %v2024_v47 }
  0x39   : > { %1088 = vmatprep.mubr.bf16.mxu1 %v2026_v49  ;;  %1915 = vmatpush3.bf16.msra.mxu0 %v2050_v50 }
  0x3a   : > { %1958 = vmatpush3.bf16.msra.mxu1 %v2050_v50  ;;  %1916 = vmatprep.subr.bf16.mxu0 %v2057_v55 }
  0x3b   : > { %1951 = vmatprep.subr.bf16.mxu1 %v2057_v55 }
  0x3d   : > { %1917 = vmatpush3.bf16.msra.mxu0 %v2057_v55 }
  0x3e   : > { %1959 = vmatpush3.bf16.msra.mxu1 %v2057_v55  ;;  %1918 = vmatprep.subr.bf16.mxu0 %v2070_v59 }
  0x3f   : > { %960 = vmatmul.mubr.bf16.gmra.mrb[12].mxu0 %v2028_v51  ;;  %1952 = vmatprep.subr.bf16.mxu1 %v2070_v59 }
  0x40   : > { %1089 = vmatmul.mubr.bf16.gmra.mrb[12].mxu1 %v2029_v52  ;;  %967 = vmatprep.mubr.bf16.mxu0 %v2031_v53 }
  0x41   : > { %1096 = vmatprep.mubr.bf16.mxu1 %v2033_v54  ;;  %1919 = vmatpush3.bf16.msra.mxu0 %v2070_v59 }
  0x42   : > { %1960 = vmatpush3.bf16.msra.mxu1 %v2070_v59  ;;  %1920 = vmatprep.subr.bf16.mxu0 %v2077_v61 }
  0x43   : > { %1953 = vmatprep.subr.bf16.mxu1 %v2077_v61 }
  0x45   : > { %1921 = vmatpush3.bf16.msra.mxu0 %v2077_v61 }
  0x46   : > { %1961 = vmatpush3.bf16.msra.mxu1 %v2077_v61 }
  0x47   : > { %968 = vmatmul.mubr.bf16.gmra.mrb[16].mxu0 %v2035_v56 }
  0x48   : > { %1097 = vmatmul.mubr.bf16.gmra.mrb[16].mxu1 %v2036_v57  ;;  %975 = vmatprep.mubr.bf16.mxu0 %v2038_v58 }
  0x49   : > { %1104 = vmatprep.mubr.bf16.mxu1 %v2040_v60 }
  0x4f   : > { %976 = vmatmul.mubr.bf16.gmra.mrb[20].mxu0 %v2042_v62 }
  0x50   : > { %1105 = vmatmul.mubr.bf16.gmra.mrb[20].mxu1 %v2043_v63  ;;  %983 = vmatprep.mubr.bf16.mxu0 %v2044_v0 }
  0x51   : > { %1112 = vmatprep.mubr.bf16.mxu1 %v2046_v1 }
  0x57   : > { %984 = vmatmul.mubr.bf16.gmra.mrb[24].mxu0 %v2048_v2 }
  0x58   : > { %1113 = vmatmul.mubr.bf16.gmra.mrb[24].mxu1 %v2049_v3  ;;  %991 = vmatprep.mubr.bf16.mxu0 %v2051_v4 }
  0x59   : > { %1120 = vmatprep.mubr.bf16.mxu1 %v2053_v5 }
  0x5f   : > { %992 = vmatmul.mubr.bf16.gmra.mrb[28].mxu0 %v2055_v6 }
  0x60   : > { %1121 = vmatmul.mubr.bf16.gmra.mrb[28].mxu1 %v2056_v7  ;;  %999 = vmatprep.mubr.bf16.mxu0 %v2058_v8 }
  0x61   : > { %1128 = vmatprep.mubr.bf16.mxu1 %v2060_v9 }
  0x67   : > { %1000 = vmatmul.mubr.bf16.gmra.mrb[32].mxu0 %v2062_v10 }
  0x68   : > { %1129 = vmatmul.mubr.bf16.gmra.mrb[32].mxu1 %v2063_v11  ;;  %1007 = vmatprep.mubr.bf16.mxu0 %v2064_v12 }
  0x69   : > { %1136 = vmatprep.mubr.bf16.mxu1 %v2066_v13 }
  0x6f   : > { %1008 = vmatmul.mubr.bf16.gmra.mrb[36].mxu0 %v2068_v14 }
  0x70   : > { %1137 = vmatmul.mubr.bf16.gmra.mrb[36].mxu1 %v2069_v15  ;;  %1015 = vmatprep.mubr.bf16.mxu0 %v2071_v16 }
  0x71   : > { %1144 = vmatprep.mubr.bf16.mxu1 %v2073_v17 }
  0x77   : > { %1016 = vmatmul.mubr.bf16.gmra.mrb[40].mxu0 %v2075_v18 }
  0x78   : > { %1145 = vmatmul.mubr.bf16.gmra.mrb[40].mxu1 %v2076_v19  ;;  %1023 = vmatprep.mubr.bf16.mxu0 %v2078_v20 }
  0x79   : > { %1152 = vmatprep.mubr.bf16.mxu1 %v2080_v21 }
  0x7f   : > { %1024 = vmatmul.mubr.bf16.gmra.mrb[44].mxu0 %v2082_v22 }
  0x80   : > { %1153 = vmatmul.mubr.bf16.gmra.mrb[44].mxu1 %v2083_v23  ;;  %1922 = vmatprep.mubr.bf16.mxu0 %v2084_v24 }
  0x81   : > { %1934 = vmatprep.mubr.bf16.mxu1 %v2085_v25 }
  0x87   : > { %1923 = vmatmul.mubr.bf16.vlgmr.msra.gmra.mrb[48].mxu0 %v2086_v26 }
  0x88   : > { %1935 = vmatmul.mubr.bf16.vlgmr.msra.gmra.mrb[48].mxu1 %v2087_v27  ;;  %1926 = vmatprep.mubr.bf16.mxu0 %v2088_v28 }
  0x89   : > { %1938 = vmatprep.mubr.bf16.mxu1 %v2089_v29 }
  0x8f   : > { %1927 = vmatmul.mubr.bf16.gmra.mrb[52].mxu0 %v2090_v30 }
  0x90   : > { %1939 = vmatmul.mubr.bf16.gmra.mrb[52].mxu1 %v2091_v31  ;;  %1930 = vmatprep.mubr.bf16.mxu0 %v2092_v32 }
  0x91   : > { %1942 = vmatprep.mubr.bf16.mxu1 %v2093_v33 }
  0x97   : > { %1931 = vmatmul.mubr.bf16.gmra.mrb[56].mxu0 %v2094_v34 }
  0x98   : > { %1943 = vmatmul.mubr.bf16.gmra.mrb[56].mxu1 %v2095_v35 }
  0xfa   : > { %v1726_v36 = vpop.f32.mrb[0].mxu0 }
  0xfb   : > { %v1814_v37 = vpop.f32.mrb[0].mxu1  ;;  %v1727_v38 = vpop.f32.mrb[1].mxu0 }
  0xfc   : > { %v1728_v39 = vadd.f32 %v1727_v38, %v1726_v36  ;;  %v1815_v40 = vpop.f32.mrb[1].mxu1  ;;  %v1729_v41 = vpop.f32.mrb[2].mxu0 }
  0xfd   : > { %v1816_v42 = vadd.f32 %v1815_v40, %v1814_v37  ;;  %v1817_v43 = vpop.f32.mrb[2].mxu1  ;;  %v1730_v44 = vpop.f32.mrb[3].mxu0 }
  0xfe   : > { %v1731_v45 = vadd.f32 %v1730_v44, %v1729_v41  ;;  %v1818_v46 = vpop.f32.mrb[3].mxu1 }
  0xff   : > { %v1819_v47 = vadd.f32 %v1818_v46, %v1817_v43  ;;  %v2329_v48 = vadd.f32 %v1816_v42, %v1728_v39 }
 0x101   : > { %v2331_v49 = vadd.f32 %v1819_v47, %v1731_v45 }
 0x102   : > { %v1732_v50 = vpop.f32.mrb[4].mxu0 }
 0x103   : > { %v1820_v51 = vpop.f32.mrb[4].mxu1  ;;  %v1733_v52 = vpop.f32.mrb[5].mxu0 }
 0x104   : > { %v1734_v53 = vadd.f32 %v1733_v52, %v1732_v50  ;;  %v1821_v54 = vpop.f32.mrb[5].mxu1  ;;  %v1735_v55 = vpop.f32.mrb[6].mxu0 }
 0x105   : > { %v1822_v56 = vadd.f32 %v1821_v54, %v1820_v51  ;;  %v1823_v57 = vpop.f32.mrb[6].mxu1  ;;  %v1736_v58 = vpop.f32.mrb[7].mxu0 }
 0x106   : > { %v1737_v59 = vadd.f32 %v1736_v58, %v1735_v55  ;;  %v1824_v60 = vpop.f32.mrb[7].mxu1 }
 0x107   : > { %v1825_v61 = vadd.f32 %v1824_v60, %v1823_v57  ;;  %v2333_v62 = vadd.f32 %v1822_v56, %v1734_v53 }
 0x109   : > { %v2335_v63 = vadd.f32 %v1825_v61, %v1737_v59 }
 0x10a   : > { %v1738_v0 = vpop.f32.mrb[8].mxu0 }
 0x10b   : > { %v1826_v1 = vpop.f32.mrb[8].mxu1  ;;  %v1739_v2 = vpop.f32.mrb[9].mxu0 }
 0x10c   : > { %v1740_v3 = vadd.f32 %v1739_v2, %v1738_v0  ;;  %v1827_v4 = vpop.f32.mrb[9].mxu1  ;;  %v1741_v5 = vpop.f32.mrb[10].mxu0 }
 0x10d   : > { %v1828_v6 = vadd.f32 %v1827_v4, %v1826_v1  ;;  %v1829_v7 = vpop.f32.mrb[10].mxu1  ;;  %v1742_v8 = vpop.f32.mrb[11].mxu0 }
 0x10e   : > { %v1743_v9 = vadd.f32 %v1742_v8, %v1741_v5  ;;  %v1830_v10 = vpop.f32.mrb[11].mxu1 }
 0x10f   : > { %v1831_v11 = vadd.f32 %v1830_v10, %v1829_v7  ;;  %v2337_v12 = vadd.f32 %v1828_v6, %v1740_v3 }
 0x111   : > { %v2339_v13 = vadd.f32 %v1831_v11, %v1743_v9 }
 0x112   : > { %v1744_v14 = vpop.f32.mrb[12].mxu0 }
 0x113   : > { %v1832_v15 = vpop.f32.mrb[12].mxu1  ;;  %v1745_v16 = vpop.f32.mrb[13].mxu0 }
 0x114   : > { %v1746_v17 = vadd.f32 %v1745_v16, %v1744_v14  ;;  %v1833_v18 = vpop.f32.mrb[13].mxu1  ;;  %v1747_v19 = vpop.f32.mrb[14].mxu0 }
 0x115   : > { %v1834_v20 = vadd.f32 %v1833_v18, %v1832_v15  ;;  %v1835_v21 = vpop.f32.mrb[14].mxu1  ;;  %v1748_v22 = vpop.f32.mrb[15].mxu0 }
 0x116   : > { %v1749_v23 = vadd.f32 %v1748_v22, %v1747_v19  ;;  %v1836_v24 = vpop.f32.mrb[15].mxu1 }
 0x117   : > { %v1837_v25 = vadd.f32 %v1836_v24, %v1835_v21  ;;  %v2341_v26 = vadd.f32 %v1834_v20, %v1746_v17 }
 0x119   : > { %v2343_v27 = vadd.f32 %v1837_v25, %v1749_v23 }
 0x11a   : > { %v1750_v28 = vpop.f32.mrb[16].mxu0 }
 0x11b   : > { %v1838_v29 = vpop.f32.mrb[16].mxu1  ;;  %v1751_v30 = vpop.f32.mrb[17].mxu0 }
 0x11c   : > { %v1752_v31 = vadd.f32 %v1751_v30, %v1750_v28  ;;  %v1839_v32 = vpop.f32.mrb[17].mxu1  ;;  %v1753_v33 = vpop.f32.mrb[18].mxu0 }
 0x11d   : > { %v1840_v34 = vadd.f32 %v1839_v32, %v1838_v29  ;;  %v1841_v35 = vpop.f32.mrb[18].mxu1  ;;  %v1754_v36 = vpop.f32.mrb[19].mxu0 }
 0x11e   : > { %v1755_v37 = vadd.f32 %v1754_v36, %v1753_v33  ;;  %v1842_v38 = vpop.f32.mrb[19].mxu1 }
 0x11f   : > { %v1843_v39 = vadd.f32 %v1842_v38, %v1841_v35  ;;  %v2345_v40 = vadd.f32 %v1840_v34, %v1752_v31 }
 0x121   : > { %v2347_v41 = vadd.f32 %v1843_v39, %v1755_v37 }
 0x122   : > { %v1756_v42 = vpop.f32.mrb[20].mxu0 }
 0x123   : > { %v1844_v43 = vpop.f32.mrb[20].mxu1  ;;  %v1757_v44 = vpop.f32.mrb[21].mxu0 }
 0x124   : > { %v1758_v45 = vadd.f32 %v1757_v44, %v1756_v42  ;;  %v1845_v46 = vpop.f32.mrb[21].mxu1  ;;  %v1759_v47 = vpop.f32.mrb[22].mxu0 }
 0x125   : > { %v1846_v50 = vadd.f32 %v1845_v46, %v1844_v43  ;;  %v1847_v51 = vpop.f32.mrb[22].mxu1  ;;  %v1760_v52 = vpop.f32.mrb[23].mxu0 }
 0x126   : > { %v1761_v53 = vadd.f32 %v1760_v52, %v1759_v47  ;;  %v1848_v54 = vpop.f32.mrb[23].mxu1 }
 0x127   : > { %v1849_v55 = vadd.f32 %v1848_v54, %v1847_v51  ;;  %v2349_v56 = vadd.f32 %v1846_v50, %v1758_v45 }
 0x129   : > { %v2351_v57 = vadd.f32 %v1849_v55, %v1761_v53 }
 0x12a   : > { %v1762_v58 = vpop.f32.mrb[24].mxu0 }
 0x12b   : > { %v1850_v59 = vpop.f32.mrb[24].mxu1  ;;  %v1763_v60 = vpop.f32.mrb[25].mxu0 }
 0x12c   : > { %v1764_v61 = vadd.f32 %v1763_v60, %v1762_v58  ;;  %v1851_v0 = vpop.f32.mrb[25].mxu1  ;;  %v1765_v1 = vpop.f32.mrb[26].mxu0 }
 0x12d   : > { %v1852_v2 = vadd.f32 %v1851_v0, %v1850_v59  ;;  %v1853_v3 = vpop.f32.mrb[26].mxu1  ;;  %v1766_v4 = vpop.f32.mrb[27].mxu0 }
 0x12e   : > { %v1767_v5 = vadd.f32 %v1766_v4, %v1765_v1  ;;  %v1854_v6 = vpop.f32.mrb[27].mxu1 }
 0x12f   : > { %v1855_v7 = vadd.f32 %v1854_v6, %v1853_v3  ;;  %v2353_v8 = vadd.f32 %v1852_v2, %v1764_v61 }
 0x131   : > { %v2355_v9 = vadd.f32 %v1855_v7, %v1767_v5 }
 0x132   : > { %v1768_v10 = vpop.f32.mrb[28].mxu0 }
 0x133   : > { %v1856_v11 = vpop.f32.mrb[28].mxu1  ;;  %v1769_v14 = vpop.f32.mrb[29].mxu0 }
 0x134   : > { %v1770_v15 = vadd.f32 %v1769_v14, %v1768_v10  ;;  %v1857_v16 = vpop.f32.mrb[29].mxu1  ;;  %v1771_v17 = vpop.f32.mrb[30].mxu0 }
 0x135   : > { %v1858_v18 = vadd.f32 %v1857_v16, %v1856_v11  ;;  %v1859_v19 = vpop.f32.mrb[30].mxu1  ;;  %v1772_v20 = vpop.f32.mrb[31].mxu0 }
 0x136   : > { %v1773_v21 = vadd.f32 %v1772_v20, %v1771_v17  ;;  %v1860_v22 = vpop.f32.mrb[31].mxu1 }
 0x137   : > { %v1861_v23 = vadd.f32 %v1860_v22, %v1859_v19  ;;  %v2357_v24 = vadd.f32 %v1858_v18, %v1770_v15 }
 0x139   : > { %v2359_v25 = vadd.f32 %v1861_v23, %v1773_v21 }
 0x13a   : > { %v1774_v28 = vpop.f32.mrb[32].mxu0 }
 0x13b   : > { %v1862_v29 = vpop.f32.mrb[32].mxu1  ;;  %v1775_v30 = vpop.f32.mrb[33].mxu0 }
 0x13c   : > { %v1776_v31 = vadd.f32 %v1775_v30, %v1774_v28  ;;  %v1863_v32 = vpop.f32.mrb[33].mxu1  ;;  %v1777_v33 = vpop.f32.mrb[34].mxu0 }
 0x13d   : > { %v1864_v34 = vadd.f32 %v1863_v32, %v1862_v29  ;;  %v1865_v35 = vpop.f32.mrb[34].mxu1  ;;  %v1778_v36 = vpop.f32.mrb[35].mxu0 }
 0x13e   : > { %v1779_v37 = vadd.f32 %v1778_v36, %v1777_v33  ;;  %v1866_v38 = vpop.f32.mrb[35].mxu1 }
 0x13f   : > { %v1867_v39 = vadd.f32 %v1866_v38, %v1865_v35  ;;  %v2361_v42 = vadd.f32 %v1864_v34, %v1776_v31 }
 0x141   : > { %v2363_v43 = vadd.f32 %v1867_v39, %v1779_v37  ;;  %v2380_v37 = vld [vmem:[%s2494_s2] ss:$0 sm:$0xff] }
 0x142   : > { %v1780_v44 = vpop.f32.mrb[36].mxu0 }
 0x143   : > { %v1868_v45 = vpop.f32.mrb[36].mxu1  ;;  %v1781_v46 = vpop.f32.mrb[37].mxu0 }
 0x144   : > { %v1782_v47 = vadd.f32 %v1781_v46, %v1780_v44  ;;  %v1869_v50 = vpop.f32.mrb[37].mxu1  ;;  %v1783_v51 = vpop.f32.mrb[38].mxu0 }
 0x145   : > { %v1870_v52 = vadd.f32 %v1869_v50, %v1868_v45  ;;  %v1871_v53 = vpop.f32.mrb[38].mxu1  ;;  %v1784_v54 = vpop.f32.mrb[39].mxu0  ;;  %v2386_v45 = vld [vmem:[%s2495_s3] ss:$0 sm:$0xff] }
 0x146   : > { %v1785_v55 = vadd.f32 %v1784_v54, %v1783_v51  ;;  %v1872_v58 = vpop.f32.mrb[39].mxu1 }
 0x147   : > { %v1873_v59 = vadd.f32 %v1872_v58, %v1871_v53  ;;  %v2365_v60 = vadd.f32 %v1870_v52, %v1782_v47 }
 0x149   : > { %v2367_v61 = vadd.f32 %v1873_v59, %v1785_v55 }
 0x14a   : > { %v1786_v0 = vpop.f32.mrb[40].mxu0 }
 0x14b   : > { %v1874_v1 = vpop.f32.mrb[40].mxu1  ;;  %v1787_v2 = vpop.f32.mrb[41].mxu0 }
 0x14c   : > { %v1788_v3 = vadd.f32 %v1787_v2, %v1786_v0  ;;  %v1875_v4 = vpop.f32.mrb[41].mxu1  ;;  %v1789_v5 = vpop.f32.mrb[42].mxu0 }
 0x14d   : > { %v1876_v6 = vadd.f32 %v1875_v4, %v1874_v1  ;;  %v1877_v7 = vpop.f32.mrb[42].mxu1  ;;  %v1790_v10 = vpop.f32.mrb[43].mxu0 }
 0x14e   : > { %v1791_v11 = vadd.f32 %v1790_v10, %v1789_v5  ;;  %v1878_v14 = vpop.f32.mrb[43].mxu1 }
 0x14f   : > { %v1879_v15 = vadd.f32 %v1878_v14, %v1877_v7  ;;  %v2369_v16 = vadd.f32 %v1876_v6, %v1788_v3 }
 0x151   : > { %v2371_v17 = vadd.f32 %v1879_v15, %v1791_v11 }
 0x152   : > { %v1792_v18 = vpop.f32.mrb[44].mxu0 }
 0x153   : > { %v1880_v19 = vpop.f32.mrb[44].mxu1  ;;  %v1793_v20 = vpop.f32.mrb[45].mxu0 }
 0x154   : > { %v1794_v21 = vadd.f32 %v1793_v20, %v1792_v18  ;;  %v1881_v22 = vpop.f32.mrb[45].mxu1  ;;  %v1795_v23 = vpop.f32.mrb[46].mxu0 }
 0x155   : > { %v1882_v28 = vadd.f32 %v1881_v22, %v1880_v19  ;;  %v1883_v29 = vpop.f32.mrb[46].mxu1  ;;  %v1796_v30 = vpop.f32.mrb[47].mxu0 }
 0x156   : > { %v1797_v31 = vadd.f32 %v1796_v30, %v1795_v23  ;;  %v1884_v32 = vpop.f32.mrb[47].mxu1 }
 0x157   : > { %v1885_v33 = vadd.f32 %v1884_v32, %v1883_v29  ;;  %v2373_v34 = vadd.f32 %v1882_v28, %v1794_v21 }
 0x159   : > { %v2375_v35 = vadd.f32 %v1885_v33, %v1797_v31 }
 0x15a   : > { %v1924_v36 = vpop.f32.mrb[48].mxu0 }
 0x15b   : > { %v1204_v38 = vadd.f32 %v1924_v36, %v2333_v62  ;;  %v1936_v39 = vpop.f32.mrb[48].mxu1  ;;  %v1195_v44 = vpop.f32.mrb[49].mxu0 }
 0x15c   : > { %v1252_v46 = vadd.f32 %v1936_v39, %v2357_v24  ;;  %v1196_v47 = vadd.f32 %v1195_v44, %v2329_v48  ;;  %v1243_v50 = vpop.f32.mrb[49].mxu1  ;;  %v1925_v51 = vpop.f32.mrb[50].mxu0 }
 0x15d   : > { %v1299_v52 = vmul.f32 %v2380_v37, %v1204_v38  ;;  %v1244_v53 = vadd.f32 %v1243_v50, %v2353_v8  ;;  %v1207_v54 = vadd.f32 %v1925_v51, %v2335_v63  ;;  %v1937_v62 = vpop.f32.mrb[50].mxu1  ;;  %v1198_v55 = vpop.f32.mrb[51].mxu0 }
 0x15e   : > { %v1311_v58 = vmul.f32 %v2380_v37, %v1252_v46  ;;  %v1297_v59 = vmul.f32 %v2380_v37, %v1196_v47  ;;  %v1255_v0 = vadd.f32 %v1937_v62, %v2359_v25  ;;  %v1199_v24 = vadd.f32 %v1198_v55, %v2331_v49  ;;  %v1246_v48 = vpop.f32.mrb[51].mxu1 }
 0x15f   : > { %v1330_v1 = vadd.f32 %v2386_v45, %v1299_v52  ;;  %v1309_v2 = vmul.f32 %v2380_v37, %v1244_v53  ;;  %v1300_v8 = vmul.f32 %v2380_v37, %v1207_v54  ;;  %v1247_v63 = vadd.f32 %v1246_v48, %v2355_v9 }
 0x160   : > { %v1342_v3 = vadd.f32 %v2386_v45, %v1311_v58  ;;  %v1328_v4 = vadd.f32 %v2386_v45, %v1297_v59  ;;  %v1312_v5 = vmul.f32 %v2380_v37, %v1255_v0  ;;  %v1298_v6 = vmul.f32 %v2380_v37, %v1199_v24 }
 0x161   : > { %v1354_v25 = vmax.f32 %v1330_v1, 0.0  ;;  %v1340_v49 = vadd.f32 %v2386_v45, %v1309_v2  ;;  %v1331_v7 = vadd.f32 %v2386_v45, %v1300_v8  ;;  %v1310_v10 = vmul.f32 %v2380_v37, %v1247_v63 }
 0x162   : > { %v1366_v9 = vmax.f32 %v1342_v3, 0.0  ;;  %v1352_v11 = vmax.f32 %v1328_v4, 0.0  ;;  %v1343_v14 = vadd.f32 %v2386_v45, %v1312_v5  ;;  %v1329_v15 = vadd.f32 %v2386_v45, %v1298_v6  ;;  %v1928_v18 = vpop.f32.mrb[52].mxu0 }
 0x163   : > { %v1688_v19 = vpack.c.bf16 %v1354_v25, %v1354_v25  ;;  %v1364_v20 = vmax.f32 %v1340_v49, 0.0  ;;  %v1355_v21 = vmax.f32 %v1331_v7, 0.0  ;;  %v1341_v22 = vadd.f32 %v2386_v45, %v1310_v10  ;;  %v1940_v23 = vpop.f32.mrb[52].mxu1  ;;  %v1211_v28 = vpop.f32.mrb[53].mxu0 }
 0x164   : > { %v1700_v29 = vpack.c.bf16 %v1366_v9, %v1366_v9  ;;  %v1686_v30 = vpack.c.bf16 %v1352_v11, %v1352_v11  ;;  %v1367_v31 = vmax.f32 %v1343_v14, 0.0  ;;  %v1353_v32 = vmax.f32 %v1329_v15, 0.0  ;;  %v1259_v33 = vpop.f32.mrb[53].mxu1  ;;  %v1929_v36 = vpop.f32.mrb[54].mxu0 }
 0x165   : > { %1474 = vst [vmem:[%s2412_s9 + $0x8] sm:$0xf] %v1688_v19  ;;  %v1698_v38 = vpack.c.bf16 %v1364_v20, %v1364_v20  ;;  %v1689_v39 = vpack.c.bf16 %v1355_v21, %v1355_v21  ;;  %v1365_v44 = vmax.f32 %v1341_v22, 0.0  ;;  %v1220_v46 = vadd.f32 %v1928_v18, %v2341_v26  ;;  %v1941_v47 = vpop.f32.mrb[54].mxu1  ;;  %v1214_v50 = vpop.f32.mrb[55].mxu0 }
 0x166   : > { %1486 = vst [vmem:[%s2412_s9 + $0x38] sm:$0xf] %v1700_v29  ;;  %1472 = vst [vmem:[%s2412_s9] sm:$0xf] %v1686_v30  ;;  %v1701_v51 = vpack.c.bf16 %v1367_v31, %v1367_v31  ;;  %v1687_v52 = vpack.c.bf16 %v1353_v32, %v1353_v32  ;;  %v1268_v53 = vadd.f32 %v1940_v23, %v2365_v60  ;;  %v1262_v62 = vpop.f32.mrb[55].mxu1 }
 0x167   : > { %v1212_v54 = vadd.f32 %v1211_v28, %v2337_v12  ;;  %1484 = vst [vmem:[%s2412_s9 + $0x30] sm:$0xf] %v1698_v38  ;;  %1475 = vst [vmem:[%s2412_s9 + $0xc] sm:$0x3] %v1689_v39  ;;  %v1699_v55 = vpack.c.bf16 %v1365_v44, %v1365_v44  ;;  %v1303_v58 = vmul.f32 %v2380_v37, %v1220_v46 }
 0x168   : > { %v1260_v26 = vadd.f32 %v1259_v33, %v2361_v42  ;;  %v1223_v59 = vadd.f32 %v1929_v36, %v2343_v27  ;;  %1487 = vst [vmem:[%s2412_s9 + $0x3c] sm:$0x3] %v1701_v51  ;;  %1473 = vst [vmem:[%s2412_s9 + $0x4] sm:$0x3] %v1687_v52  ;;  %v1315_v0 = vmul.f32 %v2380_v37, %v1268_v53 }
 0x169   : > { %v1301_v24 = vmul.f32 %v2380_v37, %v1212_v54  ;;  %v1271_v60 = vadd.f32 %v1941_v47, %v2367_v61  ;;  %v1215_v12 = vadd.f32 %v1214_v50, %v2339_v13  ;;  %1485 = vst [vmem:[%s2412_s9 + $0x34] sm:$0x3] %v1699_v55  ;;  %v1334_v48 = vadd.f32 %v2386_v45, %v1303_v58 }
 0x16a   : > { %v1313_v1 = vmul.f32 %v2380_v37, %v1260_v26  ;;  %v1304_v2 = vmul.f32 %v2380_v37, %v1223_v59  ;;  %v1263_v42 = vadd.f32 %v1262_v62, %v2363_v43  ;;  %v1346_v27 = vadd.f32 %v2386_v45, %v1315_v0  ;;  %v1932_v61 = vpop.f32.mrb[56].mxu0 }
 0x16b   : > { %v1332_v8 = vadd.f32 %v2386_v45, %v1301_v24  ;;  %v1316_v63 = vmul.f32 %v2380_v37, %v1271_v60  ;;  %v1302_v3 = vmul.f32 %v2380_v37, %v1215_v12  ;;  %v1358_v4 = vmax.f32 %v1334_v48, 0.0  ;;  %v1944_v25 = vpop.f32.mrb[56].mxu1  ;;  %v1227_v49 = vpop.f32.mrb[57].mxu0 }
 0x16c   : > { %v1344_v13 = vadd.f32 %v2386_v45, %v1313_v1  ;;  %v1335_v5 = vadd.f32 %v2386_v45, %v1304_v2  ;;  %v1314_v6 = vmul.f32 %v2380_v37, %v1263_v42  ;;  %v1370_v7 = vmax.f32 %v1346_v27, 0.0  ;;  %v1275_v11 = vpop.f32.mrb[57].mxu1  ;;  %v1933_v14 = vpop.f32.mrb[58].mxu0 }
 0x16d   : > { %v1356_v43 = vmax.f32 %v1332_v8, 0.0  ;;  %v1347_v10 = vadd.f32 %v2386_v45, %v1316_v63  ;;  %v1333_v9 = vadd.f32 %v2386_v45, %v1302_v3  ;;  %v1692_v15 = vpack.c.bf16 %v1358_v4, %v1358_v4  ;;  %v1945_v21 = vpop.f32.mrb[58].mxu1  ;;  %v1230_v22 = vpop.f32.mrb[59].mxu0 }
 0x16e   : > { %v1368_v18 = vmax.f32 %v1344_v13, 0.0  ;;  %v1359_v19 = vmax.f32 %v1335_v5, 0.0  ;;  %v1345_v20 = vadd.f32 %v2386_v45, %v1314_v6  ;;  %v1704_v23 = vpack.c.bf16 %v1370_v7, %v1370_v7  ;;  %v1278_v31 = vpop.f32.mrb[59].mxu1 }
 0x16f   : > { %v1690_v28 = vpack.c.bf16 %v1356_v43, %v1356_v43  ;;  %v1371_v29 = vmax.f32 %v1347_v10, 0.0  ;;  %v1357_v30 = vmax.f32 %v1333_v9, 0.0  ;;  %1478 = vst [vmem:[%s2412_s9 + $0x18] sm:$0xf] %v1692_v15  ;;  %v1236_v38 = vadd.f32 %v1932_v61, %v2349_v56 }
 0x170   : > { %v1702_v32 = vpack.c.bf16 %v1368_v18, %v1368_v18  ;;  %v1693_v33 = vpack.c.bf16 %v1359_v19, %v1359_v19  ;;  %v1369_v36 = vmax.f32 %v1345_v20, 0.0  ;;  %1490 = vst [vmem:[%s2412_s9 + $0x48] sm:$0xf] %v1704_v23  ;;  %v1284_v46 = vadd.f32 %v1944_v25, %v2373_v34 }
 0x171   : > { %1476 = vst [vmem:[%s2412_s9 + $0x10] sm:$0xf] %v1690_v28  ;;  %v1705_v39 = vpack.c.bf16 %v1371_v29, %v1371_v29  ;;  %v1691_v44 = vpack.c.bf16 %v1357_v30, %v1357_v30  ;;  %v1228_v47 = vadd.f32 %v1227_v49, %v2345_v40  ;;  %v1307_v51 = vmul.f32 %v2380_v37, %v1236_v38 }
 0x172   : > { %1488 = vst [vmem:[%s2412_s9 + $0x40] sm:$0xf] %v1702_v32  ;;  %1479 = vst [vmem:[%s2412_s9 + $0x1c] sm:$0x3] %v1693_v33  ;;  %v1703_v50 = vpack.c.bf16 %v1369_v36, %v1369_v36  ;;  %v1276_v52 = vadd.f32 %v1275_v11, %v2369_v16  ;;  %v1239_v53 = vadd.f32 %v1933_v14, %v2351_v57 }
 0x173   : > { %1491 = vst [vmem:[%s2412_s9 + $0x4c] sm:$0x3] %v1705_v39  ;;  %1477 = vst [vmem:[%s2412_s9 + $0x14] sm:$0x3] %v1691_v44  ;;  %v1319_v56 = vmul.f32 %v2380_v37, %v1284_v46  ;;  %v1305_v54 = vmul.f32 %v2380_v37, %v1228_v47  ;;  %v1287_v62 = vadd.f32 %v1945_v21, %v2375_v35 }
 0x174   : > { %v1231_v34 = vadd.f32 %v1230_v22, %v2347_v41  ;;  %1489 = vst [vmem:[%s2412_s9 + $0x44] sm:$0x3] %v1703_v50  ;;  %v1338_v40 = vadd.f32 %v2386_v45, %v1307_v51  ;;  %v1317_v55 = vmul.f32 %v2380_v37, %v1276_v52  ;;  %v1308_v58 = vmul.f32 %v2380_v37, %v1239_v53 }
 0x175   : > { %v1279_v16 = vadd.f32 %v1278_v31, %v2371_v17  ;;  %v1350_v57 = vadd.f32 %v2386_v45, %v1319_v56  ;;  %v1336_v26 = vadd.f32 %v2386_v45, %v1305_v54  ;;  %v1320_v59 = vmul.f32 %v2380_v37, %v1287_v62 }
 0x176   : > { %v1306_v0 = vmul.f32 %v2380_v37, %v1231_v34  ;;  %v1362_v35 = vmax.f32 %v1338_v40, 0.0  ;;  %v1348_v41 = vadd.f32 %v2386_v45, %v1317_v55  ;;  %v1339_v24 = vadd.f32 %v2386_v45, %v1308_v58 }
 0x177   : > { %v1318_v60 = vmul.f32 %v2380_v37, %v1279_v16  ;;  %v1374_v12 = vmax.f32 %v1350_v57, 0.0  ;;  %v1360_v48 = vmax.f32 %v1336_v26, 0.0  ;;  %v1351_v17 = vadd.f32 %v2386_v45, %v1320_v59 }
 0x178   : > { %v1337_v1 = vadd.f32 %v2386_v45, %v1306_v0  ;;  %v1696_v2 = vpack.c.bf16 %v1362_v35, %v1362_v35  ;;  %v1372_v42 = vmax.f32 %v1348_v41, 0.0  ;;  %v1363_v27 = vmax.f32 %v1339_v24, 0.0 }
 0x179   : > { %v1349_v8 = vadd.f32 %v2386_v45, %v1318_v60  ;;  %v1708_v63 = vpack.c.bf16 %v1374_v12, %v1374_v12  ;;  %v1694_v3 = vpack.c.bf16 %v1360_v48, %v1360_v48  ;;  %v1375_v37 = vmax.f32 %v1351_v17, 0.0 }
 0x17a   : > { %v1361_v61 = vmax.f32 %v1337_v1, 0.0  ;;  %1482 = vst [vmem:[%s2412_s9 + $0x28] sm:$0xf] %v1696_v2  ;;  %v1706_v4 = vpack.c.bf16 %v1372_v42, %v1372_v42  ;;  %v1697_v13 = vpack.c.bf16 %v1363_v27, %v1363_v27 }
 0x17b   : > { %v1373_v5 = vmax.f32 %v1349_v8, 0.0  ;;  %1494 = vst [vmem:[%s2412_s9 + $0x58] sm:$0xf] %v1708_v63  ;;  %1480 = vst [vmem:[%s2412_s9 + $0x20] sm:$0xf] %v1694_v3  ;;  %v1709_v6 = vpack.c.bf16 %v1375_v37, %v1375_v37 }
 0x17c   : > { %v1695_v25 = vpack.c.bf16 %v1361_v61, %v1361_v61  ;;  %1492 = vst [vmem:[%s2412_s9 + $0x50] sm:$0xf] %v1706_v4  ;;  %1483 = vst [vmem:[%s2412_s9 + $0x2c] sm:$0x3] %v1697_v13 }
 0x17d   : > { %v1707_v49 = vpack.c.bf16 %v1373_v5, %v1373_v5  ;;  %1495 = vst [vmem:[%s2412_s9 + $0x5c] sm:$0x3] %v1709_v6 }
 0x17e   : > { %1481 = vst [vmem:[%s2412_s9 + $0x24] sm:$0x3] %v1695_v25 }
 0x17f   : > { %1493 = vst [vmem:[%s2412_s9 + $0x54] sm:$0x3] %v1707_v49 }
 0x180 PF: > { %s14_s15 = sadd.s32 1, %s2102_s15  }
 0x181   : > { %p11_p4 = scmp.ge.s32.totalorder %s14_s15, 4  }
 0x183   :  { %13 = sbr.rel (!%p11_p4) target bundleno = 1 (0x1), region = 66 }

// kernel: vggf2_face_forward.9
= control target key start
LH: loop header
LB: loop body
LE: loop exit
PB: predicated region body
PF: predicated region fallthrough
CT: control target
= control target key end

     0   :  { %s3286_s18 = smov 0   ;;  %s3288_s19 = smov 0   ;;  %s3961_s0 = inlined_call_operand.vmem [shape: bf16[2,12,16,640], index: 0, kind: input, shape index: {}]   ;;  %s3962_s1 = inlined_call_operand.vmem [shape: bf16[2,12,16,640], index: 1, kind: input, shape index: {}]   ;;  %s3963_s2 = inlined_call_operand.vmem [shape: bf16[640,128], index: 2, kind: input, shape index: {}]   ;;  %s3964_s3 = inlined_call_operand.vmem [shape: f32[1,128], index: 3, kind: input, shape index: {}]   ;;  %s3965_s4 = inlined_call_operand.vmem [shape: f32[1,128], index: 4, kind: input, shape index: {}]   ;;  %s3966_s5 = inlined_call_operand.vmem [shape: bf16[2,6,6,128], index: 5, kind: output, shape index: {}]  }
   0x1   :  { %s3290_s20 = smov 0  }
   0x2 LB: > { %s27_s21 = sadd.s32 1, %s3250_s19  ;;  %p2353_p0 = scmp.ge.s32.totalorder %s3254_s20, 1  ;;  %s3254_s20 = sphi %s3290_s20, %s15_s20   ;;  %s3250_s19 = sphi %s3288_s19, %s3968_s19   ;;  %s3246_s18 = sphi %s3286_s18, %s3967_s18  }
   0x3   : > { %p29_p1 = scmp.ge.s32.totalorder %s27_s21, 2  ;;  %p211_p2 = scmp.lt.s32.totalorder %s3254_s20, 3 }
   0x5   : > { %s3970_s21 = smov (%p29_p1, %s27_s21), 0  ;;  %p212_p3 = pnand %p2353_p0, %p211_p2 }
   0x6   : > { %v3309_v0 = vld [vmem:[%s3963_s2 + $0x40] sm:$0xff] (!%p212_p3)   ;;  %v3332_v4 = vld [vmem:[%s3963_s2 + $0x48] sm:$0xff] (!%p212_p3)   ;;  %v3356_v8 = vld [vmem:[%s3963_s2 + $0x50] sm:$0xff] (!%p212_p3)   ;;  %p248_p4 = scmp.lt.s32.totalorder (!%p212_p3), %s3246_s18, 1  ;;  %vm2187_vm0 = vcmask (!%p212_p3), 1044480  }
   0x7   : > { %215 = sbr.rel (%p212_p3) target bundleno = 506 (0x1fa), region = 40  ;;  %v3314_v1 = vld [vmem:[%s3963_s2 + $0xc0] sm:$0xff] (!%p212_p3)   ;;  %2526 = vmatprep.subr.bf16.mxu0 (!%p212_p3), %v3309_v0  ;;  %v3338_v5 = vld [vmem:[%s3963_s2 + $0xc8] sm:$0xff] (!%p212_p3)   ;;  %v3362_v9 = vld [vmem:[%s3963_s2 + $0xd0] sm:$0xff] (!%p212_p3)  }
   0x8   : > { %v3320_v2 = vld [vmem:[%s3963_s2] sm:$0xff] (!%p212_p3)   ;;  %2614 = vmatprep.subr.bf16.mxu1 (!%p212_p3), %v3314_v1  ;;  %v3344_v6 = vld [vmem:[%s3963_s2 + $0x8] sm:$0xff] (!%p212_p3)   ;;  %v3368_v10 = vld [vmem:[%s3963_s2 + $0x10] sm:$0xff] (!%p212_p3)  }
   0x9   : > { %v3326_v3 = vld [vmem:[%s3963_s2 + $0x80] sm:$0xff] (!%p212_p3)   ;;  %2527 = vmatpush3.bf16.msra.mxu0 (!%p212_p3), %v3320_v2  ;;  %v3350_v7 = vld [vmem:[%s3963_s2 + $0x88] sm:$0xff] (!%p212_p3)   ;;  %v3374_v11 = vld [vmem:[%s3963_s2 + $0x90] sm:$0xff] (!%p212_p3)  }
   0xa   : > { %2615 = vmatpush3.bf16.msra.mxu1 (!%p212_p3), %v3326_v3  ;;  %2528 = vmatprep.subr.bf16.mxu0 (!%p212_p3), %v3332_v4  ;;  %v3380_v12 = vld [vmem:[%s3963_s2 + $0x58] sm:$0xff] (!%p212_p3)   ;;  %v3404_v16 = vld [vmem:[%s3963_s2 + $0x60] sm:$0xff] (!%p212_p3)   ;;  %v3429_v20 = vld [vmem:[%s3963_s2 + $0x68] sm:$0xff] (!%p212_p3)  }
   0xb   : > { %2616 = vmatprep.subr.bf16.mxu1 (!%p212_p3), %v3338_v5  ;;  %v3386_v13 = vld [vmem:[%s3963_s2 + $0xd8] sm:$0xff] (!%p212_p3)   ;;  %v3410_v17 = vld [vmem:[%s3963_s2 + $0xe0] sm:$0xff] (!%p212_p3)   ;;  %v3435_v21 = vld [vmem:[%s3963_s2 + $0xe8] sm:$0xff] (!%p212_p3)  }
   0xc   : > { %v3392_v14 = vld [vmem:[%s3963_s2 + $0x18] sm:$0xff] (!%p212_p3)   ;;  %v3417_v18 = vld [vmem:[%s3963_s2 + $0x20] sm:$0xff] (!%p212_p3)   ;;  %v3444_v22 = vld [vmem:[%s3963_s2 + $0x28] sm:$0xff] (!%p212_p3)  }
   0xd   : > { %2529 = vmatpush3.bf16.msra.mxu0 (!%p212_p3), %v3344_v6  ;;  %v3398_v15 = vld [vmem:[%s3963_s2 + $0x98] sm:$0xff] (!%p212_p3)   ;;  %v3423_v19 = vld [vmem:[%s3963_s2 + $0xa0] sm:$0xff] (!%p212_p3)   ;;  %v3450_v23 = vld [vmem:[%s3963_s2 + $0xa8] sm:$0xff] (!%p212_p3)  }
   0xe   : > { %2617 = vmatpush3.bf16.msra.mxu1 %v3350_v7  ;;  %2530 = vmatprep.subr.bf16.mxu0 %v3356_v8  ;;  %s3972_s18 = smov (!%p248_p4, %s3246_s18), 1  ;;  %v3456_v24 = vld [vmem:[%s3963_s2 + $0x70] sm:$0xff]   ;;  %v3481_v28 = vld [vmem:[%s3963_s2 + $0x78] sm:$0xff]   ;;  %v3518_v36 = vld [vmem:[%s3963_s2 + $0x100] sm:$0xff]  }
   0xf   : > { %2618 = vmatprep.subr.bf16.mxu1 %v3362_v9  ;;  %v3462_v25 = vld [vmem:[%s3963_s2 + $0xf0] sm:$0xff]   ;;  %s2998_s7 = smul.u32 480, %s3972_s18  ;;  %v3487_v29 = vld [vmem:[%s3963_s2 + $0xf8] sm:$0xff]   ;;  %v3528_v39 = vld [vmem:[%s3963_s2 + $0x108] sm:$0xff]  }
  0x10   : > { %v3469_v26 = vld [vmem:[%s3963_s2 + $0x30] sm:$0xff]   ;;  %v3500_v30 = vld [vmem:[%s3963_s2 + $0x38] sm:$0xff]   ;;  %v3564_v50 = vld [vmem:[%s3963_s2 + $0x120] sm:$0xff]   ;;  %s2999_s29 = smul.u32 24, %s3972_s18 }
  0x11   : > { %2531 = vmatpush3.bf16.msra.mxu0 %v3368_v10  ;;  %v3475_v27 = vld [vmem:[%s3963_s2 + $0xb0] sm:$0xff]   ;;  %s3494_s22 = scalar_lea.vmem %s3961_s0, %s2998_s7  ;;  %v3506_v31 = vld [vmem:[%s3963_s2 + $0xb8] sm:$0xff]   ;;  %v3577_v55 = vld [vmem:[%s3963_s2 + $0x128] sm:$0xff]   ;;  %s3611_s26 = scalar_lea.vmem %s3962_s1, %s2998_s7 }
  0x12   : > { %2619 = vmatpush3.bf16.msra.mxu1 %v3374_v11  ;;  %2532 = vmatprep.subr.bf16.mxu0 %v3380_v12  ;;  %v3056_v32 = vld [vmem:[%s3494_s22] ss:$20 sps:$4 sm:$0xff]   ;;  %v3058_v33 = vld [vmem:[%s3494_s22 + $0x4] ss:$20 sps:$4 sm:$0xff]   ;;  %v3059_v34 = vld [vmem:[%s3494_s22 + $0x8] ss:$20 sps:$4 sm:$0xff]   ;;  %s3906_s6 = scalar_lea.vmem %s3966_s5, %s2999_s29 }
  0x13   : > { %2620 = vmatprep.subr.bf16.mxu1 %v3386_v13  ;;  %v3061_v35 = vld [vmem:[%s3494_s22 + $0xc] ss:$20 sps:$4 sm:$0xff]   ;;  %1085 = vmatprep.mubr.bf16.mxu0 %v3058_v33  ;;  %v3065_v38 = vld [vmem:[%s3494_s22 + $0x34] ss:$20 sps:$4 sm:$0xff]   ;;  %v3068_v41 = vld [vmem:[%s3494_s22 + $0x30] ss:$20 sps:$4 sm:$0xff]  }
  0x14   : > { %1202 = vmatprep.mubr.bf16.mxu1 %v3061_v35  ;;  %v3063_v37 = vld [vmem:[%s3494_s22 + $0x2c] ss:$20 sps:$4 sm:$0xff]   ;;  %v3067_v40 = vld [vmem:[%s3494_s22 + $0x28] ss:$20 sps:$4 sm:$0xff]   ;;  %v3542_v44 = vld [vmem:[%s3963_s2 + $0x110] sm:$0xff]  }
  0x15   : > { %2533 = vmatpush3.bf16.msra.mxu0 %v3392_v14  ;;  %v3070_v42 = vld [vmem:[%s3494_s22 + $0x54] ss:$20 sps:$4 sm:$0xff]   ;;  %v3072_v43 = vld [vmem:[%s3494_s22 + $0x5c] ss:$20 sps:$4 sm:$0xff]   ;;  %v3075_v46 = vld [vmem:[%s3494_s22 + $0x58] ss:$20 sps:$4 sm:$0xff]  }
  0x16   : > { %2621 = vmatpush3.bf16.msra.mxu1 %v3398_v15  ;;  %2534 = vmatprep.subr.bf16.mxu0 %v3404_v16  ;;  %v3074_v45 = vld [vmem:[%s3494_s22 + $0x50] ss:$20 sps:$4 sm:$0xff]   ;;  %v3554_v48 = vld [vmem:[%s3963_s2 + $0x118] sm:$0xff]   ;;  %v3081_v52 = vld [vmem:[%s3494_s22 + $0x80] ss:$20 sps:$4 sm:$0xff]  }
  0x17   : > { %2622 = vmatprep.subr.bf16.mxu1 %v3410_v17  ;;  %v3076_v47 = vld [vmem:[%s3494_s22 + $0x7c] ss:$20 sps:$4 sm:$0xff]   ;;  %v3078_v49 = vld [vmem:[%s3494_s22 + $0x84] ss:$20 sps:$4 sm:$0xff]   ;;  %v3085_v54 = vld [vmem:[%s3494_s22 + $0xac] ss:$20 sps:$4 sm:$0xff]  }
  0x18   : > { %v3080_v51 = vld [vmem:[%s3494_s22 + $0x78] ss:$20 sps:$4 sm:$0xff]   ;;  %v3087_v56 = vld [vmem:[%s3494_s22 + $0xa0] ss:$20 sps:$4 sm:$0xff]   ;;  %v3088_v57 = vld [vmem:[%s3494_s22 + $0xa8] ss:$20 sps:$4 sm:$0xff]  }
  0x19   : > { %2535 = vmatpush3.bf16.msra.mxu0 %v3417_v18  ;;  %v3083_v53 = vld [vmem:[%s3494_s22 + $0xa4] ss:$20 sps:$4 sm:$0xff]   ;;  %v3090_v58 = vld [vmem:[%s3494_s22 + $0xcc] ss:$20 sps:$4 sm:$0xff]   ;;  %v3591_v59 = vld [vmem:[%s3963_s2 + $0x130] sm:$0xff]  }
  0x1a   : > { %2623 = vmatpush3.bf16.msra.mxu1 %v3423_v19  ;;  %2536 = vmatprep.subr.bf16.mxu0 %v3429_v20  ;;  %v3092_v60 = vld [vmem:[%s3494_s22 + $0xd4] ss:$20 sps:$4 sm:$0xff]   ;;  %v3600_v61 = vld [vmem:[%s3963_s2 + $0x138] sm:$0xff]   ;;  %v3095_v63 = vld [vmem:[%s3494_s22 + $0xd0] ss:$20 sps:$4 sm:$0xff]  }
  0x1b   : > { %2624 = vmatprep.subr.bf16.mxu1 %v3435_v21  ;;  %v3094_v62 = vld [vmem:[%s3494_s22 + $0xc8] ss:$20 sps:$4 sm:$0xff]   ;;  %v3127_v33 = vld [vmem:[%s3494_s22 + $0x190] ss:$20 sps:$4 sm:$0xff]  }
  0x1c   : > { %v3130_v35 = vld [vmem:[%s3494_s22 + $0x1bc] ss:$20 sps:$4 sm:$0xff]  }
  0x1d   : > { %2537 = vmatpush3.bf16.msra.mxu0 %v3444_v22 }
  0x1e   : > { %2625 = vmatpush3.bf16.msra.mxu1 %v3450_v23  ;;  %2538 = vmatprep.subr.bf16.mxu0 %v3456_v24 }
  0x1f   : > { %2626 = vmatprep.subr.bf16.mxu1 %v3462_v25 }
  0x21   : > { %2539 = vmatpush3.bf16.msra.mxu0 %v3469_v26 }
  0x22   : > { %2627 = vmatpush3.bf16.msra.mxu1 %v3475_v27  ;;  %2540 = vmatprep.subr.bf16.mxu0 %v3481_v28 }
  0x23   : > { %2628 = vmatprep.subr.bf16.mxu1 %v3487_v29 }
  0x25   : > { %2541 = vmatpush3.bf16.msra.mxu0 %v3500_v30 }
  0x26   : > { %2629 = vmatpush3.bf16.msra.mxu1 %v3506_v31  ;;  %2918 = vmatprep.subr.bf16.mxu0 %v3518_v36 }
  0x27   : > { %2722 = vmatprep.subr.bf16.mxu1 %v3309_v0  ;;  %v3096_v0 = vld [vmem:[%s3494_s22 + $0xf4] ss:$20 sps:$4 sm:$0xff]  }
  0x28   : > { %1086 = vmatmul.mubr.bf16.vlgmr.msra.gmra.mrb[0].mxu0 %v3056_v32  ;;  %v3125_v32 = vld [vmem:[%s3494_s22 + $0x19c] ss:$20 sps:$4 sm:$0xff]  }
  0x29   : > { %1203 = vmatmul.mubr.bf16.vlgmr.msra.gmra.mrb[0].mxu1 %v3059_v34  ;;  %2919 = vmatpush3.bf16.msra.mxu0 %v3518_v36  ;;  %v3128_v34 = vld [vmem:[%s3494_s22 + $0x198] ss:$20 sps:$4 sm:$0xff]  }
  0x2a   : > { %2723 = vmatpush3.bf16.msra.mxu1 %v3320_v2  ;;  %1092 = vmatprep.mubr.bf16.mxu0 %v3063_v37  ;;  %v3098_v2 = vld [vmem:[%s3494_s22 + $0xfc] ss:$20 sps:$4 sm:$0xff]   ;;  %v3132_v37 = vld [vmem:[%s3494_s22 + $0x1c4] ss:$20 sps:$4 sm:$0xff]  }
  0x2b   : > { %1209 = vmatprep.mubr.bf16.mxu1 %v3065_v38  ;;  %2724 = vmatprep.subr.bf16.mxu1 %v3332_v4  ;;  %v3100_v4 = vld [vmem:[%s3494_s22 + $0xf0] ss:$20 sps:$4 sm:$0xff]   ;;  %v3134_v38 = vld [vmem:[%s3494_s22 + $0x1b8] ss:$20 sps:$4 sm:$0xff]  }
  0x2c   : > { %2920 = vmatprep.subr.bf16.mxu0 %v3528_v39 }
  0x2d   : > { %2921 = vmatpush3.bf16.msra.mxu0 %v3528_v39 }
  0x2e   : > { %2725 = vmatpush3.bf16.msra.mxu1 %v3344_v6  ;;  %2922 = vmatprep.subr.bf16.mxu0 %v3542_v44  ;;  %v3101_v6 = vld [vmem:[%s3494_s22 + $0xf8] ss:$20 sps:$4 sm:$0xff]  }
  0x2f   : > { %2726 = vmatprep.subr.bf16.mxu1 %v3356_v8  ;;  %v3103_v8 = vld [vmem:[%s3494_s22 + $0x11c] ss:$20 sps:$4 sm:$0xff]  }
  0x30   : > { %1093 = vmatmul.mubr.bf16.gmra.mrb[4].mxu0 %v3067_v40  ;;  %v3135_v40 = vld [vmem:[%s3494_s22 + $0x1c0] ss:$20 sps:$4 sm:$0xff]  }
  0x31   : > { %1210 = vmatmul.mubr.bf16.gmra.mrb[4].mxu1 %v3068_v41  ;;  %1099 = vmatprep.mubr.bf16.mxu0 %v3070_v42  ;;  %v3136_v41 = vld [vmem:[%s3494_s22 + $0x10] ss:$20 sps:$4 sm:$0xff]  }
  0x32   : > { %1216 = vmatprep.mubr.bf16.mxu1 %v3072_v43  ;;  %2727 = vmatpush3.bf16.msra.mxu1 %v3368_v10  ;;  %v3105_v10 = vld [vmem:[%s3494_s22 + $0x124] ss:$20 sps:$4 sm:$0xff]  }
  0x33   : > { %2728 = vmatprep.subr.bf16.mxu1 %v3380_v12  ;;  %2923 = vmatpush3.bf16.msra.mxu0 %v3542_v44  ;;  %v3107_v12 = vld [vmem:[%s3494_s22 + $0x118] ss:$20 sps:$4 sm:$0xff]  }
  0x34   : > { %2924 = vmatprep.subr.bf16.mxu0 %v3554_v48  ;;  %v3139_v42 = vld [vmem:[%s3611_s26 + $0x4] ss:$20 sps:$4 sm:$0xff]  }
  0x35   : > { %v3140_v43 = vld [vmem:[%s3494_s22 + $0x38] ss:$20 sps:$4 sm:$0xff]  }
  0x36   : > { %2729 = vmatpush3.bf16.msra.mxu1 %v3392_v14  ;;  %v3110_v14 = vld [vmem:[%s3494_s22 + $0x144] ss:$20 sps:$4 sm:$0xff]  }
  0x37   : > { %2730 = vmatprep.subr.bf16.mxu1 %v3404_v16  ;;  %2925 = vmatpush3.bf16.msra.mxu0 %v3554_v48  ;;  %v3112_v16 = vld [vmem:[%s3494_s22 + $0x14c] ss:$20 sps:$4 sm:$0xff]  }
  0x38   : > { %1100 = vmatmul.mubr.bf16.gmra.mrb[8].mxu0 %v3074_v45  ;;  %2926 = vmatprep.subr.bf16.mxu0 %v3564_v50  ;;  %v3137_v45 = vld [vmem:[%s3611_s26] ss:$20 sps:$4 sm:$0xff]  }
  0x39   : > { %1217 = vmatmul.mubr.bf16.gmra.mrb[8].mxu1 %v3075_v46  ;;  %1106 = vmatprep.mubr.bf16.mxu0 %v3076_v47  ;;  %v3141_v46 = vld [vmem:[%s3494_s22 + $0x60] ss:$20 sps:$4 sm:$0xff]  }
  0x3a   : > { %1223 = vmatprep.mubr.bf16.mxu1 %v3078_v49  ;;  %2731 = vmatpush3.bf16.msra.mxu1 %v3417_v18  ;;  %v3114_v18 = vld [vmem:[%s3494_s22 + $0x140] ss:$20 sps:$4 sm:$0xff]   ;;  %v3144_v49 = vld [vmem:[%s3494_s22 + $0x88] ss:$20 sps:$4 sm:$0xff]  }
  0x3b   : > { %2732 = vmatprep.subr.bf16.mxu1 %v3429_v20  ;;  %2927 = vmatpush3.bf16.msra.mxu0 %v3564_v50  ;;  %v3115_v20 = vld [vmem:[%s3494_s22 + $0x148] ss:$20 sps:$4 sm:$0xff]   ;;  %v3142_v47 = vld [vmem:[%s3611_s26 + $0x2c] ss:$20 sps:$4 sm:$0xff]  }
  0x3c   : > { %2928 = vmatprep.subr.bf16.mxu0 %v3577_v55 }
  0x3e   : > { %2733 = vmatpush3.bf16.msra.mxu1 %v3444_v22  ;;  %v3116_v22 = vld [vmem:[%s3494_s22 + $0x16c] ss:$20 sps:$4 sm:$0xff]  }
  0x3f   : > { %2734 = vmatprep.subr.bf16.mxu1 %v3456_v24  ;;  %2929 = vmatpush3.bf16.msra.mxu0 %v3577_v55  ;;  %v3118_v24 = vld [vmem:[%s3494_s22 + $0x174] ss:$20 sps:$4 sm:$0xff]  }
  0x40   : > { %1107 = vmatmul.mubr.bf16.gmra.mrb[12].mxu0 %v3080_v51  ;;  %2930 = vmatprep.subr.bf16.mxu0 %v3591_v59  ;;  %v3145_v51 = vld [vmem:[%s3611_s26 + $0x28] ss:$20 sps:$4 sm:$0xff]  }
  0x41   : > { %1224 = vmatmul.mubr.bf16.gmra.mrb[12].mxu1 %v3081_v52  ;;  %1113 = vmatprep.mubr.bf16.mxu0 %v3083_v53  ;;  %v3146_v52 = vld [vmem:[%s3494_s22 + $0xb0] ss:$20 sps:$4 sm:$0xff]  }
  0x42   : > { %1230 = vmatprep.mubr.bf16.mxu1 %v3085_v54  ;;  %2735 = vmatpush3.bf16.msra.mxu1 %v3469_v26  ;;  %v3120_v26 = vld [vmem:[%s3494_s22 + $0x168] ss:$20 sps:$4 sm:$0xff]   ;;  %v3177_v54 = vld [vmem:[%s3611_s26 + $0x30] ss:$20 sps:$4 sm:$0xff]  }
  0x43   : > { %2736 = vmatprep.subr.bf16.mxu1 %v3481_v28  ;;  %2931 = vmatpush3.bf16.msra.mxu0 %v3591_v59  ;;  %v3121_v28 = vld [vmem:[%s3494_s22 + $0x170] ss:$20 sps:$4 sm:$0xff]  }
  0x44   : > { %2932 = vmatprep.subr.bf16.mxu0 %v3600_v61  ;;  %v3172_v53 = vld [vmem:[%s3611_s26 + $0x11c] ss:$20 sps:$4 sm:$0xff]  }
  0x46   : > { %2737 = vmatpush3.bf16.msra.mxu1 %v3500_v30  ;;  %v3123_v30 = vld [vmem:[%s3494_s22 + $0x194] ss:$20 sps:$4 sm:$0xff]  }
  0x47   : > { %2958 = vmatprep.subr.bf16.mxu1 %v3518_v36  ;;  %2933 = vmatpush3.bf16.msra.mxu0 %v3600_v61 }
  0x48   : > { %1114 = vmatmul.mubr.bf16.gmra.mrb[16].mxu0 %v3087_v56  ;;  %2810 = vmatprep.subr.bf16.mxu0 %v3314_v1  ;;  %v3108_v1 = vld [vmem:[%s3494_s22 + $0x120] ss:$20 sps:$4 sm:$0xff]   ;;  %v3180_v56 = vld [vmem:[%s3611_s26 + $0x5c] ss:$20 sps:$4 sm:$0xff]  }
  0x49   : > { %1231 = vmatmul.mubr.bf16.gmra.mrb[16].mxu1 %v3088_v57  ;;  %1120 = vmatprep.mubr.bf16.mxu0 %v3090_v58  ;;  %v3178_v57 = vld [vmem:[%s3611_s26 + $0x144] ss:$20 sps:$4 sm:$0xff]  }
  0x4a   : > { %1237 = vmatprep.mubr.bf16.mxu1 %v3092_v60  ;;  %v3183_v58 = vld [vmem:[%s3611_s26 + $0x58] ss:$20 sps:$4 sm:$0xff]  }
  0x4b   : > { %v3186_v60 = vld [vmem:[%s3611_s26 + $0x84] ss:$20 sps:$4 sm:$0xff]  }
  0x50   : > { %1121 = vmatmul.mubr.bf16.gmra.mrb[20].mxu0 %v3094_v62  ;;  %v3189_v62 = vld [vmem:[%s3611_s26 + $0x80] ss:$20 sps:$4 sm:$0xff]  }
  0x51   : > { %1238 = vmatmul.mubr.bf16.gmra.mrb[20].mxu1 %v3095_v63  ;;  %1127 = vmatprep.mubr.bf16.mxu0 %v3096_v0  ;;  %v3188_v63 = vld [vmem:[%s3611_s26 + $0x168] ss:$20 sps:$4 sm:$0xff]   ;;  %v3192_v0 = vld [vmem:[%s3611_s26 + $0xac] ss:$20 sps:$4 sm:$0xff]  }
  0x52   : > { %1244 = vmatprep.mubr.bf16.mxu1 %v3098_v2  ;;  %v3190_v2 = vld [vmem:[%s3611_s26 + $0x194] ss:$20 sps:$4 sm:$0xff]  }
  0x58   : > { %1128 = vmatmul.mubr.bf16.gmra.mrb[24].mxu0 %v3100_v4  ;;  %v3195_v4 = vld [vmem:[%s3611_s26 + $0xa8] ss:$20 sps:$4 sm:$0xff]  }
  0x59   : > { %1245 = vmatmul.mubr.bf16.gmra.mrb[24].mxu1 %v3101_v6  ;;  %1134 = vmatprep.mubr.bf16.mxu0 %v3103_v8  ;;  %v3194_v6 = vld [vmem:[%s3611_s26 + $0x190] ss:$20 sps:$4 sm:$0xff]   ;;  %v3198_v8 = vld [vmem:[%s3611_s26 + $0xd4] ss:$20 sps:$4 sm:$0xff]  }
  0x5a   : > { %1251 = vmatprep.mubr.bf16.mxu1 %v3105_v10  ;;  %v3196_v10 = vld [vmem:[%s3611_s26 + $0x1bc] ss:$20 sps:$4 sm:$0xff]  }
  0x60   : > { %1135 = vmatmul.mubr.bf16.gmra.mrb[28].mxu0 %v3107_v12  ;;  %v3201_v12 = vld [vmem:[%s3611_s26 + $0xd0] ss:$20 sps:$4 sm:$0xff]  }
  0x61   : > { %1252 = vmatmul.mubr.bf16.gmra.mrb[28].mxu1 %v3108_v1  ;;  %1141 = vmatprep.mubr.bf16.mxu0 %v3110_v14  ;;  %v3200_v1 = vld [vmem:[%s3611_s26 + $0x1b8] ss:$20 sps:$4 sm:$0xff]   ;;  %v3202_v14 = vld [vmem:[%s3611_s26 + $0xfc] ss:$20 sps:$4 sm:$0xff]  }
  0x62   : > { %1258 = vmatprep.mubr.bf16.mxu1 %v3112_v16  ;;  %v3204_v16 = vld [vmem:[%s3611_s26 + $0x10] ss:$20 sps:$4 sm:$0xff]  }
  0x68   : > { %1142 = vmatmul.mubr.bf16.gmra.mrb[32].mxu0 %v3114_v18  ;;  %v3205_v18 = vld [vmem:[%s3611_s26 + $0xf8] ss:$20 sps:$4 sm:$0xff]  }
  0x69   : > { %1259 = vmatmul.mubr.bf16.gmra.mrb[32].mxu1 %v3115_v20  ;;  %1148 = vmatprep.mubr.bf16.mxu0 %v3116_v22  ;;  %v3206_v20 = vld [vmem:[%s3611_s26 + $0x38] ss:$20 sps:$4 sm:$0xff]  }
  0x6a   : > { %1265 = vmatprep.mubr.bf16.mxu1 %v3118_v24  ;;  %v3207_v22 = vld [vmem:[%s3611_s26 + $0x124] ss:$20 sps:$4 sm:$0xff]   ;;  %v3209_v24 = vld [vmem:[%s3611_s26 + $0x60] ss:$20 sps:$4 sm:$0xff]  }
  0x70   : > { %1149 = vmatmul.mubr.bf16.gmra.mrb[36].mxu0 %v3120_v26  ;;  %v3210_v26 = vld [vmem:[%s3611_s26 + $0x120] ss:$20 sps:$4 sm:$0xff]  }
  0x71   : > { %1266 = vmatmul.mubr.bf16.gmra.mrb[36].mxu1 %v3121_v28  ;;  %1155 = vmatprep.mubr.bf16.mxu0 %v3123_v30  ;;  %v3211_v28 = vld [vmem:[%s3611_s26 + $0x88] ss:$20 sps:$4 sm:$0xff]   ;;  %v3212_v30 = vld [vmem:[%s3611_s26 + $0x14c] ss:$20 sps:$4 sm:$0xff]  }
  0x72   : > { %1272 = vmatprep.mubr.bf16.mxu1 %v3125_v32  ;;  %v3214_v32 = vld [vmem:[%s3611_s26 + $0xb0] ss:$20 sps:$4 sm:$0xff]  }
  0x78   : > { %1156 = vmatmul.mubr.bf16.gmra.mrb[40].mxu0 %v3127_v33  ;;  %v3215_v33 = vld [vmem:[%s3611_s26 + $0x148] ss:$20 sps:$4 sm:$0xff]  }
  0x79   : > { %1273 = vmatmul.mubr.bf16.gmra.mrb[40].mxu1 %v3128_v34  ;;  %1162 = vmatprep.mubr.bf16.mxu0 %v3130_v35  ;;  %v3216_v34 = vld [vmem:[%s3611_s26 + $0xd8] ss:$20 sps:$4 sm:$0xff]   ;;  %v3217_v35 = vld [vmem:[%s3611_s26 + $0x174] ss:$20 sps:$4 sm:$0xff]  }
  0x7a   : > { %1279 = vmatprep.mubr.bf16.mxu1 %v3132_v37  ;;  %v3219_v37 = vld [vmem:[%s3611_s26 + $0x100] ss:$20 sps:$4 sm:$0xff]  }
  0x80   : > { %1163 = vmatmul.mubr.bf16.gmra.mrb[44].mxu0 %v3134_v38 }
  0x81   : > { %1280 = vmatmul.mubr.bf16.gmra.mrb[44].mxu1 %v3135_v40  ;;  %2934 = vmatprep.mubr.bf16.mxu0 %v3136_v41 }
  0x82   : > { %1748 = vmatprep.mubr.bf16.mxu1 %v3139_v42  ;;  %v3220_v42 = vld [vmem:[%s3611_s26 + $0x170] ss:$20 sps:$4 sm:$0xff]  }
  0x88   : > { %2935 = vmatmul.mubr.bf16.vlgmr.msra.gmra.mrb[48].mxu0 %v3140_v43 }
  0x89   : > { %1749 = vmatmul.mubr.bf16.vlgmr.msra.gmra.mrb[48].mxu1 %v3137_v45  ;;  %2811 = vmatpush3.bf16.msra.mxu0 %v3326_v3  ;;  %v3147_v3 = vld [vmem:[%s3611_s26 + $0x54] ss:$20 sps:$4 sm:$0xff]  }
  0x8a   : > { %2959 = vmatpush3.bf16.msra.mxu1 %v3518_v36  ;;  %2812 = vmatprep.subr.bf16.mxu0 %v3338_v5  ;;  %v3149_v5 = vld [vmem:[%s3494_s22 + $0xd8] ss:$20 sps:$4 sm:$0xff]   ;;  %v3152_v36 = vld [vmem:[%s3611_s26 + $0x7c] ss:$20 sps:$4 sm:$0xff]  }
  0x8b   : > { %2938 = vmatprep.mubr.bf16.mxu0 %v3141_v46  ;;  %1755 = vmatprep.mubr.bf16.mxu1 %v3142_v47  ;;  %v3221_v47 = vld [vmem:[%s3611_s26 + $0x128] ss:$20 sps:$4 sm:$0xff]  }
  0x8c   : > { %2960 = vmatprep.subr.bf16.mxu1 %v3528_v39 }
  0x8d   : > { %2813 = vmatpush3.bf16.msra.mxu0 %v3350_v7  ;;  %v3150_v7 = vld [vmem:[%s3611_s26 + $0x50] ss:$20 sps:$4 sm:$0xff]  }
  0x8e   : > { %2814 = vmatprep.subr.bf16.mxu0 %v3362_v9  ;;  %2961 = vmatpush3.bf16.msra.mxu1 %v3528_v39  ;;  %v3151_v9 = vld [vmem:[%s3494_s22 + $0x100] ss:$20 sps:$4 sm:$0xff]  }
  0x8f   : > { %2962 = vmatprep.subr.bf16.mxu1 %v3542_v44  ;;  %v3170_v39 = vld [vmem:[%s3611_s26 + $0xc] ss:$20 sps:$4 sm:$0xff]  }
  0x90   : > { %2939 = vmatmul.mubr.bf16.gmra.mrb[52].mxu0 %v3144_v49  ;;  %v3222_v49 = vld [vmem:[%s3611_s26 + $0x19c] ss:$20 sps:$4 sm:$0xff]  }
  0x91   : > { %1756 = vmatmul.mubr.bf16.gmra.mrb[52].mxu1 %v3145_v51  ;;  %2815 = vmatpush3.bf16.msra.mxu0 %v3374_v11  ;;  %v3154_v11 = vld [vmem:[%s3494_s22 + $0x128] ss:$20 sps:$4 sm:$0xff]  }
  0x92   : > { %2942 = vmatprep.mubr.bf16.mxu0 %v3146_v52  ;;  %1762 = vmatprep.mubr.bf16.mxu1 %v3147_v3 }
  0x93   : > { %2816 = vmatprep.subr.bf16.mxu0 %v3386_v13  ;;  %2963 = vmatpush3.bf16.msra.mxu1 %v3542_v44  ;;  %v3155_v13 = vld [vmem:[%s3611_s26 + $0x78] ss:$20 sps:$4 sm:$0xff]   ;;  %v3166_v44 = vld [vmem:[%s3611_s26 + $0xf4] ss:$20 sps:$4 sm:$0xff]  }
  0x94   : > { %2964 = vmatprep.subr.bf16.mxu1 %v3554_v48 }
  0x95   : > { %2817 = vmatpush3.bf16.msra.mxu0 %v3398_v15  ;;  %v3156_v15 = vld [vmem:[%s3494_s22 + $0x150] ss:$20 sps:$4 sm:$0xff]  }
  0x96   : > { %2818 = vmatprep.subr.bf16.mxu0 %v3410_v17  ;;  %v3157_v17 = vld [vmem:[%s3611_s26 + $0xa4] ss:$20 sps:$4 sm:$0xff]  }
  0x97   : > { %2965 = vmatpush3.bf16.msra.mxu1 %v3554_v48  ;;  %v3171_v48 = vld [vmem:[%s3611_s26 + $0xf0] ss:$20 sps:$4 sm:$0xff]  }
  0x98   : > { %2943 = vmatmul.mubr.bf16.gmra.mrb[56].mxu0 %v3149_v5  ;;  %2966 = vmatprep.subr.bf16.mxu1 %v3564_v50  ;;  %v3224_v5 = vld [vmem:[%s3611_s26 + $0x150] ss:$20 sps:$4 sm:$0xff]  }
  0x99   : > { %1763 = vmatmul.mubr.bf16.gmra.mrb[56].mxu1 %v3150_v7  ;;  %2946 = vmatprep.mubr.bf16.mxu0 %v3151_v9 }
  0x9a   : > { %1769 = vmatprep.mubr.bf16.mxu1 %v3152_v36  ;;  %2819 = vmatpush3.bf16.msra.mxu0 %v3423_v19  ;;  %v3159_v19 = vld [vmem:[%s3494_s22 + $0x178] ss:$20 sps:$4 sm:$0xff]  }
  0x9b   : > { %2820 = vmatprep.subr.bf16.mxu0 %v3435_v21  ;;  %2967 = vmatpush3.bf16.msra.mxu1 %v3564_v50  ;;  %v3160_v21 = vld [vmem:[%s3611_s26 + $0xa0] ss:$20 sps:$4 sm:$0xff]  }
  0x9c   : > { %2968 = vmatprep.subr.bf16.mxu1 %v3577_v55  ;;  %v3174_v50 = vld [vmem:[%s3611_s26 + $0x34] ss:$20 sps:$4 sm:$0xff]  }
  0x9e   : > { %2821 = vmatpush3.bf16.msra.mxu0 %v3450_v23  ;;  %v3161_v23 = vld [vmem:[%s3494_s22 + $0x1a0] ss:$20 sps:$4 sm:$0xff]  }
  0x9f   : > { %2822 = vmatprep.subr.bf16.mxu0 %v3462_v25  ;;  %2969 = vmatpush3.bf16.msra.mxu1 %v3577_v55  ;;  %v3162_v25 = vld [vmem:[%s3611_s26 + $0xcc] ss:$20 sps:$4 sm:$0xff]  }
  0xa0   : > { %2947 = vmatmul.mubr.bf16.gmra.mrb[60].mxu0 %v3154_v11  ;;  %2970 = vmatprep.subr.bf16.mxu1 %v3591_v59  ;;  %v3176_v55 = vld [vmem:[%s3611_s26 + $0x118] ss:$20 sps:$4 sm:$0xff]  }
  0xa1   : > { %1770 = vmatmul.mubr.bf16.gmra.mrb[60].mxu1 %v3155_v13  ;;  %2950 = vmatprep.mubr.bf16.mxu0 %v3156_v15  ;;  %v3225_v15 = vld [vmem:[%s3611_s26 + $0x198] ss:$20 sps:$4 sm:$0xff]  }
  0xa2   : > { %1776 = vmatprep.mubr.bf16.mxu1 %v3157_v17  ;;  %2823 = vmatpush3.bf16.msra.mxu0 %v3475_v27  ;;  %v3164_v27 = vld [vmem:[%s3494_s22 + $0x1c8] ss:$20 sps:$4 sm:$0xff]  }
  0xa3   : > { %2824 = vmatprep.subr.bf16.mxu0 %v3487_v29  ;;  %2971 = vmatpush3.bf16.msra.mxu1 %v3591_v59  ;;  %v3165_v29 = vld [vmem:[%s3611_s26 + $0xc8] ss:$20 sps:$4 sm:$0xff]   ;;  %v3182_v59 = vld [vmem:[%s3611_s26 + $0x140] ss:$20 sps:$4 sm:$0xff]  }
  0xa4   : > { %2972 = vmatprep.subr.bf16.mxu1 %v3600_v61 }
  0xa6   : > { %2825 = vmatpush3.bf16.msra.mxu0 %v3506_v31  ;;  %v3168_v31 = vld [vmem:[%s3611_s26 + $0x8] ss:$20 sps:$4 sm:$0xff]  }
  0xa7   : > { %2973 = vmatpush3.bf16.msra.mxu1 %v3600_v61  ;;  %v3184_v61 = vld [vmem:[%s3611_s26 + $0x16c] ss:$20 sps:$4 sm:$0xff]  }
  0xa8   : > { %2951 = vmatmul.mubr.bf16.gmra.mrb[64].mxu0 %v3159_v19 }
  0xa9   : > { %1777 = vmatmul.mubr.bf16.gmra.mrb[64].mxu1 %v3160_v21  ;;  %2954 = vmatprep.mubr.bf16.mxu0 %v3161_v23  ;;  %v3226_v23 = vld [vmem:[%s3611_s26 + $0x178] ss:$20 sps:$4 sm:$0xff]  }
  0xaa   : > { %1783 = vmatprep.mubr.bf16.mxu1 %v3162_v25  ;;  %v3227_v25 = vld [vmem:[%s3611_s26 + $0x1c4] ss:$20 sps:$4 sm:$0xff]  }
  0xb0   : > { %2955 = vmatmul.mubr.bf16.gmra.mrb[68].mxu0 %v3164_v27 }
  0xb1   : > { %1784 = vmatmul.mubr.bf16.gmra.mrb[68].mxu1 %v3165_v29  ;;  %1865 = vmatprep.mubr.bf16.mxu0 %v3170_v39 }
  0xb2   : > { %1790 = vmatprep.mubr.bf16.mxu1 %v3166_v44  ;;  %v3229_v44 = vld [vmem:[%s3611_s26 + $0x1a0] ss:$20 sps:$4 sm:$0xff]  }
  0xb8   : > { %1866 = vmatmul.mubr.bf16.vlgmr.msra.gmra.mrb[72].mxu0 %v3168_v31 }
  0xb9   : > { %1791 = vmatmul.mubr.bf16.gmra.mrb[72].mxu1 %v3171_v48  ;;  %1872 = vmatprep.mubr.bf16.mxu0 %v3174_v50 }
  0xba   : > { %1797 = vmatprep.mubr.bf16.mxu1 %v3172_v53 }
  0xc0   : > { %1873 = vmatmul.mubr.bf16.gmra.mrb[76].mxu0 %v3177_v54 }
  0xc1   : > { %1798 = vmatmul.mubr.bf16.gmra.mrb[76].mxu1 %v3176_v55  ;;  %1879 = vmatprep.mubr.bf16.mxu0 %v3180_v56  ;;  %v3230_v55 = vld [vmem:[%s3611_s26 + $0x1c0] ss:$20 sps:$4 sm:$0xff]  }
  0xc2   : > { %1804 = vmatprep.mubr.bf16.mxu1 %v3178_v57 }
  0xc8   : > { %1880 = vmatmul.mubr.bf16.gmra.mrb[80].mxu0 %v3183_v58 }
  0xc9   : > { %1805 = vmatmul.mubr.bf16.gmra.mrb[80].mxu1 %v3182_v59  ;;  %1886 = vmatprep.mubr.bf16.mxu0 %v3186_v60  ;;  %v3231_v59 = vld [vmem:[%s3611_s26 + $0x1c8] ss:$20 sps:$4 sm:$0xff]  }
  0xca   : > { %1811 = vmatprep.mubr.bf16.mxu1 %v3184_v61 }
  0xd0   : > { %1887 = vmatmul.mubr.bf16.gmra.mrb[84].mxu0 %v3189_v62 }
  0xd1   : > { %1812 = vmatmul.mubr.bf16.gmra.mrb[84].mxu1 %v3188_v63  ;;  %1893 = vmatprep.mubr.bf16.mxu0 %v3192_v0 }
  0xd2   : > { %1818 = vmatprep.mubr.bf16.mxu1 %v3190_v2 }
  0xd8   : > { %1894 = vmatmul.mubr.bf16.gmra.mrb[88].mxu0 %v3195_v4 }
  0xd9   : > { %1819 = vmatmul.mubr.bf16.gmra.mrb[88].mxu1 %v3194_v6  ;;  %1900 = vmatprep.mubr.bf16.mxu0 %v3198_v8 }
  0xda   : > { %1825 = vmatprep.mubr.bf16.mxu1 %v3196_v10 }
  0xe0   : > { %1901 = vmatmul.mubr.bf16.gmra.mrb[92].mxu0 %v3201_v12 }
  0xe1   : > { %1826 = vmatmul.mubr.bf16.gmra.mrb[92].mxu1 %v3200_v1  ;;  %1907 = vmatprep.mubr.bf16.mxu0 %v3202_v14 }
  0xe2   : > { %2974 = vmatprep.mubr.bf16.mxu1 %v3204_v16 }
  0xe8   : > { %1908 = vmatmul.mubr.bf16.gmra.mrb[96].mxu0 %v3205_v18 }
  0xe9   : > { %2975 = vmatmul.mubr.bf16.vlgmr.msra.gmra.mrb[96].mxu1 %v3206_v20  ;;  %1914 = vmatprep.mubr.bf16.mxu0 %v3207_v22 }
  0xea   : > { %2978 = vmatprep.mubr.bf16.mxu1 %v3209_v24 }
  0xf0   : > { %1915 = vmatmul.mubr.bf16.gmra.mrb[100].mxu0 %v3210_v26 }
  0xf1   : > { %2979 = vmatmul.mubr.bf16.gmra.mrb[100].mxu1 %v3211_v28  ;;  %1921 = vmatprep.mubr.bf16.mxu0 %v3212_v30 }
  0xf2   : > { %2982 = vmatprep.mubr.bf16.mxu1 %v3214_v32 }
  0xf8   : > { %1922 = vmatmul.mubr.bf16.gmra.mrb[104].mxu0 %v3215_v33 }
  0xf9   : > { %2983 = vmatmul.mubr.bf16.gmra.mrb[104].mxu1 %v3216_v34  ;;  %1928 = vmatprep.mubr.bf16.mxu0 %v3217_v35 }
  0xfa   : > { %2986 = vmatprep.mubr.bf16.mxu1 %v3219_v37 }
  0xfb   : > { %v2542_v38 = vpop.f32.mrb[0].mxu0 }
  0xfc   : > { %v2630_v40 = vpop.f32.mrb[0].mxu1  ;;  %v2543_v41 = vpop.f32.mrb[1].mxu0 }
  0xfd   : > { %v2544_v43 = vadd.f32 %v2543_v41, %v2542_v38  ;;  %v2631_v45 = vpop.f32.mrb[1].mxu1  ;;  %v2545_v46 = vpop.f32.mrb[2].mxu0 }
  0xfe   : > { %v2632_v51 = vadd.f32 %v2631_v45, %v2630_v40  ;;  %v2546_v52 = vpop.f32.mrb[3].mxu0  ;;  %v2633_v3 = vpop.f32.mrb[2].mxu1 }
  0xff   : > { %v2634_v7 = vpop.f32.mrb[3].mxu1 }
 0x100   : > { %1929 = vmatmul.mubr.bf16.gmra.mrb[108].mxu0 %v3220_v42  ;;  %v3735_v9 = vadd.f32 %v2632_v51, %v2544_v43 }
 0x101   : > { %2987 = vmatmul.mubr.bf16.gmra.mrb[108].mxu1 %v3221_v47  ;;  %1935 = vmatprep.mubr.bf16.mxu0 %v3222_v49 }
 0x102   : > { %2990 = vmatprep.mubr.bf16.mxu1 %v3224_v5 }
 0x103   : > { %v2548_v36 = vpop.f32.mrb[4].mxu0 }
 0x104   : > { %v2636_v11 = vpop.f32.mrb[4].mxu1  ;;  %v2549_v13 = vpop.f32.mrb[5].mxu0 }
 0x105   : > { %v2550_v17 = vadd.f32 %v2549_v13, %v2548_v36  ;;  %v2637_v19 = vpop.f32.mrb[5].mxu1  ;;  %v2551_v21 = vpop.f32.mrb[6].mxu0 }
 0x106   : > { %v2638_v27 = vadd.f32 %v2637_v19, %v2636_v11  ;;  %v2552_v29 = vpop.f32.mrb[7].mxu0  ;;  %v2639_v39 = vpop.f32.mrb[6].mxu1 }
 0x107   : > { %v2640_v31 = vpop.f32.mrb[7].mxu1 }
 0x108   : > { %1936 = vmatmul.mubr.bf16.gmra.mrb[112].mxu0 %v3225_v15  ;;  %v3741_v48 = vadd.f32 %v2638_v27, %v2550_v17 }
 0x109   : > { %2991 = vmatmul.mubr.bf16.gmra.mrb[112].mxu1 %v3226_v23  ;;  %1942 = vmatprep.mubr.bf16.mxu0 %v3227_v25 }
 0x10a   : > { %2994 = vmatprep.mubr.bf16.mxu1 %v3229_v44 }
 0x10b   : > { %v2554_v50 = vpop.f32.mrb[8].mxu0 }
 0x10c   : > { %v2642_v53 = vpop.f32.mrb[8].mxu1  ;;  %v2555_v54 = vpop.f32.mrb[9].mxu0 }
 0x10d   : > { %v2556_v56 = vadd.f32 %v2555_v54, %v2554_v50  ;;  %v2643_v57 = vpop.f32.mrb[9].mxu1  ;;  %v2557_v58 = vpop.f32.mrb[10].mxu0 }
 0x10e   : > { %v2644_v60 = vadd.f32 %v2643_v57, %v2642_v53  ;;  %v2558_v61 = vpop.f32.mrb[11].mxu0  ;;  %v2645_v62 = vpop.f32.mrb[10].mxu1 }
 0x10f   : > { %v2646_v63 = vpop.f32.mrb[11].mxu1 }
 0x110   : > { %1943 = vmatmul.mubr.bf16.gmra.mrb[116].mxu0 %v3230_v55  ;;  %v3745_v0 = vadd.f32 %v2644_v60, %v2556_v56 }
 0x111   : > { %2995 = vmatmul.mubr.bf16.gmra.mrb[116].mxu1 %v3231_v59 }
 0x113   : > { %v2560_v2 = vpop.f32.mrb[12].mxu0 }
 0x114   : > { %v2648_v4 = vpop.f32.mrb[12].mxu1  ;;  %v2561_v6 = vpop.f32.mrb[13].mxu0 }
 0x115   : > { %v2562_v8 = vadd.f32 %v2561_v6, %v2560_v2  ;;  %v2649_v10 = vpop.f32.mrb[13].mxu1  ;;  %v2563_v12 = vpop.f32.mrb[14].mxu0 }
 0x116   : > { %v2650_v1 = vadd.f32 %v2649_v10, %v2648_v4  ;;  %v2564_v14 = vpop.f32.mrb[15].mxu0  ;;  %v2651_v16 = vpop.f32.mrb[14].mxu1 }
 0x117   : > { %v2652_v18 = vpop.f32.mrb[15].mxu1 }
 0x118   : > { %v3747_v20 = vadd.f32 %v2650_v1, %v2562_v8 }
 0x11b   : > { %v2566_v22 = vpop.f32.mrb[16].mxu0 }
 0x11c   : > { %v2654_v24 = vpop.f32.mrb[16].mxu1  ;;  %v2567_v26 = vpop.f32.mrb[17].mxu0 }
 0x11d   : > { %v2568_v28 = vadd.f32 %v2567_v26, %v2566_v22  ;;  %v2655_v30 = vpop.f32.mrb[17].mxu1  ;;  %v2569_v32 = vpop.f32.mrb[18].mxu0 }
 0x11e   : > { %v2656_v33 = vadd.f32 %v2655_v30, %v2654_v24  ;;  %v2570_v34 = vpop.f32.mrb[19].mxu0  ;;  %v2657_v35 = vpop.f32.mrb[18].mxu1 }
 0x11f   : > { %v2658_v37 = vpop.f32.mrb[19].mxu1 }
 0x120   : > { %v3749_v38 = vadd.f32 %v2656_v33, %v2568_v28 }
 0x123   : > { %v2572_v40 = vpop.f32.mrb[20].mxu0 }
 0x124   : > { %v2660_v41 = vpop.f32.mrb[20].mxu1  ;;  %v2573_v42 = vpop.f32.mrb[21].mxu0 }
 0x125   : > { %v2574_v43 = vadd.f32 %v2573_v42, %v2572_v40  ;;  %v2661_v45 = vpop.f32.mrb[21].mxu1  ;;  %v2575_v46 = vpop.f32.mrb[22].mxu0 }
 0x126   : > { %v2662_v47 = vadd.f32 %v2661_v45, %v2660_v41  ;;  %v2576_v49 = vpop.f32.mrb[23].mxu0  ;;  %v2663_v51 = vpop.f32.mrb[22].mxu1 }
 0x127   : > { %v2664_v52 = vpop.f32.mrb[23].mxu1 }
 0x128   : > { %v3751_v3 = vadd.f32 %v2662_v47, %v2574_v43 }
 0x12b   : > { %v2578_v5 = vpop.f32.mrb[24].mxu0 }
 0x12c   : > { %v2666_v7 = vpop.f32.mrb[24].mxu1  ;;  %v2579_v36 = vpop.f32.mrb[25].mxu0 }
 0x12d   : > { %v2580_v11 = vadd.f32 %v2579_v36, %v2578_v5  ;;  %v2667_v13 = vpop.f32.mrb[25].mxu1  ;;  %v2581_v15 = vpop.f32.mrb[26].mxu0 }
 0x12e   : > { %v2668_v17 = vadd.f32 %v2667_v13, %v2666_v7  ;;  %v2582_v19 = vpop.f32.mrb[27].mxu0  ;;  %v2669_v21 = vpop.f32.mrb[26].mxu1 }
 0x12f   : > { %v2670_v23 = vpop.f32.mrb[27].mxu1 }
 0x130   : > { %v3753_v25 = vadd.f32 %v2668_v17, %v2580_v11 }
 0x133   : > { %v2584_v27 = vpop.f32.mrb[28].mxu0 }
 0x134   : > { %v2672_v29 = vpop.f32.mrb[28].mxu1  ;;  %v2585_v39 = vpop.f32.mrb[29].mxu0 }
 0x135   : > { %v2586_v44 = vadd.f32 %v2585_v39, %v2584_v27  ;;  %v2673_v31 = vpop.f32.mrb[29].mxu1  ;;  %v2587_v50 = vpop.f32.mrb[30].mxu0 }
 0x136   : > { %v2674_v53 = vadd.f32 %v2673_v31, %v2672_v29  ;;  %v2588_v54 = vpop.f32.mrb[31].mxu0  ;;  %v2675_v55 = vpop.f32.mrb[30].mxu1 }
 0x137   : > { %v2676_v56 = vpop.f32.mrb[31].mxu1 }
 0x138   : > { %v3755_v57 = vadd.f32 %v2674_v53, %v2586_v44 }
 0x13b   : > { %v2590_v58 = vpop.f32.mrb[32].mxu0 }
 0x13c   : > { %v2678_v59 = vpop.f32.mrb[32].mxu1  ;;  %v2591_v60 = vpop.f32.mrb[33].mxu0 }
 0x13d   : > { %v2592_v61 = vadd.f32 %v2591_v60, %v2590_v58  ;;  %v2679_v62 = vpop.f32.mrb[33].mxu1  ;;  %v2593_v63 = vpop.f32.mrb[34].mxu0 }
 0x13e   : > { %v2680_v2 = vadd.f32 %v2679_v62, %v2678_v59  ;;  %v2594_v4 = vpop.f32.mrb[35].mxu0  ;;  %v2681_v6 = vpop.f32.mrb[34].mxu1 }
 0x13f   : > { %v2682_v8 = vpop.f32.mrb[35].mxu1 }
 0x140   : > { %v3757_v10 = vadd.f32 %v2680_v2, %v2592_v61 }
 0x143   : > { %v2596_v12 = vpop.f32.mrb[36].mxu0 }
 0x144   : > { %v2684_v1 = vpop.f32.mrb[36].mxu1  ;;  %v2597_v14 = vpop.f32.mrb[37].mxu0 }
 0x145   : > { %v2598_v16 = vadd.f32 %v2597_v14, %v2596_v12  ;;  %v2685_v18 = vpop.f32.mrb[37].mxu1  ;;  %v2599_v22 = vpop.f32.mrb[38].mxu0 }
 0x146   : > { %v2686_v24 = vadd.f32 %v2685_v18, %v2684_v1  ;;  %v2600_v26 = vpop.f32.mrb[39].mxu0  ;;  %v2687_v28 = vpop.f32.mrb[38].mxu1 }
 0x147   : > { %v2688_v30 = vpop.f32.mrb[39].mxu1 }
 0x148   : > { %v3759_v32 = vadd.f32 %v2686_v24, %v2598_v16 }
 0x14b   : > { %v2602_v33 = vpop.f32.mrb[40].mxu0 }
 0x14c   : > { %v2690_v34 = vpop.f32.mrb[40].mxu1  ;;  %v2603_v35 = vpop.f32.mrb[41].mxu0 }
 0x14d   : > { %v2604_v37 = vadd.f32 %v2603_v35, %v2602_v33  ;;  %v2691_v40 = vpop.f32.mrb[41].mxu1  ;;  %v2605_v41 = vpop.f32.mrb[42].mxu0 }
 0x14e   : > { %v2692_v42 = vadd.f32 %v2691_v40, %v2690_v34  ;;  %v2606_v43 = vpop.f32.mrb[43].mxu0  ;;  %v2693_v45 = vpop.f32.mrb[42].mxu1 }
 0x14f   : > { %v2694_v46 = vpop.f32.mrb[43].mxu1 }
 0x150   : > { %v3761_v47 = vadd.f32 %v2692_v42, %v2604_v37 }
 0x153   : > { %v2608_v49 = vpop.f32.mrb[44].mxu0 }
 0x154   : > { %v2696_v51 = vpop.f32.mrb[44].mxu1  ;;  %v2609_v52 = vpop.f32.mrb[45].mxu0 }
 0x155   : > { %v2610_v5 = vadd.f32 %v2609_v52, %v2608_v49  ;;  %v2697_v7 = vpop.f32.mrb[45].mxu1  ;;  %v2611_v36 = vpop.f32.mrb[46].mxu0 }
 0x156   : > { %v2698_v11 = vadd.f32 %v2697_v7, %v2696_v51  ;;  %v2612_v13 = vpop.f32.mrb[47].mxu0  ;;  %v2699_v15 = vpop.f32.mrb[46].mxu1 }
 0x157   : > { %v2700_v17 = vpop.f32.mrb[47].mxu1 }
 0x158   : > { %v1282_v19 = vadd.f32 %v2698_v11, %v2610_v5 }
 0x15b   : > { %v2936_v21 = vpop.f32.mrb[48].mxu0 }
 0x15c   : > { %v3764_v23 = vadd.f32 %v2936_v21, %v3741_v48  ;;  %v1321_v27 = vpop.f32.mrb[49].mxu0  ;;  %v2738_v29 = vpop.f32.mrb[48].mxu1 }
 0x15d   : > { %v3767_v39 = vadd.f32 %v1321_v27, %v3735_v9  ;;  %v2937_v44 = vpop.f32.mrb[50].mxu0  ;;  %v2739_v31 = vpop.f32.mrb[49].mxu1 }
 0x15e   : > { %v1324_v50 = vpop.f32.mrb[51].mxu0  ;;  %v3769_v53 = vadd.f32 %v2739_v31, %v2738_v29  ;;  %v2741_v54 = vpop.f32.mrb[50].mxu1 }
 0x15f   : > { %v2742_v55 = vpop.f32.mrb[51].mxu1 }
 0x163   : > { %v2940_v56 = vpop.f32.mrb[52].mxu0 }
 0x164   : > { %v3772_v58 = vadd.f32 %v2940_v56, %v3747_v20  ;;  %v1335_v59 = vpop.f32.mrb[53].mxu0  ;;  %v2744_v60 = vpop.f32.mrb[52].mxu1 }
 0x165   : > { %v3775_v48 = vadd.f32 %v1335_v59, %v3745_v0  ;;  %v2941_v61 = vpop.f32.mrb[54].mxu0  ;;  %v2745_v62 = vpop.f32.mrb[53].mxu1 }
 0x166   : > { %v1338_v9 = vpop.f32.mrb[55].mxu0  ;;  %v3777_v63 = vadd.f32 %v2745_v62, %v2744_v60  ;;  %v2747_v2 = vpop.f32.mrb[54].mxu1 }
 0x167   : > { %v2748_v4 = vpop.f32.mrb[55].mxu1 }
 0x16b   : > { %v2944_v6 = vpop.f32.mrb[56].mxu0 }
 0x16c   : > { %v3780_v8 = vadd.f32 %v2944_v6, %v3751_v3  ;;  %v1349_v12 = vpop.f32.mrb[57].mxu0  ;;  %v2750_v1 = vpop.f32.mrb[56].mxu1 }
 0x16d   : > { %v3783_v20 = vadd.f32 %v1349_v12, %v3749_v38  ;;  %v2945_v14 = vpop.f32.mrb[58].mxu0  ;;  %v2751_v16 = vpop.f32.mrb[57].mxu1 }
 0x16e   : > { %v1352_v0 = vpop.f32.mrb[59].mxu0  ;;  %v3785_v18 = vadd.f32 %v2751_v16, %v2750_v1  ;;  %v2753_v22 = vpop.f32.mrb[58].mxu1 }
 0x16f   : > { %v2754_v24 = vpop.f32.mrb[59].mxu1 }
 0x173   : > { %v2948_v26 = vpop.f32.mrb[60].mxu0 }
 0x174   : > { %v3788_v28 = vadd.f32 %v2948_v26, %v3755_v57  ;;  %v1363_v30 = vpop.f32.mrb[61].mxu0  ;;  %v2756_v33 = vpop.f32.mrb[60].mxu1 }
 0x175   : > { %v3791_v3 = vadd.f32 %v1363_v30, %v3753_v25  ;;  %v2949_v34 = vpop.f32.mrb[62].mxu0  ;;  %v2757_v35 = vpop.f32.mrb[61].mxu1 }
 0x176   : > { %v1366_v38 = vpop.f32.mrb[63].mxu0  ;;  %v3793_v37 = vadd.f32 %v2757_v35, %v2756_v33  ;;  %v2759_v40 = vpop.f32.mrb[62].mxu1 }
 0x177   : > { %v2760_v41 = vpop.f32.mrb[63].mxu1 }
 0x17b   : > { %v2952_v42 = vpop.f32.mrb[64].mxu0 }
 0x17c   : > { %v3796_v43 = vadd.f32 %v2952_v42, %v3759_v32  ;;  %v1377_v45 = vpop.f32.mrb[65].mxu0  ;;  %v2762_v46 = vpop.f32.mrb[64].mxu1 }
 0x17d   : > { %v3799_v57 = vadd.f32 %v1377_v45, %v3757_v10  ;;  %v2953_v49 = vpop.f32.mrb[66].mxu0  ;;  %v2763_v51 = vpop.f32.mrb[65].mxu1 }
 0x17e   : > { %v1380_v25 = vpop.f32.mrb[67].mxu0  ;;  %v3801_v52 = vadd.f32 %v2763_v51, %v2762_v46  ;;  %v2765_v5 = vpop.f32.mrb[66].mxu1 }
 0x17f   : > { %v2766_v7 = vpop.f32.mrb[67].mxu1 }
 0x183   : > { %v2956_v36 = vpop.f32.mrb[68].mxu0 }
 0x184   : > { %v3803_v11 = vadd.f32 %v2956_v36, %v1282_v19  ;;  %v1391_v13 = vpop.f32.mrb[69].mxu0  ;;  %v2768_v15 = vpop.f32.mrb[68].mxu1 }
 0x185   : > { %v3806_v32 = vadd.f32 %v1391_v13, %v3761_v47  ;;  %v2957_v17 = vpop.f32.mrb[70].mxu0  ;;  %v2769_v21 = vpop.f32.mrb[69].mxu1 }
 0x186   : > { %v1394_v27 = vpop.f32.mrb[71].mxu0  ;;  %v3808_v10 = vadd.f32 %v2769_v21, %v2768_v15  ;;  %v2771_v29 = vpop.f32.mrb[70].mxu1 }
 0x187   : > { %v2772_v44 = vpop.f32.mrb[71].mxu1 }
 0x18b   : > { %v2826_v31 = vpop.f32.mrb[72].mxu0 }
 0x18c   : > { %v2827_v50 = vpop.f32.mrb[73].mxu0  ;;  %v2774_v54 = vpop.f32.mrb[72].mxu1 }
 0x18d   : > { %v2828_v55 = vadd.f32 %v2827_v50, %v2826_v31  ;;  %v2829_v56 = vpop.f32.mrb[74].mxu0  ;;  %v2775_v59 = vpop.f32.mrb[73].mxu1 }
 0x18e   : > { %v3810_v19 = vadd.f32 %v2775_v59, %v2774_v54  ;;  %v2830_v60 = vpop.f32.mrb[75].mxu0  ;;  %v2777_v61 = vpop.f32.mrb[74].mxu1 }
 0x18f   : > { %v2778_v62 = vpop.f32.mrb[75].mxu1  ;;  %v3813_v47 = vadd.f32 %v2828_v55, %v3769_v53  ;;  %v3836_v60 = vld [vmem:[%s3964_s3] ss:$0 sm:$0xff] }
 0x190   : > { %v2074_v61 = vmul.f32 %v3836_v60, %v3764_v23  ;;  %v2073_v62 = vmul.f32 %v3836_v60, %v3767_v39 }
 0x193   : > { %v2832_v9 = vpop.f32.mrb[76].mxu0 }
 0x194   : > { %v2833_v2 = vpop.f32.mrb[77].mxu0  ;;  %v2780_v4 = vpop.f32.mrb[76].mxu1 }
 0x195   : > { %v2834_v6 = vadd.f32 %v2833_v2, %v2832_v9  ;;  %v2835_v12 = vpop.f32.mrb[78].mxu0  ;;  %v2781_v1 = vpop.f32.mrb[77].mxu1 }
 0x196   : > { %v3815_v14 = vadd.f32 %v2781_v1, %v2780_v4  ;;  %v2836_v16 = vpop.f32.mrb[79].mxu0  ;;  %v2783_v0 = vpop.f32.mrb[78].mxu1  ;;  %v3845_v4 = vld [vmem:[%s3965_s4] ss:$0 sm:$0xff] }
 0x197   : > { %v2784_v22 = vpop.f32.mrb[79].mxu1  ;;  %v1875_v24 = vadd.f32 %v2834_v6, %v3777_v63  ;;  %v2092_v39 = vadd.f32 %v3845_v4, %v2074_v61 }
 0x19b   : > { %v2838_v26 = vpop.f32.mrb[80].mxu0 }
 0x19c   : > { %v2839_v30 = vpop.f32.mrb[81].mxu0  ;;  %v2786_v33 = vpop.f32.mrb[80].mxu1 }
 0x19d   : > { %v2840_v34 = vadd.f32 %v2839_v30, %v2838_v26  ;;  %v2841_v35 = vpop.f32.mrb[82].mxu0  ;;  %v2787_v53 = vpop.f32.mrb[81].mxu1  ;;  %v2091_v26 = vadd.f32 %v3845_v4, %v2073_v62 }
 0x19e   : > { %v3818_v38 = vadd.f32 %v2787_v53, %v2786_v33  ;;  %v2842_v40 = vpop.f32.mrb[83].mxu0  ;;  %v2789_v41 = vpop.f32.mrb[82].mxu1  ;;  %v2104_v33 = vmax.f32 %v2092_v39, 0.0  ;;  %v2077_v39 = vmul.f32 %v3836_v60, %v3783_v20 }
 0x19f   : > { %v2790_v42 = vpop.f32.mrb[83].mxu1  ;;  %v3821_v45 = vadd.f32 %v2840_v34, %v3785_v18  ;;  %v2103_v34 = vmax.f32 %v2091_v26, 0.0  ;;  %v2076_v40 = vmul.f32 %v3836_v60, %v3772_v58 }
 0x1a0   : > { %v2095_v20 = vadd.f32 %v3845_v4, %v2077_v39 }
 0x1a3   : > { %v2844_v46 = vpop.f32.mrb[84].mxu0 }
 0x1a4   : > { %v2845_v49 = vpop.f32.mrb[85].mxu0  ;;  %v2792_v51 = vpop.f32.mrb[84].mxu1 }
 0x1a5   : > { %v2846_v25 = vadd.f32 %v2845_v49, %v2844_v46  ;;  %v2847_v5 = vpop.f32.mrb[86].mxu0  ;;  %v2793_v63 = vpop.f32.mrb[85].mxu1 }
 0x1a6   : > { %v3823_v7 = vadd.f32 %v2793_v63, %v2792_v51  ;;  %v2848_v36 = vpop.f32.mrb[87].mxu0  ;;  %v2795_v13 = vpop.f32.mrb[86].mxu1 }
 0x1a7   : > { %v2796_v15 = vpop.f32.mrb[87].mxu1  ;;  %v3826_v17 = vadd.f32 %v2846_v25, %v3793_v37 }
 0x1a8   : > { %v2164_v15 = vrot.slane %v2104_v33, 1 }
 0x1ab   : > { %v2850_v21 = vpop.f32.mrb[88].mxu0 }
 0x1ac   : > { %v2851_v27 = vpop.f32.mrb[89].mxu0  ;;  %v2798_v29 = vpop.f32.mrb[88].mxu1 }
 0x1ad   : > { %v2852_v44 = vadd.f32 %v2851_v27, %v2850_v21  ;;  %v2853_v18 = vpop.f32.mrb[90].mxu0  ;;  %v2799_v31 = vpop.f32.mrb[89].mxu1  ;;  %v2163_v21 = vrot.slane %v2103_v34, 1 }
 0x1ae   : > { %v3828_v50 = vadd.f32 %v2799_v31, %v2798_v29  ;;  %v2854_v54 = vpop.f32.mrb[91].mxu0  ;;  %v2801_v55 = vpop.f32.mrb[90].mxu1  ;;  %v2189_v18 = vsel %vm2187_vm0, %v2164_v15, 0.0 }
 0x1af   : > { %v2802_v56 = vpop.f32.mrb[91].mxu1  ;;  %v3831_v59 = vadd.f32 %v2852_v44, %v3801_v52 }
 0x1b3   : > { %v2856_v37 = vpop.f32.mrb[92].mxu0 }
 0x1b4   : > { %v2857_v9 = vpop.f32.mrb[93].mxu0  ;;  %v2804_v2 = vpop.f32.mrb[92].mxu1 }
 0x1b5   : > { %v2858_v52 = vadd.f32 %v2857_v9, %v2856_v37  ;;  %v2859_v6 = vpop.f32.mrb[94].mxu0  ;;  %v2805_v12 = vpop.f32.mrb[93].mxu1 }
 0x1b6   : > { %v3847_v1 = vadd.f32 %v2805_v12, %v2804_v2  ;;  %v2860_v16 = vpop.f32.mrb[95].mxu0  ;;  %v2807_v0 = vpop.f32.mrb[94].mxu1  ;;  %v2078_v6 = vmul.f32 %v3836_v60, %v3780_v8 }
 0x1b7   : > { %v2808_v22 = vpop.f32.mrb[95].mxu1  ;;  %v3850_v23 = vadd.f32 %v2858_v52, %v3808_v10  ;;  %v2075_v10 = vmul.f32 %v3836_v60, %v3775_v48 }
 0x1b9   : > { %v2093_v48 = vadd.f32 %v3845_v4, %v2075_v10  ;;  %v2080_v10 = vmul.f32 %v3836_v60, %v3788_v28 }
 0x1bb   : > { %v2862_v30 = vpop.f32.mrb[96].mxu0  ;;  %v2105_v52 = vmax.f32 %v2093_v48, 0.0 }
 0x1bc   : > { %v2976_v35 = vpop.f32.mrb[96].mxu1  ;;  %v2863_v53 = vpop.f32.mrb[97].mxu0 }
 0x1bd   : > { %v1992_v41 = vadd.f32 %v2976_v35, %v1875_v24  ;;  %v2864_v42 = vadd.f32 %v2863_v53, %v2862_v30  ;;  %v1984_v46 = vpop.f32.mrb[97].mxu1  ;;  %v2865_v49 = vpop.f32.mrb[98].mxu0  ;;  %v2094_v24 = vadd.f32 %v3845_v4, %v2076_v40 }
 0x1be   : > { %v1985_v51 = vadd.f32 %v1984_v46, %v3813_v47  ;;  %v2866_v25 = vpop.f32.mrb[99].mxu0  ;;  %v2977_v5 = vpop.f32.mrb[98].mxu1 }
 0x1bf   : > { %v2116_v63 = vmul.f32 %v3836_v60, %v1992_v41  ;;  %v1987_v36 = vpop.f32.mrb[99].mxu1  ;;  %v3861_v13 = vadd.f32 %v2864_v42, %v3810_v19  ;;  %v2188_v19 = vsel %vm2187_vm0, %v2163_v21, 0.0  ;;  %v2106_v56 = vmax.f32 %v2094_v24, 0.0 }
 0x1c0   : > { %v2115_v58 = vmul.f32 %v3836_v60, %v1985_v51 }
 0x1c1   : > { %v2128_v27 = vadd.f32 %v3845_v4, %v2116_v63  ;;  %v2166_v40 = vrot.slane %v2106_v56, 1 }
 0x1c2   : > { %v2127_v47 = vadd.f32 %v3845_v4, %v2115_v58 }
 0x1c3   : > { %v2140_v29 = vmax.f32 %v2128_v27, 0.0  ;;  %v2868_v44 = vpop.f32.mrb[100].mxu0  ;;  %v2191_v63 = vsel %vm2187_vm0, %v2166_v40, 0.0 }
 0x1c4   : > { %v2139_v31 = vmax.f32 %v2127_v47, 0.0  ;;  %v2980_v54 = vpop.f32.mrb[100].mxu1  ;;  %v2869_v55 = vpop.f32.mrb[101].mxu0 }
 0x1c5   : > { %v2201_v37 = vmax.f32 %v2104_v33, %v2140_v29  ;;  %v2006_v61 = vadd.f32 %v2980_v54, %v3826_v17  ;;  %v2870_v62 = vadd.f32 %v2869_v55, %v2868_v44  ;;  %v1998_v9 = vpop.f32.mrb[101].mxu1  ;;  %v2871_v2 = vpop.f32.mrb[102].mxu0  ;;  %v2107_v44 = vmax.f32 %v2095_v20, 0.0 }
 0x1c6   : > { %v2200_v12 = vmax.f32 %v2103_v34, %v2139_v31  ;;  %v1999_v16 = vadd.f32 %v1998_v9, %v3821_v45  ;;  %v2872_v0 = vpop.f32.mrb[103].mxu0  ;;  %v2981_v22 = vpop.f32.mrb[102].mxu1  ;;  %v2165_v34 = vrot.slane %v2105_v52, 1  ;;  %v2096_v45 = vadd.f32 %v3845_v4, %v2078_v6 }
 0x1c7   : > { %v2213_v26 = vmax.f32 %v2201_v37, %v2189_v18  ;;  %v2118_v30 = vmul.f32 %v3836_v60, %v2006_v61  ;;  %v2001_v33 = vpop.f32.mrb[103].mxu1  ;;  %v1917_v17 = vadd.f32 %v2870_v62, %v3815_v14  ;;  %v2079_v14 = vmul.f32 %v3836_v60, %v3791_v3 }
 0x1c8   : > { %v2212_v35 = vmax.f32 %v2200_v12, %v2188_v19  ;;  %v2117_v53 = vmul.f32 %v3836_v60, %v1999_v16  ;;  %v2190_v27 = vsel %vm2187_vm0, %v2165_v34, 0.0  ;;  %v2108_v48 = vmax.f32 %v2096_v45, 0.0 }
 0x1c9   : > { %v2130_v8 = vadd.f32 %v3845_v4, %v2118_v30  ;;  %v3898_v55 = vadd.f32 %v3845_v4, %v2079_v14  ;;  %v2082_v30 = vmul.f32 %v3836_v60, %v3796_v43  ;;  %v2081_v45 = vmul.f32 %v3836_v60, %v3799_v57 }
 0x1ca   : > { %v2224_v41 = vmax.f32 %v2212_v35, %v2213_v26  ;;  %v2129_v42 = vadd.f32 %v3845_v4, %v2117_v53  ;;  %v2168_v61 = vrot.slane %v2108_v48, 1 }
 0x1cb   : > { %v2142_v46 = vmax.f32 %v2130_v8, 0.0  ;;  %v2874_v49 = vpop.f32.mrb[104].mxu0  ;;  %v2109_v16 = vmax.f32 %v3898_v55, 0.0  ;;  %v2100_v57 = vadd.f32 %v3845_v4, %v2082_v30 }
 0x1cc   : > { %v2141_v51 = vmax.f32 %v2129_v42, 0.0  ;;  %v2984_v25 = vpop.f32.mrb[104].mxu1  ;;  %v2875_v5 = vpop.f32.mrb[105].mxu0  ;;  %v2193_v34 = vsel %vm2187_vm0, %v2168_v61, 0.0 }
 0x1cd   : > { %v2203_v36 = vmax.f32 %v2106_v56, %v2142_v46  ;;  %v2020_v15 = vadd.f32 %v2984_v25, %v3850_v23  ;;  %v2876_v21 = vadd.f32 %v2875_v5, %v2874_v49  ;;  %v2012_v58 = vpop.f32.mrb[105].mxu1  ;;  %v2877_v24 = vpop.f32.mrb[106].mxu0  ;;  %v2098_v23 = vadd.f32 %v3845_v4, %v2080_v10 }
 0x1ce   : > { %v2202_v47 = vmax.f32 %v2105_v52, %v2141_v51  ;;  %v2013_v28 = vadd.f32 %v2012_v58, %v3831_v59  ;;  %v2878_v29 = vpop.f32.mrb[107].mxu0  ;;  %v2985_v3 = vpop.f32.mrb[106].mxu1  ;;  %v2167_v52 = vrot.slane %v2107_v44, 1 }
 0x1cf   : > { %v2215_v18 = vmax.f32 %v2203_v36, %v2191_v63  ;;  %v2120_v19 = vmul.f32 %v3836_v60, %v2020_v15  ;;  %v2015_v31 = vpop.f32.mrb[107].mxu1  ;;  %v3894_v54 = vadd.f32 %v2876_v21, %v3818_v38  ;;  %v2110_v12 = vmax.f32 %v2098_v23, 0.0 }
 0x1d0   : > { %v2214_v56 = vmax.f32 %v2202_v47, %v2190_v27  ;;  %v2119_v37 = vmul.f32 %v3836_v60, %v2013_v28  ;;  %v2192_v49 = vsel %vm2187_vm0, %v2167_v52, 0.0  ;;  %v2169_v63 = vrot.slane %v2109_v16, 1 }
 0x1d1   : > { %v2132_v59 = vadd.f32 %v3845_v4, %v2120_v19  ;;  %v2170_v51 = vrot.slane %v2110_v12, 1  ;;  %v2112_v3 = vmax.f32 %v2100_v57, 0.0 }
 0x1d2   : > { %v2225_v62 = vmax.f32 %v2224_v41, %v2214_v56  ;;  %v2228_v9 = vmax.f32 %v2214_v56, %v2215_v18  ;;  %v2131_v2 = vadd.f32 %v3845_v4, %v2119_v37  ;;  %v2194_v55 = vsel %vm2187_vm0, %v2169_v63, 0.0 }
 0x1d3   : > { %v2144_v38 = vmax.f32 %v2132_v59, 0.0  ;;  %v2880_v6 = vpop.f32.mrb[108].mxu0 }
 0x1d4   : > { %v2226_v0 = vpack.c.bf16 %v2225_v62, %v2225_v62  ;;  %v2143_v22 = vmax.f32 %v2131_v2, 0.0  ;;  %v2988_v39 = vpop.f32.mrb[108].mxu1  ;;  %v2881_v26 = vpop.f32.mrb[109].mxu0 }
 0x1d5   : > { %v2205_v33 = vmax.f32 %v2108_v48, %v2144_v38  ;;  %v2034_v35 = vadd.f32 %v2988_v39, %v1917_v17  ;;  %v2882_v53 = vadd.f32 %v2881_v26, %v2880_v6  ;;  %v2026_v40 = vpop.f32.mrb[109].mxu1  ;;  %v2883_v8 = vpop.f32.mrb[110].mxu0 }
 0x1d6   : > { %2227 = vst [vmem:[%s3906_s6] sm:$0x7] %v2226_v0  ;;  %v2204_v41 = vmax.f32 %v2107_v44, %v2143_v22  ;;  %v2027_v42 = vadd.f32 %v2026_v40, %v3861_v13  ;;  %v2884_v20 = vpop.f32.mrb[111].mxu0  ;;  %v2989_v46 = vpop.f32.mrb[110].mxu1  ;;  %v2099_v13 = vadd.f32 %v3845_v4, %v2081_v45  ;;  %v2172_v22 = vrot.slane %v2112_v3, 1 }
 0x1d7   : > { %v2217_v10 = vmax.f32 %v2205_v33, %v2193_v34  ;;  %v2122_v43 = vmul.f32 %v3836_v60, %v2034_v35  ;;  %v2029_v17 = vpop.f32.mrb[111].mxu1  ;;  %v1931_v14 = vadd.f32 %v2882_v53, %v3823_v7  ;;  %v2195_v7 = vsel %vm2187_vm0, %v2170_v51, 0.0 }
 0x1d8   : > { %v2216_v25 = vmax.f32 %v2204_v41, %v2192_v49  ;;  %v2121_v5 = vmul.f32 %v3836_v60, %v2027_v42  ;;  %v2111_v56 = vmax.f32 %v2099_v13, 0.0 }
 0x1d9   : > { %v2134_v36 = vadd.f32 %v3845_v4, %v2122_v43 }
 0x1da   : > { %v2229_v15 = vmax.f32 %v2228_v9, %v2216_v25  ;;  %v2233_v21 = vmax.f32 %v2216_v25, %v2217_v10  ;;  %v2133_v58 = vadd.f32 %v3845_v4, %v2121_v5  ;;  %v2083_v9 = vmul.f32 %v3836_v60, %v3806_v32 }
 0x1db   : > { %v2146_v24 = vmax.f32 %v2134_v36, 0.0  ;;  %v2886_v27 = vpop.f32.mrb[112].mxu0  ;;  %v2171_v30 = vrot.slane %v2111_v56, 1 }
 0x1dc   : > { %v2230_v48 = vpack.c.bf16 %v2229_v15, %v2229_v15  ;;  %v2145_v47 = vmax.f32 %v2133_v58, 0.0  ;;  %v2992_v28 = vpop.f32.mrb[112].mxu1  ;;  %v2887_v29 = vpop.f32.mrb[113].mxu0  ;;  %v2101_v33 = vadd.f32 %v3845_v4, %v2083_v9 }
 0x1dd   : > { %v2207_v44 = vmax.f32 %v2110_v12, %v2146_v24  ;;  %v2048_v18 = vadd.f32 %v2992_v28, %v1931_v14  ;;  %v2888_v19 = vadd.f32 %v2887_v29, %v2886_v27  ;;  %v2040_v31 = vpop.f32.mrb[113].mxu1  ;;  %v2889_v23 = vpop.f32.mrb[114].mxu0  ;;  %v2196_v14 = vsel %vm2187_vm0, %v2171_v30, 0.0 }
 0x1de   : > { %2519 = vst [vmem:[%s3906_s6 + $0x4] sm:$0x7] %v2230_v48  ;;  %v2206_v37 = vmax.f32 %v2109_v16, %v2145_v47  ;;  %v2041_v59 = vadd.f32 %v2040_v31, %v3894_v54  ;;  %v2890_v61 = vpop.f32.mrb[115].mxu0  ;;  %v2993_v62 = vpop.f32.mrb[114].mxu1  ;;  %v2084_v54 = vmul.f32 %v3836_v60, %v3803_v11  ;;  %v2197_v11 = vsel %vm2187_vm0, %v2172_v22, 0.0 }
 0x1df   : > { %v2219_v2 = vmax.f32 %v2207_v44, %v2195_v7  ;;  %v2124_v52 = vmul.f32 %v3836_v60, %v2048_v18  ;;  %v2043_v38 = vpop.f32.mrb[115].mxu1  ;;  %v1938_v6 = vadd.f32 %v2888_v19, %v3828_v50  ;;  %v2113_v51 = vmax.f32 %v2101_v33, 0.0 }
 0x1e0   : > { %v2218_v12 = vmax.f32 %v2206_v37, %v2194_v55  ;;  %v2123_v0 = vmul.f32 %v3836_v60, %v2041_v59  ;;  %v2102_v46 = vadd.f32 %v3845_v4, %v2084_v54 }
 0x1e1   : > { %v2136_v39 = vadd.f32 %v3845_v4, %v2124_v52  ;;  %v2173_v27 = vrot.slane %v2113_v51, 1 }
 0x1e2   : > { %v2234_v16 = vmax.f32 %v2233_v21, %v2218_v12  ;;  %v2238_v26 = vmax.f32 %v2218_v12, %v2219_v2  ;;  %v2135_v32 = vadd.f32 %v3845_v4, %v2123_v0  ;;  %v2114_v15 = vmax.f32 %v2102_v46, 0.0 }
 0x1e3   : > { %v2148_v35 = vmax.f32 %v2136_v39, 0.0  ;;  %v2892_v53 = vpop.f32.mrb[116].mxu0 }
 0x1e4   : > { %v2235_v50 = vpack.c.bf16 %v2234_v16, %v2234_v16  ;;  %v2147_v40 = vmax.f32 %v2135_v32, 0.0  ;;  %v2996_v8 = vpop.f32.mrb[116].mxu1  ;;  %v2893_v34 = vpop.f32.mrb[117].mxu0 }
 0x1e5   : > { %v2209_v45 = vmax.f32 %v2112_v3, %v2148_v35  ;;  %v2894_v41 = vadd.f32 %v2893_v34, %v2892_v53  ;;  %v2054_v42 = vpop.f32.mrb[117].mxu1  ;;  %v2895_v20 = vpop.f32.mrb[118].mxu0  ;;  %v2198_v3 = vsel %vm2187_vm0, %v2173_v27, 0.0 }
 0x1e6   : > { %2520 = vst [vmem:[%s3906_s6 + $0x8] sm:$0x7] %v2235_v50  ;;  %v2208_v49 = vmax.f32 %v2111_v56, %v2147_v40  ;;  %v2055_v10 = vadd.f32 %v2054_v42, %v1938_v6  ;;  %v2896_v43 = vpop.f32.mrb[119].mxu0  ;;  %v2997_v17 = vpop.f32.mrb[118].mxu1 }
 0x1e7   : > { %v2221_v25 = vmax.f32 %v2209_v45, %v2197_v11  ;;  %v1945_v5 = vadd.f32 %v2894_v41, %v3847_v1  ;;  %v2057_v63 = vpop.f32.mrb[119].mxu1  ;;  %v2174_v1 = vrot.slane %v2114_v15, 1 }
 0x1e8   : > { %v2220_v57 = vmax.f32 %v2208_v49, %v2196_v14  ;;  %v2125_v36 = vmul.f32 %v3836_v60, %v2055_v10 }
 0x1e9   : > { %v2062_v13 = vadd.f32 %v2996_v8, %v1945_v5  ;;  %v2199_v31 = vsel %vm2187_vm0, %v2174_v1, 0.0 }
 0x1ea   : > { %v2239_v21 = vmax.f32 %v2238_v26, %v2220_v57  ;;  %v2243_v58 = vmax.f32 %v2220_v57, %v2221_v25  ;;  %v2137_v24 = vadd.f32 %v3845_v4, %v2125_v36 }
 0x1eb   : > { %v2126_v7 = vmul.f32 %v3836_v60, %v2062_v13 }
 0x1ec   : > { %v2240_v48 = vpack.c.bf16 %v2239_v21, %v2239_v21  ;;  %v2149_v47 = vmax.f32 %v2137_v24, 0.0 }
 0x1ed   : > { %v2138_v28 = vadd.f32 %v3845_v4, %v2126_v7 }
 0x1ee   : > { %2521 = vst [vmem:[%s3906_s6 + $0xc] sm:$0x7] %v2240_v48  ;;  %v2210_v29 = vmax.f32 %v2113_v51, %v2149_v47 }
 0x1ef   : > { %v2150_v44 = vmax.f32 %v2138_v28, 0.0 }
 0x1f0   : > { %v2222_v18 = vmax.f32 %v2210_v29, %v2198_v3 }
 0x1f1   : > { %v2211_v19 = vmax.f32 %v2114_v15, %v2150_v44 }
 0x1f2   : > { %v2244_v23 = vmax.f32 %v2243_v58, %v2222_v18 }
 0x1f3   : > { %v2223_v55 = vmax.f32 %v2211_v19, %v2199_v31 }
 0x1f4   : > { %v2245_v56 = vpack.c.bf16 %v2244_v23, %v2244_v23 }
 0x1f5   : > { %v2248_v60 = vmax.f32 %v2222_v18, %v2223_v55 }
 0x1f6   : > { %2522 = vst [vmem:[%s3906_s6 + $0x10] sm:$0x7] %v2245_v56 }
 0x1f7   : > { %v2249_v37 = vpack.c.bf16 %v2248_v60, %v2248_v60 }
 0x1f9   : > { %2523 = vst [vmem:[%s3906_s6 + $0x14] sm:$0x7] %v2249_v37 }
 0x1fa PF: > { %s15_s20 = sadd.s32 1, %s3254_s20   ;;  %s3967_s18 = smov %s3250_s19 }
 0x1fb   : > { %p12_p5 = scmp.ge.s32.totalorder %s15_s20, 4   ;;  %s3968_s19 = smov %s3970_s21 }
 0x1fd   :  { %14 = sbr.rel (!%p12_p5) target bundleno = 2 (0x2), region = 80 }

</bundles_post_ra>
